<compile_context>
chip_gen: v7x
topology: tpu7x:2x2x1
jax: 0.10.0
libtpu: 0.0.40
codegen_flags: <defaults>
</compile_context>

<pallas_src>
import math

import numpy as np

import jax
import jax.numpy as jnp
from jax import lax
from jax.experimental import pallas as pl
from jax.experimental.pallas import tpu as pltpu

NUM_CLASSES = 10
IN_H = IN_W = 32
HW = IN_H * IN_W
CIN0_PAD = 8          # first conv's Cin (3) zero-padded to 8 for aligned stacking

# (name, Cin, Cout, H, W) -- H, W are the spatial size of this conv's *input*.
CONV_LAYERS = (
    ("conv1_1", 3, 8, 32, 32),
    ("conv1_2", 8, 8, 32, 32),
    ("conv2_1", 8, 16, 16, 16),
    ("conv2_2", 16, 16, 16, 16),
    ("conv3_1", 16, 32, 8, 8),
    ("conv3_2", 32, 32, 8, 8),
    ("conv3_3", 32, 32, 8, 8),
    ("conv4_1", 32, 64, 4, 4),
    ("conv4_2", 64, 64, 4, 4),
    ("conv4_3", 64, 64, 4, 4),
)
POOL_AFTER = (1, 3, 6, 9)            # MaxPool2d(2,2) after these conv indices
CONV1x1 = ("conv4_1x1", 64, 32)      # 1x1 conv + ReLU
FC_HIDDEN = 128
FLAT_HW = 4                          # 2*2 spatial positions feeding fc1
FLAT_C = 32
FC_DEFS = (("fc1", FLAT_C * FLAT_HW, FC_HIDDEN),
           ("fc2", FC_HIDDEN, FC_HIDDEN),
           ("fc3", FC_HIDDEN, NUM_CLASSES))
GEOM_WS = (32, 16, 8, 4)             # the four spatial geometries (H == W)


# ----------------------------------------------------------------------------
# Host-side precomputed constants (built with numpy -> baked into the jaxpr).
# ----------------------------------------------------------------------------
def _make_masks_np(W, imgs):
    """(8, imgs*W*W) 0/1 border masks for the 8 non-center conv taps."""
    H = W
    L = H * W
    p = np.arange(L)
    h, w = p // W, p % W
    rows = []
    for di in (-1, 0, 1):
        for dj in (-1, 0, 1):
            if di == 0 and dj == 0:
                continue
            ok = (h + di >= 0) & (h + di < H) & (w + dj >= 0) & (w + dj < W)
            rows.append(ok.astype(np.float32))
    return np.tile(np.stack(rows, 0), (1, imgs))


def _make_pool_sel_np(W):
    """(L, L//4) 0/1 selector: column q keeps position (2*qh, 2*qw)."""
    H = W
    L, Wo = H * W, W // 2
    Lq = (H // 2) * Wo
    sel = np.zeros((L, Lq), np.float32)
    q = np.arange(Lq)
    sel[(2 * (q // Wo)) * W + 2 * (q % Wo), q] = 1.0
    return sel


def _make_fc1_gather_np(imgs):
    """(FLAT_HW, imgs*FLAT_HW, imgs): G[s, i*4+s, i] = 1 (per-position gather)."""
    g = np.zeros((FLAT_HW, imgs * FLAT_HW, imgs), np.float32)
    for s in range(FLAT_HW):
        for i in range(imgs):
            g[s, i * FLAT_HW + s, i] = 1.0
    return g


# ----------------------------------------------------------------------------
# In-kernel building blocks (activation layout: (C, imgs*H*W), images
# concatenated along the lane axis).
# ----------------------------------------------------------------------------
def _conv3x3_relu(xb, W, w_ref, b_ref, mask_ref):
    """3x3 / stride-1 / pad-1 conv + ReLU as ONE K=9*Cin MXU matmul."""
    cin, N = xb.shape
    R = W + 1                                     # max |tap offset|
    halo = jnp.zeros((cin, R), xb.dtype)
    xpad = jnp.concatenate([halo, xb, halo], axis=1)
    m_all = mask_ref[...]                         # (8, N) bf16 0/1
    taps = []
    mi = 0
    for di in (-1, 0, 1):
        for dj in (-1, 0, 1):
            d = di * W + dj
            tap = xpad[:, R + d:R + d + N]        # lane shift (XLU)
            if di or dj:
                tap = tap * m_all[mi:mi + 1, :]   # exact 0/1 mask, finite data
                mi += 1
            taps.append(tap)
    k = jnp.concatenate(taps, axis=0)             # (9*cin, N) bf16
    acc = jnp.dot(w_ref[...], k, preferred_element_type=jnp.float32)
    return jnp.maximum(acc + b_ref[...], 0.0).astype(jnp.bfloat16)


def _maxpool2x2(xb, W, sel_ref):
    """MaxPool2d(2,2): 3 shifted maxes + one selection matmul per image."""
    C, N = xb.shape
    L = W * W
    imgs = N // L
    pad = jnp.zeros((C, W + 1), xb.dtype)
    xp = jnp.concatenate([xb, pad], axis=1)
    m = jnp.maximum(jnp.maximum(xb, xp[:, 1:1 + N]),
                    jnp.maximum(xp[:, W:W + N], xp[:, W + 1:W + 1 + N]))
    sel = sel_ref[...]                            # (L, L//4) bf16 0/1
    outs = [jnp.dot(m[:, i * L:(i + 1) * L], sel,
                    preferred_element_type=jnp.float32)
            for i in range(imgs)]
    out = outs[0] if imgs == 1 else jnp.concatenate(outs, axis=1)
    return out.astype(jnp.bfloat16)


# ----------------------------------------------------------------------------
# The fused kernel: one grid step = `imgs` images through the whole network.
# ----------------------------------------------------------------------------
def _vgg_kernel(x_ref, *refs):
    it = iter(refs)
    conv_p = [(next(it), next(it)) for _ in range(len(CONV_LAYERS))]
    w11_ref, b11_ref = next(it), next(it)
    fc_p = [(next(it), next(it)) for _ in range(len(FC_DEFS))]
    mask_refs = [next(it) for _ in range(len(GEOM_WS))]
    sel_refs = [next(it) for _ in range(len(GEOM_WS))]
    g_ref = next(it)
    out_ref = next(it)
    gi = {w: i for i, w in enumerate(GEOM_WS)}

    x = x_ref[0]                                   # (8, imgs*1024) bf16
    for li, (_, _, _, _, W) in enumerate(CONV_LAYERS):
        w_ref, b_ref = conv_p[li]
        x = _conv3x3_relu(x, W, w_ref, b_ref, mask_refs[gi[W]])
        if li in POOL_AFTER:
            x = _maxpool2x2(x, W, sel_refs[gi[W]])

    # 1x1 conv + ReLU: (32, 64) @ (64, imgs*4)
    x = jnp.maximum(
        jnp.dot(w11_ref[...], x, preferred_element_type=jnp.float32)
        + b11_ref[...], 0.0).astype(jnp.bfloat16)

    # NCHW flatten via 4 tiny lane-gather matmuls + sublane stack -> (128, imgs)
    cols = [jnp.dot(x, g_ref[s], preferred_element_type=jnp.float32)
            for s in range(FLAT_HW)]
    y = jnp.concatenate(cols, axis=0).astype(jnp.bfloat16)

    w1, b1 = fc_p[0]
    y = jnp.maximum(jnp.dot(w1[...], y, preferred_element_type=jnp.float32)
                    + b1[...], 0.0).astype(jnp.bfloat16)
    w2, b2 = fc_p[1]
    y = jnp.maximum(jnp.dot(w2[...], y, preferred_element_type=jnp.float32)
                    + b2[...], 0.0).astype(jnp.bfloat16)
    w3, b3 = fc_p[2]
    out_ref[0] = (jnp.dot(w3[...], y, preferred_element_type=jnp.float32)
                  + b3[...])                        # (NUM_CLASSES, imgs) f32


# ----------------------------------------------------------------------------
# Parameters: He-uniform init (keeps logits O(1) so the bf16-vs-f32 check in
# __main__ is meaningful; forward semantics unchanged), then one-time repack.
# ----------------------------------------------------------------------------
def _uniform(key, shape, bound):
    return jax.random.uniform(key, shape, jnp.float32, -bound, bound)


def init_params(key):
    params = {}
    for name, cin, cout, _, _ in CONV_LAYERS:
        key, kw, kb = jax.random.split(key, 3)
        fan_in = cin * 9
        params[name] = (_uniform(kw, (cout, cin, 3, 3), math.sqrt(6.0 / fan_in)),
                        _uniform(kb, (cout,), 1.0 / math.sqrt(fan_in)))
    name, cin, cout = CONV1x1
    key, kw, kb = jax.random.split(key, 3)
    params[name] = (_uniform(kw, (cout, cin, 1, 1), math.sqrt(6.0 / cin)),
                    _uniform(kb, (cout,), 1.0 / math.sqrt(cin)))
    for name, fin, fout in FC_DEFS:
        key, kw, kb = jax.random.split(key, 3)
        params[name] = (_uniform(kw, (fout, fin), math.sqrt(6.0 / fin)),
                        _uniform(kb, (fout,), 1.0 / math.sqrt(fin)))
    return params


def pack_params(params):
    """One-time host-side weight re-layout for the kernel."""
    packed = []
    for name, cin, cout, _, _ in CONV_LAYERS:
        w, b = params[name]
        cin_p = max(cin, CIN0_PAD) if cin < CIN0_PAD else cin
        if cin_p != cin:
            w = jnp.pad(w, ((0, 0), (0, cin_p - cin), (0, 0), (0, 0)))
        wp = jnp.transpose(w, (0, 2, 3, 1)).reshape(cout, 9 * cin_p)
        packed += [wp.astype(jnp.bfloat16),
                   b.reshape(cout, 1).astype(jnp.float32)]
    name, cin, cout = CONV1x1
    w, b = params[name]
    packed += [w.reshape(cout, cin).astype(jnp.bfloat16),
               b.reshape(cout, 1).astype(jnp.float32)]
    w, b = params["fc1"]   # PyTorch flatten order: col = c*FLAT_HW + s
    wp = (w.reshape(FC_HIDDEN, FLAT_C, FLAT_HW)
           .transpose(0, 2, 1)                   # -> (out, s, c)
           .reshape(FC_HIDDEN, FLAT_HW * FLAT_C))
    packed += [wp.astype(jnp.bfloat16),
               b.reshape(FC_HIDDEN, 1).astype(jnp.float32)]
    for name in ("fc2", "fc3"):
        w, b = params[name]
        packed += [w.astype(jnp.bfloat16),
                   b.reshape(-1, 1).astype(jnp.float32)]
    return packed


def _const_spec(a):
    zeros = (0,) * a.ndim
    return pl.BlockSpec(a.shape, lambda s, _z=zeros: _z)


def _pick_imgs_per_step(batch):
    """v5e/v6e: fold the whole (small) batch onto the lane axis of one grid
    step; v7x: keep >= 2 grid steps so both TensorCores stay busy."""
    try:
        kind = jax.devices()[0].device_kind.lower()
    except Exception:
        kind = ""
    two_tc = "7" in kind
    cap = 4
    per = max(1, min(cap, batch // 2)) if (two_tc and batch >= 2) else min(cap, batch)
    while batch % per:
        per -= 1
    return per


# ----------------------------------------------------------------------------
# Forward pass: one fused pallas_call; grid = batch / imgs_per_step.
# ----------------------------------------------------------------------------
def vgg16_sub_forward(packed_params, x_nchw, imgs_per_step=1):
    B = x_nchw.shape[0]
    imgs = imgs_per_step
    assert B % imgs == 0
    steps = B // imgs

    # Input: NCHW -> bf16, channels zero-padded 3->8, `imgs` images
    # concatenated along the lane axis per grid step.
    x = x_nchw.reshape(B, 3, HW).astype(jnp.float32)
    x = jnp.pad(x, ((0, 0), (0, CIN0_PAD - 3), (0, 0)))
    x = x.reshape(steps, imgs, CIN0_PAD, HW)
    x = jnp.transpose(x, (0, 2, 1, 3)).reshape(steps, CIN0_PAD, imgs * HW)
    x = x.astype(jnp.bfloat16)

    # Precomputed constants (host/numpy -> baked in at compile time).
    masks = [jnp.asarray(_make_masks_np(W, imgs), jnp.bfloat16) for W in GEOM_WS]
    sels = [jnp.asarray(_make_pool_sel_np(W), jnp.bfloat16) for W in GEOM_WS]
    gmat = jnp.asarray(_make_fc1_gather_np(imgs), jnp.bfloat16)

    const_inputs = list(packed_params) + masks + sels + [gmat]
    in_specs = ([pl.BlockSpec((1, CIN0_PAD, imgs * HW), lambda s: (s, 0, 0))]
                + [_const_spec(a) for a in const_inputs])

    out = pl.pallas_call(
        _vgg_kernel,
        out_shape=jax.ShapeDtypeStruct((steps, NUM_CLASSES, imgs), jnp.float32),
        grid=(steps,),
        in_specs=in_specs,
        out_specs=pl.BlockSpec((1, NUM_CLASSES, imgs), lambda s: (s, 0, 0)),
        compiler_params=pltpu.CompilerParams(
            dimension_semantics=("parallel",),
            vmem_limit_bytes=32 * 1024 * 1024),
        cost_estimate=pl.CostEstimate(
            flops=16_000_000 * B, transcendentals=0,
            bytes_accessed=1_500_000 + 20_000 * B),
    )(x, *const_inputs)

    # (steps, classes, imgs) -> (B, classes); image index = step*imgs + i.
    return out.transpose(0, 2, 1).reshape(B, NUM_CLASSES)


# ----------------------------------------------------------------------------
# Pure-JAX f32 reference (same forward semantics) for validation.
# ----------------------------------------------------------------------------
def reference_forward(params, x):
    def conv(h, w, b, pad):
        y = lax.conv_general_dilated(
            h, w, window_strides=(1, 1), padding=[(pad, pad), (pad, pad)],
            dimension_numbers=("NCHW", "OIHW", "NCHW"))
        return jnp.maximum(y + b[None, :, None, None], 0.0)

    h = x
    for li, (name, _, _, _, _) in enumerate(CONV_LAYERS):
        w, b = params[name]
        h = conv(h, w, b, 1)
        if li in POOL_AFTER:
            h = lax.reduce_window(h, -jnp.inf, lax.max,
                                  (1, 1, 2, 2), (1, 1, 2, 2), "VALID")
    w, b = params[CONV1x1[0]]
    h = conv(h, w, b, 0)
    h = h.reshape(h.shape[0], -1)
    for i, (name, _, _) in enumerate(FC_DEFS):
        w, b = params[name]
        h = h @ w.T + b
        if i < len(FC_DEFS) - 1:
            h = jnp.maximum(h, 0.0)
    return h


if __name__ == "__main__":
    root = jax.random.PRNGKey(0)
    pkey, xkey = jax.random.split(root)
    params = init_params(pkey)
    packed = pack_params(params)                       # one-time re-layout
    x = jax.random.normal(xkey, (2, 3, IN_H, IN_W), jnp.float32)

    imgs_per_step = _pick_imgs_per_step(x.shape[0])
    fwd = jax.jit(vgg16_sub_forward, static_argnums=(2,))
    out = jax.block_until_ready(fwd(packed, x, imgs_per_step))

    ref = jax.block_until_ready(jax.jit(reference_forward)(params, x))

    assert out.shape == (2, NUM_CLASSES)
    assert bool(jnp.all(jnp.isfinite(out)))
    err = float(jnp.max(jnp.abs(out - ref)))
    scale = float(jnp.max(jnp.abs(ref))) + 1e-6
    # bf16 MXU vs f32 reference: allow a generous relative tolerance.
    assert err <= 0.15 * scale + 0.02, f"mismatch: err={err} scale={scale}"
    print("KERNEL_OK")
</pallas_src>

<mosaic_0001>
module attributes {stable_mosaic.version = 11 : i64} {
  func.func @_vgg_kernel(%arg0: i32, %arg1: memref<1x8x2048xbf16, #tpu.memory_space<vmem>>, %arg2: memref<8x72xbf16, #tpu.memory_space<vmem>>, %arg3: memref<8x1xf32, #tpu.memory_space<vmem>>, %arg4: memref<8x72xbf16, #tpu.memory_space<vmem>>, %arg5: memref<8x1xf32, #tpu.memory_space<vmem>>, %arg6: memref<16x72xbf16, #tpu.memory_space<vmem>>, %arg7: memref<16x1xf32, #tpu.memory_space<vmem>>, %arg8: memref<16x144xbf16, #tpu.memory_space<vmem>>, %arg9: memref<16x1xf32, #tpu.memory_space<vmem>>, %arg10: memref<32x144xbf16, #tpu.memory_space<vmem>>, %arg11: memref<32x1xf32, #tpu.memory_space<vmem>>, %arg12: memref<32x288xbf16, #tpu.memory_space<vmem>>, %arg13: memref<32x1xf32, #tpu.memory_space<vmem>>, %arg14: memref<32x288xbf16, #tpu.memory_space<vmem>>, %arg15: memref<32x1xf32, #tpu.memory_space<vmem>>, %arg16: memref<64x288xbf16, #tpu.memory_space<vmem>>, %arg17: memref<64x1xf32, #tpu.memory_space<vmem>>, %arg18: memref<64x576xbf16, #tpu.memory_space<vmem>>, %arg19: memref<64x1xf32, #tpu.memory_space<vmem>>, %arg20: memref<64x576xbf16, #tpu.memory_space<vmem>>, %arg21: memref<64x1xf32, #tpu.memory_space<vmem>>, %arg22: memref<32x64xbf16, #tpu.memory_space<vmem>>, %arg23: memref<32x1xf32, #tpu.memory_space<vmem>>, %arg24: memref<128x128xbf16, #tpu.memory_space<vmem>>, %arg25: memref<128x1xf32, #tpu.memory_space<vmem>>, %arg26: memref<128x128xbf16, #tpu.memory_space<vmem>>, %arg27: memref<128x1xf32, #tpu.memory_space<vmem>>, %arg28: memref<10x128xbf16, #tpu.memory_space<vmem>>, %arg29: memref<10x1xf32, #tpu.memory_space<vmem>>, %arg30: memref<8x2048xbf16, #tpu.memory_space<vmem>>, %arg31: memref<8x512xbf16, #tpu.memory_space<vmem>>, %arg32: memref<8x128xbf16, #tpu.memory_space<vmem>>, %arg33: memref<8x32xbf16, #tpu.memory_space<vmem>>, %arg34: memref<1024x256xbf16, #tpu.memory_space<vmem>>, %arg35: memref<256x64xbf16, #tpu.memory_space<vmem>>, %arg36: memref<64x16xbf16, #tpu.memory_space<vmem>>, %arg37: memref<16x4xbf16, #tpu.memory_space<vmem>>, %arg38: memref<4x8x2xbf16, #tpu.memory_space<vmem>>, %arg39: memref<1x10x2xf32, #tpu.memory_space<vmem>>) attributes {dimension_semantics = [#tpu.dimension_semantics<parallel>], iteration_bounds = array<i64: 1>, scalar_prefetch = 0 : i64, scratch_operands = 0 : i64, tpu.core_type = #tpu.core_type<tc>, window_params = [{transform_indices = @transform_0, window_bounds = array<i64: 1, 8, 2048>}, {pipeline_mode = #tpu.pipeline_mode<synchronous>, transform_indices = @transform_1, window_bounds = array<i64: 8, 72>}, {pipeline_mode = #tpu.pipeline_mode<synchronous>, transform_indices = @transform_2, window_bounds = array<i64: 8, 1>}, {pipeline_mode = #tpu.pipeline_mode<synchronous>, transform_indices = @transform_3, window_bounds = array<i64: 8, 72>}, {pipeline_mode = #tpu.pipeline_mode<synchronous>, transform_indices = @transform_4, window_bounds = array<i64: 8, 1>}, {pipeline_mode = #tpu.pipeline_mode<synchronous>, transform_indices = @transform_5, window_bounds = array<i64: 16, 72>}, {pipeline_mode = #tpu.pipeline_mode<synchronous>, transform_indices = @transform_6, window_bounds = array<i64: 16, 1>}, {pipeline_mode = #tpu.pipeline_mode<synchronous>, transform_indices = @transform_7, window_bounds = array<i64: 16, 144>}, {pipeline_mode = #tpu.pipeline_mode<synchronous>, transform_indices = @transform_8, window_bounds = array<i64: 16, 1>}, {pipeline_mode = #tpu.pipeline_mode<synchronous>, transform_indices = @transform_9, window_bounds = array<i64: 32, 144>}, {pipeline_mode = #tpu.pipeline_mode<synchronous>, transform_indices = @transform_10, window_bounds = array<i64: 32, 1>}, {pipeline_mode = #tpu.pipeline_mode<synchronous>, transform_indices = @transform_11, window_bounds = array<i64: 32, 288>}, {pipeline_mode = #tpu.pipeline_mode<synchronous>, transform_indices = @transform_12, window_bounds = array<i64: 32, 1>}, {pipeline_mode = #tpu.pipeline_mode<synchronous>, transform_indices = @transform_13, window_bounds = array<i64: 32, 288>}, {pipeline_mode = #tpu.pipeline_mode<synchronous>, transform_indices = @transform_14, window_bounds = array<i64: 32, 1>}, {pipeline_mode = #tpu.pipeline_mode<synchronous>, transform_indices = @transform_15, window_bounds = array<i64: 64, 288>}, {pipeline_mode = #tpu.pipeline_mode<synchronous>, transform_indices = @transform_16, window_bounds = array<i64: 64, 1>}, {pipeline_mode = #tpu.pipeline_mode<synchronous>, transform_indices = @transform_17, window_bounds = array<i64: 64, 576>}, {pipeline_mode = #tpu.pipeline_mode<synchronous>, transform_indices = @transform_18, window_bounds = array<i64: 64, 1>}, {pipeline_mode = #tpu.pipeline_mode<synchronous>, transform_indices = @transform_19, window_bounds = array<i64: 64, 576>}, {pipeline_mode = #tpu.pipeline_mode<synchronous>, transform_indices = @transform_20, window_bounds = array<i64: 64, 1>}, {pipeline_mode = #tpu.pipeline_mode<synchronous>, transform_indices = @transform_21, window_bounds = array<i64: 32, 64>}, {pipeline_mode = #tpu.pipeline_mode<synchronous>, transform_indices = @transform_22, window_bounds = array<i64: 32, 1>}, {pipeline_mode = #tpu.pipeline_mode<synchronous>, transform_indices = @transform_23, window_bounds = array<i64: 128, 128>}, {pipeline_mode = #tpu.pipeline_mode<synchronous>, transform_indices = @transform_24, window_bounds = array<i64: 128, 1>}, {pipeline_mode = #tpu.pipeline_mode<synchronous>, transform_indices = @transform_25, window_bounds = array<i64: 128, 128>}, {pipeline_mode = #tpu.pipeline_mode<synchronous>, transform_indices = @transform_26, window_bounds = array<i64: 128, 1>}, {pipeline_mode = #tpu.pipeline_mode<synchronous>, transform_indices = @transform_27, window_bounds = array<i64: 10, 128>}, {pipeline_mode = #tpu.pipeline_mode<synchronous>, transform_indices = @transform_28, window_bounds = array<i64: 10, 1>}, {pipeline_mode = #tpu.pipeline_mode<synchronous>, transform_indices = @transform_29, window_bounds = array<i64: 8, 2048>}, {pipeline_mode = #tpu.pipeline_mode<synchronous>, transform_indices = @transform_30, window_bounds = array<i64: 8, 512>}, {pipeline_mode = #tpu.pipeline_mode<synchronous>, transform_indices = @transform_31, window_bounds = array<i64: 8, 128>}, {pipeline_mode = #tpu.pipeline_mode<synchronous>, transform_indices = @transform_32, window_bounds = array<i64: 8, 32>}, {pipeline_mode = #tpu.pipeline_mode<synchronous>, transform_indices = @transform_33, window_bounds = array<i64: 1024, 256>}, {pipeline_mode = #tpu.pipeline_mode<synchronous>, transform_indices = @transform_34, window_bounds = array<i64: 256, 64>}, {pipeline_mode = #tpu.pipeline_mode<synchronous>, transform_indices = @transform_35, window_bounds = array<i64: 64, 16>}, {pipeline_mode = #tpu.pipeline_mode<synchronous>, transform_indices = @transform_36, window_bounds = array<i64: 16, 4>}, {pipeline_mode = #tpu.pipeline_mode<synchronous>, transform_indices = @transform_37, window_bounds = array<i64: 4, 8, 2>}, {transform_indices = @transform_38, window_bounds = array<i64: 1, 10, 2>}]} {
    %c0 = arith.constant 0 : index
    %c0_0 = arith.constant 0 : index
    %c0_1 = arith.constant 0 : index
    %0 = vector.load %arg1[%c0, %c0_0, %c0_1] : memref<1x8x2048xbf16, #tpu.memory_space<vmem>>, vector<1x8x2048xbf16>
    %1 = vector.shape_cast %0 : vector<1x8x2048xbf16> to vector<8x2048xbf16>
    %cst = arith.constant 0.000000e+00 : bf16
    %2 = vector.broadcast %cst : bf16 to vector<8x33xbf16>
    %3 = tpu.concatenate %2, %1, %2 in 1 : vector<8x33xbf16>, vector<8x2048xbf16>, vector<8x33xbf16> -> vector<8x2114xbf16>
    %c0_2 = arith.constant 0 : index
    %c0_3 = arith.constant 0 : index
    %4 = vector.load %arg30[%c0_2, %c0_3] : memref<8x2048xbf16, #tpu.memory_space<vmem>>, vector<8x2048xbf16>
    %5 = vector.extract_strided_slice %3 {offsets = [0, 0], sizes = [8, 2048], strides = [1, 1]} : vector<8x2114xbf16> to vector<8x2048xbf16>
    %6 = vector.extract_strided_slice %4 {offsets = [0, 0], sizes = [1, 2048], strides = [1, 1]} : vector<8x2048xbf16> to vector<1x2048xbf16>
    %7 = vector.broadcast %6 : vector<1x2048xbf16> to vector<8x2048xbf16>
    %8 = arith.mulf %5, %7 : vector<8x2048xbf16>
    %9 = vector.extract_strided_slice %3 {offsets = [0, 1], sizes = [8, 2048], strides = [1, 1]} : vector<8x2114xbf16> to vector<8x2048xbf16>
    %10 = vector.extract_strided_slice %4 {offsets = [1, 0], sizes = [1, 2048], strides = [1, 1]} : vector<8x2048xbf16> to vector<1x2048xbf16>
    %11 = vector.broadcast %10 : vector<1x2048xbf16> to vector<8x2048xbf16>
    %12 = arith.mulf %9, %11 : vector<8x2048xbf16>
    %13 = vector.extract_strided_slice %3 {offsets = [0, 2], sizes = [8, 2048], strides = [1, 1]} : vector<8x2114xbf16> to vector<8x2048xbf16>
    %14 = vector.extract_strided_slice %4 {offsets = [2, 0], sizes = [1, 2048], strides = [1, 1]} : vector<8x2048xbf16> to vector<1x2048xbf16>
    %15 = vector.broadcast %14 : vector<1x2048xbf16> to vector<8x2048xbf16>
    %16 = arith.mulf %13, %15 : vector<8x2048xbf16>
    %17 = vector.extract_strided_slice %3 {offsets = [0, 32], sizes = [8, 2048], strides = [1, 1]} : vector<8x2114xbf16> to vector<8x2048xbf16>
    %18 = vector.extract_strided_slice %4 {offsets = [3, 0], sizes = [1, 2048], strides = [1, 1]} : vector<8x2048xbf16> to vector<1x2048xbf16>
    %19 = vector.broadcast %18 : vector<1x2048xbf16> to vector<8x2048xbf16>
    %20 = arith.mulf %17, %19 : vector<8x2048xbf16>
    %21 = vector.extract_strided_slice %3 {offsets = [0, 33], sizes = [8, 2048], strides = [1, 1]} : vector<8x2114xbf16> to vector<8x2048xbf16>
    %22 = vector.extract_strided_slice %3 {offsets = [0, 34], sizes = [8, 2048], strides = [1, 1]} : vector<8x2114xbf16> to vector<8x2048xbf16>
    %23 = vector.extract_strided_slice %4 {offsets = [4, 0], sizes = [1, 2048], strides = [1, 1]} : vector<8x2048xbf16> to vector<1x2048xbf16>
    %24 = vector.broadcast %23 : vector<1x2048xbf16> to vector<8x2048xbf16>
    %25 = arith.mulf %22, %24 : vector<8x2048xbf16>
    %26 = vector.extract_strided_slice %3 {offsets = [0, 64], sizes = [8, 2048], strides = [1, 1]} : vector<8x2114xbf16> to vector<8x2048xbf16>
    %27 = vector.extract_strided_slice %4 {offsets = [5, 0], sizes = [1, 2048], strides = [1, 1]} : vector<8x2048xbf16> to vector<1x2048xbf16>
    %28 = vector.broadcast %27 : vector<1x2048xbf16> to vector<8x2048xbf16>
    %29 = arith.mulf %26, %28 : vector<8x2048xbf16>
    %30 = vector.extract_strided_slice %3 {offsets = [0, 65], sizes = [8, 2048], strides = [1, 1]} : vector<8x2114xbf16> to vector<8x2048xbf16>
    %31 = vector.extract_strided_slice %4 {offsets = [6, 0], sizes = [1, 2048], strides = [1, 1]} : vector<8x2048xbf16> to vector<1x2048xbf16>
    %32 = vector.broadcast %31 : vector<1x2048xbf16> to vector<8x2048xbf16>
    %33 = arith.mulf %30, %32 : vector<8x2048xbf16>
    %34 = vector.extract_strided_slice %3 {offsets = [0, 66], sizes = [8, 2048], strides = [1, 1]} : vector<8x2114xbf16> to vector<8x2048xbf16>
    %35 = vector.extract_strided_slice %4 {offsets = [7, 0], sizes = [1, 2048], strides = [1, 1]} : vector<8x2048xbf16> to vector<1x2048xbf16>
    %36 = vector.broadcast %35 : vector<1x2048xbf16> to vector<8x2048xbf16>
    %37 = arith.mulf %34, %36 : vector<8x2048xbf16>
    %38 = tpu.concatenate %8, %12, %16, %20, %21, %25, %29, %33, %37 in 0 : vector<8x2048xbf16>, vector<8x2048xbf16>, vector<8x2048xbf16>, vector<8x2048xbf16>, vector<8x2048xbf16>, vector<8x2048xbf16>, vector<8x2048xbf16>, vector<8x2048xbf16>, vector<8x2048xbf16> -> vector<72x2048xbf16>
    %c0_4 = arith.constant 0 : index
    %c0_5 = arith.constant 0 : index
    %39 = vector.load %arg2[%c0_4, %c0_5] : memref<8x72xbf16, #tpu.memory_space<vmem>>, vector<8x72xbf16>
    %cst_6 = arith.constant dense<0.000000e+00> : vector<8x2048xf32>
    %40 = tpu.matmul %39, %38, %cst_6 {dimension_numbers = #tpu.dot_dimension_numbers<[1], [0], [0], [1], [0, 0, 1, 1], [], []>} : vector<8x72xbf16>, vector<72x2048xbf16>, vector<8x2048xf32> -> vector<8x2048xf32>
    %c0_7 = arith.constant 0 : index
    %c0_8 = arith.constant 0 : index
    %41 = vector.load %arg3[%c0_7, %c0_8] : memref<8x1xf32, #tpu.memory_space<vmem>>, vector<8x1xf32>
    %42 = vector.broadcast %41 : vector<8x1xf32> to vector<8x2048xf32>
    %43 = arith.addf %40, %42 : vector<8x2048xf32>
    %cst_9 = arith.constant 0.000000e+00 : f32
    %44 = vector.broadcast %cst_9 : f32 to vector<8x2048xf32>
    %45 = arith.maximumf %43, %44 : vector<8x2048xf32>
    %46 = arith.truncf %45 : vector<8x2048xf32> to vector<8x2048xbf16>
    %cst_10 = arith.constant 0.000000e+00 : bf16
    %47 = vector.broadcast %cst_10 : bf16 to vector<8x33xbf16>
    %48 = tpu.concatenate %47, %46, %47 in 1 : vector<8x33xbf16>, vector<8x2048xbf16>, vector<8x33xbf16> -> vector<8x2114xbf16>
    %c0_11 = arith.constant 0 : index
    %c0_12 = arith.constant 0 : index
    %49 = vector.load %arg30[%c0_11, %c0_12] : memref<8x2048xbf16, #tpu.memory_space<vmem>>, vector<8x2048xbf16>
    %50 = vector.extract_strided_slice %48 {offsets = [0, 0], sizes = [8, 2048], strides = [1, 1]} : vector<8x2114xbf16> to vector<8x2048xbf16>
    %51 = vector.extract_strided_slice %49 {offsets = [0, 0], sizes = [1, 2048], strides = [1, 1]} : vector<8x2048xbf16> to vector<1x2048xbf16>
    %52 = vector.broadcast %51 : vector<1x2048xbf16> to vector<8x2048xbf16>
    %53 = arith.mulf %50, %52 : vector<8x2048xbf16>
    %54 = vector.extract_strided_slice %48 {offsets = [0, 1], sizes = [8, 2048], strides = [1, 1]} : vector<8x2114xbf16> to vector<8x2048xbf16>
    %55 = vector.extract_strided_slice %49 {offsets = [1, 0], sizes = [1, 2048], strides = [1, 1]} : vector<8x2048xbf16> to vector<1x2048xbf16>
    %56 = vector.broadcast %55 : vector<1x2048xbf16> to vector<8x2048xbf16>
    %57 = arith.mulf %54, %56 : vector<8x2048xbf16>
    %58 = vector.extract_strided_slice %48 {offsets = [0, 2], sizes = [8, 2048], strides = [1, 1]} : vector<8x2114xbf16> to vector<8x2048xbf16>
    %59 = vector.extract_strided_slice %49 {offsets = [2, 0], sizes = [1, 2048], strides = [1, 1]} : vector<8x2048xbf16> to vector<1x2048xbf16>
    %60 = vector.broadcast %59 : vector<1x2048xbf16> to vector<8x2048xbf16>
    %61 = arith.mulf %58, %60 : vector<8x2048xbf16>
    %62 = vector.extract_strided_slice %48 {offsets = [0, 32], sizes = [8, 2048], strides = [1, 1]} : vector<8x2114xbf16> to vector<8x2048xbf16>
    %63 = vector.extract_strided_slice %49 {offsets = [3, 0], sizes = [1, 2048], strides = [1, 1]} : vector<8x2048xbf16> to vector<1x2048xbf16>
    %64 = vector.broadcast %63 : vector<1x2048xbf16> to vector<8x2048xbf16>
    %65 = arith.mulf %62, %64 : vector<8x2048xbf16>
    %66 = vector.extract_strided_slice %48 {offsets = [0, 33], sizes = [8, 2048], strides = [1, 1]} : vector<8x2114xbf16> to vector<8x2048xbf16>
    %67 = vector.extract_strided_slice %48 {offsets = [0, 34], sizes = [8, 2048], strides = [1, 1]} : vector<8x2114xbf16> to vector<8x2048xbf16>
    %68 = vector.extract_strided_slice %49 {offsets = [4, 0], sizes = [1, 2048], strides = [1, 1]} : vector<8x2048xbf16> to vector<1x2048xbf16>
    %69 = vector.broadcast %68 : vector<1x2048xbf16> to vector<8x2048xbf16>
    %70 = arith.mulf %67, %69 : vector<8x2048xbf16>
    %71 = vector.extract_strided_slice %48 {offsets = [0, 64], sizes = [8, 2048], strides = [1, 1]} : vector<8x2114xbf16> to vector<8x2048xbf16>
    %72 = vector.extract_strided_slice %49 {offsets = [5, 0], sizes = [1, 2048], strides = [1, 1]} : vector<8x2048xbf16> to vector<1x2048xbf16>
    %73 = vector.broadcast %72 : vector<1x2048xbf16> to vector<8x2048xbf16>
    %74 = arith.mulf %71, %73 : vector<8x2048xbf16>
    %75 = vector.extract_strided_slice %48 {offsets = [0, 65], sizes = [8, 2048], strides = [1, 1]} : vector<8x2114xbf16> to vector<8x2048xbf16>
    %76 = vector.extract_strided_slice %49 {offsets = [6, 0], sizes = [1, 2048], strides = [1, 1]} : vector<8x2048xbf16> to vector<1x2048xbf16>
    %77 = vector.broadcast %76 : vector<1x2048xbf16> to vector<8x2048xbf16>
    %78 = arith.mulf %75, %77 : vector<8x2048xbf16>
    %79 = vector.extract_strided_slice %48 {offsets = [0, 66], sizes = [8, 2048], strides = [1, 1]} : vector<8x2114xbf16> to vector<8x2048xbf16>
    %80 = vector.extract_strided_slice %49 {offsets = [7, 0], sizes = [1, 2048], strides = [1, 1]} : vector<8x2048xbf16> to vector<1x2048xbf16>
    %81 = vector.broadcast %80 : vector<1x2048xbf16> to vector<8x2048xbf16>
    %82 = arith.mulf %79, %81 : vector<8x2048xbf16>
    %83 = tpu.concatenate %53, %57, %61, %65, %66, %70, %74, %78, %82 in 0 : vector<8x2048xbf16>, vector<8x2048xbf16>, vector<8x2048xbf16>, vector<8x2048xbf16>, vector<8x2048xbf16>, vector<8x2048xbf16>, vector<8x2048xbf16>, vector<8x2048xbf16>, vector<8x2048xbf16> -> vector<72x2048xbf16>
    %c0_13 = arith.constant 0 : index
    %c0_14 = arith.constant 0 : index
    %84 = vector.load %arg4[%c0_13, %c0_14] : memref<8x72xbf16, #tpu.memory_space<vmem>>, vector<8x72xbf16>
    %cst_15 = arith.constant dense<0.000000e+00> : vector<8x2048xf32>
    %85 = tpu.matmul %84, %83, %cst_15 {dimension_numbers = #tpu.dot_dimension_numbers<[1], [0], [0], [1], [0, 0, 1, 1], [], []>} : vector<8x72xbf16>, vector<72x2048xbf16>, vector<8x2048xf32> -> vector<8x2048xf32>
    %c0_16 = arith.constant 0 : index
    %c0_17 = arith.constant 0 : index
    %86 = vector.load %arg5[%c0_16, %c0_17] : memref<8x1xf32, #tpu.memory_space<vmem>>, vector<8x1xf32>
    %87 = vector.broadcast %86 : vector<8x1xf32> to vector<8x2048xf32>
    %88 = arith.addf %85, %87 : vector<8x2048xf32>
    %cst_18 = arith.constant 0.000000e+00 : f32
    %89 = vector.broadcast %cst_18 : f32 to vector<8x2048xf32>
    %90 = arith.maximumf %88, %89 : vector<8x2048xf32>
    %91 = arith.truncf %90 : vector<8x2048xf32> to vector<8x2048xbf16>
    %cst_19 = arith.constant 0.000000e+00 : bf16
    %92 = vector.broadcast %cst_19 : bf16 to vector<8x33xbf16>
    %93 = tpu.concatenate %91, %92 in 1 : vector<8x2048xbf16>, vector<8x33xbf16> -> vector<8x2081xbf16>
    %94 = vector.extract_strided_slice %93 {offsets = [0, 1], sizes = [8, 2048], strides = [1, 1]} : vector<8x2081xbf16> to vector<8x2048xbf16>
    %95 = arith.maximumf %91, %94 : vector<8x2048xbf16>
    %96 = vector.extract_strided_slice %93 {offsets = [0, 32], sizes = [8, 2048], strides = [1, 1]} : vector<8x2081xbf16> to vector<8x2048xbf16>
    %97 = vector.extract_strided_slice %93 {offsets = [0, 33], sizes = [8, 2048], strides = [1, 1]} : vector<8x2081xbf16> to vector<8x2048xbf16>
    %98 = arith.maximumf %96, %97 : vector<8x2048xbf16>
    %99 = arith.maximumf %95, %98 : vector<8x2048xbf16>
    %c0_20 = arith.constant 0 : index
    %c0_21 = arith.constant 0 : index
    %100 = vector.load %arg34[%c0_20, %c0_21] : memref<1024x256xbf16, #tpu.memory_space<vmem>>, vector<1024x256xbf16>
    %101 = vector.extract_strided_slice %99 {offsets = [0, 0], sizes = [8, 1024], strides = [1, 1]} : vector<8x2048xbf16> to vector<8x1024xbf16>
    %cst_22 = arith.constant dense<0.000000e+00> : vector<8x256xf32>
    %102 = tpu.matmul %101, %100, %cst_22 {dimension_numbers = #tpu.dot_dimension_numbers<[1], [0], [0], [1], [0, 0, 1, 1], [], []>} : vector<8x1024xbf16>, vector<1024x256xbf16>, vector<8x256xf32> -> vector<8x256xf32>
    %103 = vector.extract_strided_slice %99 {offsets = [0, 1024], sizes = [8, 1024], strides = [1, 1]} : vector<8x2048xbf16> to vector<8x1024xbf16>
    %cst_23 = arith.constant dense<0.000000e+00> : vector<8x256xf32>
    %104 = tpu.matmul %103, %100, %cst_23 {dimension_numbers = #tpu.dot_dimension_numbers<[1], [0], [0], [1], [0, 0, 1, 1], [], []>} : vector<8x1024xbf16>, vector<1024x256xbf16>, vector<8x256xf32> -> vector<8x256xf32>
    %105 = tpu.concatenate %102, %104 in 1 : vector<8x256xf32>, vector<8x256xf32> -> vector<8x512xf32>
    %106 = arith.truncf %105 : vector<8x512xf32> to vector<8x512xbf16>
    %cst_24 = arith.constant 0.000000e+00 : bf16
    %107 = vector.broadcast %cst_24 : bf16 to vector<8x17xbf16>
    %108 = tpu.concatenate %107, %106, %107 in 1 : vector<8x17xbf16>, vector<8x512xbf16>, vector<8x17xbf16> -> vector<8x546xbf16>
    %c0_25 = arith.constant 0 : index
    %c0_26 = arith.constant 0 : index
    %109 = vector.load %arg31[%c0_25, %c0_26] : memref<8x512xbf16, #tpu.memory_space<vmem>>, vector<8x512xbf16>
    %110 = vector.extract_strided_slice %108 {offsets = [0, 0], sizes = [8, 512], strides = [1, 1]} : vector<8x546xbf16> to vector<8x512xbf16>
    %111 = vector.extract_strided_slice %109 {offsets = [0, 0], sizes = [1, 512], strides = [1, 1]} : vector<8x512xbf16> to vector<1x512xbf16>
    %112 = vector.broadcast %111 : vector<1x512xbf16> to vector<8x512xbf16>
    %113 = arith.mulf %110, %112 : vector<8x512xbf16>
    %114 = vector.extract_strided_slice %108 {offsets = [0, 1], sizes = [8, 512], strides = [1, 1]} : vector<8x546xbf16> to vector<8x512xbf16>
    %115 = vector.extract_strided_slice %109 {offsets = [1, 0], sizes = [1, 512], strides = [1, 1]} : vector<8x512xbf16> to vector<1x512xbf16>
    %116 = vector.broadcast %115 : vector<1x512xbf16> to vector<8x512xbf16>
    %117 = arith.mulf %114, %116 : vector<8x512xbf16>
    %118 = vector.extract_strided_slice %108 {offsets = [0, 2], sizes = [8, 512], strides = [1, 1]} : vector<8x546xbf16> to vector<8x512xbf16>
    %119 = vector.extract_strided_slice %109 {offsets = [2, 0], sizes = [1, 512], strides = [1, 1]} : vector<8x512xbf16> to vector<1x512xbf16>
    %120 = vector.broadcast %119 : vector<1x512xbf16> to vector<8x512xbf16>
    %121 = arith.mulf %118, %120 : vector<8x512xbf16>
    %122 = vector.extract_strided_slice %108 {offsets = [0, 16], sizes = [8, 512], strides = [1, 1]} : vector<8x546xbf16> to vector<8x512xbf16>
    %123 = vector.extract_strided_slice %109 {offsets = [3, 0], sizes = [1, 512], strides = [1, 1]} : vector<8x512xbf16> to vector<1x512xbf16>
    %124 = vector.broadcast %123 : vector<1x512xbf16> to vector<8x512xbf16>
    %125 = arith.mulf %122, %124 : vector<8x512xbf16>
    %126 = vector.extract_strided_slice %108 {offsets = [0, 17], sizes = [8, 512], strides = [1, 1]} : vector<8x546xbf16> to vector<8x512xbf16>
    %127 = vector.extract_strided_slice %108 {offsets = [0, 18], sizes = [8, 512], strides = [1, 1]} : vector<8x546xbf16> to vector<8x512xbf16>
    %128 = vector.extract_strided_slice %109 {offsets = [4, 0], sizes = [1, 512], strides = [1, 1]} : vector<8x512xbf16> to vector<1x512xbf16>
    %129 = vector.broadcast %128 : vector<1x512xbf16> to vector<8x512xbf16>
    %130 = arith.mulf %127, %129 : vector<8x512xbf16>
    %131 = vector.extract_strided_slice %108 {offsets = [0, 32], sizes = [8, 512], strides = [1, 1]} : vector<8x546xbf16> to vector<8x512xbf16>
    %132 = vector.extract_strided_slice %109 {offsets = [5, 0], sizes = [1, 512], strides = [1, 1]} : vector<8x512xbf16> to vector<1x512xbf16>
    %133 = vector.broadcast %132 : vector<1x512xbf16> to vector<8x512xbf16>
    %134 = arith.mulf %131, %133 : vector<8x512xbf16>
    %135 = vector.extract_strided_slice %108 {offsets = [0, 33], sizes = [8, 512], strides = [1, 1]} : vector<8x546xbf16> to vector<8x512xbf16>
    %136 = vector.extract_strided_slice %109 {offsets = [6, 0], sizes = [1, 512], strides = [1, 1]} : vector<8x512xbf16> to vector<1x512xbf16>
    %137 = vector.broadcast %136 : vector<1x512xbf16> to vector<8x512xbf16>
    %138 = arith.mulf %135, %137 : vector<8x512xbf16>
    %139 = vector.extract_strided_slice %108 {offsets = [0, 34], sizes = [8, 512], strides = [1, 1]} : vector<8x546xbf16> to vector<8x512xbf16>
    %140 = vector.extract_strided_slice %109 {offsets = [7, 0], sizes = [1, 512], strides = [1, 1]} : vector<8x512xbf16> to vector<1x512xbf16>
    %141 = vector.broadcast %140 : vector<1x512xbf16> to vector<8x512xbf16>
    %142 = arith.mulf %139, %141 : vector<8x512xbf16>
    %143 = tpu.concatenate %113, %117, %121, %125, %126, %130, %134, %138, %142 in 0 : vector<8x512xbf16>, vector<8x512xbf16>, vector<8x512xbf16>, vector<8x512xbf16>, vector<8x512xbf16>, vector<8x512xbf16>, vector<8x512xbf16>, vector<8x512xbf16>, vector<8x512xbf16> -> vector<72x512xbf16>
    %c0_27 = arith.constant 0 : index
    %c0_28 = arith.constant 0 : index
    %144 = vector.load %arg6[%c0_27, %c0_28] : memref<16x72xbf16, #tpu.memory_space<vmem>>, vector<16x72xbf16>
    %cst_29 = arith.constant dense<0.000000e+00> : vector<16x512xf32>
    %145 = tpu.matmul %144, %143, %cst_29 {dimension_numbers = #tpu.dot_dimension_numbers<[1], [0], [0], [1], [0, 0, 1, 1], [], []>} : vector<16x72xbf16>, vector<72x512xbf16>, vector<16x512xf32> -> vector<16x512xf32>
    %c0_30 = arith.constant 0 : index
    %c0_31 = arith.constant 0 : index
    %146 = vector.load %arg7[%c0_30, %c0_31] : memref<16x1xf32, #tpu.memory_space<vmem>>, vector<16x1xf32>
    %147 = vector.broadcast %146 : vector<16x1xf32> to vector<16x512xf32>
    %148 = arith.addf %145, %147 : vector<16x512xf32>
    %cst_32 = arith.constant 0.000000e+00 : f32
    %149 = vector.broadcast %cst_32 : f32 to vector<16x512xf32>
    %150 = arith.maximumf %148, %149 : vector<16x512xf32>
    %151 = arith.truncf %150 : vector<16x512xf32> to vector<16x512xbf16>
    %cst_33 = arith.constant 0.000000e+00 : bf16
    %152 = vector.broadcast %cst_33 : bf16 to vector<16x17xbf16>
    %153 = tpu.concatenate %152, %151, %152 in 1 : vector<16x17xbf16>, vector<16x512xbf16>, vector<16x17xbf16> -> vector<16x546xbf16>
    %c0_34 = arith.constant 0 : index
    %c0_35 = arith.constant 0 : index
    %154 = vector.load %arg31[%c0_34, %c0_35] : memref<8x512xbf16, #tpu.memory_space<vmem>>, vector<8x512xbf16>
    %155 = vector.extract_strided_slice %153 {offsets = [0, 0], sizes = [16, 512], strides = [1, 1]} : vector<16x546xbf16> to vector<16x512xbf16>
    %156 = vector.extract_strided_slice %154 {offsets = [0, 0], sizes = [1, 512], strides = [1, 1]} : vector<8x512xbf16> to vector<1x512xbf16>
    %157 = vector.broadcast %156 : vector<1x512xbf16> to vector<16x512xbf16>
    %158 = arith.mulf %155, %157 : vector<16x512xbf16>
    %159 = vector.extract_strided_slice %153 {offsets = [0, 1], sizes = [16, 512], strides = [1, 1]} : vector<16x546xbf16> to vector<16x512xbf16>
    %160 = vector.extract_strided_slice %154 {offsets = [1, 0], sizes = [1, 512], strides = [1, 1]} : vector<8x512xbf16> to vector<1x512xbf16>
    %161 = vector.broadcast %160 : vector<1x512xbf16> to vector<16x512xbf16>
    %162 = arith.mulf %159, %161 : vector<16x512xbf16>
    %163 = vector.extract_strided_slice %153 {offsets = [0, 2], sizes = [16, 512], strides = [1, 1]} : vector<16x546xbf16> to vector<16x512xbf16>
    %164 = vector.extract_strided_slice %154 {offsets = [2, 0], sizes = [1, 512], strides = [1, 1]} : vector<8x512xbf16> to vector<1x512xbf16>
    %165 = vector.broadcast %164 : vector<1x512xbf16> to vector<16x512xbf16>
    %166 = arith.mulf %163, %165 : vector<16x512xbf16>
    %167 = vector.extract_strided_slice %153 {offsets = [0, 16], sizes = [16, 512], strides = [1, 1]} : vector<16x546xbf16> to vector<16x512xbf16>
    %168 = vector.extract_strided_slice %154 {offsets = [3, 0], sizes = [1, 512], strides = [1, 1]} : vector<8x512xbf16> to vector<1x512xbf16>
    %169 = vector.broadcast %168 : vector<1x512xbf16> to vector<16x512xbf16>
    %170 = arith.mulf %167, %169 : vector<16x512xbf16>
    %171 = vector.extract_strided_slice %153 {offsets = [0, 17], sizes = [16, 512], strides = [1, 1]} : vector<16x546xbf16> to vector<16x512xbf16>
    %172 = vector.extract_strided_slice %153 {offsets = [0, 18], sizes = [16, 512], strides = [1, 1]} : vector<16x546xbf16> to vector<16x512xbf16>
    %173 = vector.extract_strided_slice %154 {offsets = [4, 0], sizes = [1, 512], strides = [1, 1]} : vector<8x512xbf16> to vector<1x512xbf16>
    %174 = vector.broadcast %173 : vector<1x512xbf16> to vector<16x512xbf16>
    %175 = arith.mulf %172, %174 : vector<16x512xbf16>
    %176 = vector.extract_strided_slice %153 {offsets = [0, 32], sizes = [16, 512], strides = [1, 1]} : vector<16x546xbf16> to vector<16x512xbf16>
    %177 = vector.extract_strided_slice %154 {offsets = [5, 0], sizes = [1, 512], strides = [1, 1]} : vector<8x512xbf16> to vector<1x512xbf16>
    %178 = vector.broadcast %177 : vector<1x512xbf16> to vector<16x512xbf16>
    %179 = arith.mulf %176, %178 : vector<16x512xbf16>
    %180 = vector.extract_strided_slice %153 {offsets = [0, 33], sizes = [16, 512], strides = [1, 1]} : vector<16x546xbf16> to vector<16x512xbf16>
    %181 = vector.extract_strided_slice %154 {offsets = [6, 0], sizes = [1, 512], strides = [1, 1]} : vector<8x512xbf16> to vector<1x512xbf16>
    %182 = vector.broadcast %181 : vector<1x512xbf16> to vector<16x512xbf16>
    %183 = arith.mulf %180, %182 : vector<16x512xbf16>
    %184 = vector.extract_strided_slice %153 {offsets = [0, 34], sizes = [16, 512], strides = [1, 1]} : vector<16x546xbf16> to vector<16x512xbf16>
    %185 = vector.extract_strided_slice %154 {offsets = [7, 0], sizes = [1, 512], strides = [1, 1]} : vector<8x512xbf16> to vector<1x512xbf16>
    %186 = vector.broadcast %185 : vector<1x512xbf16> to vector<16x512xbf16>
    %187 = arith.mulf %184, %186 : vector<16x512xbf16>
    %188 = tpu.concatenate %158, %162, %166, %170, %171, %175, %179, %183, %187 in 0 : vector<16x512xbf16>, vector<16x512xbf16>, vector<16x512xbf16>, vector<16x512xbf16>, vector<16x512xbf16>, vector<16x512xbf16>, vector<16x512xbf16>, vector<16x512xbf16>, vector<16x512xbf16> -> vector<144x512xbf16>
    %c0_36 = arith.constant 0 : index
    %c0_37 = arith.constant 0 : index
    %189 = vector.load %arg8[%c0_36, %c0_37] : memref<16x144xbf16, #tpu.memory_space<vmem>>, vector<16x144xbf16>
    %cst_38 = arith.constant dense<0.000000e+00> : vector<16x512xf32>
    %190 = tpu.matmul %189, %188, %cst_38 {dimension_numbers = #tpu.dot_dimension_numbers<[1], [0], [0], [1], [0, 0, 1, 1], [], []>} : vector<16x144xbf16>, vector<144x512xbf16>, vector<16x512xf32> -> vector<16x512xf32>
    %c0_39 = arith.constant 0 : index
    %c0_40 = arith.constant 0 : index
    %191 = vector.load %arg9[%c0_39, %c0_40] : memref<16x1xf32, #tpu.memory_space<vmem>>, vector<16x1xf32>
    %192 = vector.broadcast %191 : vector<16x1xf32> to vector<16x512xf32>
    %193 = arith.addf %190, %192 : vector<16x512xf32>
    %cst_41 = arith.constant 0.000000e+00 : f32
    %194 = vector.broadcast %cst_41 : f32 to vector<16x512xf32>
    %195 = arith.maximumf %193, %194 : vector<16x512xf32>
    %196 = arith.truncf %195 : vector<16x512xf32> to vector<16x512xbf16>
    %cst_42 = arith.constant 0.000000e+00 : bf16
    %197 = vector.broadcast %cst_42 : bf16 to vector<16x17xbf16>
    %198 = tpu.concatenate %196, %197 in 1 : vector<16x512xbf16>, vector<16x17xbf16> -> vector<16x529xbf16>
    %199 = vector.extract_strided_slice %198 {offsets = [0, 1], sizes = [16, 512], strides = [1, 1]} : vector<16x529xbf16> to vector<16x512xbf16>
    %200 = arith.maximumf %196, %199 : vector<16x512xbf16>
    %201 = vector.extract_strided_slice %198 {offsets = [0, 16], sizes = [16, 512], strides = [1, 1]} : vector<16x529xbf16> to vector<16x512xbf16>
    %202 = vector.extract_strided_slice %198 {offsets = [0, 17], sizes = [16, 512], strides = [1, 1]} : vector<16x529xbf16> to vector<16x512xbf16>
    %203 = arith.maximumf %201, %202 : vector<16x512xbf16>
    %204 = arith.maximumf %200, %203 : vector<16x512xbf16>
    %c0_43 = arith.constant 0 : index
    %c0_44 = arith.constant 0 : index
    %205 = vector.load %arg35[%c0_43, %c0_44] : memref<256x64xbf16, #tpu.memory_space<vmem>>, vector<256x64xbf16>
    %206 = vector.extract_strided_slice %204 {offsets = [0, 0], sizes = [16, 256], strides = [1, 1]} : vector<16x512xbf16> to vector<16x256xbf16>
    %cst_45 = arith.constant dense<0.000000e+00> : vector<16x64xf32>
    %207 = tpu.matmul %206, %205, %cst_45 {dimension_numbers = #tpu.dot_dimension_numbers<[1], [0], [0], [1], [0, 0, 1, 1], [], []>} : vector<16x256xbf16>, vector<256x64xbf16>, vector<16x64xf32> -> vector<16x64xf32>
    %208 = vector.extract_strided_slice %204 {offsets = [0, 256], sizes = [16, 256], strides = [1, 1]} : vector<16x512xbf16> to vector<16x256xbf16>
    %cst_46 = arith.constant dense<0.000000e+00> : vector<16x64xf32>
    %209 = tpu.matmul %208, %205, %cst_46 {dimension_numbers = #tpu.dot_dimension_numbers<[1], [0], [0], [1], [0, 0, 1, 1], [], []>} : vector<16x256xbf16>, vector<256x64xbf16>, vector<16x64xf32> -> vector<16x64xf32>
    %210 = tpu.concatenate %207, %209 in 1 : vector<16x64xf32>, vector<16x64xf32> -> vector<16x128xf32>
    %211 = arith.truncf %210 : vector<16x128xf32> to vector<16x128xbf16>
    %cst_47 = arith.constant 0.000000e+00 : bf16
    %212 = vector.broadcast %cst_47 : bf16 to vector<16x9xbf16>
    %213 = tpu.concatenate %212, %211, %212 in 1 : vector<16x9xbf16>, vector<16x128xbf16>, vector<16x9xbf16> -> vector<16x146xbf16>
    %c0_48 = arith.constant 0 : index
    %c0_49 = arith.constant 0 : index
    %214 = vector.load %arg32[%c0_48, %c0_49] : memref<8x128xbf16, #tpu.memory_space<vmem>>, vector<8x128xbf16>
    %215 = vector.extract_strided_slice %213 {offsets = [0, 0], sizes = [16, 128], strides = [1, 1]} : vector<16x146xbf16> to vector<16x128xbf16>
    %216 = vector.extract_strided_slice %214 {offsets = [0, 0], sizes = [1, 128], strides = [1, 1]} : vector<8x128xbf16> to vector<1x128xbf16>
    %217 = vector.broadcast %216 : vector<1x128xbf16> to vector<16x128xbf16>
    %218 = arith.mulf %215, %217 : vector<16x128xbf16>
    %219 = vector.extract_strided_slice %213 {offsets = [0, 1], sizes = [16, 128], strides = [1, 1]} : vector<16x146xbf16> to vector<16x128xbf16>
    %220 = vector.extract_strided_slice %214 {offsets = [1, 0], sizes = [1, 128], strides = [1, 1]} : vector<8x128xbf16> to vector<1x128xbf16>
    %221 = vector.broadcast %220 : vector<1x128xbf16> to vector<16x128xbf16>
    %222 = arith.mulf %219, %221 : vector<16x128xbf16>
    %223 = vector.extract_strided_slice %213 {offsets = [0, 2], sizes = [16, 128], strides = [1, 1]} : vector<16x146xbf16> to vector<16x128xbf16>
    %224 = vector.extract_strided_slice %214 {offsets = [2, 0], sizes = [1, 128], strides = [1, 1]} : vector<8x128xbf16> to vector<1x128xbf16>
    %225 = vector.broadcast %224 : vector<1x128xbf16> to vector<16x128xbf16>
    %226 = arith.mulf %223, %225 : vector<16x128xbf16>
    %227 = vector.extract_strided_slice %213 {offsets = [0, 8], sizes = [16, 128], strides = [1, 1]} : vector<16x146xbf16> to vector<16x128xbf16>
    %228 = vector.extract_strided_slice %214 {offsets = [3, 0], sizes = [1, 128], strides = [1, 1]} : vector<8x128xbf16> to vector<1x128xbf16>
    %229 = vector.broadcast %228 : vector<1x128xbf16> to vector<16x128xbf16>
    %230 = arith.mulf %227, %229 : vector<16x128xbf16>
    %231 = vector.extract_strided_slice %213 {offsets = [0, 9], sizes = [16, 128], strides = [1, 1]} : vector<16x146xbf16> to vector<16x128xbf16>
    %232 = vector.extract_strided_slice %213 {offsets = [0, 10], sizes = [16, 128], strides = [1, 1]} : vector<16x146xbf16> to vector<16x128xbf16>
    %233 = vector.extract_strided_slice %214 {offsets = [4, 0], sizes = [1, 128], strides = [1, 1]} : vector<8x128xbf16> to vector<1x128xbf16>
    %234 = vector.broadcast %233 : vector<1x128xbf16> to vector<16x128xbf16>
    %235 = arith.mulf %232, %234 : vector<16x128xbf16>
    %236 = vector.extract_strided_slice %213 {offsets = [0, 16], sizes = [16, 128], strides = [1, 1]} : vector<16x146xbf16> to vector<16x128xbf16>
    %237 = vector.extract_strided_slice %214 {offsets = [5, 0], sizes = [1, 128], strides = [1, 1]} : vector<8x128xbf16> to vector<1x128xbf16>
    %238 = vector.broadcast %237 : vector<1x128xbf16> to vector<16x128xbf16>
    %239 = arith.mulf %236, %238 : vector<16x128xbf16>
    %240 = vector.extract_strided_slice %213 {offsets = [0, 17], sizes = [16, 128], strides = [1, 1]} : vector<16x146xbf16> to vector<16x128xbf16>
    %241 = vector.extract_strided_slice %214 {offsets = [6, 0], sizes = [1, 128], strides = [1, 1]} : vector<8x128xbf16> to vector<1x128xbf16>
    %242 = vector.broadcast %241 : vector<1x128xbf16> to vector<16x128xbf16>
    %243 = arith.mulf %240, %242 : vector<16x128xbf16>
    %244 = vector.extract_strided_slice %213 {offsets = [0, 18], sizes = [16, 128], strides = [1, 1]} : vector<16x146xbf16> to vector<16x128xbf16>
    %245 = vector.extract_strided_slice %214 {offsets = [7, 0], sizes = [1, 128], strides = [1, 1]} : vector<8x128xbf16> to vector<1x128xbf16>
    %246 = vector.broadcast %245 : vector<1x128xbf16> to vector<16x128xbf16>
    %247 = arith.mulf %244, %246 : vector<16x128xbf16>
    %248 = tpu.concatenate %218, %222, %226, %230, %231, %235, %239, %243, %247 in 0 : vector<16x128xbf16>, vector<16x128xbf16>, vector<16x128xbf16>, vector<16x128xbf16>, vector<16x128xbf16>, vector<16x128xbf16>, vector<16x128xbf16>, vector<16x128xbf16>, vector<16x128xbf16> -> vector<144x128xbf16>
    %c0_50 = arith.constant 0 : index
    %c0_51 = arith.constant 0 : index
    %249 = vector.load %arg10[%c0_50, %c0_51] : memref<32x144xbf16, #tpu.memory_space<vmem>>, vector<32x144xbf16>
    %cst_52 = arith.constant dense<0.000000e+00> : vector<32x128xf32>
    %250 = tpu.matmul %249, %248, %cst_52 {dimension_numbers = #tpu.dot_dimension_numbers<[1], [0], [0], [1], [0, 0, 1, 1], [], []>} : vector<32x144xbf16>, vector<144x128xbf16>, vector<32x128xf32> -> vector<32x128xf32>
    %c0_53 = arith.constant 0 : index
    %c0_54 = arith.constant 0 : index
    %251 = vector.load %arg11[%c0_53, %c0_54] : memref<32x1xf32, #tpu.memory_space<vmem>>, vector<32x1xf32>
    %252 = vector.broadcast %251 : vector<32x1xf32> to vector<32x128xf32>
    %253 = arith.addf %250, %252 : vector<32x128xf32>
    %cst_55 = arith.constant 0.000000e+00 : f32
    %254 = vector.broadcast %cst_55 : f32 to vector<32x128xf32>
    %255 = arith.maximumf %253, %254 : vector<32x128xf32>
    %256 = arith.truncf %255 : vector<32x128xf32> to vector<32x128xbf16>
    %cst_56 = arith.constant 0.000000e+00 : bf16
    %257 = vector.broadcast %cst_56 : bf16 to vector<32x9xbf16>
    %258 = tpu.concatenate %257, %256, %257 in 1 : vector<32x9xbf16>, vector<32x128xbf16>, vector<32x9xbf16> -> vector<32x146xbf16>
    %c0_57 = arith.constant 0 : index
    %c0_58 = arith.constant 0 : index
    %259 = vector.load %arg32[%c0_57, %c0_58] : memref<8x128xbf16, #tpu.memory_space<vmem>>, vector<8x128xbf16>
    %260 = vector.extract_strided_slice %258 {offsets = [0, 0], sizes = [32, 128], strides = [1, 1]} : vector<32x146xbf16> to vector<32x128xbf16>
    %261 = vector.extract_strided_slice %259 {offsets = [0, 0], sizes = [1, 128], strides = [1, 1]} : vector<8x128xbf16> to vector<1x128xbf16>
    %262 = vector.broadcast %261 : vector<1x128xbf16> to vector<32x128xbf16>
    %263 = arith.mulf %260, %262 : vector<32x128xbf16>
    %264 = vector.extract_strided_slice %258 {offsets = [0, 1], sizes = [32, 128], strides = [1, 1]} : vector<32x146xbf16> to vector<32x128xbf16>
    %265 = vector.extract_strided_slice %259 {offsets = [1, 0], sizes = [1, 128], strides = [1, 1]} : vector<8x128xbf16> to vector<1x128xbf16>
    %266 = vector.broadcast %265 : vector<1x128xbf16> to vector<32x128xbf16>
    %267 = arith.mulf %264, %266 : vector<32x128xbf16>
    %268 = vector.extract_strided_slice %258 {offsets = [0, 2], sizes = [32, 128], strides = [1, 1]} : vector<32x146xbf16> to vector<32x128xbf16>
    %269 = vector.extract_strided_slice %259 {offsets = [2, 0], sizes = [1, 128], strides = [1, 1]} : vector<8x128xbf16> to vector<1x128xbf16>
    %270 = vector.broadcast %269 : vector<1x128xbf16> to vector<32x128xbf16>
    %271 = arith.mulf %268, %270 : vector<32x128xbf16>
    %272 = vector.extract_strided_slice %258 {offsets = [0, 8], sizes = [32, 128], strides = [1, 1]} : vector<32x146xbf16> to vector<32x128xbf16>
    %273 = vector.extract_strided_slice %259 {offsets = [3, 0], sizes = [1, 128], strides = [1, 1]} : vector<8x128xbf16> to vector<1x128xbf16>
    %274 = vector.broadcast %273 : vector<1x128xbf16> to vector<32x128xbf16>
    %275 = arith.mulf %272, %274 : vector<32x128xbf16>
    %276 = vector.extract_strided_slice %258 {offsets = [0, 9], sizes = [32, 128], strides = [1, 1]} : vector<32x146xbf16> to vector<32x128xbf16>
    %277 = vector.extract_strided_slice %258 {offsets = [0, 10], sizes = [32, 128], strides = [1, 1]} : vector<32x146xbf16> to vector<32x128xbf16>
    %278 = vector.extract_strided_slice %259 {offsets = [4, 0], sizes = [1, 128], strides = [1, 1]} : vector<8x128xbf16> to vector<1x128xbf16>
    %279 = vector.broadcast %278 : vector<1x128xbf16> to vector<32x128xbf16>
    %280 = arith.mulf %277, %279 : vector<32x128xbf16>
    %281 = vector.extract_strided_slice %258 {offsets = [0, 16], sizes = [32, 128], strides = [1, 1]} : vector<32x146xbf16> to vector<32x128xbf16>
    %282 = vector.extract_strided_slice %259 {offsets = [5, 0], sizes = [1, 128], strides = [1, 1]} : vector<8x128xbf16> to vector<1x128xbf16>
    %283 = vector.broadcast %282 : vector<1x128xbf16> to vector<32x128xbf16>
    %284 = arith.mulf %281, %283 : vector<32x128xbf16>
    %285 = vector.extract_strided_slice %258 {offsets = [0, 17], sizes = [32, 128], strides = [1, 1]} : vector<32x146xbf16> to vector<32x128xbf16>
    %286 = vector.extract_strided_slice %259 {offsets = [6, 0], sizes = [1, 128], strides = [1, 1]} : vector<8x128xbf16> to vector<1x128xbf16>
    %287 = vector.broadcast %286 : vector<1x128xbf16> to vector<32x128xbf16>
    %288 = arith.mulf %285, %287 : vector<32x128xbf16>
    %289 = vector.extract_strided_slice %258 {offsets = [0, 18], sizes = [32, 128], strides = [1, 1]} : vector<32x146xbf16> to vector<32x128xbf16>
    %290 = vector.extract_strided_slice %259 {offsets = [7, 0], sizes = [1, 128], strides = [1, 1]} : vector<8x128xbf16> to vector<1x128xbf16>
    %291 = vector.broadcast %290 : vector<1x128xbf16> to vector<32x128xbf16>
    %292 = arith.mulf %289, %291 : vector<32x128xbf16>
    %293 = tpu.concatenate %263, %267, %271, %275, %276, %280, %284, %288, %292 in 0 : vector<32x128xbf16>, vector<32x128xbf16>, vector<32x128xbf16>, vector<32x128xbf16>, vector<32x128xbf16>, vector<32x128xbf16>, vector<32x128xbf16>, vector<32x128xbf16>, vector<32x128xbf16> -> vector<288x128xbf16>
    %c0_59 = arith.constant 0 : index
    %c0_60 = arith.constant 0 : index
    %294 = vector.load %arg12[%c0_59, %c0_60] : memref<32x288xbf16, #tpu.memory_space<vmem>>, vector<32x288xbf16>
    %cst_61 = arith.constant dense<0.000000e+00> : vector<32x128xf32>
    %295 = tpu.matmul %294, %293, %cst_61 {dimension_numbers = #tpu.dot_dimension_numbers<[1], [0], [0], [1], [0, 0, 1, 1], [], []>} : vector<32x288xbf16>, vector<288x128xbf16>, vector<32x128xf32> -> vector<32x128xf32>
    %c0_62 = arith.constant 0 : index
    %c0_63 = arith.constant 0 : index
    %296 = vector.load %arg13[%c0_62, %c0_63] : memref<32x1xf32, #tpu.memory_space<vmem>>, vector<32x1xf32>
    %297 = vector.broadcast %296 : vector<32x1xf32> to vector<32x128xf32>
    %298 = arith.addf %295, %297 : vector<32x128xf32>
    %cst_64 = arith.constant 0.000000e+00 : f32
    %299 = vector.broadcast %cst_64 : f32 to vector<32x128xf32>
    %300 = arith.maximumf %298, %299 : vector<32x128xf32>
    %301 = arith.truncf %300 : vector<32x128xf32> to vector<32x128xbf16>
    %cst_65 = arith.constant 0.000000e+00 : bf16
    %302 = vector.broadcast %cst_65 : bf16 to vector<32x9xbf16>
    %303 = tpu.concatenate %302, %301, %302 in 1 : vector<32x9xbf16>, vector<32x128xbf16>, vector<32x9xbf16> -> vector<32x146xbf16>
    %c0_66 = arith.constant 0 : index
    %c0_67 = arith.constant 0 : index
    %304 = vector.load %arg32[%c0_66, %c0_67] : memref<8x128xbf16, #tpu.memory_space<vmem>>, vector<8x128xbf16>
    %305 = vector.extract_strided_slice %303 {offsets = [0, 0], sizes = [32, 128], strides = [1, 1]} : vector<32x146xbf16> to vector<32x128xbf16>
    %306 = vector.extract_strided_slice %304 {offsets = [0, 0], sizes = [1, 128], strides = [1, 1]} : vector<8x128xbf16> to vector<1x128xbf16>
    %307 = vector.broadcast %306 : vector<1x128xbf16> to vector<32x128xbf16>
    %308 = arith.mulf %305, %307 : vector<32x128xbf16>
    %309 = vector.extract_strided_slice %303 {offsets = [0, 1], sizes = [32, 128], strides = [1, 1]} : vector<32x146xbf16> to vector<32x128xbf16>
    %310 = vector.extract_strided_slice %304 {offsets = [1, 0], sizes = [1, 128], strides = [1, 1]} : vector<8x128xbf16> to vector<1x128xbf16>
    %311 = vector.broadcast %310 : vector<1x128xbf16> to vector<32x128xbf16>
    %312 = arith.mulf %309, %311 : vector<32x128xbf16>
    %313 = vector.extract_strided_slice %303 {offsets = [0, 2], sizes = [32, 128], strides = [1, 1]} : vector<32x146xbf16> to vector<32x128xbf16>
    %314 = vector.extract_strided_slice %304 {offsets = [2, 0], sizes = [1, 128], strides = [1, 1]} : vector<8x128xbf16> to vector<1x128xbf16>
    %315 = vector.broadcast %314 : vector<1x128xbf16> to vector<32x128xbf16>
    %316 = arith.mulf %313, %315 : vector<32x128xbf16>
    %317 = vector.extract_strided_slice %303 {offsets = [0, 8], sizes = [32, 128], strides = [1, 1]} : vector<32x146xbf16> to vector<32x128xbf16>
    %318 = vector.extract_strided_slice %304 {offsets = [3, 0], sizes = [1, 128], strides = [1, 1]} : vector<8x128xbf16> to vector<1x128xbf16>
    %319 = vector.broadcast %318 : vector<1x128xbf16> to vector<32x128xbf16>
    %320 = arith.mulf %317, %319 : vector<32x128xbf16>
    %321 = vector.extract_strided_slice %303 {offsets = [0, 9], sizes = [32, 128], strides = [1, 1]} : vector<32x146xbf16> to vector<32x128xbf16>
    %322 = vector.extract_strided_slice %303 {offsets = [0, 10], sizes = [32, 128], strides = [1, 1]} : vector<32x146xbf16> to vector<32x128xbf16>
    %323 = vector.extract_strided_slice %304 {offsets = [4, 0], sizes = [1, 128], strides = [1, 1]} : vector<8x128xbf16> to vector<1x128xbf16>
    %324 = vector.broadcast %323 : vector<1x128xbf16> to vector<32x128xbf16>
    %325 = arith.mulf %322, %324 : vector<32x128xbf16>
    %326 = vector.extract_strided_slice %303 {offsets = [0, 16], sizes = [32, 128], strides = [1, 1]} : vector<32x146xbf16> to vector<32x128xbf16>
    %327 = vector.extract_strided_slice %304 {offsets = [5, 0], sizes = [1, 128], strides = [1, 1]} : vector<8x128xbf16> to vector<1x128xbf16>
    %328 = vector.broadcast %327 : vector<1x128xbf16> to vector<32x128xbf16>
    %329 = arith.mulf %326, %328 : vector<32x128xbf16>
    %330 = vector.extract_strided_slice %303 {offsets = [0, 17], sizes = [32, 128], strides = [1, 1]} : vector<32x146xbf16> to vector<32x128xbf16>
    %331 = vector.extract_strided_slice %304 {offsets = [6, 0], sizes = [1, 128], strides = [1, 1]} : vector<8x128xbf16> to vector<1x128xbf16>
    %332 = vector.broadcast %331 : vector<1x128xbf16> to vector<32x128xbf16>
    %333 = arith.mulf %330, %332 : vector<32x128xbf16>
    %334 = vector.extract_strided_slice %303 {offsets = [0, 18], sizes = [32, 128], strides = [1, 1]} : vector<32x146xbf16> to vector<32x128xbf16>
    %335 = vector.extract_strided_slice %304 {offsets = [7, 0], sizes = [1, 128], strides = [1, 1]} : vector<8x128xbf16> to vector<1x128xbf16>
    %336 = vector.broadcast %335 : vector<1x128xbf16> to vector<32x128xbf16>
    %337 = arith.mulf %334, %336 : vector<32x128xbf16>
    %338 = tpu.concatenate %308, %312, %316, %320, %321, %325, %329, %333, %337 in 0 : vector<32x128xbf16>, vector<32x128xbf16>, vector<32x128xbf16>, vector<32x128xbf16>, vector<32x128xbf16>, vector<32x128xbf16>, vector<32x128xbf16>, vector<32x128xbf16>, vector<32x128xbf16> -> vector<288x128xbf16>
    %c0_68 = arith.constant 0 : index
    %c0_69 = arith.constant 0 : index
    %339 = vector.load %arg14[%c0_68, %c0_69] : memref<32x288xbf16, #tpu.memory_space<vmem>>, vector<32x288xbf16>
    %cst_70 = arith.constant dense<0.000000e+00> : vector<32x128xf32>
    %340 = tpu.matmul %339, %338, %cst_70 {dimension_numbers = #tpu.dot_dimension_numbers<[1], [0], [0], [1], [0, 0, 1, 1], [], []>} : vector<32x288xbf16>, vector<288x128xbf16>, vector<32x128xf32> -> vector<32x128xf32>
    %c0_71 = arith.constant 0 : index
    %c0_72 = arith.constant 0 : index
    %341 = vector.load %arg15[%c0_71, %c0_72] : memref<32x1xf32, #tpu.memory_space<vmem>>, vector<32x1xf32>
    %342 = vector.broadcast %341 : vector<32x1xf32> to vector<32x128xf32>
    %343 = arith.addf %340, %342 : vector<32x128xf32>
    %cst_73 = arith.constant 0.000000e+00 : f32
    %344 = vector.broadcast %cst_73 : f32 to vector<32x128xf32>
    %345 = arith.maximumf %343, %344 : vector<32x128xf32>
    %346 = arith.truncf %345 : vector<32x128xf32> to vector<32x128xbf16>
    %cst_74 = arith.constant 0.000000e+00 : bf16
    %347 = vector.broadcast %cst_74 : bf16 to vector<32x9xbf16>
    %348 = tpu.concatenate %346, %347 in 1 : vector<32x128xbf16>, vector<32x9xbf16> -> vector<32x137xbf16>
    %349 = vector.extract_strided_slice %348 {offsets = [0, 1], sizes = [32, 128], strides = [1, 1]} : vector<32x137xbf16> to vector<32x128xbf16>
    %350 = arith.maximumf %346, %349 : vector<32x128xbf16>
    %351 = vector.extract_strided_slice %348 {offsets = [0, 8], sizes = [32, 128], strides = [1, 1]} : vector<32x137xbf16> to vector<32x128xbf16>
    %352 = vector.extract_strided_slice %348 {offsets = [0, 9], sizes = [32, 128], strides = [1, 1]} : vector<32x137xbf16> to vector<32x128xbf16>
    %353 = arith.maximumf %351, %352 : vector<32x128xbf16>
    %354 = arith.maximumf %350, %353 : vector<32x128xbf16>
    %c0_75 = arith.constant 0 : index
    %c0_76 = arith.constant 0 : index
    %355 = vector.load %arg36[%c0_75, %c0_76] : memref<64x16xbf16, #tpu.memory_space<vmem>>, vector<64x16xbf16>
    %356 = vector.extract_strided_slice %354 {offsets = [0, 0], sizes = [32, 64], strides = [1, 1]} : vector<32x128xbf16> to vector<32x64xbf16>
    %cst_77 = arith.constant dense<0.000000e+00> : vector<32x16xf32>
    %357 = tpu.matmul %356, %355, %cst_77 {dimension_numbers = #tpu.dot_dimension_numbers<[1], [0], [0], [1], [0, 0, 1, 1], [], []>} : vector<32x64xbf16>, vector<64x16xbf16>, vector<32x16xf32> -> vector<32x16xf32>
    %358 = vector.extract_strided_slice %354 {offsets = [0, 64], sizes = [32, 64], strides = [1, 1]} : vector<32x128xbf16> to vector<32x64xbf16>
    %cst_78 = arith.constant dense<0.000000e+00> : vector<32x16xf32>
    %359 = tpu.matmul %358, %355, %cst_78 {dimension_numbers = #tpu.dot_dimension_numbers<[1], [0], [0], [1], [0, 0, 1, 1], [], []>} : vector<32x64xbf16>, vector<64x16xbf16>, vector<32x16xf32> -> vector<32x16xf32>
    %360 = tpu.concatenate %357, %359 in 1 : vector<32x16xf32>, vector<32x16xf32> -> vector<32x32xf32>
    %361 = arith.truncf %360 : vector<32x32xf32> to vector<32x32xbf16>
    %cst_79 = arith.constant 0.000000e+00 : bf16
    %362 = vector.broadcast %cst_79 : bf16 to vector<32x5xbf16>
    %363 = tpu.concatenate %362, %361, %362 in 1 : vector<32x5xbf16>, vector<32x32xbf16>, vector<32x5xbf16> -> vector<32x42xbf16>
    %c0_80 = arith.constant 0 : index
    %c0_81 = arith.constant 0 : index
    %364 = vector.load %arg33[%c0_80, %c0_81] : memref<8x32xbf16, #tpu.memory_space<vmem>>, vector<8x32xbf16>
    %365 = vector.extract_strided_slice %363 {offsets = [0, 0], sizes = [32, 32], strides = [1, 1]} : vector<32x42xbf16> to vector<32x32xbf16>
    %366 = vector.extract_strided_slice %364 {offsets = [0, 0], sizes = [1, 32], strides = [1, 1]} : vector<8x32xbf16> to vector<1x32xbf16>
    %367 = vector.broadcast %366 : vector<1x32xbf16> to vector<32x32xbf16>
    %368 = arith.mulf %365, %367 : vector<32x32xbf16>
    %369 = vector.extract_strided_slice %363 {offsets = [0, 1], sizes = [32, 32], strides = [1, 1]} : vector<32x42xbf16> to vector<32x32xbf16>
    %370 = vector.extract_strided_slice %364 {offsets = [1, 0], sizes = [1, 32], strides = [1, 1]} : vector<8x32xbf16> to vector<1x32xbf16>
    %371 = vector.broadcast %370 : vector<1x32xbf16> to vector<32x32xbf16>
    %372 = arith.mulf %369, %371 : vector<32x32xbf16>
    %373 = vector.extract_strided_slice %363 {offsets = [0, 2], sizes = [32, 32], strides = [1, 1]} : vector<32x42xbf16> to vector<32x32xbf16>
    %374 = vector.extract_strided_slice %364 {offsets = [2, 0], sizes = [1, 32], strides = [1, 1]} : vector<8x32xbf16> to vector<1x32xbf16>
    %375 = vector.broadcast %374 : vector<1x32xbf16> to vector<32x32xbf16>
    %376 = arith.mulf %373, %375 : vector<32x32xbf16>
    %377 = vector.extract_strided_slice %363 {offsets = [0, 4], sizes = [32, 32], strides = [1, 1]} : vector<32x42xbf16> to vector<32x32xbf16>
    %378 = vector.extract_strided_slice %364 {offsets = [3, 0], sizes = [1, 32], strides = [1, 1]} : vector<8x32xbf16> to vector<1x32xbf16>
    %379 = vector.broadcast %378 : vector<1x32xbf16> to vector<32x32xbf16>
    %380 = arith.mulf %377, %379 : vector<32x32xbf16>
    %381 = vector.extract_strided_slice %363 {offsets = [0, 5], sizes = [32, 32], strides = [1, 1]} : vector<32x42xbf16> to vector<32x32xbf16>
    %382 = vector.extract_strided_slice %363 {offsets = [0, 6], sizes = [32, 32], strides = [1, 1]} : vector<32x42xbf16> to vector<32x32xbf16>
    %383 = vector.extract_strided_slice %364 {offsets = [4, 0], sizes = [1, 32], strides = [1, 1]} : vector<8x32xbf16> to vector<1x32xbf16>
    %384 = vector.broadcast %383 : vector<1x32xbf16> to vector<32x32xbf16>
    %385 = arith.mulf %382, %384 : vector<32x32xbf16>
    %386 = vector.extract_strided_slice %363 {offsets = [0, 8], sizes = [32, 32], strides = [1, 1]} : vector<32x42xbf16> to vector<32x32xbf16>
    %387 = vector.extract_strided_slice %364 {offsets = [5, 0], sizes = [1, 32], strides = [1, 1]} : vector<8x32xbf16> to vector<1x32xbf16>
    %388 = vector.broadcast %387 : vector<1x32xbf16> to vector<32x32xbf16>
    %389 = arith.mulf %386, %388 : vector<32x32xbf16>
    %390 = vector.extract_strided_slice %363 {offsets = [0, 9], sizes = [32, 32], strides = [1, 1]} : vector<32x42xbf16> to vector<32x32xbf16>
    %391 = vector.extract_strided_slice %364 {offsets = [6, 0], sizes = [1, 32], strides = [1, 1]} : vector<8x32xbf16> to vector<1x32xbf16>
    %392 = vector.broadcast %391 : vector<1x32xbf16> to vector<32x32xbf16>
    %393 = arith.mulf %390, %392 : vector<32x32xbf16>
    %394 = vector.extract_strided_slice %363 {offsets = [0, 10], sizes = [32, 32], strides = [1, 1]} : vector<32x42xbf16> to vector<32x32xbf16>
    %395 = vector.extract_strided_slice %364 {offsets = [7, 0], sizes = [1, 32], strides = [1, 1]} : vector<8x32xbf16> to vector<1x32xbf16>
    %396 = vector.broadcast %395 : vector<1x32xbf16> to vector<32x32xbf16>
    %397 = arith.mulf %394, %396 : vector<32x32xbf16>
    %398 = tpu.concatenate %368, %372, %376, %380, %381, %385, %389, %393, %397 in 0 : vector<32x32xbf16>, vector<32x32xbf16>, vector<32x32xbf16>, vector<32x32xbf16>, vector<32x32xbf16>, vector<32x32xbf16>, vector<32x32xbf16>, vector<32x32xbf16>, vector<32x32xbf16> -> vector<288x32xbf16>
    %c0_82 = arith.constant 0 : index
    %c0_83 = arith.constant 0 : index
    %399 = vector.load %arg16[%c0_82, %c0_83] : memref<64x288xbf16, #tpu.memory_space<vmem>>, vector<64x288xbf16>
    %cst_84 = arith.constant dense<0.000000e+00> : vector<64x32xf32>
    %400 = tpu.matmul %399, %398, %cst_84 {dimension_numbers = #tpu.dot_dimension_numbers<[1], [0], [0], [1], [0, 0, 1, 1], [], []>} : vector<64x288xbf16>, vector<288x32xbf16>, vector<64x32xf32> -> vector<64x32xf32>
    %c0_85 = arith.constant 0 : index
    %c0_86 = arith.constant 0 : index
    %401 = vector.load %arg17[%c0_85, %c0_86] : memref<64x1xf32, #tpu.memory_space<vmem>>, vector<64x1xf32>
    %402 = vector.broadcast %401 : vector<64x1xf32> to vector<64x32xf32>
    %403 = arith.addf %400, %402 : vector<64x32xf32>
    %cst_87 = arith.constant 0.000000e+00 : f32
    %404 = vector.broadcast %cst_87 : f32 to vector<64x32xf32>
    %405 = arith.maximumf %403, %404 : vector<64x32xf32>
    %406 = arith.truncf %405 : vector<64x32xf32> to vector<64x32xbf16>
    %cst_88 = arith.constant 0.000000e+00 : bf16
    %407 = vector.broadcast %cst_88 : bf16 to vector<64x5xbf16>
    %408 = tpu.concatenate %407, %406, %407 in 1 : vector<64x5xbf16>, vector<64x32xbf16>, vector<64x5xbf16> -> vector<64x42xbf16>
    %c0_89 = arith.constant 0 : index
    %c0_90 = arith.constant 0 : index
    %409 = vector.load %arg33[%c0_89, %c0_90] : memref<8x32xbf16, #tpu.memory_space<vmem>>, vector<8x32xbf16>
    %410 = vector.extract_strided_slice %408 {offsets = [0, 0], sizes = [64, 32], strides = [1, 1]} : vector<64x42xbf16> to vector<64x32xbf16>
    %411 = vector.extract_strided_slice %409 {offsets = [0, 0], sizes = [1, 32], strides = [1, 1]} : vector<8x32xbf16> to vector<1x32xbf16>
    %412 = vector.broadcast %411 : vector<1x32xbf16> to vector<64x32xbf16>
    %413 = arith.mulf %410, %412 : vector<64x32xbf16>
    %414 = vector.extract_strided_slice %408 {offsets = [0, 1], sizes = [64, 32], strides = [1, 1]} : vector<64x42xbf16> to vector<64x32xbf16>
    %415 = vector.extract_strided_slice %409 {offsets = [1, 0], sizes = [1, 32], strides = [1, 1]} : vector<8x32xbf16> to vector<1x32xbf16>
    %416 = vector.broadcast %415 : vector<1x32xbf16> to vector<64x32xbf16>
    %417 = arith.mulf %414, %416 : vector<64x32xbf16>
    %418 = vector.extract_strided_slice %408 {offsets = [0, 2], sizes = [64, 32], strides = [1, 1]} : vector<64x42xbf16> to vector<64x32xbf16>
    %419 = vector.extract_strided_slice %409 {offsets = [2, 0], sizes = [1, 32], strides = [1, 1]} : vector<8x32xbf16> to vector<1x32xbf16>
    %420 = vector.broadcast %419 : vector<1x32xbf16> to vector<64x32xbf16>
    %421 = arith.mulf %418, %420 : vector<64x32xbf16>
    %422 = vector.extract_strided_slice %408 {offsets = [0, 4], sizes = [64, 32], strides = [1, 1]} : vector<64x42xbf16> to vector<64x32xbf16>
    %423 = vector.extract_strided_slice %409 {offsets = [3, 0], sizes = [1, 32], strides = [1, 1]} : vector<8x32xbf16> to vector<1x32xbf16>
    %424 = vector.broadcast %423 : vector<1x32xbf16> to vector<64x32xbf16>
    %425 = arith.mulf %422, %424 : vector<64x32xbf16>
    %426 = vector.extract_strided_slice %408 {offsets = [0, 5], sizes = [64, 32], strides = [1, 1]} : vector<64x42xbf16> to vector<64x32xbf16>
    %427 = vector.extract_strided_slice %408 {offsets = [0, 6], sizes = [64, 32], strides = [1, 1]} : vector<64x42xbf16> to vector<64x32xbf16>
    %428 = vector.extract_strided_slice %409 {offsets = [4, 0], sizes = [1, 32], strides = [1, 1]} : vector<8x32xbf16> to vector<1x32xbf16>
    %429 = vector.broadcast %428 : vector<1x32xbf16> to vector<64x32xbf16>
    %430 = arith.mulf %427, %429 : vector<64x32xbf16>
    %431 = vector.extract_strided_slice %408 {offsets = [0, 8], sizes = [64, 32], strides = [1, 1]} : vector<64x42xbf16> to vector<64x32xbf16>
    %432 = vector.extract_strided_slice %409 {offsets = [5, 0], sizes = [1, 32], strides = [1, 1]} : vector<8x32xbf16> to vector<1x32xbf16>
    %433 = vector.broadcast %432 : vector<1x32xbf16> to vector<64x32xbf16>
    %434 = arith.mulf %431, %433 : vector<64x32xbf16>
    %435 = vector.extract_strided_slice %408 {offsets = [0, 9], sizes = [64, 32], strides = [1, 1]} : vector<64x42xbf16> to vector<64x32xbf16>
    %436 = vector.extract_strided_slice %409 {offsets = [6, 0], sizes = [1, 32], strides = [1, 1]} : vector<8x32xbf16> to vector<1x32xbf16>
    %437 = vector.broadcast %436 : vector<1x32xbf16> to vector<64x32xbf16>
    %438 = arith.mulf %435, %437 : vector<64x32xbf16>
    %439 = vector.extract_strided_slice %408 {offsets = [0, 10], sizes = [64, 32], strides = [1, 1]} : vector<64x42xbf16> to vector<64x32xbf16>
    %440 = vector.extract_strided_slice %409 {offsets = [7, 0], sizes = [1, 32], strides = [1, 1]} : vector<8x32xbf16> to vector<1x32xbf16>
    %441 = vector.broadcast %440 : vector<1x32xbf16> to vector<64x32xbf16>
    %442 = arith.mulf %439, %441 : vector<64x32xbf16>
    %443 = tpu.concatenate %413, %417, %421, %425, %426, %430, %434, %438, %442 in 0 : vector<64x32xbf16>, vector<64x32xbf16>, vector<64x32xbf16>, vector<64x32xbf16>, vector<64x32xbf16>, vector<64x32xbf16>, vector<64x32xbf16>, vector<64x32xbf16>, vector<64x32xbf16> -> vector<576x32xbf16>
    %c0_91 = arith.constant 0 : index
    %c0_92 = arith.constant 0 : index
    %444 = vector.load %arg18[%c0_91, %c0_92] : memref<64x576xbf16, #tpu.memory_space<vmem>>, vector<64x576xbf16>
    %cst_93 = arith.constant dense<0.000000e+00> : vector<64x32xf32>
    %445 = tpu.matmul %444, %443, %cst_93 {dimension_numbers = #tpu.dot_dimension_numbers<[1], [0], [0], [1], [0, 0, 1, 1], [], []>} : vector<64x576xbf16>, vector<576x32xbf16>, vector<64x32xf32> -> vector<64x32xf32>
    %c0_94 = arith.constant 0 : index
    %c0_95 = arith.constant 0 : index
    %446 = vector.load %arg19[%c0_94, %c0_95] : memref<64x1xf32, #tpu.memory_space<vmem>>, vector<64x1xf32>
    %447 = vector.broadcast %446 : vector<64x1xf32> to vector<64x32xf32>
    %448 = arith.addf %445, %447 : vector<64x32xf32>
    %cst_96 = arith.constant 0.000000e+00 : f32
    %449 = vector.broadcast %cst_96 : f32 to vector<64x32xf32>
    %450 = arith.maximumf %448, %449 : vector<64x32xf32>
    %451 = arith.truncf %450 : vector<64x32xf32> to vector<64x32xbf16>
    %cst_97 = arith.constant 0.000000e+00 : bf16
    %452 = vector.broadcast %cst_97 : bf16 to vector<64x5xbf16>
    %453 = tpu.concatenate %452, %451, %452 in 1 : vector<64x5xbf16>, vector<64x32xbf16>, vector<64x5xbf16> -> vector<64x42xbf16>
    %c0_98 = arith.constant 0 : index
    %c0_99 = arith.constant 0 : index
    %454 = vector.load %arg33[%c0_98, %c0_99] : memref<8x32xbf16, #tpu.memory_space<vmem>>, vector<8x32xbf16>
    %455 = vector.extract_strided_slice %453 {offsets = [0, 0], sizes = [64, 32], strides = [1, 1]} : vector<64x42xbf16> to vector<64x32xbf16>
    %456 = vector.extract_strided_slice %454 {offsets = [0, 0], sizes = [1, 32], strides = [1, 1]} : vector<8x32xbf16> to vector<1x32xbf16>
    %457 = vector.broadcast %456 : vector<1x32xbf16> to vector<64x32xbf16>
    %458 = arith.mulf %455, %457 : vector<64x32xbf16>
    %459 = vector.extract_strided_slice %453 {offsets = [0, 1], sizes = [64, 32], strides = [1, 1]} : vector<64x42xbf16> to vector<64x32xbf16>
    %460 = vector.extract_strided_slice %454 {offsets = [1, 0], sizes = [1, 32], strides = [1, 1]} : vector<8x32xbf16> to vector<1x32xbf16>
    %461 = vector.broadcast %460 : vector<1x32xbf16> to vector<64x32xbf16>
    %462 = arith.mulf %459, %461 : vector<64x32xbf16>
    %463 = vector.extract_strided_slice %453 {offsets = [0, 2], sizes = [64, 32], strides = [1, 1]} : vector<64x42xbf16> to vector<64x32xbf16>
    %464 = vector.extract_strided_slice %454 {offsets = [2, 0], sizes = [1, 32], strides = [1, 1]} : vector<8x32xbf16> to vector<1x32xbf16>
    %465 = vector.broadcast %464 : vector<1x32xbf16> to vector<64x32xbf16>
    %466 = arith.mulf %463, %465 : vector<64x32xbf16>
    %467 = vector.extract_strided_slice %453 {offsets = [0, 4], sizes = [64, 32], strides = [1, 1]} : vector<64x42xbf16> to vector<64x32xbf16>
    %468 = vector.extract_strided_slice %454 {offsets = [3, 0], sizes = [1, 32], strides = [1, 1]} : vector<8x32xbf16> to vector<1x32xbf16>
    %469 = vector.broadcast %468 : vector<1x32xbf16> to vector<64x32xbf16>
    %470 = arith.mulf %467, %469 : vector<64x32xbf16>
    %471 = vector.extract_strided_slice %453 {offsets = [0, 5], sizes = [64, 32], strides = [1, 1]} : vector<64x42xbf16> to vector<64x32xbf16>
    %472 = vector.extract_strided_slice %453 {offsets = [0, 6], sizes = [64, 32], strides = [1, 1]} : vector<64x42xbf16> to vector<64x32xbf16>
    %473 = vector.extract_strided_slice %454 {offsets = [4, 0], sizes = [1, 32], strides = [1, 1]} : vector<8x32xbf16> to vector<1x32xbf16>
    %474 = vector.broadcast %473 : vector<1x32xbf16> to vector<64x32xbf16>
    %475 = arith.mulf %472, %474 : vector<64x32xbf16>
    %476 = vector.extract_strided_slice %453 {offsets = [0, 8], sizes = [64, 32], strides = [1, 1]} : vector<64x42xbf16> to vector<64x32xbf16>
    %477 = vector.extract_strided_slice %454 {offsets = [5, 0], sizes = [1, 32], strides = [1, 1]} : vector<8x32xbf16> to vector<1x32xbf16>
    %478 = vector.broadcast %477 : vector<1x32xbf16> to vector<64x32xbf16>
    %479 = arith.mulf %476, %478 : vector<64x32xbf16>
    %480 = vector.extract_strided_slice %453 {offsets = [0, 9], sizes = [64, 32], strides = [1, 1]} : vector<64x42xbf16> to vector<64x32xbf16>
    %481 = vector.extract_strided_slice %454 {offsets = [6, 0], sizes = [1, 32], strides = [1, 1]} : vector<8x32xbf16> to vector<1x32xbf16>
    %482 = vector.broadcast %481 : vector<1x32xbf16> to vector<64x32xbf16>
    %483 = arith.mulf %480, %482 : vector<64x32xbf16>
    %484 = vector.extract_strided_slice %453 {offsets = [0, 10], sizes = [64, 32], strides = [1, 1]} : vector<64x42xbf16> to vector<64x32xbf16>
    %485 = vector.extract_strided_slice %454 {offsets = [7, 0], sizes = [1, 32], strides = [1, 1]} : vector<8x32xbf16> to vector<1x32xbf16>
    %486 = vector.broadcast %485 : vector<1x32xbf16> to vector<64x32xbf16>
    %487 = arith.mulf %484, %486 : vector<64x32xbf16>
    %488 = tpu.concatenate %458, %462, %466, %470, %471, %475, %479, %483, %487 in 0 : vector<64x32xbf16>, vector<64x32xbf16>, vector<64x32xbf16>, vector<64x32xbf16>, vector<64x32xbf16>, vector<64x32xbf16>, vector<64x32xbf16>, vector<64x32xbf16>, vector<64x32xbf16> -> vector<576x32xbf16>
    %c0_100 = arith.constant 0 : index
    %c0_101 = arith.constant 0 : index
    %489 = vector.load %arg20[%c0_100, %c0_101] : memref<64x576xbf16, #tpu.memory_space<vmem>>, vector<64x576xbf16>
    %cst_102 = arith.constant dense<0.000000e+00> : vector<64x32xf32>
    %490 = tpu.matmul %489, %488, %cst_102 {dimension_numbers = #tpu.dot_dimension_numbers<[1], [0], [0], [1], [0, 0, 1, 1], [], []>} : vector<64x576xbf16>, vector<576x32xbf16>, vector<64x32xf32> -> vector<64x32xf32>
    %c0_103 = arith.constant 0 : index
    %c0_104 = arith.constant 0 : index
    %491 = vector.load %arg21[%c0_103, %c0_104] : memref<64x1xf32, #tpu.memory_space<vmem>>, vector<64x1xf32>
    %492 = vector.broadcast %491 : vector<64x1xf32> to vector<64x32xf32>
    %493 = arith.addf %490, %492 : vector<64x32xf32>
    %cst_105 = arith.constant 0.000000e+00 : f32
    %494 = vector.broadcast %cst_105 : f32 to vector<64x32xf32>
    %495 = arith.maximumf %493, %494 : vector<64x32xf32>
    %496 = arith.truncf %495 : vector<64x32xf32> to vector<64x32xbf16>
    %cst_106 = arith.constant 0.000000e+00 : bf16
    %497 = vector.broadcast %cst_106 : bf16 to vector<64x5xbf16>
    %498 = tpu.concatenate %496, %497 in 1 : vector<64x32xbf16>, vector<64x5xbf16> -> vector<64x37xbf16>
    %499 = vector.extract_strided_slice %498 {offsets = [0, 1], sizes = [64, 32], strides = [1, 1]} : vector<64x37xbf16> to vector<64x32xbf16>
    %500 = arith.maximumf %496, %499 : vector<64x32xbf16>
    %501 = vector.extract_strided_slice %498 {offsets = [0, 4], sizes = [64, 32], strides = [1, 1]} : vector<64x37xbf16> to vector<64x32xbf16>
    %502 = vector.extract_strided_slice %498 {offsets = [0, 5], sizes = [64, 32], strides = [1, 1]} : vector<64x37xbf16> to vector<64x32xbf16>
    %503 = arith.maximumf %501, %502 : vector<64x32xbf16>
    %504 = arith.maximumf %500, %503 : vector<64x32xbf16>
    %c0_107 = arith.constant 0 : index
    %c0_108 = arith.constant 0 : index
    %505 = vector.load %arg37[%c0_107, %c0_108] : memref<16x4xbf16, #tpu.memory_space<vmem>>, vector<16x4xbf16>
    %506 = vector.extract_strided_slice %504 {offsets = [0, 0], sizes = [64, 16], strides = [1, 1]} : vector<64x32xbf16> to vector<64x16xbf16>
    %cst_109 = arith.constant dense<0.000000e+00> : vector<64x4xf32>
    %507 = tpu.matmul %506, %505, %cst_109 {dimension_numbers = #tpu.dot_dimension_numbers<[1], [0], [0], [1], [0, 0, 1, 1], [], []>} : vector<64x16xbf16>, vector<16x4xbf16>, vector<64x4xf32> -> vector<64x4xf32>
    %508 = vector.extract_strided_slice %504 {offsets = [0, 16], sizes = [64, 16], strides = [1, 1]} : vector<64x32xbf16> to vector<64x16xbf16>
    %cst_110 = arith.constant dense<0.000000e+00> : vector<64x4xf32>
    %509 = tpu.matmul %508, %505, %cst_110 {dimension_numbers = #tpu.dot_dimension_numbers<[1], [0], [0], [1], [0, 0, 1, 1], [], []>} : vector<64x16xbf16>, vector<16x4xbf16>, vector<64x4xf32> -> vector<64x4xf32>
    %510 = tpu.concatenate %507, %509 in 1 : vector<64x4xf32>, vector<64x4xf32> -> vector<64x8xf32>
    %511 = arith.truncf %510 : vector<64x8xf32> to vector<64x8xbf16>
    %c0_111 = arith.constant 0 : index
    %c0_112 = arith.constant 0 : index
    %512 = vector.load %arg22[%c0_111, %c0_112] : memref<32x64xbf16, #tpu.memory_space<vmem>>, vector<32x64xbf16>
    %cst_113 = arith.constant dense<0.000000e+00> : vector<32x8xf32>
    %513 = tpu.matmul %512, %511, %cst_113 {dimension_numbers = #tpu.dot_dimension_numbers<[1], [0], [0], [1], [0, 0, 1, 1], [], []>} : vector<32x64xbf16>, vector<64x8xbf16>, vector<32x8xf32> -> vector<32x8xf32>
    %c0_114 = arith.constant 0 : index
    %c0_115 = arith.constant 0 : index
    %514 = vector.load %arg23[%c0_114, %c0_115] : memref<32x1xf32, #tpu.memory_space<vmem>>, vector<32x1xf32>
    %515 = vector.broadcast %514 : vector<32x1xf32> to vector<32x8xf32>
    %516 = arith.addf %513, %515 : vector<32x8xf32>
    %cst_116 = arith.constant 0.000000e+00 : f32
    %517 = vector.broadcast %cst_116 : f32 to vector<32x8xf32>
    %518 = arith.maximumf %516, %517 : vector<32x8xf32>
    %519 = arith.truncf %518 : vector<32x8xf32> to vector<32x8xbf16>
    %c0_117 = arith.constant 0 : index
    %c0_118 = arith.constant 0 : index
    %c0_119 = arith.constant 0 : index
    %520 = vector.load %arg38[%c0_117, %c0_118, %c0_119] : memref<4x8x2xbf16, #tpu.memory_space<vmem>>, vector<1x8x2xbf16>
    %521 = vector.shape_cast %520 : vector<1x8x2xbf16> to vector<8x2xbf16>
    %cst_120 = arith.constant dense<0.000000e+00> : vector<32x2xf32>
    %522 = tpu.matmul %519, %521, %cst_120 {dimension_numbers = #tpu.dot_dimension_numbers<[1], [0], [0], [1], [0, 0, 1, 1], [], []>} : vector<32x8xbf16>, vector<8x2xbf16>, vector<32x2xf32> -> vector<32x2xf32>
    %c1 = arith.constant 1 : index
    %c0_121 = arith.constant 0 : index
    %c0_122 = arith.constant 0 : index
    %523 = vector.load %arg38[%c1, %c0_121, %c0_122] : memref<4x8x2xbf16, #tpu.memory_space<vmem>>, vector<1x8x2xbf16>
    %524 = vector.shape_cast %523 : vector<1x8x2xbf16> to vector<8x2xbf16>
    %cst_123 = arith.constant dense<0.000000e+00> : vector<32x2xf32>
    %525 = tpu.matmul %519, %524, %cst_123 {dimension_numbers = #tpu.dot_dimension_numbers<[1], [0], [0], [1], [0, 0, 1, 1], [], []>} : vector<32x8xbf16>, vector<8x2xbf16>, vector<32x2xf32> -> vector<32x2xf32>
    %c2 = arith.constant 2 : index
    %c0_124 = arith.constant 0 : index
    %c0_125 = arith.constant 0 : index
    %526 = vector.load %arg38[%c2, %c0_124, %c0_125] : memref<4x8x2xbf16, #tpu.memory_space<vmem>>, vector<1x8x2xbf16>
    %527 = vector.shape_cast %526 : vector<1x8x2xbf16> to vector<8x2xbf16>
    %cst_126 = arith.constant dense<0.000000e+00> : vector<32x2xf32>
    %528 = tpu.matmul %519, %527, %cst_126 {dimension_numbers = #tpu.dot_dimension_numbers<[1], [0], [0], [1], [0, 0, 1, 1], [], []>} : vector<32x8xbf16>, vector<8x2xbf16>, vector<32x2xf32> -> vector<32x2xf32>
    %c3 = arith.constant 3 : index
    %c0_127 = arith.constant 0 : index
    %c0_128 = arith.constant 0 : index
    %529 = vector.load %arg38[%c3, %c0_127, %c0_128] : memref<4x8x2xbf16, #tpu.memory_space<vmem>>, vector<1x8x2xbf16>
    %530 = vector.shape_cast %529 : vector<1x8x2xbf16> to vector<8x2xbf16>
    %cst_129 = arith.constant dense<0.000000e+00> : vector<32x2xf32>
    %531 = tpu.matmul %519, %530, %cst_129 {dimension_numbers = #tpu.dot_dimension_numbers<[1], [0], [0], [1], [0, 0, 1, 1], [], []>} : vector<32x8xbf16>, vector<8x2xbf16>, vector<32x2xf32> -> vector<32x2xf32>
    %532 = tpu.concatenate %522, %525, %528, %531 in 0 : vector<32x2xf32>, vector<32x2xf32>, vector<32x2xf32>, vector<32x2xf32> -> vector<128x2xf32>
    %533 = arith.truncf %532 : vector<128x2xf32> to vector<128x2xbf16>
    %c0_130 = arith.constant 0 : index
    %c0_131 = arith.constant 0 : index
    %534 = vector.load %arg24[%c0_130, %c0_131] : memref<128x128xbf16, #tpu.memory_space<vmem>>, vector<128x128xbf16>
    %cst_132 = arith.constant dense<0.000000e+00> : vector<128x2xf32>
    %535 = tpu.matmul %534, %533, %cst_132 {dimension_numbers = #tpu.dot_dimension_numbers<[1], [0], [0], [1], [0, 0, 1, 1], [], []>} : vector<128x128xbf16>, vector<128x2xbf16>, vector<128x2xf32> -> vector<128x2xf32>
    %c0_133 = arith.constant 0 : index
    %c0_134 = arith.constant 0 : index
    %536 = vector.load %arg25[%c0_133, %c0_134] : memref<128x1xf32, #tpu.memory_space<vmem>>, vector<128x1xf32>
    %537 = vector.broadcast %536 : vector<128x1xf32> to vector<128x2xf32>
    %538 = arith.addf %535, %537 : vector<128x2xf32>
    %cst_135 = arith.constant 0.000000e+00 : f32
    %539 = vector.broadcast %cst_135 : f32 to vector<128x2xf32>
    %540 = arith.maximumf %538, %539 : vector<128x2xf32>
    %541 = arith.truncf %540 : vector<128x2xf32> to vector<128x2xbf16>
    %c0_136 = arith.constant 0 : index
    %c0_137 = arith.constant 0 : index
    %542 = vector.load %arg26[%c0_136, %c0_137] : memref<128x128xbf16, #tpu.memory_space<vmem>>, vector<128x128xbf16>
    %cst_138 = arith.constant dense<0.000000e+00> : vector<128x2xf32>
    %543 = tpu.matmul %542, %541, %cst_138 {dimension_numbers = #tpu.dot_dimension_numbers<[1], [0], [0], [1], [0, 0, 1, 1], [], []>} : vector<128x128xbf16>, vector<128x2xbf16>, vector<128x2xf32> -> vector<128x2xf32>
    %c0_139 = arith.constant 0 : index
    %c0_140 = arith.constant 0 : index
    %544 = vector.load %arg27[%c0_139, %c0_140] : memref<128x1xf32, #tpu.memory_space<vmem>>, vector<128x1xf32>
    %545 = vector.broadcast %544 : vector<128x1xf32> to vector<128x2xf32>
    %546 = arith.addf %543, %545 : vector<128x2xf32>
    %cst_141 = arith.constant 0.000000e+00 : f32
    %547 = vector.broadcast %cst_141 : f32 to vector<128x2xf32>
    %548 = arith.maximumf %546, %547 : vector<128x2xf32>
    %549 = arith.truncf %548 : vector<128x2xf32> to vector<128x2xbf16>
    %c0_142 = arith.constant 0 : index
    %c0_143 = arith.constant 0 : index
    %550 = vector.load %arg28[%c0_142, %c0_143] : memref<10x128xbf16, #tpu.memory_space<vmem>>, vector<10x128xbf16>
    %cst_144 = arith.constant dense<0.000000e+00> : vector<10x2xf32>
    %551 = tpu.matmul %550, %549, %cst_144 {dimension_numbers = #tpu.dot_dimension_numbers<[1], [0], [0], [1], [0, 0, 1, 1], [], []>} : vector<10x128xbf16>, vector<128x2xbf16>, vector<10x2xf32> -> vector<10x2xf32>
    %c0_145 = arith.constant 0 : index
    %c0_146 = arith.constant 0 : index
    %552 = vector.load %arg29[%c0_145, %c0_146] : memref<10x1xf32, #tpu.memory_space<vmem>>, vector<10x1xf32>
    %553 = vector.broadcast %552 : vector<10x1xf32> to vector<10x2xf32>
    %554 = arith.addf %551, %553 : vector<10x2xf32>
    %c0_147 = arith.constant 0 : index
    %c0_148 = arith.constant 0 : index
    %c0_149 = arith.constant 0 : index
    %555 = vector.load %arg39[%c0_147, %c0_148, %c0_149] : memref<1x10x2xf32, #tpu.memory_space<vmem>>, vector<1x10x2xf32>
    %556 = vector.shape_cast %555 : vector<1x10x2xf32> to vector<10x2xf32>
    %557 = vector.shape_cast %554 : vector<10x2xf32> to vector<1x10x2xf32>
    tpu.vector_store %arg39[%c0_147, %c0_148, %c0_149], %557 {strides = array<i32>} : memref<1x10x2xf32, #tpu.memory_space<vmem>>, vector<1x10x2xf32>,
    return
  }
  func.func @transform_0(%arg0: i32) -> (i32, i32, i32) {
    %c0_i32 = arith.constant 0 : i32
    %c0_i32_0 = arith.constant 0 : i32
    %c0_i32_1 = arith.constant 0 : i32
    return %arg0, %c0_i32, %c0_i32_0 : i32, i32, i32
  }
  func.func @transform_1(%arg0: i32) -> (i32, i32) {
    %c0_i32 = arith.constant 0 : i32
    %c0_i32_0 = arith.constant 0 : i32
    %c0_i32_1 = arith.constant 0 : i32
    return %c0_i32, %c0_i32_0 : i32, i32
  }
  func.func @transform_2(%arg0: i32) -> (i32, i32) {
    %c0_i32 = arith.constant 0 : i32
    %c0_i32_0 = arith.constant 0 : i32
    %c0_i32_1 = arith.constant 0 : i32
    return %c0_i32, %c0_i32_0 : i32, i32
  }
  func.func @transform_3(%arg0: i32) -> (i32, i32) {
    %c0_i32 = arith.constant 0 : i32
    %c0_i32_0 = arith.constant 0 : i32
    %c0_i32_1 = arith.constant 0 : i32
    return %c0_i32, %c0_i32_0 : i32, i32
  }
  func.func @transform_4(%arg0: i32) -> (i32, i32) {
    %c0_i32 = arith.constant 0 : i32
    %c0_i32_0 = arith.constant 0 : i32
    %c0_i32_1 = arith.constant 0 : i32
    return %c0_i32, %c0_i32_0 : i32, i32
  }
  func.func @transform_5(%arg0: i32) -> (i32, i32) {
    %c0_i32 = arith.constant 0 : i32
    %c0_i32_0 = arith.constant 0 : i32
    %c0_i32_1 = arith.constant 0 : i32
    return %c0_i32, %c0_i32_0 : i32, i32
  }
  func.func @transform_6(%arg0: i32) -> (i32, i32) {
    %c0_i32 = arith.constant 0 : i32
    %c0_i32_0 = arith.constant 0 : i32
    %c0_i32_1 = arith.constant 0 : i32
    return %c0_i32, %c0_i32_0 : i32, i32
  }
  func.func @transform_7(%arg0: i32) -> (i32, i32) {
    %c0_i32 = arith.constant 0 : i32
    %c0_i32_0 = arith.constant 0 : i32
    %c0_i32_1 = arith.constant 0 : i32
    return %c0_i32, %c0_i32_0 : i32, i32
  }
  func.func @transform_8(%arg0: i32) -> (i32, i32) {
    %c0_i32 = arith.constant 0 : i32
    %c0_i32_0 = arith.constant 0 : i32
    %c0_i32_1 = arith.constant 0 : i32
    return %c0_i32, %c0_i32_0 : i32, i32
  }
  func.func @transform_9(%arg0: i32) -> (i32, i32) {
    %c0_i32 = arith.constant 0 : i32
    %c0_i32_0 = arith.constant 0 : i32
    %c0_i32_1 = arith.constant 0 : i32
    return %c0_i32, %c0_i32_0 : i32, i32
  }
  func.func @transform_10(%arg0: i32) -> (i32, i32) {
    %c0_i32 = arith.constant 0 : i32
    %c0_i32_0 = arith.constant 0 : i32
    %c0_i32_1 = arith.constant 0 : i32
    return %c0_i32, %c0_i32_0 : i32, i32
  }
  func.func @transform_11(%arg0: i32) -> (i32, i32) {
    %c0_i32 = arith.constant 0 : i32
    %c0_i32_0 = arith.constant 0 : i32
    %c0_i32_1 = arith.constant 0 : i32
    return %c0_i32, %c0_i32_0 : i32, i32
  }
  func.func @transform_12(%arg0: i32) -> (i32, i32) {
    %c0_i32 = arith.constant 0 : i32
    %c0_i32_0 = arith.constant 0 : i32
    %c0_i32_1 = arith.constant 0 : i32
    return %c0_i32, %c0_i32_0 : i32, i32
  }
  func.func @transform_13(%arg0: i32) -> (i32, i32) {
    %c0_i32 = arith.constant 0 : i32
    %c0_i32_0 = arith.constant 0 : i32
    %c0_i32_1 = arith.constant 0 : i32
    return %c0_i32, %c0_i32_0 : i32, i32
  }
  func.func @transform_14(%arg0: i32) -> (i32, i32) {
    %c0_i32 = arith.constant 0 : i32
    %c0_i32_0 = arith.constant 0 : i32
    %c0_i32_1 = arith.constant 0 : i32
    return %c0_i32, %c0_i32_0 : i32, i32
  }
  func.func @transform_15(%arg0: i32) -> (i32, i32) {
    %c0_i32 = arith.constant 0 : i32
    %c0_i32_0 = arith.constant 0 : i32
    %c0_i32_1 = arith.constant 0 : i32
    return %c0_i32, %c0_i32_0 : i32, i32
  }
  func.func @transform_16(%arg0: i32) -> (i32, i32) {
    %c0_i32 = arith.constant 0 : i32
    %c0_i32_0 = arith.constant 0 : i32
    %c0_i32_1 = arith.constant 0 : i32
    return %c0_i32, %c0_i32_0 : i32, i32
  }
  func.func @transform_17(%arg0: i32) -> (i32, i32) {
    %c0_i32 = arith.constant 0 : i32
    %c0_i32_0 = arith.constant 0 : i32
    %c0_i32_1 = arith.constant 0 : i32
    return %c0_i32, %c0_i32_0 : i32, i32
  }
  func.func @transform_18(%arg0: i32) -> (i32, i32) {
    %c0_i32 = arith.constant 0 : i32
    %c0_i32_0 = arith.constant 0 : i32
    %c0_i32_1 = arith.constant 0 : i32
    return %c0_i32, %c0_i32_0 : i32, i32
  }
  func.func @transform_19(%arg0: i32) -> (i32, i32) {
    %c0_i32 = arith.constant 0 : i32
    %c0_i32_0 = arith.constant 0 : i32
    %c0_i32_1 = arith.constant 0 : i32
    return %c0_i32, %c0_i32_0 : i32, i32
  }
  func.func @transform_20(%arg0: i32) -> (i32, i32) {
    %c0_i32 = arith.constant 0 : i32
    %c0_i32_0 = arith.constant 0 : i32
    %c0_i32_1 = arith.constant 0 : i32
    return %c0_i32, %c0_i32_0 : i32, i32
  }
  func.func @transform_21(%arg0: i32) -> (i32, i32) {
    %c0_i32 = arith.constant 0 : i32
    %c0_i32_0 = arith.constant 0 : i32
    %c0_i32_1 = arith.constant 0 : i32
    return %c0_i32, %c0_i32_0 : i32, i32
  }
  func.func @transform_22(%arg0: i32) -> (i32, i32) {
    %c0_i32 = arith.constant 0 : i32
    %c0_i32_0 = arith.constant 0 : i32
    %c0_i32_1 = arith.constant 0 : i32
    return %c0_i32, %c0_i32_0 : i32, i32
  }
  func.func @transform_23(%arg0: i32) -> (i32, i32) {
    %c0_i32 = arith.constant 0 : i32
    %c0_i32_0 = arith.constant 0 : i32
    %c0_i32_1 = arith.constant 0 : i32
    return %c0_i32, %c0_i32_0 : i32, i32
  }
  func.func @transform_24(%arg0: i32) -> (i32, i32) {
    %c0_i32 = arith.constant 0 : i32
    %c0_i32_0 = arith.constant 0 : i32
    %c0_i32_1 = arith.constant 0 : i32
    return %c0_i32, %c0_i32_0 : i32, i32
  }
  func.func @transform_25(%arg0: i32) -> (i32, i32) {
    %c0_i32 = arith.constant 0 : i32
    %c0_i32_0 = arith.constant 0 : i32
    %c0_i32_1 = arith.constant 0 : i32
    return %c0_i32, %c0_i32_0 : i32, i32
  }
  func.func @transform_26(%arg0: i32) -> (i32, i32) {
    %c0_i32 = arith.constant 0 : i32
    %c0_i32_0 = arith.constant 0 : i32
    %c0_i32_1 = arith.constant 0 : i32
    return %c0_i32, %c0_i32_0 : i32, i32
  }
  func.func @transform_27(%arg0: i32) -> (i32, i32) {
    %c0_i32 = arith.constant 0 : i32
    %c0_i32_0 = arith.constant 0 : i32
    %c0_i32_1 = arith.constant 0 : i32
    return %c0_i32, %c0_i32_0 : i32, i32
  }
  func.func @transform_28(%arg0: i32) -> (i32, i32) {
    %c0_i32 = arith.constant 0 : i32
    %c0_i32_0 = arith.constant 0 : i32
    %c0_i32_1 = arith.constant 0 : i32
    return %c0_i32, %c0_i32_0 : i32, i32
  }
  func.func @transform_29(%arg0: i32) -> (i32, i32) {
    %c0_i32 = arith.constant 0 : i32
    %c0_i32_0 = arith.constant 0 : i32
    %c0_i32_1 = arith.constant 0 : i32
    return %c0_i32, %c0_i32_0 : i32, i32
  }
  func.func @transform_30(%arg0: i32) -> (i32, i32) {
    %c0_i32 = arith.constant 0 : i32
    %c0_i32_0 = arith.constant 0 : i32
    %c0_i32_1 = arith.constant 0 : i32
    return %c0_i32, %c0_i32_0 : i32, i32
  }
  func.func @transform_31(%arg0: i32) -> (i32, i32) {
    %c0_i32 = arith.constant 0 : i32
    %c0_i32_0 = arith.constant 0 : i32
    %c0_i32_1 = arith.constant 0 : i32
    return %c0_i32, %c0_i32_0 : i32, i32
  }
  func.func @transform_32(%arg0: i32) -> (i32, i32) {
    %c0_i32 = arith.constant 0 : i32
    %c0_i32_0 = arith.constant 0 : i32
    %c0_i32_1 = arith.constant 0 : i32
    return %c0_i32, %c0_i32_0 : i32, i32
  }
  func.func @transform_33(%arg0: i32) -> (i32, i32) {
    %c0_i32 = arith.constant 0 : i32
    %c0_i32_0 = arith.constant 0 : i32
    %c0_i32_1 = arith.constant 0 : i32
    return %c0_i32, %c0_i32_0 : i32, i32
  }
  func.func @transform_34(%arg0: i32) -> (i32, i32) {
    %c0_i32 = arith.constant 0 : i32
    %c0_i32_0 = arith.constant 0 : i32
    %c0_i32_1 = arith.constant 0 : i32
    return %c0_i32, %c0_i32_0 : i32, i32
  }
  func.func @transform_35(%arg0: i32) -> (i32, i32) {
    %c0_i32 = arith.constant 0 : i32
    %c0_i32_0 = arith.constant 0 : i32
    %c0_i32_1 = arith.constant 0 : i32
    return %c0_i32, %c0_i32_0 : i32, i32
  }
  func.func @transform_36(%arg0: i32) -> (i32, i32) {
    %c0_i32 = arith.constant 0 : i32
    %c0_i32_0 = arith.constant 0 : i32
    %c0_i32_1 = arith.constant 0 : i32
    return %c0_i32, %c0_i32_0 : i32, i32
  }
  func.func @transform_37(%arg0: i32) -> (i32, i32, i32) {
    %c0_i32 = arith.constant 0 : i32
    %c0_i32_0 = arith.constant 0 : i32
    %c0_i32_1 = arith.constant 0 : i32
    %c0_i32_2 = arith.constant 0 : i32
    return %c0_i32, %c0_i32_0, %c0_i32_1 : i32, i32, i32
  }
  func.func @transform_38(%arg0: i32) -> (i32, i32, i32) {
    %c0_i32 = arith.constant 0 : i32
    %c0_i32_0 = arith.constant 0 : i32
    %c0_i32_1 = arith.constant 0 : i32
    return %arg0, %c0_i32, %c0_i32_0 : i32, i32, i32
  }
}

</mosaic_0001>

<bundles_post_ra>
// kernel: vgg16_sub_forward.1
= control target key start
LH: loop header
LB: loop body
LE: loop exit
PB: predicated region body
PF: predicated region fallthrough
CT: control target
= control target key end

     0   :  { %v329_v0 = vlaneseq  ;;  %s12581_s6 = smov 29   ;;  %s12582_s10 = smov 34   ;;  %vm614_vm0 = vcmask 7168   ;;  %vm239_vm1 = vcmask 269312   ;;  %vm938_vm2 = vcmask 261120   ;;  %s18054_s0 = inlined_call_operand.smem [shape: u32[39], index: -1, kind: input, shape index: {}] }
   0x1   :  { %s12649_s5 = sld [smem:[%s18054_s0]]   ;;  %s12583_s14 = smov 33   ;;  %vm18201_vm3 = vcmask 15360   ;;  %vm18199_vm4 = vcmask 277504   ;;  %vm1424_vm5 = vcmask 531456   ;;  %vm1262_vm6 = vcmask 523264  }
   0x2   :  { %s12654_s9 = sld [smem:[%s18054_s0 + %s12581_s6]]   ;;  %v330_v1 = vshrl.u32 %v329_v0, 7  ;;  %s12584_s15 = smov 2   ;;  %vm18209_vm7 = vcmask 539648   ;;  %vm1704_vm8 = vcmask 1039360   ;;  %vm2232_vm9 = vcmask 1043456  }
   0x3   :  { %s12660_s13 = sld [smem:[%s18054_s0 + %s12582_s10]]   ;;  %s12585_s16 = smov 1   ;;  %vm1772_vm10 = vcmask 1031168   ;;  %vm1857_vm11 = vcmask 785408   ;;  %vm1910_vm12 = vcmask 777216   ;;  %vm1995_vm13 = vcmask 769024  }
   0x4   :  { %v12670_v9 = vsub.s32 1, %v330_v1  ;;  %v12674_v13 = vsub.s32 0, %v330_v1  ;;  %s12586_s17 = smov 32   ;;  %v12711_v31 = vsub.s32 2, %v330_v1  ;;  %v12722_v35 = vsub.s32 3, %v330_v1  ;;  %s12587_s18 = smov 65  }
   0x5   :  { %s12588_s19 = smov 64   ;;  %s12589_s20 = smov 66   ;;  %vm2147_vm14 = vcmask 515072   ;;  %vm18186_vm15 = vcmask 506880  }
   0x6   :  { %18260 = vst [vmem:[#allocation2_spill] sm:$0xff] %v12670_v9  ;;  %18261 = vst [vmem:[#allocation3_spill] sm:$0xff] %v12674_v13  ;;  %s12590_s21 = smov 127   ;;  %s12591_s22 = smov 126  }
   0x7   :  { %v12663_v2 = vld [vmem:[%s12649_s5 + $0x8] sm:$0xff]  ;;  %v159_v3 = vld [vmem:[%s12649_s5] sm:$0xff]  ;;  %18264 = vst [vmem:[#allocation6_spill] sm:$0xff] %v12711_v31  ;;  %18265 = vst [vmem:[#allocation7_spill] sm:$0xff] %v12722_v35  ;;  %s12592_s23 = smov 96   ;;  %s12593_s24 = smov 95  }
   0x8   :  { %v11098_v4 = vcombine.low %v12663_v2, %v12663_v2  ;;  %v11096_v5 = vcombine.low %v159_v3, %v159_v3  ;;  %v278_v6 = vld [vmem:[%s12654_s9] sm:$0xff]  ;;  %v279_v7 = vld [vmem:[%s12654_s9 + $0x8] sm:$0xff]  ;;  %v11097_v12 = vcombine.high %v159_v3, %v159_v3  ;;  %v280_v41 = vld [vmem:[%s12654_s9 + $0x10] sm:$0xff]  ;;  %v11099_v48 = vcombine.high %v12663_v2, %v12663_v2  ;;  %s12594_s25 = smov 94   ;;  %s12595_s26 = smov 63  }
   0x9   :  { %v11112_v8 = vcombine.low %v278_v6, %v278_v6  ;;  %v11113_v10 = vcombine.high %v278_v6, %v278_v6  ;;  %v11114_v11 = vcombine.low %v279_v7, %v279_v7  ;;  %v11115_v40 = vcombine.high %v279_v7, %v279_v7  ;;  %v161_v50 = vld [vmem:[%s12649_s5 + $0x10] sm:$0xff]  ;;  %v12759_v54 = vld [vmem:[%s12654_s9 + $0x18] sm:$0xff]  ;;  %s12596_s27 = smov 62   ;;  %s14020_s30 = sld [smem:[%s18054_s0 + %s12585_s16]]  }
   0xa   :  { %211 = vrot.lane.b32.xlu1 %v11098_v4, %s12583_s14  ;;  %207 = vrot.lane.b32.xlu0 %v11096_v5, %s12583_s14  ;;  %v11116_v43 = vcombine.low %v280_v41, %v280_v41  ;;  %v11100_v51 = vcombine.low %v161_v50, %v161_v50  ;;  %v11117_v56 = vcombine.high %v280_v41, %v280_v41  ;;  %v12776_v63 = vld [vmem:[%s12649_s5 + $0x18] sm:$0xff]  ;;  %s11059_s3 = sld [smem:[%s18054_s0 + %s12584_s15]]   ;;  %s12598_s4 = smov 3  }
   0xb   :  { %v12676_v14 = vpack.i.b16 %v11112_v8, %v11112_v8  ;;  %v454_v15 = vshrl.u32 %v11112_v8, 16  ;;  %v461_v16 = vshrl.u32 %v11113_v10, 16  ;;  %v468_v17 = vshrl.u32 %v11114_v11, 16  ;;  %s15348_s7 = sld [smem:[%s18054_s0 + %s12598_s4]]   ;;  %s12599_s8 = smov 4  }
   0xc   :  { %v12701_v27 = vpack.i.b16 %v11113_v10, %v11113_v10  ;;  %v12706_v29 = vpack.i.b16 %v11114_v11, %v11114_v11  ;;  %v475_v45 = vshrl.u32 %v11115_v40, 16  ;;  %v482_v47 = vshrl.u32 %v11116_v43, 16  ;;  %s11061_s12 = sld [smem:[%s18054_s0 + %s12599_s8]]   ;;  %s12601_s1 = smov 16  }
   0xd   :  { %18262 = vst [vmem:[#allocation4_spill] sm:$0xff] %v12676_v14  ;;  %v667_v18 = vrot.slane %v12676_v14, %v12670_v9  ;;  %v12680_v19 = vpack.i.b16 %v454_v15, %v454_v15  ;;  %v12682_v20 = vpack.i.b16 %v461_v16, %v461_v16  ;;  %v12690_v23 = vpack.i.b16 %v468_v17, %v468_v17  ;;  %s12602_s2 = smov 18   ;;  %s12605_s6 = smov 112  }
   0xe   :  { %209 = vrot.lane.b32.xlu0 %v11097_v12, %s12583_s14  ;;  %18263 = vst [vmem:[#allocation5_spill] sm:$0xff] %v12706_v29  ;;  %v671_v30 = vrot.slane %v12701_v27, %v12670_v9  ;;  %v675_v32 = vrot.slane %v12706_v29, %v12670_v9  ;;  %v991_v33 = vrot.slane %v12676_v14, %v12711_v31  ;;  %v489_v60 = vshrl.u32 %v11117_v56, 16  ;;  %s12609_s29 = smov 7   ;;  %s12610_s11 = smov 8  }
   0xf   :  { %744 = vrot.lane.b32.xlu1 %v667_v18, %s12584_s15  ;;  %v460_v21 = vrot.slane %v12680_v19, %v12674_v13  ;;  %v467_v22 = vrot.slane %v12682_v20, %v12674_v13  ;;  %v829_v24 = vrot.slane %v12680_v19, %v12670_v9  ;;  %v474_v25 = vrot.slane %v12690_v23, %v12674_v13  ;;  %s16897_s4 = sld [smem:[%s18054_s0 + %s12609_s29]]   ;;  %s12618_s29 = smov 12  }
  0x10   :  { %v837_v26 = vrot.slane %v12690_v23, %v12670_v9  ;;  %v833_v28 = vrot.slane %v12682_v20, %v12670_v9  ;;  %v995_v34 = vrot.slane %v12701_v27, %v12711_v31  ;;  %v999_v36 = vrot.slane %v12706_v29, %v12711_v31 }
  0x11   :  { %v1315_v37 = vrot.slane %v12676_v14, %v12722_v35  ;;  %v1319_v38 = vrot.slane %v12701_v27, %v12722_v35  ;;  %v1323_v39 = vrot.slane %v12706_v29, %v12722_v35  ;;  %v1153_v42 = vrot.slane %v12680_v19, %v12711_v31 }
  0x12   :  { %584 = vrot.lane.b32.xlu0 %v467_v22, %s12585_s16  ;;  %v1157_v44 = vrot.slane %v12682_v20, %v12711_v31  ;;  %v1161_v46 = vrot.slane %v12690_v23, %v12711_v31  ;;  %v12749_v49 = vpack.i.b16 %v475_v45, %v475_v45  ;;  %v12753_v52 = vpack.i.b16 %v482_v47, %v482_v47 }
  0x13   :  { %582 = vrot.lane.b32.xlu1 %v460_v21, %s12585_s16  ;;  %v1477_v57 = vrot.slane %v12680_v19, %v12722_v35  ;;  %v11118_v58 = vcombine.low %v12759_v54, %v12759_v54  ;;  %v1481_v59 = vrot.slane %v12682_v20, %v12722_v35  ;;  %v1485_v61 = vrot.slane %v12690_v23, %v12722_v35 }
  0x14   :  { %v481_v53 = vrot.slane %v12749_v49, %v12674_v13  ;;  %v488_v55 = vrot.slane %v12753_v52, %v12674_v13  ;;  %v11101_v0 = vcombine.high %v161_v50, %v161_v50  ;;  %v12779_v1 = vpack.i.b16 %v489_v60, %v489_v60  ;;  %v12900_v60 = vld [vmem:[%s12649_s5 + $0x28] sm:$0xff] }
  0x15   :  { %v496_v62 = vshrl.u32 %v11118_v58, 16  ;;  %v11102_v2 = vcombine.low %v12776_v63, %v12776_v63  ;;  %v841_v6 = vrot.slane %v12749_v49, %v12670_v9  ;;  %v845_v7 = vrot.slane %v12753_v52, %v12670_v9 }
  0x16   :  { %906 = vrot.lane.b32.xlu0 %v829_v24, %s12586_s17  ;;  %v495_v4 = vrot.slane %v12779_v1, %v12674_v13  ;;  %v849_v8 = vrot.slane %v12779_v1, %v12670_v9  ;;  %v12801_v10 = vpack.i.b16 %v11115_v40, %v11115_v40  ;;  %v12806_v12 = vpack.i.b16 %v11116_v43, %v11116_v43 }
  0x17   :  { %586 = vrot.lane.b32.xlu1 %v474_v25, %s12585_s16  ;;  %v12784_v3 = vpack.i.b16 %v496_v62, %v496_v62  ;;  %v12811_v16 = vpack.i.b16 %v11117_v56, %v11117_v56  ;;  %v12816_v18 = vpack.i.b16 %v11118_v58, %v11118_v58  ;;  %v1489_v40 = vrot.slane %v12749_v49, %v12722_v35 }
  0x18   :  { %18266 = vst [vmem:[#allocation8_spill] sm:$0xff] %v12801_v10  ;;  %18267 = vst [vmem:[#allocation9_spill] sm:$0xff] %v12806_v12  ;;  %v679_v15 = vrot.slane %v12801_v10, %v12670_v9  ;;  %v683_v17 = vrot.slane %v12806_v12, %v12670_v9  ;;  %v1003_v21 = vrot.slane %v12801_v10, %v12711_v31 }
  0x19   :  { %v502_v5 = vrot.slane %v12784_v3, %v12674_v13  ;;  %v853_v11 = vrot.slane %v12784_v3, %v12670_v9  ;;  %18268 = vst [vmem:[#allocation10_spill] sm:$0xff] %v12811_v16  ;;  %18269 = vst [vmem:[#allocation11_spill] sm:$0xff] %v12816_v18  ;;  %v687_v19 = vrot.slane %v12811_v16, %v12670_v9 }
  0x1a   :  { %910 = vrot.lane.b32.xlu0 %v837_v26, %s12586_s17  ;;  %v691_v20 = vrot.slane %v12816_v18, %v12670_v9  ;;  %v1007_v22 = vrot.slane %v12806_v12, %v12711_v31  ;;  %v1011_v23 = vrot.slane %v12811_v16, %v12711_v31  ;;  %v1015_v24 = vrot.slane %v12816_v18, %v12711_v31 }
  0x1b   :  { %908 = vrot.lane.b32.xlu1 %v833_v28, %s12586_s17  ;;  %v1327_v25 = vrot.slane %v12801_v10, %v12722_v35  ;;  %v1331_v26 = vrot.slane %v12806_v12, %v12722_v35  ;;  %v1335_v28 = vrot.slane %v12811_v16, %v12722_v35  ;;  %v11103_v45 = vcombine.high %v12776_v63, %v12776_v63 }
  0x1c   :  { %v1501_v56 = vrot.slane %v12784_v3, %v12722_v35  ;;  %v11106_v63 = vcombine.low %v12900_v60, %v12900_v60 }
  0x1e   :  { %746 = vrot.lane.b32.xlu0 %v671_v30, %s12584_s15  ;;  %v1339_v30 = vrot.slane %v12816_v18, %v12722_v35 }
  0x1f   :  { %748 = vrot.lane.b32.xlu1 %v675_v32, %s12584_s15  ;;  %v1165_v32 = vrot.slane %v12749_v49, %v12711_v31  ;;  %v12879_v49 = vld [vmem:[%s12654_s9 + $0x28] sm:$0xff] }
  0x22   :  { %1068 = vrot.lane.b32.xlu0 %v991_v33, %s12582_s10  ;;  %v1169_v33 = vrot.slane %v12753_v52, %v12711_v31 }
  0x23   :  { %1070 = vrot.lane.b32.xlu1 %v995_v34, %s12582_s10  ;;  %v282_v34 = vld [vmem:[%s12654_s9 + $0x20] sm:$0xff] }
  0x26   :  { %1072 = vrot.lane.b32.xlu0 %v999_v36, %s12582_s10  ;;  %v1173_v36 = vrot.slane %v12779_v1, %v12711_v31 }
  0x27   :  { %1392 = vrot.lane.b32.xlu1 %v1315_v37, %s12587_s18  ;;  %v11119_v37 = vcombine.high %v12759_v54, %v12759_v54  ;;  %v1497_v54 = vrot.slane %v12779_v1, %v12722_v35 }
  0x29   :  { %v503_v41 = vshrl.u32 %v11119_v37, 16 }
  0x2a   :  { %1394 = vrot.lane.b32.xlu0 %v1319_v38, %s12587_s18  ;;  %v1177_v38 = vrot.slane %v12784_v3, %v12711_v31 }
  0x2b   :  { %1396 = vrot.lane.b32.xlu1 %v1323_v39, %s12587_s18  ;;  %v11120_v39 = vcombine.low %v282_v34, %v282_v34 }
  0x2d   :  { %v510_v43 = vshrl.u32 %v11120_v39, 16 }
  0x2e   :  { %1230 = vrot.lane.b32.xlu0 %v1153_v42, %s12588_s19  ;;  %v1493_v42 = vrot.slane %v12753_v52, %v12722_v35 }
  0x2f   :  { %1232 = vrot.lane.b32.xlu1 %v1157_v44, %s12588_s19  ;;  %v163_v44 = vld [vmem:[%s12649_s5 + $0x20] sm:$0xff] }
  0x30   :  { %v11104_v47 = vcombine.low %v163_v44, %v163_v44 }
  0x32   :  { %1234 = vrot.lane.b32.xlu0 %v1161_v46, %s12588_s19  ;;  %v12873_v46 = vpack.i.b16 %v503_v41, %v503_v41 }
  0x33   :  { %213 = vrot.lane.b32.xlu1 %v11099_v48, %s12583_s14  ;;  %v12876_v48 = vpack.i.b16 %v510_v43, %v510_v43 }
  0x34   :  { %v509_v50 = vrot.slane %v12873_v46, %v12674_v13 }
  0x35   :  { %v516_v52 = vrot.slane %v12876_v48, %v12674_v13 }
  0x36   :  { %215 = vrot.lane.b32.xlu0 %v11100_v51, %s12583_s14  ;;  %v11121_v51 = vcombine.high %v282_v34, %v282_v34 }
  0x37   :  { %588 = vrot.lane.b32.xlu1 %v481_v53, %s12585_s16  ;;  %v11122_v53 = vcombine.low %v12879_v49, %v12879_v49 }
  0x3a   :  { %590 = vrot.lane.b32.xlu0 %v488_v55, %s12585_s16  ;;  %v517_v55 = vshrl.u32 %v11121_v51, 16 }
  0x3b   :  { %1554 = vrot.lane.b32.xlu1 %v1477_v57, %s12589_s20  ;;  %v524_v57 = vshrl.u32 %v11122_v53, 16 }
  0x3c   :  { %v12903_v62 = vpack.i.b16 %v517_v55, %v517_v55 }
  0x3e   :  { %1556 = vrot.lane.b32.xlu0 %v1481_v59, %s12589_s20  ;;  %v523_v3 = vrot.slane %v12903_v62, %v12674_v13 }
  0x3f   :  { %1558 = vrot.lane.b32.xlu1 %v1485_v61, %s12589_s20  ;;  %v11105_v61 = vcombine.high %v163_v44, %v163_v44 }
  0x42   :  { %217 = vrot.lane.b32.xlu0 %v11101_v0, %s12583_s14  ;;  %v12908_v0 = vpack.i.b16 %v524_v57, %v524_v57  ;;  %v1181_v57 = vrot.slane %v12873_v46, %v12711_v31 }
  0x43   :  { %219 = vrot.lane.b32.xlu1 %v11102_v2, %s12583_s14 }
  0x46   :  { %592 = vrot.lane.b32.xlu0 %v495_v4, %s12585_s16  ;;  %v530_v4 = vrot.slane %v12908_v0, %v12674_v13 }
  0x47   :  { %594 = vrot.lane.b32.xlu1 %v502_v5, %s12585_s16 }
  0x4a   :  { %912 = vrot.lane.b32.xlu0 %v841_v6, %s12586_s17 }
  0x4b   :  { %914 = vrot.lane.b32.xlu1 %v845_v7, %s12586_s17  ;;  %v857_v7 = vrot.slane %v12873_v46, %v12670_v9 }
  0x4e   :  { %916 = vrot.lane.b32.xlu0 %v849_v8, %s12586_s17  ;;  %v861_v8 = vrot.slane %v12876_v48, %v12670_v9 }
  0x4f   :  { %918 = vrot.lane.b32.xlu1 %v853_v11, %s12586_s17 }
  0x52   :  { %750 = vrot.lane.b32.xlu0 %v679_v15, %s12584_s15 }
  0x53   :  { %752 = vrot.lane.b32.xlu1 %v683_v17, %s12584_s15  ;;  %v865_v17 = vrot.slane %v12903_v62, %v12670_v9 }
  0x56   :  { %754 = vrot.lane.b32.xlu0 %v687_v19, %s12584_s15  ;;  %v12937_v19 = vpack.i.b16 %v11119_v37, %v11119_v37 }
  0x57   :  { %756 = vrot.lane.b32.xlu1 %v691_v20, %s12584_s15  ;;  %v869_v20 = vrot.slane %v12908_v0, %v12670_v9 }
  0x58   :  { %18273 = vst [vmem:[#allocation15_spill] sm:$0xff] %v12937_v19 }
  0x5a   :  { %1074 = vrot.lane.b32.xlu0 %v1003_v21, %s12582_s10  ;;  %v12942_v21 = vpack.i.b16 %v11120_v39, %v11120_v39 }
  0x5b   :  { %1076 = vrot.lane.b32.xlu1 %v1007_v22, %s12582_s10 }
  0x5c   :  { %18274 = vst [vmem:[#allocation16_spill] sm:$0xff] %v12942_v21  ;;  %v1023_v39 = vrot.slane %v12942_v21, %v12711_v31 }
  0x5e   :  { %1078 = vrot.lane.b32.xlu0 %v1011_v23, %s12582_s10 }
  0x5f   :  { %1080 = vrot.lane.b32.xlu1 %v1015_v24, %s12582_s10  ;;  %v695_v24 = vrot.slane %v12937_v19, %v12670_v9 }
  0x62   :  { %1398 = vrot.lane.b32.xlu0 %v1327_v25, %s12587_s18  ;;  %v12951_v25 = vpack.i.b16 %v11121_v51, %v11121_v51 }
  0x63   :  { %1400 = vrot.lane.b32.xlu1 %v1331_v26, %s12587_s18  ;;  %v699_v26 = vrot.slane %v12942_v21, %v12670_v9 }
  0x64   :  { %18275 = vst [vmem:[#allocation17_spill] sm:$0xff] %v12951_v25 }
  0x66   :  { %1402 = vrot.lane.b32.xlu0 %v1335_v28, %s12587_s18  ;;  %v12956_v28 = vpack.i.b16 %v11122_v53, %v11122_v53  ;;  %v1351_v53 = vrot.slane %v12951_v25, %v12722_v35 }
  0x67   :  { %1404 = vrot.lane.b32.xlu1 %v1339_v30, %s12587_s18 }
  0x68   :  { %18276 = vst [vmem:[#allocation18_spill] sm:$0xff] %v12956_v28  ;;  %v707_v34 = vrot.slane %v12956_v28, %v12670_v9  ;;  %v1031_v43 = vrot.slane %v12956_v28, %v12711_v31 }
  0x6a   :  { %1236 = vrot.lane.b32.xlu0 %v1165_v32, %s12588_s19 }
  0x6b   :  { %1238 = vrot.lane.b32.xlu1 %v1169_v33, %s12588_s19  ;;  %v703_v33 = vrot.slane %v12951_v25, %v12670_v9 }
  0x6e   :  { %1240 = vrot.lane.b32.xlu0 %v1173_v36, %s12588_s19 }
  0x6f   :  { %1242 = vrot.lane.b32.xlu1 %v1177_v38, %s12588_s19  ;;  %v1019_v38 = vrot.slane %v12937_v19, %v12711_v31 }
  0x72   :  { %1560 = vrot.lane.b32.xlu0 %v1489_v40, %s12589_s20 }
  0x73   :  { %1562 = vrot.lane.b32.xlu1 %v1493_v42, %s12589_s20  ;;  %v1027_v42 = vrot.slane %v12951_v25, %v12711_v31 }
  0x76   :  { %221 = vrot.lane.b32.xlu0 %v11103_v45, %s12583_s14 }
  0x77   :  { %223 = vrot.lane.b32.xlu1 %v11104_v47, %s12583_s14  ;;  %v1343_v47 = vrot.slane %v12937_v19, %v12722_v35 }
  0x7a   :  { %596 = vrot.lane.b32.xlu0 %v509_v50, %s12585_s16  ;;  %v1347_v50 = vrot.slane %v12942_v21, %v12722_v35 }
  0x7b   :  { %598 = vrot.lane.b32.xlu1 %v516_v52, %s12585_s16 }
  0x7c   :  { %v12895_v58 = vpop.permute.xlu1 %211  ;;  %v12897_v59 = vpop.permute.xlu0 %207 }
  0x7e   :  { %1564 = vrot.lane.b32.xlu0 %v1497_v54, %s12589_s20  ;;  %v1355_v54 = vrot.slane %v12956_v28, %v12722_v35 }
  0x7f   :  { %1566 = vrot.lane.b32.xlu1 %v1501_v56, %s12589_s20 }
  0x80   :  { %v12910_v1 = vpop.permute.xlu0 %209 }
  0x81   :  { %v12912_v2 = vpop.permute.xlu1 %744 }
  0x82   :  { %18270 = vst [vmem:[#allocation12_spill] sm:$0xff] %v12912_v2  ;;  %225 = vrot.lane.b32.xlu0 %v11105_v61, %s12583_s14  ;;  %v1185_v61 = vrot.slane %v12876_v48, %v12711_v31 }
  0x83   :  { %227 = vrot.lane.b32.xlu1 %v11106_v63, %s12583_s14 }
  0x84   :  { %v12920_v5 = vpop.permute.xlu0 %584 }
  0x85   :  { %v12922_v6 = vpop.permute.xlu1 %582 }
  0x86   :  { %18271 = vst [vmem:[#allocation13_spill] sm:$0xff] %v12922_v6  ;;  %600 = vrot.lane.b32.xlu0 %v523_v3, %s12585_s16  ;;  %v284_v3 = vld [vmem:[%s12654_s9 + $0x30] sm:$0xff] }
  0x87   :  { %602 = vrot.lane.b32.xlu1 %v530_v4, %s12585_s16 }
  0x88   :  { %v12930_v11 = vpop.permute.xlu0 %906 }
  0x89   :  { %18272 = vst [vmem:[#allocation14_spill] sm:$0xff] %v12930_v11  ;;  %v12932_v15 = vpop.permute.xlu1 %586 }
  0x8a   :  { %920 = vrot.lane.b32.xlu0 %v857_v7, %s12586_s17  ;;  %v1189_v7 = vrot.slane %v12903_v62, %v12711_v31 }
  0x8b   :  { %922 = vrot.lane.b32.xlu1 %v861_v8, %s12586_s17  ;;  %v13028_v8 = vcombine.high %v12879_v49, %v12879_v49 }
  0x8c   :  { %v12944_v22 = vpop.permute.xlu0 %910 }
  0x8d   :  { %v12946_v23 = vpop.permute.xlu1 %908  ;;  %v531_v49 = vshrl.u32 %v13028_v8, 16 }
  0x8e   :  { %924 = vrot.lane.b32.xlu0 %v865_v17, %s12586_s17  ;;  %v1193_v17 = vrot.slane %v12908_v0, %v12711_v31 }
  0x8f   :  { %926 = vrot.lane.b32.xlu1 %v869_v20, %s12586_s17  ;;  %v13033_v20 = vcombine.low %v284_v3, %v284_v3 }
  0x90   :  { %v12958_v30 = vpop.permute.xlu0 %746 }
  0x91   :  { %v12960_v32 = vpop.permute.xlu1 %748 }
  0x92   :  { %758 = vrot.lane.b32.xlu0 %v695_v24, %s12584_s15 }
  0x93   :  { %760 = vrot.lane.b32.xlu1 %v699_v26, %s12584_s15 }
  0x94   :  { %v12968_v36 = vpop.permute.xlu0 %1068 }
  0x95   :  { %18277 = vst [vmem:[#allocation19_spill] sm:$0xff] %v12968_v36  ;;  %v12970_v37 = vpop.permute.xlu1 %1070 }
  0x96   :  { %762 = vrot.lane.b32.xlu0 %v703_v33, %s12584_s15  ;;  %v1505_v33 = vrot.slane %v12873_v46, %v12722_v35  ;;  %v13055_v46 = vpack.i.b16 %v531_v49, %v531_v49 }
  0x97   :  { %764 = vrot.lane.b32.xlu1 %v707_v34, %s12584_s15  ;;  %v1509_v34 = vrot.slane %v12876_v48, %v12722_v35 }
  0x98   :  { %v12978_v40 = vpop.permute.xlu0 %1072 }
  0x99   :  { %v12980_v41 = vpop.permute.xlu1 %1392 }
  0x9a   :  { %18278 = vst [vmem:[#allocation20_spill] sm:$0xff] %v12980_v41  ;;  %1082 = vrot.lane.b32.xlu0 %v1019_v38, %s12582_s10  ;;  %v538_v38 = vshrl.u32 %v13033_v20, 16 }
  0x9b   :  { %1084 = vrot.lane.b32.xlu1 %v1023_v39, %s12582_s10 }
  0x9c   :  { %v12988_v44 = vpop.permute.xlu0 %1394 }
  0x9d   :  { %v12990_v45 = vpop.permute.xlu1 %1396 }
  0x9e   :  { %1086 = vrot.lane.b32.xlu0 %v1027_v42, %s12582_s10  ;;  %v165_v42 = vld [vmem:[%s12649_s5 + $0x30] sm:$0xff] }
  0x9f   :  { %1088 = vrot.lane.b32.xlu1 %v1031_v43, %s12582_s10 }
  0xa0   :  { %v12998_v51 = vpop.permute.xlu0 %1230 }
  0xa1   :  { %18279 = vst [vmem:[#allocation21_spill] sm:$0xff] %v12998_v51  ;;  %v13000_v52 = vpop.permute.xlu1 %1232 }
  0xa2   :  { %1406 = vrot.lane.b32.xlu0 %v1343_v47, %s12587_s18  ;;  %v11107_v47 = vcombine.high %v12900_v60, %v12900_v60 }
  0xa3   :  { %1408 = vrot.lane.b32.xlu1 %v1347_v50, %s12587_s18  ;;  %v11108_v50 = vcombine.low %v165_v42, %v165_v42 }
  0xa4   :  { %v13008_v55 = vpop.permute.xlu0 %1234 }
  0xa5   :  { %v13010_v56 = vpop.permute.xlu1 %213 }
  0xa6   :  { %1410 = vrot.lane.b32.xlu0 %v1351_v53, %s12587_s18  ;;  %v13058_v53 = vpack.i.b16 %v538_v38, %v538_v38 }
  0xa7   :  { %1412 = vrot.lane.b32.xlu1 %v1355_v54, %s12587_s18  ;;  %v285_v54 = vld [vmem:[%s12654_s9 + $0x38] sm:$0xff] }
  0xa8   :  { %v13018_v63 = vpop.permute.xlu0 %215  ;;  %v544_v60 = vrot.slane %v13058_v53, %v12674_v13 }
  0xa9   :  { %v13021_v4 = vpop.permute.xlu1 %588 }
  0xaa   :  { %1244 = vrot.lane.b32.xlu0 %v1181_v57, %s12588_s19 }
  0xab   :  { %1246 = vrot.lane.b32.xlu1 %v1185_v61, %s12588_s19  ;;  %v537_v61 = vrot.slane %v13055_v46, %v12674_v13 }
  0xac   :  { %v13035_v24 = vpop.permute.xlu0 %590 }
  0xad   :  { %v13037_v26 = vpop.permute.xlu1 %1554 }
  0xae   :  { %18280 = vst [vmem:[#allocation22_spill] sm:$0xff] %v13037_v26  ;;  %1248 = vrot.lane.b32.xlu0 %v1189_v7, %s12588_s19  ;;  %v13068_v7 = vcombine.high %v284_v3, %v284_v3  ;;  %v1517_v3 = vrot.slane %v12908_v0, %v12722_v35 }
  0xaf   :  { %1250 = vrot.lane.b32.xlu1 %v1193_v17, %s12588_s19  ;;  %v13073_v17 = vcombine.low %v285_v54, %v285_v54  ;;  %v166_v54 = vld [vmem:[%s12649_s5 + $0x38] sm:$0xff] }
  0xb0   :  { %v13047_v39 = vpop.permute.xlu0 %1556  ;;  %v545_v38 = vshrl.u32 %v13068_v7, 16 }
  0xb1   :  { %v13050_v43 = vpop.permute.xlu1 %1558 }
  0xb2   :  { %1568 = vrot.lane.b32.xlu0 %v1505_v33, %s12589_s20  ;;  %v13093_v21 = vpack.i.b16 %v545_v38, %v545_v38  ;;  %v13113_v38 = vsel %vm614_vm0, %v12922_v6, %v12920_v5 }
  0xb3   :  { %1570 = vrot.lane.b32.xlu1 %v1509_v34, %s12589_s20  ;;  %v1513_v34 = vrot.slane %v12903_v62, %v12722_v35  ;;  %v11110_v62 = vcombine.low %v166_v54, %v166_v54  ;;  %18281 = vst [vmem:[#allocation23_spill] sm:$0xff] %v13113_v38  ;;  %v873_v54 = vrot.slane %v13055_v46, %v12670_v9 }
  0xb4   :  { %v13060_v48 = vpop.permute.xlu0 %217  ;;  %v551_v18 = vrot.slane %v13093_v21, %v12674_v13 }
  0xb5   :  { %v13063_v57 = vpop.permute.xlu1 %219 }
  0xb6   :  { %229 = vrot.lane.b32.xlu0 %v11107_v47, %s12583_s14  ;;  %v552_v47 = vshrl.u32 %v13073_v17, 16 }
  0xb7   :  { %231 = vrot.lane.b32.xlu1 %v11108_v50, %s12583_s14 }
  0xb8   :  { %v13075_v33 = vpop.permute.xlu0 %592  ;;  %v13096_v25 = vpack.i.b16 %v552_v47, %v552_v47  ;;  %v13120_v47 = vsel %vm614_vm0, %v12920_v5, %v12932_v15  ;;  %v13136_v5 = vsel %vm239_vm1, %v12910_v1, %v12895_v58 }
  0xb9   :  { %v13077_v49 = vpop.permute.xlu1 %594  ;;  %18282 = vst [vmem:[#allocation24_spill] sm:$0xff] %v13120_v47  ;;  %v649_v16 = vmul.bf16 %v13120_v47, %v13136_v5  ;;  %v13157_v47 = vsel %vm239_vm1, 0, %v12897_v59 }
  0xba   :  { %604 = vrot.lane.b32.xlu0 %v537_v61, %s12585_s16  ;;  %v11109_v61 = vcombine.high %v165_v42, %v165_v42  ;;  %v558_v42 = vrot.slane %v13096_v25, %v12674_v13 }
  0xbb   :  { %606 = vrot.lane.b32.xlu1 %v544_v60, %s12585_s16  ;;  %v1655_v29 = vrot.slane %v649_v16, 4  ;;  %v13164_v16 = vpack.i.b16 %v13028_v8, %v13028_v8  ;;  %v13182_v8 = vpack.i.b16 %v13068_v7, %v13068_v7 }
  0xbc   :  { %v13087_v50 = vpop.permute.xlu0 %912 }
  0xbd   :  { %v13090_v28 = vpop.permute.xlu1 %914  ;;  %18283 = vst [vmem:[#allocation25_spill] sm:$0xff] %v13164_v16  ;;  %18286 = vst [vmem:[#allocation28_spill] sm:$0xff] %v13182_v8  ;;  %v719_v7 = vrot.slane %v13182_v8, %v12670_v9 }
  0xbe   :  { %1572 = vrot.lane.b32.xlu0 %v1513_v34, %s12589_s20 }
  0xbf   :  { %1574 = vrot.lane.b32.xlu1 %v1517_v3, %s12589_s20 }
  0xc0   :  { %v13098_v60 = vpop.permute.xlu0 %916 }
  0xc1   :  { %v13100_v0 = vpop.permute.xlu1 %918 }
  0xc2   :  { %233 = vrot.lane.b32.xlu0 %v11109_v61, %s12583_s14  ;;  %v13128_v61 = vsel %vm239_vm1, %v12897_v59, %v12910_v1  ;;  %v13175_v59 = vpack.i.b16 %v13033_v20, %v13033_v20 }
  0xc3   :  { %235 = vrot.lane.b32.xlu1 %v11110_v62, %s12583_s14  ;;  %v877_v62 = vrot.slane %v13058_v53, %v12670_v9 }
  0xc4   :  { %v13108_v34 = vpop.permute.xlu0 %750  ;;  %18285 = vst [vmem:[#allocation27_spill] sm:$0xff] %v13175_v59  ;;  %v715_v20 = vrot.slane %v13175_v59, %v12670_v9 }
  0xc5   :  { %v13115_v3 = vpop.permute.xlu1 %752 }
  0xc6   :  { %608 = vrot.lane.b32.xlu0 %v551_v18, %s12585_s16  ;;  %v648_v18 = vmul.bf16 %v13113_v38, %v13128_v61  ;;  %v881_v38 = vrot.slane %v13093_v21, %v12670_v9 }
  0xc7   :  { %610 = vrot.lane.b32.xlu1 %v558_v42, %s12585_s16 }
  0xc8   :  { %v13140_v19 = vpop.permute.xlu0 %754  ;;  %v1654_v42 = vrot.slane %v648_v18, 4 }
  0xc9   :  { %v13144_v12 = vpop.permute.xlu1 %756 }
  0xca   :  { %928 = vrot.lane.b32.xlu0 %v873_v54, %s12586_s17  ;;  %v885_v54 = vrot.slane %v13096_v25, %v12670_v9 }
  0xcb   :  { %930 = vrot.lane.b32.xlu1 %v877_v62, %s12586_s17  ;;  %v647_v62 = vmul.bf16 %v12922_v6, %v13157_v47 }
  0xcc   :  { %v13148_v10 = vpop.permute.xlu0 %1074 }
  0xcd   :  { %v13150_v1 = vpop.permute.xlu1 %1076  ;;  %v1653_v6 = vrot.slane %v647_v62, 4 }
  0xce   :  { %1672 = vrot.lane.b32.xlu0 %v1654_v42, %s12590_s21 }
  0xcf   :  { %1674 = vrot.lane.b32.xlu1 %v1655_v29, %s12590_s21  ;;  %v711_v29 = vrot.slane %v13164_v16, %v12670_v9 }
  0xd0   :  { %v13168_v18 = vpop.permute.xlu0 %1078 }
  0xd1   :  { %18284 = vst [vmem:[#allocation26_spill] sm:$0xff] %v13168_v18  ;;  %v13170_v42 = vpop.permute.xlu1 %1080 }
  0xd2   :  { %932 = vrot.lane.b32.xlu0 %v881_v38, %s12586_s17  ;;  %v13193_v38 = vpack.i.b16 %v13073_v17, %v13073_v17  ;;  %v1035_v17 = vrot.slane %v13164_v16, %v12711_v31 }
  0xd3   :  { %934 = vrot.lane.b32.xlu1 %v885_v54, %s12586_s17 }
  0xd4   :  { %v13184_v14 = vpop.permute.xlu0 %1398  ;;  %18289 = vst [vmem:[#allocation31_spill] sm:$0xff] %v13193_v38 }
  0xd5   :  { %18287 = vst [vmem:[#allocation29_spill] sm:$0xff] %v13184_v14  ;;  %v13186_v18 = vpop.permute.xlu1 %1400 }
  0xd6   :  { %18288 = vst [vmem:[#allocation30_spill] sm:$0xff] %v13186_v18  ;;  %1670 = vrot.lane.b32.xlu0 %v1653_v6, %s12590_s21  ;;  %v723_v6 = vrot.slane %v13193_v38, %v12670_v9 }
  0xd7   :  { %766 = vrot.lane.b32.xlu1 %v711_v29, %s12584_s15 }
  0xd8   :  { %v13198_v54 = vpop.permute.xlu0 %1402 }
  0xd9   :  { %18290 = vst [vmem:[#allocation32_spill] sm:$0xff] %v13198_v54  ;;  %v13200_v62 = vpop.permute.xlu1 %1404 }
  0xda   :  { %18291 = vst [vmem:[#allocation33_spill] sm:$0xff] %v13200_v62  ;;  %768 = vrot.lane.b32.xlu0 %v715_v20, %s12584_s15  ;;  %v13215_v62 = vsel %vm938_vm2, %v12930_v11, %v12946_v23  ;;  %v13220_v20 = vsel %vm18201_vm3, %v12912_v2, %v12958_v30 }
  0xdb   :  { %770 = vrot.lane.b32.xlu1 %v719_v7, %s12584_s15  ;;  %18294 = vst [vmem:[#allocation36_spill] sm:$0xff] %v13215_v62  ;;  %18295 = vst [vmem:[#allocation37_spill] sm:$0xff] %v13220_v20  ;;  %v1039_v7 = vrot.slane %v13175_v59, %v12711_v31  ;;  %v972_v54 = vmul.bf16 %v13215_v62, %v13128_v61 }
  0xdc   :  { %v13208_v29 = vpop.permute.xlu0 %1236 }
  0xdd   :  { %18292 = vst [vmem:[#allocation34_spill] sm:$0xff] %v13208_v29  ;;  %v13210_v18 = vpop.permute.xlu1 %1238  ;;  %v13238_v29 = vsel %vm18201_vm3, %v12958_v30, %v12960_v32  ;;  %v1807_v30 = vrot.slane %v972_v54, 4  ;;  %v1047_v54 = vrot.slane %v13193_v38, %v12711_v31 }
  0xde   :  { %18293 = vst [vmem:[#allocation35_spill] sm:$0xff] %v13210_v18  ;;  %772 = vrot.lane.b32.xlu0 %v723_v6, %s12584_s15  ;;  %v13233_v18 = vsel %vm938_vm2, %v12946_v23, %v12944_v22  ;;  %18298 = vst [vmem:[#allocation40_spill] sm:$0xff] %v13238_v29  ;;  %v810_v6 = vmul.bf16 %v13220_v20, %v13128_v61  ;;  %v811_v23 = vmul.bf16 %v13238_v29, %v13136_v5 }
  0xdf   :  { %1090 = vrot.lane.b32.xlu1 %v1035_v17, %s12582_s10  ;;  %18297 = vst [vmem:[#allocation39_spill] sm:$0xff] %v13233_v18  ;;  %v973_v17 = vmul.bf16 %v13233_v18, %v13136_v5 }
  0xe0   :  { %v13226_v9 = vpop.permute.xlu0 %1240 }
  0xe1   :  { %18296 = vst [vmem:[#allocation38_spill] sm:$0xff] %v13226_v9  ;;  %v13242_v14 = vpop.permute.xlu1 %1242 }
  0xe2   :  { %1092 = vrot.lane.b32.xlu0 %v1039_v7, %s12582_s10  ;;  %v1043_v7 = vrot.slane %v13182_v8, %v12711_v31 }
  0xe3   :  { %1740 = vrot.lane.b32.xlu1 %v810_v6, %s12591_s22  ;;  %v1808_v6 = vrot.slane %v973_v17, 4 }
  0xe4   :  { %v13250_v62 = vpop.permute.xlu0 %1560 }
  0xe5   :  { %v13252_v9 = vpop.permute.xlu1 %1562 }
  0xe6   :  { %1742 = vrot.lane.b32.xlu0 %v811_v23, %s12591_s22  ;;  %v971_v23 = vmul.bf16 %v12930_v11, %v13157_v47  ;;  %v13285_v11 = vsel %vm18199_vm4, %v12968_v36, %v12970_v37 }
  0xe7   :  { %1825 = vrot.lane.b32.xlu1 %v1807_v30, %s12592_s23  ;;  %v809_v30 = vmul.bf16 %v12912_v2, %v13157_v47  ;;  %18301 = vst [vmem:[#allocation43_spill] sm:$0xff] %v13285_v11  ;;  %v13298_v2 = vsel %vm18199_vm4, %v12970_v37, %v12978_v40  ;;  %v1367_v37 = vrot.slane %v13182_v8, %v12722_v35 }
  0xe8   :  { %v13258_v20 = vpop.permute.xlu0 %221  ;;  %18303 = vst [vmem:[#allocation45_spill] sm:$0xff] %v13298_v2 }
  0xe9   :  { %18299 = vst [vmem:[#allocation41_spill] sm:$0xff] %v13258_v20  ;;  %v13260_v18 = vpop.permute.xlu1 %223 }
  0xea   :  { %18300 = vst [vmem:[#allocation42_spill] sm:$0xff] %v13260_v18  ;;  %1827 = vrot.lane.b32.xlu0 %v1808_v6, %s12592_s23  ;;  %v1359_v6 = vrot.slane %v13164_v16, %v12722_v35  ;;  %v1806_v18 = vrot.slane %v971_v23, 4  ;;  %v1134_v23 = vmul.bf16 %v13285_v11, %v13128_v61 }
  0xeb   :  { %1094 = vrot.lane.b32.xlu1 %v1043_v7, %s12582_s10 }
  0xec   :  { %v13268_v29 = vpop.permute.xlu0 %596 }
  0xed   :  { %v13272_v17 = vpop.permute.xlu1 %598 }
  0xee   :  { %1096 = vrot.lane.b32.xlu0 %v1047_v54, %s12582_s10  ;;  %v1363_v54 = vrot.slane %v13175_v59, %v12722_v35  ;;  %v1945_v59 = vrot.slane %v1134_v23, 4  ;;  %v1371_v23 = vrot.slane %v13193_v38, %v12722_v35 }
  0xef   :  { %1738 = vrot.lane.b32.xlu1 %v809_v30, %s12591_s22 }
  0xf0   :  { %v13278_v7 = vpop.permute.xlu0 %1564 }
  0xf1   :  { %v13280_v20 = vpop.permute.xlu1 %1566 }
  0xf2   :  { %1823 = vrot.lane.b32.xlu0 %v1806_v18, %s12592_s23  ;;  %v1135_v18 = vmul.bf16 %v13298_v2, %v13136_v5  ;;  %v1133_v2 = vmul.bf16 %v12968_v36, %v13157_v47 }
  0xf3   :  { %1414 = vrot.lane.b32.xlu1 %v1359_v6, %s12587_s18 }
  0xf4   :  { %v13291_v30 = vpop.permute.xlu0 %225 }
  0xf5   :  { %18302 = vst [vmem:[#allocation44_spill] sm:$0xff] %v13291_v30  ;;  %v13300_v16 = vpop.permute.xlu1 %227 }
  0xf6   :  { %18304 = vst [vmem:[#allocation46_spill] sm:$0xff] %v13300_v16  ;;  %1416 = vrot.lane.b32.xlu0 %v1363_v54, %s12587_s18  ;;  %v1946_v54 = vrot.slane %v1135_v18, 4  ;;  %v1197_v18 = vrot.slane %v13055_v46, %v12711_v31 }
  0xf7   :  { %1878 = vrot.lane.b32.xlu1 %v13128_v61, %s12593_s24 }
  0xf8   :  { %v13307_v6 = vpop.permute.xlu0 %600 }
  0xf9   :  { %v13309_v11 = vpop.permute.xlu1 %602 }
  0xfa   :  { %18305 = vst [vmem:[#allocation47_spill] sm:$0xff] %v13309_v11  ;;  %1880 = vrot.lane.b32.xlu0 %v13136_v5, %s12593_s24 }
  0xfb   :  { %1963 = vrot.lane.b32.xlu1 %v1945_v59, %s12594_s25 }
  0xfc   :  { %v13316_v16 = vpop.permute.xlu0 %920 }
  0xfd   :  { %v13318_v30 = vpop.permute.xlu1 %922 }
  0xfe   :  { %1965 = vrot.lane.b32.xlu0 %v1946_v54, %s12594_s25  ;;  %v1944_v54 = vrot.slane %v1133_v2, 4  ;;  %v13352_v2 = vsel %vm1424_vm5, %v12980_v41, %v12988_v44 }
  0xff   :  { %1418 = vrot.lane.b32.xlu1 %v1367_v37, %s12587_s18  ;;  %v1201_v37 = vrot.slane %v13058_v53, %v12711_v31  ;;  %18311 = vst [vmem:[#allocation53_spill] sm:$0xff] %v13352_v2 }
 0x100   :  { %v13326_v11 = vpop.permute.xlu0 %924 }
 0x101   :  { %18306 = vst [vmem:[#allocation48_spill] sm:$0xff] %v13326_v11  ;;  %v13328_v59 = vpop.permute.xlu1 %926  ;;  %v1458_v11 = vmul.bf16 %v13352_v2, %v13128_v61 }
 0x102   :  { %18307 = vst [vmem:[#allocation49_spill] sm:$0xff] %v13328_v59  ;;  %1420 = vrot.lane.b32.xlu0 %v1371_v23, %s12587_s18  ;;  %v1205_v23 = vrot.slane %v13093_v21, %v12711_v31 }
 0x103   :  { %1876 = vrot.lane.b32.xlu1 %v13157_v47, %s12593_s24 }
 0x104   :  { %v13335_v8 = vpop.permute.xlu0 %758 }
 0x105   :  { %v13337_v38 = vpop.permute.xlu1 %760 }
 0x106   :  { %18308 = vst [vmem:[#allocation50_spill] sm:$0xff] %v13337_v38  ;;  %1961 = vrot.lane.b32.xlu0 %v1944_v54, %s12594_s25  ;;  %v13357_v54 = vsel %vm1262_vm6, %v12998_v51, %v13000_v52 }
 0x107   :  { %1252 = vrot.lane.b32.xlu1 %v1197_v18, %s12588_s19  ;;  %18312 = vst [vmem:[#allocation54_spill] sm:$0xff] %v13357_v54  ;;  %v1209_v18 = vrot.slane %v13096_v25, %v12711_v31  ;;  %v1296_v38 = vmul.bf16 %v13357_v54, %v13128_v61  ;;  %v2097_v54 = vrot.slane %v1458_v11, 4  ;;  %v1521_v11 = vrot.slane %v13055_v46, %v12722_v35 }
 0x108   :  { %v13345_v36 = vpop.permute.xlu0 %762  ;;  %v1533_v46 = vrot.slane %v13096_v25, %v12722_v35  ;;  %v13442_v25 = vsel %vm614_vm0, %v13021_v4, %v13035_v24 }
 0x109   :  { %18309 = vst [vmem:[#allocation51_spill] sm:$0xff] %v13345_v36  ;;  %v13347_v59 = vpop.permute.xlu1 %764  ;;  %18319 = vst [vmem:[#allocation61_spill] sm:$0xff] %v13442_v25 }
 0x10a   :  { %18310 = vst [vmem:[#allocation52_spill] sm:$0xff] %v13347_v59  ;;  %1254 = vrot.lane.b32.xlu0 %v1201_v37, %s12588_s19  ;;  %v13368_v59 = vsel %vm1424_vm5, %v12988_v44, %v12990_v45  ;;  %v13377_v37 = vsel %vm1262_vm6, %v13000_v52, %v13008_v55  ;;  %v1457_v52 = vmul.bf16 %v12980_v41, %v13157_v47 }
 0x10b   :  { %1256 = vrot.lane.b32.xlu1 %v1205_v23, %s12588_s19  ;;  %18314 = vst [vmem:[#allocation56_spill] sm:$0xff] %v13368_v59  ;;  %18315 = vst [vmem:[#allocation57_spill] sm:$0xff] %v13377_v37  ;;  %v1459_v44 = vmul.bf16 %v13368_v59, %v13136_v5  ;;  %v1297_v23 = vmul.bf16 %v13377_v37, %v13136_v5  ;;  %v1295_v59 = vmul.bf16 %v12998_v51, %v13157_v47 }
 0x10c   :  { %v13363_v36 = vpop.permute.xlu0 %1082 }
 0x10d   :  { %18313 = vst [vmem:[#allocation55_spill] sm:$0xff] %v13363_v36  ;;  %v13379_v31 = vpop.permute.xlu1 %1084 }
 0x10e   :  { %1258 = vrot.lane.b32.xlu0 %v1209_v18, %s12588_s19 }
 0x10f   :  { %2031 = vrot.lane.b32.xlu1 %v1296_v38, %s12588_s19  ;;  %v2098_v38 = vrot.slane %v1459_v44, 4  ;;  %v1525_v44 = vrot.slane %v13058_v53, %v12722_v35  ;;  %v13428_v53 = vsel %vm614_vm0, %v12932_v15, %v13021_v4  ;;  %v13447_v15 = vsel %vm18209_vm7, %v13047_v39, %v13050_v43 }
 0x110   :  { %v13387_v2 = vpop.permute.xlu0 %1086  ;;  %18317 = vst [vmem:[#allocation59_spill] sm:$0xff] %v13428_v53  ;;  %18320 = vst [vmem:[#allocation62_spill] sm:$0xff] %v13447_v15  ;;  %v13461_v4 = vsel %vm239_vm1, %v13010_v56, %v13018_v63 }
 0x111   :  { %v13389_v36 = vpop.permute.xlu1 %1088 }
 0x112   :  { %18316 = vst [vmem:[#allocation58_spill] sm:$0xff] %v13389_v36  ;;  %2033 = vrot.lane.b32.xlu0 %v1297_v23, %s12588_s19  ;;  %v2096_v23 = vrot.slane %v1457_v52, 4 }
 0x113   :  { %2115 = vrot.lane.b32.xlu1 %v2097_v54, %s12595_s26 }
 0x114   :  { %v13395_v18 = vpop.permute.xlu0 %1406 }
 0x115   :  { %v13399_v37 = vpop.permute.xlu1 %1408 }
 0x116   :  { %2117 = vrot.lane.b32.xlu0 %v2098_v38, %s12595_s26  ;;  %v1529_v38 = vrot.slane %v13093_v21, %v12722_v35  ;;  %v1619_v21 = vmul.bf16 %v13037_v26, %v13157_v47 }
 0x117   :  { %2029 = vrot.lane.b32.xlu1 %v1295_v59, %s12588_s19 }
 0x118   :  { %v13405_v54 = vpop.permute.xlu0 %1410 }
 0x119   :  { %v13407_v36 = vpop.permute.xlu1 %1412 }
 0x11a   :  { %2113 = vrot.lane.b32.xlu0 %v2096_v23, %s12595_s26 }
 0x11b   :  { %1576 = vrot.lane.b32.xlu1 %v1521_v11, %s12589_s20  ;;  %v13435_v11 = vsel %vm18209_vm7, %v13037_v26, %v13047_v39  ;;  %v18115_v26 = vmov 0  }
 0x11c   :  { %v13415_v51 = vpop.permute.xlu0 %1244  ;;  %18318 = vst [vmem:[#allocation60_spill] sm:$0xff] %v13435_v11  ;;  %v1620_v39 = vmul.bf16 %v13435_v11, %v13128_v61  ;;  %2580 = vmatprep.mubr.bf16.mxu0 %v18115_v26  ;;  %2621 = vmatprep.mubr.bf16.mxu1 %v18115_v26  ;;  %v13485_v11 = vsel %vm614_vm0, %v13075_v33, %v13077_v49 }
 0x11d   :  { %v13417_v59 = vpop.permute.xlu1 %1246  ;;  %12175 = vset.pattern.permute.xlu0 %v18115_v26  ;;  %12176 = vset.pattern.permute.xlu1 %v18115_v26  ;;  %18322 = vst [vmem:[#allocation64_spill] sm:$0xff] %v13485_v11 }
 0x11e   :  { %1578 = vrot.lane.b32.xlu0 %v1525_v44, %s12589_s20  ;;  %v13453_v44 = vsel %vm239_vm1, %v12895_v58, %v13010_v56  ;;  %v651_v58 = vmul.bf16 %v13442_v25, %v13461_v4  ;;  %v13476_v56 = vsel %vm614_vm0, %v13035_v24, %v13075_v33  ;;  %v13497_v25 = vsel %vm239_vm1, %v13060_v48, %v13063_v57 }
 0x11f   :  { %1580 = vrot.lane.b32.xlu1 %v1529_v38, %s12589_s20  ;;  %v650_v38 = vmul.bf16 %v13428_v53, %v13453_v44  ;;  %18321 = vst [vmem:[#allocation63_spill] sm:$0xff] %v13476_v56  ;;  %18323 = vst [vmem:[#allocation65_spill] sm:$0xff] %v13497_v25 }
 0x120   :  { %v13423_v52 = vpop.permute.xlu0 %1248  ;;  %v1657_v53 = vrot.slane %v651_v58, 4  ;;  %v13519_v58 = vsel %vm18201_vm3, %v12960_v32, %v13108_v34 }
 0x121   :  { %v13437_v23 = vpop.permute.xlu1 %1250  ;;  %v1656_v24 = vrot.slane %v650_v38, 4  ;;  %18325 = vst [vmem:[#allocation67_spill] sm:$0xff] %v13519_v58  ;;  %v812_v32 = vmul.bf16 %v13519_v58, %v13453_v44 }
 0x122   :  { %1582 = vrot.lane.b32.xlu0 %v1533_v46, %s12589_s20 }
 0x123   :  { %2181 = vrot.lane.b32.xlu1 %v1619_v21, %s12596_s27  ;;  %v1621_v21 = vmul.bf16 %v13447_v15, %v13136_v5  ;;  %v13491_v15 = vsel %vm239_vm1, %v13018_v63, %v13060_v48 }
 0x124   :  { %v13465_v46 = vpop.permute.xlu0 %1568  ;;  %v652_v26 = vmul.bf16 %v13476_v56, %v13491_v15 }
 0x125   :  { %v13478_v41 = vpop.permute.xlu1 %1570 }
 0x126   :  { %2183 = vrot.lane.b32.xlu0 %v1620_v39, %s12596_s27  ;;  %v653_v39 = vmul.bf16 %v13485_v11, %v13497_v25  ;;  %v1658_v63 = vrot.slane %v652_v26, 4  ;;  %v13531_v26 = vsel %vm18201_vm3, %v13108_v34, %v13115_v3 }
 0x127   :  { %2185 = vrot.lane.b32.xlu1 %v1621_v21, %s12596_s27  ;;  %v13514_v21 = vsel %vm938_vm2, %v12944_v22, %v13087_v50  ;;  %18327 = vst [vmem:[#allocation69_spill] sm:$0xff] %v13531_v26 }
 0x128   :  { %v13501_v33 = vpop.permute.xlu0 %229  ;;  %v1659_v48 = vrot.slane %v653_v39, 4  ;;  %18324 = vst [vmem:[#allocation66_spill] sm:$0xff] %v13514_v21  ;;  %v974_v22 = vmul.bf16 %v13514_v21, %v13453_v44  ;;  %v813_v39 = vmul.bf16 %v13531_v26, %v13461_v4  ;;  %v13554_v21 = vsel %vm938_vm2, %v13090_v28, %v13098_v60 }
 0x129   :  { %v13505_v35 = vpop.permute.xlu1 %231  ;;  %18328 = vst [vmem:[#allocation70_spill] sm:$0xff] %v13554_v21 }
 0x12a   :  { %1676 = vrot.lane.b32.xlu0 %v1656_v24, %s12590_s21 }
 0x12b   :  { %1678 = vrot.lane.b32.xlu1 %v1657_v53, %s12590_s21  ;;  %v13526_v53 = vsel %vm938_vm2, %v13087_v50, %v13090_v28  ;;  %v976_v28 = vmul.bf16 %v13554_v21, %v13491_v15 }
 0x12c   :  { %v13509_v38 = vpop.permute.xlu0 %604  ;;  %18326 = vst [vmem:[#allocation68_spill] sm:$0xff] %v13526_v53  ;;  %v975_v50 = vmul.bf16 %v13526_v53, %v13461_v4  ;;  %v13559_v53 = vsel %vm18201_vm3, %v13115_v3, %v13140_v19 }
 0x12d   :  { %v13521_v56 = vpop.permute.xlu1 %606  ;;  %18329 = vst [vmem:[#allocation71_spill] sm:$0xff] %v13559_v53  ;;  %v814_v3 = vmul.bf16 %v13559_v53, %v13491_v15  ;;  %v13594_v53 = vsel %vm18199_vm4, %v12978_v40, %v13148_v10 }
 0x12e   :  { %1680 = vrot.lane.b32.xlu0 %v1658_v63, %s12590_s21  ;;  %v1809_v63 = vrot.slane %v974_v22, 4  ;;  %v1810_v11 = vrot.slane %v975_v50, 4  ;;  %v13571_v22 = vsel %vm18201_vm3, %v13140_v19, %v13144_v12  ;;  %18333 = vst [vmem:[#allocation75_spill] sm:$0xff] %v13594_v53  ;;  %v1136_v40 = vmul.bf16 %v13594_v53, %v13453_v44 }
 0x12f   :  { %1682 = vrot.lane.b32.xlu1 %v1659_v48, %s12590_s21  ;;  %18331 = vst [vmem:[#allocation73_spill] sm:$0xff] %v13571_v22 }
 0x130   :  { %v13539_v24 = vpop.permute.xlu0 %1572 }
 0x131   :  { %v13545_v34 = vpop.permute.xlu1 %1574 }
 0x132   :  { %1744 = vrot.lane.b32.xlu0 %v812_v32, %s12591_s22  ;;  %v13566_v32 = vsel %vm938_vm2, %v13098_v60, %v13100_v0 }
 0x133   :  { %1746 = vrot.lane.b32.xlu1 %v813_v39, %s12591_s22  ;;  %18330 = vst [vmem:[#allocation72_spill] sm:$0xff] %v13566_v32  ;;  %v977_v60 = vmul.bf16 %v13566_v32, %v13497_v25  ;;  %v815_v39 = vmul.bf16 %v13571_v22, %v13497_v25  ;;  %v13600_v32 = vrot.slane %v12701_v27, %v12674_v13 }
 0x134   :  { %v13549_v48 = vpop.permute.xlu0 %233 }
 0x135   :  { %v13561_v26 = vpop.permute.xlu1 %235  ;;  %v1812_v21 = vrot.slane %v977_v60, 4  ;;  %18335 = vst [vmem:[#allocation77_spill] sm:$0xff] %v13600_v32 }
 0x136   :  { %1829 = vrot.lane.b32.xlu0 %v1809_v63, %s12592_s23 }
 0x137   :  { %1831 = vrot.lane.b32.xlu1 %v1810_v11, %s12592_s23  ;;  %v1811_v11 = vrot.slane %v976_v28, 4 }
 0x138   :  { %v13579_v50 = vpop.permute.xlu0 %608 }
 0x139   :  { %v13585_v19 = vpop.permute.xlu1 %610 }
 0x13a   :  { %1748 = vrot.lane.b32.xlu0 %v814_v3, %s12591_s22  ;;  %v13605_v3 = vsel %vm18199_vm4, %v13148_v10, %v13150_v1 }
 0x13b   :  { %1750 = vrot.lane.b32.xlu1 %v815_v39, %s12591_s22  ;;  %18336 = vst [vmem:[#allocation78_spill] sm:$0xff] %v13605_v3  ;;  %v1137_v60 = vmul.bf16 %v13605_v3, %v13461_v4  ;;  %v439_v39 = vmul.bf16 %v13600_v32, %v13128_v61  ;;  %v18337_v3 = vld [vmem:[#allocation4_spill] sm:$0xff]  ;;  %v18339_v32 = vld [vmem:[#allocation26_spill] sm:$0xff] }
 0x13c   :  { %v13589_v63 = vpop.permute.xlu0 %928  ;;  %v13628_v53 = vrot.slane %v18337_v3, %v12674_v13 }
 0x13d   :  { %18332 = vst [vmem:[#allocation74_spill] sm:$0xff] %v13589_v63  ;;  %v13596_v58 = vpop.permute.xlu1 %930  ;;  %v1948_v61 = vrot.slane %v1137_v60, 4 }
 0x13e   :  { %18334 = vst [vmem:[#allocation76_spill] sm:$0xff] %v13596_v58  ;;  %1833 = vrot.lane.b32.xlu0 %v1811_v11, %s12592_s23  ;;  %v1947_v11 = vrot.slane %v1136_v40, 4  ;;  %18338 = vst [vmem:[#allocation4_spill] sm:$0xff] %v13628_v53  ;;  %v13633_v58 = vsel %vm18199_vm4, %v13150_v1, %v18339_v32  ;;  %v438_v60 = vmul.bf16 %v13628_v53, %v13157_v47  ;;  %v18343_v53 = vld [vmem:[#allocation29_spill] sm:$0xff] }
 0x13f   :  { %1835 = vrot.lane.b32.xlu1 %v1812_v21, %s12592_s23  ;;  %18340 = vst [vmem:[#allocation26_spill] sm:$0xff] %v13633_v58  ;;  %v1138_v3 = vmul.bf16 %v13633_v58, %v13491_v15  ;;  %v13663_v58 = vsel %vm1424_vm5, %v12990_v45, %v18343_v53 }
 0x140   :  { %v1673_v28 = vpop.permute.xlu0 %1672  ;;  %18344 = vst [vmem:[#allocation29_spill] sm:$0xff] %v13663_v58  ;;  %v1460_v45 = vmul.bf16 %v13663_v58, %v13453_v44 }
 0x141   :  { %v13613_v27 = vpop.permute.xlu1 %1674 }
 0x142   :  { %1882 = vrot.lane.b32.xlu0 %v13453_v44, %s12593_s24  ;;  %v1706_v10 = vsel %vm1704_vm8, %v1673_v28, %v13613_v27 }
 0x143   :  { %1884 = vrot.lane.b32.xlu1 %v13461_v4, %s12593_s24  ;;  %v2239_v21 = vsel %vm2232_vm9, %v439_v39, %v1706_v10  ;;  %v13640_v39 = vsel %vm18199_vm4, %v18339_v32, %v13170_v42 }
 0x144   :  { %2548 = vmatprep.subr.bf16.mxu0 %v2239_v21  ;;  %v13624_v22 = vpop.permute.xlu0 %932  ;;  %18342 = vst [vmem:[#allocation80_spill] sm:$0xff] %v13640_v39  ;;  %v1139_v1 = vmul.bf16 %v13640_v39, %v13497_v25  ;;  %v18345_v39 = vld [vmem:[#allocation34_spill] sm:$0xff] }
 0x145   :  { %v13635_v63 = vpop.permute.xlu1 %934 }
 0x146   :  { %18341 = vst [vmem:[#allocation79_spill] sm:$0xff] %v13635_v63  ;;  %1967 = vrot.lane.b32.xlu0 %v1947_v11, %s12594_s25  ;;  %v1949_v11 = vrot.slane %v1138_v3, 4  ;;  %v1950_v47 = vrot.slane %v1139_v1, 4  ;;  %v18350_v3 = vld [vmem:[#allocation35_spill] sm:$0xff]  ;;  %v18355_v63 = vld [vmem:[#allocation32_spill] sm:$0xff] }
 0x147   :  { %1969 = vrot.lane.b32.xlu1 %v1948_v61, %s12594_s25  ;;  %v13680_v1 = vsel %vm1262_vm6, %v18345_v39, %v18350_v3 }
 0x148   :  { %v1671_v40 = vpop.permute.xlu0 %1670  ;;  %18351 = vst [vmem:[#allocation35_spill] sm:$0xff] %v13680_v1 }
 0x149   :  { %v13650_v10 = vpop.permute.xlu1 %766  ;;  %v1705_v21 = vsel %vm1704_vm8, %v1671_v40, %v1673_v28  ;;  %v13668_v28 = vsel %vm1262_vm6, %v13008_v55, %v18345_v39 }
 0x14a   :  { %1886 = vrot.lane.b32.xlu0 %v13491_v15, %s12593_s24  ;;  %v2235_v32 = vsel %vm2232_vm9, %v438_v60, %v1705_v21  ;;  %18346 = vst [vmem:[#allocation34_spill] sm:$0xff] %v13668_v28  ;;  %v18348_v60 = vld [vmem:[#allocation30_spill] sm:$0xff]  ;;  %v1298_v55 = vmul.bf16 %v13668_v28, %v13453_v44 }
 0x14b   :  { %1888 = vrot.lane.b32.xlu1 %v13497_v25, %s12593_s24  ;;  %2549 = vmatpush1.bf16.msra.mxu0 %v2235_v32  ;;  %v13675_v21 = vsel %vm1424_vm5, %v18343_v53, %v18348_v60  ;;  %v13703_v28 = vsel %vm1424_vm5, %v18348_v60, %v18355_v63 }
 0x14c   :  { %v13658_v61 = vpop.permute.xlu0 %768  ;;  %18349 = vst [vmem:[#allocation30_spill] sm:$0xff] %v13675_v21  ;;  %v1461_v53 = vmul.bf16 %v13675_v21, %v13461_v4  ;;  %18356 = vst [vmem:[#allocation32_spill] sm:$0xff] %v13703_v28  ;;  %v1462_v60 = vmul.bf16 %v13703_v28, %v13491_v15 }
 0x14d   :  { %v13670_v40 = vpop.permute.xlu1 %770 }
 0x14e   :  { %18347 = vst [vmem:[#allocation81_spill] sm:$0xff] %v13670_v40  ;;  %1971 = vrot.lane.b32.xlu0 %v1949_v11, %s12594_s25  ;;  %v1299_v40 = vmul.bf16 %v13680_v1, %v13461_v4  ;;  %v2099_v11 = vrot.slane %v1460_v45, 4  ;;  %v2100_v58 = vrot.slane %v1461_v53, 4 }
 0x14f   :  { %1973 = vrot.lane.b32.xlu1 %v1950_v47, %s12594_s25 }
 0x150   :  { %v13688_v32 = vpop.permute.xlu0 %772 }
 0x151   :  { %18352 = vst [vmem:[#allocation82_spill] sm:$0xff] %v13688_v32  ;;  %v13694_v39 = vpop.permute.xlu1 %1090  ;;  %v18357_v32 = vld [vmem:[#allocation38_spill] sm:$0xff] }
 0x152   :  { %18353 = vst [vmem:[#allocation83_spill] sm:$0xff] %v13694_v39  ;;  %2035 = vrot.lane.b32.xlu0 %v1298_v55, %s12588_s19  ;;  %v13708_v21 = vsel %vm1262_vm6, %v18350_v3, %v18357_v32  ;;  %v18359_v39 = vld [vmem:[#allocation33_spill] sm:$0xff] }
 0x153   :  { %2037 = vrot.lane.b32.xlu1 %v1299_v40, %s12588_s19  ;;  %18358 = vst [vmem:[#allocation38_spill] sm:$0xff] %v13708_v21  ;;  %v13713_v55 = vsel %vm1424_vm5, %v18355_v63, %v18359_v39  ;;  %v13718_v40 = vsel %vm1262_vm6, %v18357_v32, %v13242_v14  ;;  %v1300_v3 = vmul.bf16 %v13708_v21, %v13491_v15 }
 0x154   :  { %v13698_v47 = vpop.permute.xlu0 %1092  ;;  %18360 = vst [vmem:[#allocation33_spill] sm:$0xff] %v13713_v55  ;;  %18361 = vst [vmem:[#allocation85_spill] sm:$0xff] %v13718_v40  ;;  %v1463_v63 = vmul.bf16 %v13713_v55, %v13497_v25  ;;  %v1301_v53 = vmul.bf16 %v13718_v40, %v13497_v25  ;;  %v13739_v21 = vsel %vm18209_vm7, %v13050_v43, %v13250_v62 }
 0x155   :  { %18354 = vst [vmem:[#allocation84_spill] sm:$0xff] %v13698_v47  ;;  %v1741_v1 = vpop.permute.xlu1 %1740  ;;  %18362 = vst [vmem:[#allocation86_spill] sm:$0xff] %v13739_v21  ;;  %v1622_v43 = vmul.bf16 %v13739_v21, %v13453_v44  ;;  %v18374_v47 = vld [vmem:[#allocation47_spill] sm:$0xff] }
 0x156   :  { %2119 = vrot.lane.b32.xlu0 %v2099_v11, %s12595_s26  ;;  %v2102_v28 = vrot.slane %v1463_v63, 4 }
 0x157   :  { %2121 = vrot.lane.b32.xlu1 %v2100_v58, %s12595_s26  ;;  %v2101_v58 = vrot.slane %v1462_v60, 4  ;;  %v13750_v60 = vsel %vm18209_vm7, %v13250_v62, %v13252_v9  ;;  %v13764_v62 = vsel %vm614_vm0, %v13077_v49, %v13268_v29  ;;  %v18370_v49 = vld [vmem:[#allocation41_spill] sm:$0xff] }
 0x158   :  { %v13726_v45 = vpop.permute.xlu0 %1742  ;;  %18364 = vst [vmem:[#allocation88_spill] sm:$0xff] %v13750_v60  ;;  %18366 = vst [vmem:[#allocation90_spill] sm:$0xff] %v13764_v62 }
 0x159   :  { %v1826_v32 = vpop.permute.xlu1 %1825  ;;  %v1774_v55 = vsel %vm1772_vm10, %v1741_v1, %v13726_v45 }
 0x15a   :  { %2039 = vrot.lane.b32.xlu0 %v1300_v3, %s12588_s19 }
 0x15b   :  { %2041 = vrot.lane.b32.xlu1 %v1301_v53, %s12588_s19 }
 0x15c   :  { %v13734_v11 = vpop.permute.xlu0 %1827 }
 0x15d   :  { %v13743_v40 = vpop.permute.xlu1 %1094  ;;  %v1859_v3 = vsel %vm1857_vm11, %v1826_v32, %v13734_v11 }
 0x15e   :  { %18363 = vst [vmem:[#allocation87_spill] sm:$0xff] %v13743_v40  ;;  %2123 = vrot.lane.b32.xlu0 %v2101_v58, %s12595_s26  ;;  %v2303_v63 = vsel %vm2232_vm9, %v1774_v55, %v1859_v3  ;;  %v1623_v40 = vmul.bf16 %v13750_v60, %v13461_v4  ;;  %v13769_v55 = vsel %vm614_vm0, %v13268_v29, %v13272_v17  ;;  %v18371_v29 = vld [vmem:[#allocation42_spill] sm:$0xff] }
 0x15f   :  { %2125 = vrot.lane.b32.xlu1 %v2102_v28, %s12595_s26  ;;  %2550 = vmatprep.subr.bf16.mxu0 %v2303_v63  ;;  %18367 = vst [vmem:[#allocation91_spill] sm:$0xff] %v13769_v55  ;;  %v13774_v28 = vsel %vm18209_vm7, %v13252_v9, %v13278_v7  ;;  %v13779_v3 = vsel %vm18209_vm7, %v13278_v7, %v13280_v20 }
 0x160   :  { %v13757_v53 = vpop.permute.xlu0 %1096  ;;  %18368 = vst [vmem:[#allocation92_spill] sm:$0xff] %v13774_v28  ;;  %18369 = vst [vmem:[#allocation93_spill] sm:$0xff] %v13779_v3  ;;  %v13785_v63 = vsel %vm239_vm1, %v13063_v57, %v18370_v49  ;;  %v13790_v21 = vsel %vm239_vm1, %v18370_v49, %v18371_v29  ;;  %v1625_v57 = vmul.bf16 %v13779_v3, %v13497_v25  ;;  %v18376_v3 = vld [vmem:[#allocation44_spill] sm:$0xff] }
 0x161   :  { %18365 = vst [vmem:[#allocation89_spill] sm:$0xff] %v13757_v53  ;;  %v1739_v58 = vpop.permute.xlu1 %1738  ;;  %v654_v9 = vmul.bf16 %v13764_v62, %v13785_v63  ;;  %v655_v7 = vmul.bf16 %v13769_v55, %v13790_v21  ;;  %v13804_v49 = vsel %vm614_vm0, %v13272_v17, %v13307_v6  ;;  %v13813_v55 = vsel %vm614_vm0, %v13307_v6, %v18374_v47 }
 0x162   :  { %2187 = vrot.lane.b32.xlu0 %v1622_v43, %s12596_s27  ;;  %v1624_v43 = vmul.bf16 %v13774_v28, %v13491_v15  ;;  %18372 = vst [vmem:[#allocation41_spill] sm:$0xff] %v13804_v49  ;;  %18375 = vst [vmem:[#allocation47_spill] sm:$0xff] %v13813_v55  ;;  %v13820_v17 = vsel %vm239_vm1, %v18371_v29, %v18376_v3 }
 0x163   :  { %2189 = vrot.lane.b32.xlu1 %v1623_v40, %s12596_s27  ;;  %v1773_v40 = vsel %vm1772_vm10, %v1739_v58, %v1741_v1  ;;  %v1660_v1 = vrot.slane %v654_v9, 4  ;;  %v18377_v58 = vld [vmem:[#allocation46_spill] sm:$0xff]  ;;  %v656_v6 = vmul.bf16 %v13804_v49, %v13820_v17 }
 0x164   :  { %v1824_v60 = vpop.permute.xlu0 %1823 }
 0x165   :  { %v13807_v53 = vpop.permute.xlu1 %1414  ;;  %v1858_v62 = vsel %vm1857_vm11, %v1824_v60, %v1826_v32  ;;  %v13826_v32 = vsel %vm239_vm1, %v18376_v3, %v18377_v58  ;;  %v13841_v3 = vsel %vm938_vm2, %v13100_v0, %v13316_v16 }
 0x166   :  { %18373 = vst [vmem:[#allocation42_spill] sm:$0xff] %v13807_v53  ;;  %2191 = vrot.lane.b32.xlu0 %v1624_v43, %s12596_s27  ;;  %v2299_v28 = vsel %vm2232_vm9, %v1773_v40, %v1858_v62  ;;  %v1661_v62 = vrot.slane %v655_v7, 4  ;;  %v657_v43 = vmul.bf16 %v13813_v55, %v13826_v32  ;;  %18379 = vst [vmem:[#allocation46_spill] sm:$0xff] %v13841_v3  ;;  %v18390_v53 = vld [vmem:[#allocation49_spill] sm:$0xff] }
 0x167   :  { %2193 = vrot.lane.b32.xlu1 %v1625_v57, %s12596_s27  ;;  %2551 = vmatpush1.bf16.msra.mxu0 %v2299_v28  ;;  %v1662_v28 = vrot.slane %v656_v6, 4  ;;  %v13846_v7 = vsel %vm18201_vm3, %v13144_v12, %v13335_v8  ;;  %v18382_v6 = vld [vmem:[#allocation50_spill] sm:$0xff]  ;;  %v978_v12 = vmul.bf16 %v13841_v3, %v13785_v63 }
 0x168   :  { %v13830_v60 = vpop.permute.xlu0 %1416  ;;  %v1663_v57 = vrot.slane %v657_v43, 4  ;;  %18380 = vst [vmem:[#allocation94_spill] sm:$0xff] %v13846_v7  ;;  %v816_v0 = vmul.bf16 %v13846_v7, %v13785_v63 }
 0x169   :  { %18378 = vst [vmem:[#allocation44_spill] sm:$0xff] %v13830_v60  ;;  %v1879_v29 = vpop.permute.xlu1 %1878  ;;  %v1813_v3 = vrot.slane %v978_v12, 4 }
 0x16a   :  { %1684 = vrot.lane.b32.xlu0 %v1660_v1, %s12590_s21  ;;  %v13851_v1 = vsel %vm938_vm2, %v13316_v16, %v13318_v30 }
 0x16b   :  { %1686 = vrot.lane.b32.xlu1 %v1661_v62, %s12590_s21  ;;  %18381 = vst [vmem:[#allocation95_spill] sm:$0xff] %v13851_v1  ;;  %v13856_v62 = vsel %vm18201_vm3, %v13335_v8, %v18382_v6  ;;  %v979_v16 = vmul.bf16 %v13851_v1, %v13790_v21 }
 0x16c   :  { %v13836_v9 = vpop.permute.xlu0 %1880  ;;  %18383 = vst [vmem:[#allocation50_spill] sm:$0xff] %v13856_v62  ;;  %v817_v8 = vmul.bf16 %v13856_v62, %v13790_v21  ;;  %v18386_v62 = vld [vmem:[#allocation48_spill] sm:$0xff] }
 0x16d   :  { %v1964_v40 = vpop.permute.xlu1 %1963  ;;  %v1814_v7 = vrot.slane %v979_v16, 4  ;;  %v13884_v25 = vsel %vm938_vm2, %v13318_v30, %v18386_v62 }
 0x16e   :  { %1688 = vrot.lane.b32.xlu0 %v1662_v28, %s12590_s21  ;;  %v1912_v28 = vsel %vm1910_vm12, %v1879_v29, %v13836_v9  ;;  %18387 = vst [vmem:[#allocation48_spill] sm:$0xff] %v13884_v25  ;;  %v980_v30 = vmul.bf16 %v13884_v25, %v13820_v17 }
 0x16f   :  { %1690 = vrot.lane.b32.xlu1 %v1663_v57, %s12590_s21 }
 0x170   :  { %v13864_v43 = vpop.permute.xlu0 %1965  ;;  %v1815_v25 = vrot.slane %v980_v30, 4 }
 0x171   :  { %v13872_v49 = vpop.permute.xlu1 %1418  ;;  %v1997_v57 = vsel %vm1995_vm13, %v1964_v40, %v13864_v43 }
 0x172   :  { %18384 = vst [vmem:[#allocation96_spill] sm:$0xff] %v13872_v49  ;;  %1752 = vrot.lane.b32.xlu0 %v816_v0, %s12591_s22  ;;  %v2367_v55 = vsel %vm2232_vm9, %v1912_v28, %v1997_v57  ;;  %v18388_v49 = vld [vmem:[#allocation51_spill] sm:$0xff] }
 0x173   :  { %1754 = vrot.lane.b32.xlu1 %v817_v8, %s12591_s22  ;;  %2552 = vmatprep.subr.bf16.mxu0 %v2367_v55  ;;  %v13889_v60 = vsel %vm18201_vm3, %v18382_v6, %v18388_v49  ;;  %v13894_v8 = vsel %vm938_vm2, %v18386_v62, %v18390_v53  ;;  %v18392_v55 = vld [vmem:[#allocation52_spill] sm:$0xff] }
 0x174   :  { %v13879_v1 = vpop.permute.xlu0 %1420  ;;  %18389 = vst [vmem:[#allocation51_spill] sm:$0xff] %v13889_v60  ;;  %18391 = vst [vmem:[#allocation49_spill] sm:$0xff] %v13894_v8  ;;  %v13899_v12 = vsel %vm18201_vm3, %v18388_v49, %v18392_v55  ;;  %v818_v6 = vmul.bf16 %v13889_v60, %v13820_v17  ;;  %v981_v62 = vmul.bf16 %v13894_v8, %v13826_v32 }
 0x175   :  { %18385 = vst [vmem:[#allocation97_spill] sm:$0xff] %v13879_v1  ;;  %v1877_v0 = vpop.permute.xlu1 %1876  ;;  %18393 = vst [vmem:[#allocation52_spill] sm:$0xff] %v13899_v12  ;;  %v819_v28 = vmul.bf16 %v13899_v12, %v13826_v32  ;;  %v18394_v1 = vld [vmem:[#allocation55_spill] sm:$0xff] }
 0x176   :  { %1837 = vrot.lane.b32.xlu0 %v1813_v3, %s12592_s23  ;;  %v1911_v49 = vsel %vm1910_vm12, %v1877_v0, %v1879_v29  ;;  %v1816_v8 = vrot.slane %v981_v62, 4  ;;  %v13923_v12 = vsel %vm18199_vm4, %v13170_v42, %v18394_v1  ;;  %v18399_v62 = vld [vmem:[#allocation58_spill] sm:$0xff] }
 0x177   :  { %1839 = vrot.lane.b32.xlu1 %v1814_v7, %s12592_s23  ;;  %18395 = vst [vmem:[#allocation55_spill] sm:$0xff] %v13923_v12  ;;  %v1140_v0 = vmul.bf16 %v13923_v12, %v13785_v63  ;;  %v13976_v12 = vsel %vm1424_vm5, %v18359_v39, %v13395_v18  ;;  %v13995_v39 = vsel %vm1262_vm6, %v13415_v51, %v13417_v59 }
 0x178   :  { %v1962_v16 = vpop.permute.xlu0 %1961  ;;  %18401 = vst [vmem:[#allocation101_spill] sm:$0xff] %v13976_v12 }
 0x179   :  { %v13912_v57 = vpop.permute.xlu1 %1252  ;;  %v1996_v3 = vsel %vm1995_vm13, %v1962_v16, %v1964_v40  ;;  %v13930_v40 = vsel %vm18199_vm4, %v18394_v1, %v13379_v31  ;;  %v1951_v1 = vrot.slane %v1140_v0, 4 }
 0x17a   :  { %1756 = vrot.lane.b32.xlu0 %v818_v6, %s12591_s22  ;;  %v2363_v7 = vsel %vm2232_vm9, %v1911_v49, %v1996_v3  ;;  %18396 = vst [vmem:[#allocation98_spill] sm:$0xff] %v13930_v40  ;;  %v1141_v42 = vmul.bf16 %v13930_v40, %v13790_v21  ;;  %v13981_v40 = vsel %vm1262_vm6, %v13242_v14, %v13415_v51 }
 0x17b   :  { %1758 = vrot.lane.b32.xlu1 %v819_v28, %s12591_s22  ;;  %2553 = vmatpush1.bf16.msra.mxu0 %v2363_v7  ;;  %v13954_v28 = vsel %vm18199_vm4, %v13387_v2, %v18399_v62  ;;  %18402 = vst [vmem:[#allocation102_spill] sm:$0xff] %v13981_v40  ;;  %v1303_v51 = vmul.bf16 %v13995_v39, %v13790_v21 }
 0x17c   :  { %v13918_v60 = vpop.permute.xlu0 %1254  ;;  %18400 = vst [vmem:[#allocation58_spill] sm:$0xff] %v13954_v28  ;;  %v1143_v7 = vmul.bf16 %v13954_v28, %v13826_v32 }
 0x17d   :  { %v13925_v29 = vpop.permute.xlu1 %1256 }
 0x17e   :  { %1841 = vrot.lane.b32.xlu0 %v1815_v25, %s12592_s23  ;;  %v1952_v25 = vrot.slane %v1141_v42, 4 }
 0x17f   :  { %1843 = vrot.lane.b32.xlu1 %v1816_v8, %s12592_s23  ;;  %v13949_v8 = vsel %vm18199_vm4, %v13379_v31, %v13387_v2 }
 0x180   :  { %v13936_v30 = vpop.permute.xlu0 %1258  ;;  %18398 = vst [vmem:[#allocation100_spill] sm:$0xff] %v13949_v8  ;;  %v1142_v3 = vmul.bf16 %v13949_v8, %v13820_v17  ;;  %v1954_v8 = vrot.slane %v1143_v7, 4 }
 0x181   :  { %18397 = vst [vmem:[#allocation99_spill] sm:$0xff] %v13936_v30  ;;  %v2032_v6 = vpop.permute.xlu1 %2031 }
 0x182   :  { %1890 = vrot.lane.b32.xlu0 %v13785_v63, %s12593_s24 }
 0x183   :  { %1892 = vrot.lane.b32.xlu1 %v13790_v21, %s12593_s24 }
 0x184   :  { %v13944_v16 = vpop.permute.xlu0 %2033 }
 0x185   :  { %v2116_v49 = vpop.permute.xlu1 %2115  ;;  %v2064_v31 = vsel %vm1262_vm6, %v2032_v6, %v13944_v16 }
 0x186   :  { %1975 = vrot.lane.b32.xlu0 %v1951_v1, %s12594_s25 }
 0x187   :  { %1977 = vrot.lane.b32.xlu1 %v1952_v25, %s12594_s25  ;;  %v1953_v25 = vrot.slane %v1142_v3, 4  ;;  %v13990_v3 = vsel %vm1424_vm5, %v13395_v18, %v13399_v37 }
 0x188   :  { %v13962_v0 = vpop.permute.xlu0 %2117  ;;  %18403 = vst [vmem:[#allocation103_spill] sm:$0xff] %v13990_v3 }
 0x189   :  { %v2030_v42 = vpop.permute.xlu1 %2029  ;;  %v2149_v2 = vsel %vm2147_vm14, %v2116_v49, %v13962_v0 }
 0x18a   :  { %1894 = vrot.lane.b32.xlu0 %v13820_v17, %s12593_s24  ;;  %v2431_v1 = vsel %vm2232_vm9, %v2064_v31, %v2149_v2  ;;  %v2063_v30 = vsel %vm1262_vm6, %v2030_v42, %v2032_v6  ;;  %v1464_v6 = vmul.bf16 %v13976_v12, %v13785_v63 }
 0x18b   :  { %1896 = vrot.lane.b32.xlu1 %v13826_v32, %s12593_s24  ;;  %2554 = vmatprep.subr.bf16.mxu0 %v2431_v1  ;;  %v14025_v1 = vsel %vm1424_vm5, %v13399_v37, %v13405_v54 }
 0x18c   :  { %v2114_v28 = vpop.permute.xlu0 %2113  ;;  %18404 = vst [vmem:[#allocation104_spill] sm:$0xff] %v14025_v1  ;;  %v1466_v37 = vmul.bf16 %v14025_v1, %v13820_v17  ;;  %v18410_v1 = vld [vmem:[#allocation8_spill] sm:$0xff] }
 0x18d   :  { %v13984_v31 = vpop.permute.xlu1 %1576  ;;  %v2148_v2 = vsel %vm2147_vm14, %v2114_v28, %v2116_v49  ;;  %v1302_v28 = vmul.bf16 %v13981_v40, %v13785_v63  ;;  %v1465_v49 = vmul.bf16 %v13990_v3, %v13790_v21  ;;  %v14061_v12 = vrot.slane %v18410_v1, %v12674_v13 }
 0x18e   :  { %1979 = vrot.lane.b32.xlu0 %v1953_v25, %s12594_s25  ;;  %v2427_v14 = vsel %vm2232_vm9, %v2063_v30, %v2148_v2  ;;  %v2103_v30 = vrot.slane %v1464_v6, 4  ;;  %v14030_v25 = vsel %vm1262_vm6, %v13417_v59, %v13423_v52  ;;  %v14040_v6 = vsel %vm1262_vm6, %v13423_v52, %v13437_v23 }
 0x18f   :  { %1981 = vrot.lane.b32.xlu1 %v1954_v8, %s12594_s25  ;;  %2555 = vmatpush1.bf16.msra.mxu0 %v2427_v14  ;;  %v2104_v42 = vrot.slane %v1465_v49, 4  ;;  %18405 = vst [vmem:[#allocation105_spill] sm:$0xff] %v14030_v25  ;;  %v14035_v14 = vsel %vm1424_vm5, %v13405_v54, %v13407_v36  ;;  %18407 = vst [vmem:[#allocation107_spill] sm:$0xff] %v14040_v6  ;;  %v1304_v59 = vmul.bf16 %v14030_v25, %v13820_v17  ;;  %v18408_v54 = vld [vmem:[#allocation5_spill] sm:$0xff] }
 0x190   :  { %v14004_v18 = vpop.permute.xlu0 %1578  ;;  %18406 = vst [vmem:[#allocation106_spill] sm:$0xff] %v14035_v14  ;;  %v14050_v49 = vrot.slane %v18408_v54, %v12674_v13  ;;  %v1467_v52 = vmul.bf16 %v14035_v14, %v13826_v32  ;;  %v18411_v14 = vld [vmem:[#allocation9_spill] sm:$0xff] }
 0x191   :  { %v14010_v7 = vpop.permute.xlu1 %1580 }
 0x192   :  { %2043 = vrot.lane.b32.xlu0 %v1302_v28, %s12588_s19  ;;  %18409 = vst [vmem:[#allocation5_spill] sm:$0xff] %v14050_v49  ;;  %v440_v1 = vmul.bf16 %v14050_v49, %v13136_v5 }
 0x193   :  { %2045 = vrot.lane.b32.xlu1 %v1303_v51, %s12588_s19  ;;  %v1305_v51 = vmul.bf16 %v14040_v6, %v13826_v32  ;;  %v14071_v6 = vrot.slane %v18411_v14, %v12674_v13 }
 0x194   :  { %v14014_v8 = vpop.permute.xlu0 %1582 }
 0x195   :  { %v2182_v2 = vpop.permute.xlu1 %2181  ;;  %18412 = vst [vmem:[#allocation8_spill] sm:$0xff] %v14071_v6 }
 0x196   :  { %2127 = vrot.lane.b32.xlu0 %v2103_v30, %s12595_s26 }
 0x197   :  { %2129 = vrot.lane.b32.xlu1 %v2104_v42, %s12595_s26 }
 0x198   :  { %v2184_v28 = vpop.permute.xlu0 %2183 }
 0x199   :  { %v14056_v30 = vpop.permute.xlu1 %2185  ;;  %v2216_v42 = vsel %vm18186_vm15, %v2182_v2, %v2184_v28  ;;  %v2105_v2 = vrot.slane %v1466_v37, 4  ;;  %v14094_v37 = vsel %vm18209_vm7, %v13465_v46, %v13478_v41 }
 0x19a   :  { %2047 = vrot.lane.b32.xlu0 %v1304_v59, %s12588_s19  ;;  %v2217_v54 = vsel %vm18186_vm15, %v2184_v28, %v14056_v30  ;;  %v2501_v25 = vsel %vm2232_vm9, %v2216_v42, 0  ;;  %v18413_v59 = vld [vmem:[#allocation10_spill] sm:$0xff]  ;;  %vm2496_vm15 = vcmask 588800   ;;  %v14085_v42 = vsel %vm18209_vm7, %v13280_v20, %v13465_v46 }
 0x19b   :  { %2049 = vrot.lane.b32.xlu1 %v1305_v51, %s12588_s19  ;;  %11128 = vmatprep.subr.msk.bf16.mxu0 %vm2232_vm9, %v2217_v54  ;;  %v14077_v40 = vrot.slane %v18413_v59, %v12674_v13  ;;  %v14080_v28 = vld [vmem:[%s14020_s30] sm:$0xf]  ;;  %v2106_v51 = vrot.slane %v1467_v52, 4  ;;  %v14115_v59 = vsel %vm614_vm0, %v18374_v47, %v13509_v38  ;;  %v14133_v47 = vsel %vm18209_vm7, %v13539_v24, %v13545_v34 }
 0x19c   :  { %2557 = vmatpush1.bf16.msra.mxu0 %v2501_v25  ;;  %v1677_v3 = vpop.permute.xlu0 %1676  ;;  %v441_v25 = vmul.bf16 %v14061_v12, %v13453_v44  ;;  %v1626_v44 = vmul.bf16 %v14085_v42, %v13785_v63  ;;  %18417 = vst [vmem:[#allocation108_spill] sm:$0xff] %v14133_v47 }
 0x19d   :  { %18414 = vst [vmem:[#allocation9_spill] sm:$0xff] %v14077_v40  ;;  %v1679_v14 = vpop.permute.xlu1 %1678  ;;  %v1707_v5 = vsel %vm1704_vm8, %v13613_v27, %v1677_v3  ;;  %v443_v27 = vmul.bf16 %v14077_v40, %v13491_v15 }
 0x19e   :  { %2131 = vrot.lane.b32.xlu0 %v2105_v2, %s12595_s26  ;;  %v1708_v52 = vsel %vm1704_vm8, %v1677_v3, %v1679_v14  ;;  %v2243_v54 = vsel %vm2232_vm9, %v440_v1, %v1707_v5  ;;  %v442_v3 = vmul.bf16 %v14071_v6, %v13461_v4  ;;  %v18415_v2 = vmov 0  }
 0x19f   :  { %2133 = vrot.lane.b32.xlu1 %v2106_v51, %s12595_s26  ;;  %v2247_v20 = vsel %vm2232_vm9, %v441_v25, %v1708_v52  ;;  %11129 = vmatmul.mubr.msk.bf16.vlgmr.msra.gmra.mrb[0].mxu0 %vm2496_vm15, %v14080_v28  ;;  %v1627_v1 = vmul.bf16 %v14094_v37, %v13790_v21  ;;  %v14120_v51 = vsel %vm18209_vm7, %v13478_v41, %v13539_v24  ;;  %v12578_v52 = vld [vmem:[%s12654_s9 + $0x38] sm:$0xff]  ;;  %s12607_s9 = smov 6  }
 0x1a0   :  { %2589 = vmatprep.subr.bf16.mxu1 %v2247_v20  ;;  %v1681_v46 = vpop.permute.xlu0 %1680  ;;  %2662 = vmatprep.mubr.bf16.mxu0 %v18415_v2  ;;  %18416 = vst [vmem:[#allocation10_spill] sm:$0xff] %v14120_v51  ;;  %v14128_v4 = vsel %vm614_vm0, %v13509_v38, %v13521_v56  ;;  %v14145_v38 = vsel %vm239_vm1, %v18377_v58, %v13501_v33 }
 0x1a1   :  { %v14122_v25 = vpop.permute.xlu1 %1682  ;;  %2590 = vmatpush1.bf16.msra.mxu1 %v2243_v54  ;;  %v1709_v15 = vsel %vm1704_vm8, %v1679_v14, %v1681_v46  ;;  %v14140_v54 = vcombine.high %v12578_v52, %v12578_v52  ;;  %v14152_v14 = vsel %vm239_vm1, %v13501_v33, %v13505_v35  ;;  %v658_v20 = vmul.bf16 %v14115_v59, %v14145_v38 }
 0x1a2   :  { %v1710_v5 = vsel %vm1704_vm8, %v1681_v46, %v14122_v25  ;;  %2195 = vrot.lane.b32.xlu0 %v1626_v44, %s12596_s27  ;;  %v2251_v41 = vsel %vm2232_vm9, %v442_v3, %v1709_v15  ;;  %v1628_v44 = vmul.bf16 %v14120_v51, %v13820_v17  ;;  %v659_v58 = vmul.bf16 %v14128_v4, %v14152_v14 }
 0x1a3   :  { %2197 = vrot.lane.b32.xlu1 %v1627_v1, %s12596_s27  ;;  %v2255_v24 = vsel %vm2232_vm9, %v443_v27, %v1710_v5  ;;  %v1629_v3 = vmul.bf16 %v14133_v47, %v13826_v32  ;;  %v14165_v27 = vsel %vm614_vm0, %v13521_v56, %v13579_v50  ;;  %v14170_v1 = vsel %vm614_vm0, %v13579_v50, %v13585_v19 }
 0x1a4   :  { %2630 = vmatprep.subr.bf16.mxu0 %v2255_v24  ;;  %v1745_v46 = vpop.permute.xlu0 %1744  ;;  %18418 = vst [vmem:[#allocation109_spill] sm:$0xff] %v14165_v27  ;;  %18419 = vst [vmem:[#allocation110_spill] sm:$0xff] %v14170_v1  ;;  %v14176_v15 = vsel %vm239_vm1, %v13505_v35, %v13549_v48  ;;  %v559_v5 = vshrl.u32 %v14140_v54, 16  ;;  %v1664_v56 = vrot.slane %v658_v20, 4  ;;  %v1665_v24 = vrot.slane %v659_v58, 4 }
 0x1a5   :  { %v1747_v33 = vpop.permute.xlu1 %1746  ;;  %2631 = vmatpush1.bf16.msra.mxu0 %v2251_v41  ;;  %v14183_v41 = vsel %vm239_vm1, %v13549_v48, %v13561_v26  ;;  %v660_v50 = vmul.bf16 %v14165_v27, %v14176_v15  ;;  %v1775_v35 = vsel %vm1772_vm10, %v13726_v45, %v1745_v46 }
 0x1a6   :  { %2199 = vrot.lane.b32.xlu0 %v1628_v44, %s12596_s27  ;;  %v661_v44 = vmul.bf16 %v14170_v1, %v14183_v41  ;;  %v1776_v51 = vsel %vm1772_vm10, %v1745_v46, %v1747_v33  ;;  %v14199_v1 = vpack.i.b16 %v559_v5, %v559_v5 }
 0x1a7   :  { %2201 = vrot.lane.b32.xlu1 %v1629_v3, %s12596_s27  ;;  %v1666_v45 = vrot.slane %v660_v50, 4  ;;  %v18421_v50 = vld [vmem:[#allocation76_spill] sm:$0xff] }
 0x1a8   :  { %v1830_v52 = vpop.permute.xlu0 %1829  ;;  %v1667_v6 = vrot.slane %v661_v44, 4 }
 0x1a9   :  { %v1832_v3 = vpop.permute.xlu1 %1831  ;;  %v1860_v20 = vsel %vm1857_vm11, %v13734_v11, %v1830_v52  ;;  %v12579_v11 = vld [vmem:[%s12649_s5 + $0x38] sm:$0xff] }
 0x1aa   :  { %v1861_v48 = vsel %vm1857_vm11, %v1830_v52, %v1832_v3  ;;  %1692 = vrot.lane.b32.xlu0 %v1664_v56, %s12590_s21  ;;  %v2307_v27 = vsel %vm2232_vm9, %v1775_v35, %v1860_v20  ;;  %v11111_v46 = vcombine.high %v12579_v11, %v12579_v11  ;;  %v565_v56 = vrot.slane %v14199_v1, %v12674_v13  ;;  %v18420_v52 = vld [vmem:[#allocation74_spill] sm:$0xff] }
 0x1ab   :  { %1694 = vrot.lane.b32.xlu1 %v1665_v24, %s12590_s21  ;;  %v2311_v58 = vsel %vm2232_vm9, %v1776_v51, %v1861_v48  ;;  %v14211_v51 = vsel %vm938_vm2, %v18390_v53, %v18420_v52  ;;  %v14216_v24 = vsel %vm938_vm2, %v18420_v52, %v18421_v50  ;;  %v14230_v53 = vsel %vm18201_vm3, %v13650_v10, %v13658_v61 }
 0x1ac   :  { %2591 = vmatprep.subr.bf16.mxu1 %v2311_v58  ;;  %v1749_v47 = vpop.permute.xlu0 %1748  ;;  %v14253_v52 = vsel %vm938_vm2, %v18421_v50, %v13624_v22  ;;  %v18427_v50 = vld [vmem:[#allocation82_spill] sm:$0xff] }
 0x1ad   :  { %v14201_v40 = vpop.permute.xlu1 %1750  ;;  %2592 = vmatpush1.bf16.msra.mxu1 %v2307_v27  ;;  %v14221_v27 = vsel %vm18201_vm3, %v18392_v55, %v13650_v10  ;;  %v983_v10 = vmul.bf16 %v14216_v24, %v14152_v14  ;;  %18422 = vst [vmem:[#allocation74_spill] sm:$0xff] %v14253_v52 }
 0x1ae   :  { %1696 = vrot.lane.b32.xlu0 %v1666_v45, %s12590_s21  ;;  %v1778_v20 = vsel %vm1772_vm10, %v1749_v47, %v14201_v40  ;;  %v821_v45 = vmul.bf16 %v14230_v53, %v14152_v14 }
 0x1af   :  { %1698 = vrot.lane.b32.xlu1 %v1667_v6, %s12590_s21  ;;  %v1777_v6 = vsel %vm1772_vm10, %v1747_v33, %v1749_v47  ;;  %v820_v47 = vmul.bf16 %v14221_v27, %v14145_v38 }
 0x1b0   :  { %v1834_v5 = vpop.permute.xlu0 %1833 }
 0x1b1   :  { %v14224_v44 = vpop.permute.xlu1 %1835  ;;  %v1862_v35 = vsel %vm1857_vm11, %v1832_v3, %v1834_v5  ;;  %v982_v3 = vmul.bf16 %v14211_v51, %v14145_v38 }
 0x1b2   :  { %v1863_v48 = vsel %vm1857_vm11, %v1834_v5, %v14224_v44  ;;  %237 = vrot.lane.b32.xlu0 %v11111_v46, %s12583_s14  ;;  %v2315_v55 = vsel %vm2232_vm9, %v1777_v6, %v1862_v35  ;;  %v18423_v6 = vld [vmem:[#allocation79_spill] sm:$0xff] }
 0x1b3   :  { %612 = vrot.lane.b32.xlu1 %v565_v56, %s12585_s16  ;;  %v2319_v33 = vsel %vm2232_vm9, %v1778_v20, %v1863_v48  ;;  %v1817_v46 = vrot.slane %v982_v3, 4  ;;  %v1818_v56 = vrot.slane %v983_v10, 4  ;;  %v14258_v35 = vsel %vm938_vm2, %v13624_v22, %v18423_v6  ;;  %v18425_v20 = vld [vmem:[#allocation81_spill] sm:$0xff] }
 0x1b4   :  { %2632 = vmatprep.subr.bf16.mxu0 %v2319_v33  ;;  %v1883_v58 = vpop.permute.xlu0 %1882  ;;  %18424 = vst [vmem:[#allocation76_spill] sm:$0xff] %v14258_v35  ;;  %v14263_v48 = vsel %vm18201_vm3, %v13658_v61, %v18425_v20  ;;  %v14272_v10 = vsel %vm18201_vm3, %v18425_v20, %v18427_v50 }
 0x1b5   :  { %v1885_v11 = vpop.permute.xlu1 %1884  ;;  %2633 = vmatpush1.bf16.msra.mxu0 %v2315_v55  ;;  %18426 = vst [vmem:[#allocation79_spill] sm:$0xff] %v14263_v48  ;;  %v1913_v55 = vsel %vm1910_vm12, %v13836_v9, %v1883_v58  ;;  %18428 = vst [vmem:[#allocation81_spill] sm:$0xff] %v14272_v10 }
 0x1b6   :  { %1760 = vrot.lane.b32.xlu0 %v820_v47, %s12591_s22  ;;  %v1914_v22 = vsel %vm1910_vm12, %v1883_v58, %v1885_v11  ;;  %v985_v58 = vmul.bf16 %v14258_v35, %v14183_v41 }
 0x1b7   :  { %1762 = vrot.lane.b32.xlu1 %v821_v45, %s12591_s22  ;;  %v822_v45 = vmul.bf16 %v14263_v48, %v14176_v15  ;;  %v18432_v48 = vld [vmem:[#allocation87_spill] sm:$0xff] }
 0x1b8   :  { %v1968_v5 = vpop.permute.xlu0 %1967 }
 0x1b9   :  { %v1970_v33 = vpop.permute.xlu1 %1969  ;;  %v1998_v3 = vsel %vm1995_vm13, %v13864_v43, %v1968_v5  ;;  %v984_v43 = vmul.bf16 %v14253_v52, %v14176_v15 }
 0x1ba   :  { %v1999_v47 = vsel %vm1995_vm13, %v1968_v5, %v1970_v33  ;;  %1845 = vrot.lane.b32.xlu0 %v1817_v46, %s12592_s23  ;;  %v2371_v61 = vsel %vm2232_vm9, %v1913_v55, %v1998_v3  ;;  %v823_v46 = vmul.bf16 %v14272_v10, %v14183_v41 }
 0x1bb   :  { %1847 = vrot.lane.b32.xlu1 %v1818_v56, %s12592_s23  ;;  %v2375_v9 = vsel %vm2232_vm9, %v1914_v22, %v1999_v47  ;;  %v14294_v56 = vpack.i.b16 %v14140_v54, %v14140_v54  ;;  %v1819_v55 = vrot.slane %v984_v43, 4  ;;  %v1820_v22 = vrot.slane %v985_v58, 4 }
 0x1bc   :  { %2593 = vmatprep.subr.bf16.mxu1 %v2375_v9  ;;  %v1887_v20 = vpop.permute.xlu0 %1886 }
 0x1bd   :  { %v14288_v5 = vpop.permute.xlu1 %1888  ;;  %2594 = vmatpush1.bf16.msra.mxu1 %v2371_v61  ;;  %v1915_v47 = vsel %vm1910_vm12, %v1885_v11, %v1887_v20 }
 0x1be   :  { %1764 = vrot.lane.b32.xlu0 %v822_v45, %s12591_s22  ;;  %v1916_v61 = vsel %vm1910_vm12, %v1887_v20, %v14288_v5  ;;  %v18430_v20 = vld [vmem:[#allocation83_spill] sm:$0xff] }
 0x1bf   :  { %1766 = vrot.lane.b32.xlu1 %v823_v46, %s12591_s22  ;;  %v18429_v46 = vld [vmem:[#allocation2_spill] sm:$0xff] }
 0x1c0   :  { %v1972_v3 = vpop.permute.xlu0 %1971  ;;  %v889_v43 = vrot.slane %v14199_v1, %v18429_v46 }
 0x1c1   :  { %v14297_v9 = vpop.permute.xlu1 %1973  ;;  %v2000_v35 = vsel %vm1995_vm13, %v1970_v33, %v1972_v3  ;;  %v727_v33 = vrot.slane %v14294_v56, %v18429_v46 }
 0x1c2   :  { %v2001_v45 = vsel %vm1995_vm13, %v1972_v3, %v14297_v9  ;;  %1849 = vrot.lane.b32.xlu0 %v1819_v55, %s12592_s23  ;;  %v2379_v54 = vsel %vm2232_vm9, %v1915_v47, %v2000_v35  ;;  %v14315_v3 = vsel %vm18199_vm4, %v18399_v62, %v18430_v20  ;;  %v18431_v35 = vld [vmem:[#allocation84_spill] sm:$0xff] }
 0x1c3   :  { %1851 = vrot.lane.b32.xlu1 %v1820_v22, %s12592_s23  ;;  %v2383_v11 = vsel %vm2232_vm9, %v1916_v61, %v2001_v45  ;;  %v14320_v47 = vsel %vm18199_vm4, %v18430_v20, %v18431_v35  ;;  %v1144_v22 = vmul.bf16 %v14315_v3, %v14145_v38 }
 0x1c4   :  { %2634 = vmatprep.subr.bf16.mxu0 %v2383_v11  ;;  %v2036_v58 = vpop.permute.xlu0 %2035  ;;  %v1145_v45 = vmul.bf16 %v14320_v47, %v14152_v14 }
 0x1c5   :  { %v2038_v55 = vpop.permute.xlu1 %2037  ;;  %2635 = vmatpush1.bf16.msra.mxu0 %v2379_v54  ;;  %v2065_v62 = vsel %vm1262_vm6, %v13944_v16, %v2036_v58  ;;  %v1955_v10 = vrot.slane %v1144_v22, 4 }
 0x1c6   :  { %936 = vrot.lane.b32.xlu0 %v889_v43, %s12586_s17  ;;  %v2066_v20 = vsel %vm1262_vm6, %v2036_v58, %v2038_v55  ;;  %v1956_v52 = vrot.slane %v1145_v45, 4 }
 0x1c7   :  { %774 = vrot.lane.b32.xlu1 %v727_v33, %s12584_s15 }
 0x1c8   :  { %v2120_v61 = vpop.permute.xlu0 %2119 }
 0x1c9   :  { %v2122_v54 = vpop.permute.xlu1 %2121  ;;  %v2150_v11 = vsel %vm2147_vm14, %v13962_v0, %v2120_v61  ;;  %v14343_v0 = vsel %vm18199_vm4, %v18431_v35, %v18432_v48 }
 0x1ca   :  { %v2151_v43 = vsel %vm2147_vm14, %v2120_v61, %v2122_v54  ;;  %1898 = vrot.lane.b32.xlu0 %v14145_v38, %s12593_s24  ;;  %v2435_v33 = vsel %vm2232_vm9, %v2065_v62, %v2150_v11  ;;  %18433 = vst [vmem:[#allocation82_spill] sm:$0xff] %v14343_v0  ;;  %v18434_v61 = vld [vmem:[#allocation89_spill] sm:$0xff] }
 0x1cb   :  { %1900 = vrot.lane.b32.xlu1 %v14152_v14, %s12593_s24  ;;  %v2439_v46 = vsel %vm2232_vm9, %v2066_v20, %v2151_v43  ;;  %v14350_v62 = vsel %vm18199_vm4, %v18432_v48, %v18434_v61  ;;  %vm18438_vm4 = vcmask 506880  }
 0x1cc   :  { %2595 = vmatprep.subr.bf16.mxu1 %v2439_v46  ;;  %v2040_v16 = vpop.permute.xlu0 %2039  ;;  %18435 = vst [vmem:[#allocation83_spill] sm:$0xff] %v14350_v62  ;;  %v1146_v46 = vmul.bf16 %v14343_v0, %v14176_v15  ;;  %v1147_v35 = vmul.bf16 %v14350_v62, %v14183_v41  ;;  %v18436_v62 = vld [vmem:[#allocation42_spill] sm:$0xff]  ;;  %vm18440_vm3 = vmmov %vm18438_vm4 }
 0x1cd   :  { %v14345_v58 = vpop.permute.xlu1 %2041  ;;  %2596 = vmatpush1.bf16.msra.mxu1 %v2435_v33  ;;  %v2067_v45 = vsel %vm1262_vm6, %v2038_v55, %v2040_v16 }
 0x1ce   :  { %1983 = vrot.lane.b32.xlu0 %v1955_v10, %s12594_s25  ;;  %v2068_v48 = vsel %vm1262_vm6, %v2040_v16, %v14345_v58  ;;  %v1957_v43 = vrot.slane %v1146_v46, 4  ;;  %v14375_v16 = vsel %vm1424_vm5, %v13407_v36, %v18436_v62 }
 0x1cf   :  { %1985 = vrot.lane.b32.xlu1 %v1956_v52, %s12594_s25  ;;  %18437 = vst [vmem:[#allocation84_spill] sm:$0xff] %v14375_v16 }
 0x1d0   :  { %v2124_v22 = vpop.permute.xlu0 %2123 }
 0x1d1   :  { %v14359_v11 = vpop.permute.xlu1 %2125  ;;  %v2152_v20 = vsel %vm2147_vm14, %v2122_v54, %v2124_v22  ;;  %v1958_v54 = vrot.slane %v1147_v35, 4 }
 0x1d2   :  { %v2153_v10 = vsel %vm2147_vm14, %v2124_v22, %v14359_v11  ;;  %1902 = vrot.lane.b32.xlu0 %v14176_v15, %s12593_s24  ;;  %v2443_v52 = vsel %vm2232_vm9, %v2067_v45, %v2152_v20  ;;  %v14382_v45 = vsel %vm1262_vm6, %v13437_v23, %v13912_v57  ;;  %v18441_v20 = vld [vmem:[#allocation6_spill] sm:$0xff]  ;;  %v18442_v23 = vld [vmem:[#allocation15_spill] sm:$0xff] }
 0x1d3   :  { %1904 = vrot.lane.b32.xlu1 %v14183_v41, %s12593_s24  ;;  %v2447_v55 = vsel %vm2232_vm9, %v2068_v48, %v2153_v10  ;;  %18439 = vst [vmem:[#allocation87_spill] sm:$0xff] %v14382_v45  ;;  %v1051_v36 = vrot.slane %v14294_v56, %v18441_v20  ;;  %v14395_v10 = vrot.slane %v18442_v23, %v12674_v13 }
 0x1d4   :  { %2636 = vmatprep.subr.bf16.mxu0 %v2447_v55  ;;  %v2188_v33 = vpop.permute.xlu0 %2187 }
 0x1d5   :  { %v2190_v22 = vpop.permute.xlu1 %2189  ;;  %2637 = vmatpush1.bf16.msra.mxu0 %v2443_v52  ;;  %v2218_v0 = vsel %vm18438_vm4, %v14056_v30, %v2188_v33  ;;  %v1468_v30 = vmul.bf16 %v14375_v16, %v14145_v38  ;;  %v18443_v52 = vld [vmem:[#allocation11_spill] sm:$0xff]  ;;  %vm18447_vm4 = vmmov %vm18440_vm3 }
 0x1d6   :  { %1987 = vrot.lane.b32.xlu0 %v1957_v43, %s12594_s25  ;;  %v2219_v46 = vsel %vm18440_vm3, %v2188_v33, %v2190_v22  ;;  %v2507_v35 = vsel %vm2232_vm9, %v2218_v0, 0  ;;  %v14399_v55 = vrot.slane %v18443_v52, %v12674_v13  ;;  %v18444_v0 = vld [vmem:[#allocation44_spill] sm:$0xff]  ;;  %v1306_v33 = vmul.bf16 %v14382_v45, %v14145_v38  ;;  %v18448_v52 = vld [vmem:[#allocation17_spill] sm:$0xff] }
 0x1d7   :  { %1989 = vrot.lane.b32.xlu1 %v1958_v54, %s12594_s25  ;;  %11130 = vmatprep.subr.msk.bf16.mxu1 %vm2232_vm9, %v2219_v46  ;;  %v14404_v43 = vsel %vm1424_vm5, %v18436_v62, %v18444_v0  ;;  %v14411_v54 = vsel %vm1262_vm6, %v13912_v57, %v13918_v60  ;;  %v14424_v16 = vrot.slane %v18448_v52, %v12674_v13  ;;  %v18449_v57 = vld [vmem:[#allocation16_spill] sm:$0xff] }
 0x1d8   :  { %2598 = vmatpush1.bf16.msra.mxu1 %v2507_v35  ;;  %v2192_v48 = vpop.permute.xlu0 %2191  ;;  %18445 = vst [vmem:[#allocation89_spill] sm:$0xff] %v14404_v43  ;;  %18446 = vst [vmem:[#allocation42_spill] sm:$0xff] %v14411_v54  ;;  %v14428_v45 = vrot.slane %v18449_v57, %v12674_v13  ;;  %v18451_v52 = vld [vmem:[#allocation96_spill] sm:$0xff] }
 0x1d9   :  { %v14413_v46 = vpop.permute.xlu1 %2193  ;;  %v2220_v35 = vsel %vm18440_vm3, %v2190_v22, %v2192_v48  ;;  %v1469_v22 = vmul.bf16 %v14404_v43, %v14152_v14  ;;  %v14441_v57 = vsel %vm1424_vm5, %v18444_v0, %v18451_v52 }
 0x1da   :  { %1098 = vrot.lane.b32.xlu0 %v1051_v36, %s12582_s10  ;;  %v2221_v23 = vsel %vm18447_vm4, %v2192_v48, %v14413_v46  ;;  %v2513_v62 = vsel %vm2232_vm9, %v2220_v35, 0  ;;  %v1307_v36 = vmul.bf16 %v14411_v54, %v14152_v14  ;;  %18452 = vst [vmem:[#allocation15_spill] sm:$0xff] %v14441_v57  ;;  %v14451_v54 = vsel %vm1262_vm6, %v13918_v60, %v13925_v29  ;;  %vm18461_vm4 = vmmov %vm18440_vm3 }
 0x1db   :  { %2051 = vrot.lane.b32.xlu1 %v1306_v33, %s12588_s19  ;;  %11132 = vmatprep.subr.msk.bf16.mxu0 %vm2232_vm9, %v2221_v23  ;;  %v18450_v33 = vld [vmem:[#allocation65_spill] sm:$0xff]  ;;  %v2107_v23 = vrot.slane %v1468_v30, 4  ;;  %18453 = vst [vmem:[#allocation11_spill] sm:$0xff] %v14451_v54 }
 0x1dc   :  { %2639 = vmatpush1.bf16.msra.mxu0 %v2513_v62  ;;  %v1685_v48 = vpop.permute.xlu0 %1684  ;;  %11131 = vmatmul.mubr.msk.bf16.vlgmr.msra.gmra.mrb[0].mxu1 %vm2496_vm15, %v14080_v28  ;;  %v444_v35 = vmul.bf16 %v14399_v55, %v18450_v33  ;;  %v445_v62 = vmul.bf16 %v14395_v10, %v13785_v63  ;;  %v2108_v63 = vrot.slane %v1469_v22, 4  ;;  %v1470_v33 = vmul.bf16 %v14441_v57, %v14176_v15 }
 0x1dd   :  { %v1687_v49 = vpop.permute.xlu1 %1686  ;;  %v1711_v43 = vsel %vm1704_vm8, %v14122_v25, %v1685_v48  ;;  %2703 = vmatprep.mubr.bf16.mxu1 %v18415_v2  ;;  %v1308_v22 = vmul.bf16 %v14451_v54, %v14176_v15 }
 0x1de   :  { %v1712_v30 = vsel %vm1704_vm8, %v1685_v48, %v1687_v49  ;;  %2053 = vrot.lane.b32.xlu0 %v1307_v36, %s12588_s19  ;;  %v2259_v0 = vsel %vm2232_vm9, %v444_v35, %v1711_v43  ;;  %v447_v48 = vmul.bf16 %v14424_v16, %v13820_v17  ;;  %v446_v36 = vmul.bf16 %v14428_v45, %v13790_v21  ;;  %v18454_v43 = vld [vmem:[#allocation97_spill] sm:$0xff] }
 0x1df   :  { %2135 = vrot.lane.b32.xlu1 %v2107_v23, %s12595_s26  ;;  %v2263_v25 = vsel %vm2232_vm9, %v445_v62, %v1712_v30  ;;  %11133 = vmatmul.mubr.msk.bf16.vlgmr.msra.gmra.mrb[4].mxu0 %vm2496_vm15, %v14080_v28  ;;  %v14470_v35 = vsel %vm1424_vm5, %v18451_v52, %v18454_v43  ;;  %v18456_v23 = vld [vmem:[#allocation99_spill] sm:$0xff] }
 0x1e0   :  { %2671 = vmatprep.subr.bf16.mxu1 %v2263_v25  ;;  %v1689_v60 = vpop.permute.xlu0 %1688  ;;  %2744 = vmatprep.mubr.bf16.mxu0 %v18415_v2  ;;  %18455 = vst [vmem:[#allocation44_spill] sm:$0xff] %v14470_v35  ;;  %v14477_v62 = vsel %vm1262_vm6, %v13925_v29, %v18456_v23  ;;  %v1471_v29 = vmul.bf16 %v14470_v35, %v14183_v41 }
 0x1e1   :  { %18457 = vst [vmem:[#allocation17_spill] sm:$0xff] %v14477_v62  ;;  %v14479_v30 = vpop.permute.xlu1 %1690  ;;  %2672 = vmatpush1.bf16.msra.mxu1 %v2259_v0  ;;  %v1713_v21 = vsel %vm1704_vm8, %v1687_v49, %v1689_v60  ;;  %v1309_v57 = vmul.bf16 %v14477_v62, %v14183_v41  ;;  %v2109_v49 = vrot.slane %v1470_v33, 4  ;;  %v1213_v33 = vrot.slane %v14199_v1, %v18441_v20 }
 0x1e2   :  { %v1714_v17 = vsel %vm1704_vm8, %v1689_v60, %v14479_v30  ;;  %2137 = vrot.lane.b32.xlu0 %v2108_v63, %s12595_s26  ;;  %v2267_v52 = vsel %vm2232_vm9, %v446_v36, %v1713_v21  ;;  %v18458_v63 = vld [vmem:[#allocation7_spill] sm:$0xff]  ;;  %v2110_v36 = vrot.slane %v1471_v29, 4 }
 0x1e3   :  { %2055 = vrot.lane.b32.xlu1 %v1308_v22, %s12588_s19  ;;  %v2271_v25 = vsel %vm2232_vm9, %v447_v48, %v1714_v17  ;;  %v1375_v60 = vrot.slane %v14294_v56, %v18458_v63 }
 0x1e4   :  { %2712 = vmatprep.subr.bf16.mxu0 %v2271_v25  ;;  %v1753_v0 = vpop.permute.xlu0 %1752 }
 0x1e5   :  { %v1755_v54 = vpop.permute.xlu1 %1754  ;;  %2713 = vmatpush1.bf16.msra.mxu0 %v2267_v52  ;;  %v1779_v22 = vsel %vm1772_vm10, %v14201_v40, %v1753_v0 }
 0x1e6   :  { %2057 = vrot.lane.b32.xlu0 %v1309_v57, %s12588_s19  ;;  %v14505_v57 = vsel %vm18209_vm7, %v13545_v34, %v13984_v31  ;;  %v1780_v52 = vsel %vm1772_vm10, %v1753_v0, %v1755_v54  ;;  %v14518_v34 = vsel %vm18209_vm7, %v13984_v31, %v14004_v18 }
 0x1e7   :  { %2139 = vrot.lane.b32.xlu1 %v2109_v49, %s12595_s26  ;;  %v1630_v49 = vmul.bf16 %v14505_v57, %v14145_v38 }
 0x1e8   :  { %v1838_v48 = vpop.permute.xlu0 %1837 }
 0x1e9   :  { %v1840_v21 = vpop.permute.xlu1 %1839  ;;  %v1864_v17 = vsel %vm1857_vm11, %v14224_v44, %v1838_v48 }
 0x1ea   :  { %v1865_v25 = vsel %vm1857_vm11, %v1838_v48, %v1840_v21  ;;  %2141 = vrot.lane.b32.xlu0 %v2110_v36, %s12595_s26  ;;  %v2323_v40 = vsel %vm2232_vm9, %v1779_v22, %v1864_v17  ;;  %v14525_v36 = vsel %vm18209_vm7, %v14004_v18, %v14010_v7  ;;  %v14536_v22 = vsel %vm18209_vm7, %v14010_v7, %v14014_v8  ;;  %vm18463_vm7 = vmmov %vm18440_vm3 }
 0x1eb   :  { %1422 = vrot.lane.b32.xlu1 %v1375_v60, %s12587_s18  ;;  %v2327_v44 = vsel %vm2232_vm9, %v1780_v52, %v1865_v25  ;;  %18459 = vst [vmem:[#allocation16_spill] sm:$0xff] %v14525_v36  ;;  %v1631_v60 = vmul.bf16 %v14518_v34, %v14152_v14  ;;  %v1632_v31 = vmul.bf16 %v14525_v36, %v14176_v15  ;;  %18460 = vst [vmem:[#allocation65_spill] sm:$0xff] %v14536_v22  ;;  %s11063_s18 = sld [smem:[%s18054_s0 + %s12607_s9]]  }
 0x1ec   :  { %2673 = vmatprep.subr.bf16.mxu1 %v2327_v44  ;;  %v1757_v29 = vpop.permute.xlu0 %1756 }
 0x1ed   :  { %v14520_v0 = vpop.permute.xlu1 %1758  ;;  %2674 = vmatpush1.bf16.msra.mxu1 %v2323_v40  ;;  %v1781_v17 = vsel %vm1772_vm10, %v1755_v54, %v1757_v29  ;;  %v1537_v54 = vrot.slane %v14199_v1, %v18458_v63 }
 0x1ee   :  { %1260 = vrot.lane.b32.xlu0 %v1213_v33, %s12588_s19  ;;  %v1782_v52 = vsel %vm1772_vm10, %v1757_v29, %v14520_v0 }
 0x1ef   :  { %2203 = vrot.lane.b32.xlu1 %v1630_v49, %s12596_s27 }
 0x1f0   :  { %v1842_v48 = vpop.permute.xlu0 %1841 }
 0x1f1   :  { %v14539_v18 = vpop.permute.xlu1 %1843  ;;  %v1866_v33 = vsel %vm1857_vm11, %v1840_v21, %v1842_v48  ;;  %v1633_v21 = vmul.bf16 %v14536_v22, %v14183_v41 }
 0x1f2   :  { %v1867_v25 = vsel %vm1857_vm11, %v1842_v48, %v14539_v18  ;;  %2205 = vrot.lane.b32.xlu0 %v1631_v60, %s12596_s27  ;;  %v2331_v40 = vsel %vm2232_vm9, %v1781_v17, %v1866_v33 }
 0x1f3   :  { %2207 = vrot.lane.b32.xlu1 %v1632_v31, %s12596_s27  ;;  %v2335_v7 = vsel %vm2232_vm9, %v1782_v52, %v1867_v25 }
 0x1f4   :  { %2714 = vmatprep.subr.bf16.mxu0 %v2335_v7  ;;  %v1891_v44 = vpop.permute.xlu0 %1890 }
 0x1f5   :  { %v1893_v29 = vpop.permute.xlu1 %1892  ;;  %2715 = vmatpush1.bf16.msra.mxu0 %v2331_v40  ;;  %v1917_v60 = vsel %vm1910_vm12, %v14288_v5, %v1891_v44 }
 0x1f6   :  { %2209 = vrot.lane.b32.xlu0 %v1633_v21, %s12596_s27  ;;  %v1918_v1 = vsel %vm1910_vm12, %v1891_v44, %v1893_v29 }
 0x1f7   :  { %1584 = vrot.lane.b32.xlu1 %v1537_v54, %s12589_s20  ;;  %s12608_s20 = smov 5  }
 0x1f8   :  { %v1976_v49 = vpop.permute.xlu0 %1975  ;;  %s16690_s28 = sld [smem:[%s18054_s0 + %s12608_s20]]  }
 0x1f9   :  { %v1978_v48 = vpop.permute.xlu1 %1977  ;;  %v2002_v31 = vsel %vm1995_vm13, %v14297_v9, %v1976_v49 }
 0x1fa   :  { %v2003_v17 = vsel %vm1995_vm13, %v1976_v49, %v1978_v48  ;;  %v2387_v33 = vsel %vm2232_vm9, %v1917_v60, %v2002_v31 }
 0x1fb   :  { %v2391_v52 = vsel %vm2232_vm9, %v1918_v1, %v2003_v17 }
 0x1fc   :  { %2675 = vmatprep.subr.bf16.mxu1 %v2391_v52  ;;  %v1895_v25 = vpop.permute.xlu0 %1894 }
 0x1fd   :  { %v14564_v40 = vpop.permute.xlu1 %1896  ;;  %2676 = vmatpush1.bf16.msra.mxu1 %v2387_v33  ;;  %v1919_v5 = vsel %vm1910_vm12, %v1893_v29, %v1895_v25 }
 0x1fe   :  { %v1920_v21 = vsel %vm1910_vm12, %v1895_v25, %v14564_v40 }
 0x200   :  { %v1980_v7 = vpop.permute.xlu0 %1979 }
 0x201   :  { %v14567_v54 = vpop.permute.xlu1 %1981  ;;  %v2004_v9 = vsel %vm1995_vm13, %v1978_v48, %v1980_v7 }
 0x202   :  { %v2005_v44 = vsel %vm1995_vm13, %v1980_v7, %v14567_v54  ;;  %v2395_v49 = vsel %vm2232_vm9, %v1919_v5, %v2004_v9 }
 0x203   :  { %v2399_v60 = vsel %vm2232_vm9, %v1920_v21, %v2005_v44 }
 0x204   :  { %2716 = vmatprep.subr.bf16.mxu0 %v2399_v60  ;;  %v2044_v31 = vpop.permute.xlu0 %2043 }
 0x205   :  { %v2046_v1 = vpop.permute.xlu1 %2045  ;;  %2717 = vmatpush1.bf16.msra.mxu0 %v2395_v49  ;;  %v2069_v29 = vsel %vm1262_vm6, %v14345_v58, %v2044_v31 }
 0x206   :  { %v2070_v52 = vsel %vm1262_vm6, %v2044_v31, %v2046_v1 }
 0x208   :  { %v2128_v17 = vpop.permute.xlu0 %2127 }
 0x209   :  { %v2130_v33 = vpop.permute.xlu1 %2129  ;;  %v2154_v48 = vsel %vm2147_vm14, %v14359_v11, %v2128_v17 }
 0x20a   :  { %v2155_v25 = vsel %vm2147_vm14, %v2128_v17, %v2130_v33  ;;  %v2451_v7 = vsel %vm2232_vm9, %v2069_v29, %v2154_v48 }
 0x20b   :  { %v2455_v5 = vsel %vm2232_vm9, %v2070_v52, %v2155_v25 }
 0x20c   :  { %2677 = vmatprep.subr.bf16.mxu1 %v2455_v5  ;;  %v2048_v9 = vpop.permute.xlu0 %2047  ;;  %v18462_v5 = vld [vmem:[#allocation18_spill] sm:$0xff] }
 0x20d   :  { %v14584_v21 = vpop.permute.xlu1 %2049  ;;  %2678 = vmatpush1.bf16.msra.mxu1 %v2451_v7  ;;  %v2071_v58 = vsel %vm1262_vm6, %v2046_v1, %v2048_v9 }
 0x20e   :  { %v2072_v60 = vsel %vm1262_vm6, %v2048_v9, %v14584_v21  ;;  %v14603_v9 = vrot.slane %v18462_v5, %v12674_v13 }
 0x210   :  { %v2132_v44 = vpop.permute.xlu0 %2131 }
 0x211   :  { %v14587_v49 = vpop.permute.xlu1 %2133  ;;  %v2156_v11 = vsel %vm2147_vm14, %v2130_v33, %v2132_v44 }
 0x212   :  { %v2157_v31 = vsel %vm2147_vm14, %v2132_v44, %v14587_v49  ;;  %v2459_v17 = vsel %vm2232_vm9, %v2071_v58, %v2156_v11  ;;  %v18464_v11 = vld [vmem:[#allocation25_spill] sm:$0xff] }
 0x213   :  { %v2463_v29 = vsel %vm2232_vm9, %v2072_v60, %v2157_v31  ;;  %v14610_v60 = vrot.slane %v18464_v11, %v12674_v13 }
 0x214   :  { %2718 = vmatprep.subr.bf16.mxu0 %v2463_v29  ;;  %v2196_v48 = vpop.permute.xlu0 %2195  ;;  %v448_v29 = vmul.bf16 %v14603_v9, %v13826_v32 }
 0x215   :  { %v2198_v52 = vpop.permute.xlu1 %2197  ;;  %2719 = vmatpush1.bf16.msra.mxu0 %v2459_v17  ;;  %v2222_v1 = vsel %vm18440_vm3, %v14413_v46, %v2196_v48 }
 0x216   :  { %v2223_v25 = vsel %vm18461_vm4, %v2196_v48, %v2198_v52  ;;  %v2519_v33 = vsel %vm2232_vm9, %v2222_v1, 0  ;;  %v18465_v48 = vld [vmem:[#allocation27_spill] sm:$0xff]  ;;  %vm18477_vm4 = vcmask 277504  }
 0x217   :  { %11134 = vmatprep.subr.msk.bf16.mxu1 %vm2232_vm9, %v2223_v25 }
 0x218   :  { %2680 = vmatpush1.bf16.msra.mxu1 %v2519_v33  ;;  %v2200_v7 = vpop.permute.xlu0 %2199  ;;  %v449_v33 = vmul.bf16 %v14610_v60, %v14145_v38 }
 0x219   :  { %v14605_v44 = vpop.permute.xlu1 %2201  ;;  %v2224_v58 = vsel %vm18463_vm7, %v2198_v52, %v2200_v7  ;;  %v14622_v52 = vrot.slane %v18465_v48, %v12674_v13  ;;  %vm18474_vm7 = vcmask 15360  }
 0x21a   :  { %v2225_v46 = vsel %vm18440_vm3, %v2200_v7, %v14605_v44  ;;  %v2525_v31 = vsel %vm2232_vm9, %v2224_v58, 0  ;;  %v18467_v7 = vld [vmem:[#allocation28_spill] sm:$0xff] }
 0x21b   :  { %11136 = vmatprep.subr.msk.bf16.mxu0 %vm2232_vm9, %v2225_v46  ;;  %11135 = vmatmul.mubr.msk.bf16.vlgmr.msra.gmra.mrb[4].mxu1 %vm2496_vm15, %v14080_v28  ;;  %18466 = vst [vmem:[#allocation96_spill] sm:$0xff] %v14622_v52  ;;  %v14631_v5 = vrot.slane %v18467_v7, %v12674_v13 }
 0x21c   :  { %2721 = vmatpush1.bf16.msra.mxu0 %v2525_v31  ;;  %v1693_v17 = vpop.permute.xlu0 %1692  ;;  %2785 = vmatprep.mubr.bf16.mxu1 %v18415_v2 }
 0x21d   :  { %v1695_v1 = vpop.permute.xlu1 %1694  ;;  %v1715_v25 = vsel %vm1704_vm8, %v14479_v30, %v1693_v17  ;;  %18468 = vst [vmem:[#allocation97_spill] sm:$0xff] %v14631_v5  ;;  %v450_v30 = vmul.bf16 %v14622_v52, %v14152_v14  ;;  %v18551_v52 = vld [vmem:[#allocation93_spill] sm:$0xff] }
 0x21e   :  { %v1716_v58 = vsel %vm1704_vm8, %v1693_v17, %v1695_v1  ;;  %v2275_v32 = vsel %vm2232_vm9, %v448_v29, %v1715_v25  ;;  %v451_v17 = vmul.bf16 %v14631_v5, %v14176_v15 }
 0x21f   :  { %11137 = vmatmul.mubr.msk.bf16.vlgmr.msra.gmra.mrb[8].mxu0 %vm2496_vm15, %v14080_v28  ;;  %v2279_v11 = vsel %vm2232_vm9, %v449_v33, %v1716_v58 }
 0x220   :  { %2753 = vmatprep.subr.bf16.mxu1 %v2279_v11  ;;  %v1697_v46 = vpop.permute.xlu0 %1696  ;;  %2826 = vmatprep.mubr.bf16.mxu0 %v18415_v2 }
 0x221   :  { %v14641_v38 = vpop.permute.xlu1 %1698  ;;  %2754 = vmatpush1.bf16.msra.mxu1 %v2275_v32  ;;  %v1717_v31 = vsel %vm1704_vm8, %v1695_v1, %v1697_v46 }
 0x222   :  { %v1718_v28 = vsel %vm1704_vm8, %v1697_v46, %v14641_v38  ;;  %v2283_v29 = vsel %vm2232_vm9, %v450_v30, %v1717_v31 }
 0x223   :  { %v2287_v48 = vsel %vm2232_vm9, %v451_v17, %v1718_v28 }
 0x224   :  { %2794 = vmatprep.subr.bf16.mxu0 %v2287_v48  ;;  %v238_v25 = vpop.permute.xlu0 %237 }
 0x225   :  { %v14650_v14 = vpop.permute.xlu1 %612  ;;  %2795 = vmatpush1.bf16.msra.mxu0 %v2283_v29  ;;  %v14654_v33 = vsel %vm239_vm1, %v13561_v26, %v238_v25  ;;  %v14657_v1 = vsel %vm239_vm1, %v238_v25, 0 }
 0x226   :  { %18469 = vst [vmem:[#allocation99_spill] sm:$0xff] %v14650_v14  ;;  %v14662_v15 = vsel %vm614_vm0, %v13585_v19, %v14650_v14  ;;  %v663_v7 = vmul.bf16 %v14650_v14, %v14657_v1  ;;  %v18550_v14 = vld [vmem:[#allocation101_spill] sm:$0xff] }
 0x227   :  { %18470 = vst [vmem:[#allocation18_spill] sm:$0xff] %v14662_v15  ;;  %v662_v58 = vmul.bf16 %v14662_v15, %v14654_v33 }
 0x228   :  { %v1761_v32 = vpop.permute.xlu0 %1760  ;;  %v1669_v11 = vrot.slane %v663_v7, 4 }
 0x229   :  { %v1763_v46 = vpop.permute.xlu1 %1762  ;;  %v1668_v30 = vrot.slane %v662_v58, 4  ;;  %v1783_v31 = vsel %vm1772_vm10, %v14520_v0, %v1761_v32 }
 0x22a   :  { %1702 = vrot.lane.b32.xlu1 %v1669_v11, %s12590_s21  ;;  %v1784_v28 = vsel %vm1772_vm10, %v1761_v32, %v1763_v46 }
 0x22b   :  { %1700 = vrot.lane.b32.xlu0 %v1668_v30, %s12590_s21 }
 0x22c   :  { %v1846_v26 = vpop.permute.xlu0 %1845 }
 0x22d   :  { %v1848_v19 = vpop.permute.xlu1 %1847  ;;  %v1868_v17 = vsel %vm1857_vm11, %v14539_v18, %v1846_v26 }
 0x22e   :  { %v1869_v29 = vsel %vm1857_vm11, %v1846_v26, %v1848_v19  ;;  %v2339_v48 = vsel %vm2232_vm9, %v1783_v31, %v1868_v17 }
 0x22f   :  { %v2343_v25 = vsel %vm2232_vm9, %v1784_v28, %v1869_v29 }
 0x230   :  { %2755 = vmatprep.subr.bf16.mxu1 %v2343_v25  ;;  %v1765_v7 = vpop.permute.xlu0 %1764 }
 0x231   :  { %v14678_v58 = vpop.permute.xlu1 %1766  ;;  %2756 = vmatpush1.bf16.msra.mxu1 %v2339_v48  ;;  %v1785_v0 = vsel %vm1772_vm10, %v1763_v46, %v1765_v7 }
 0x232   :  { %v1786_v32 = vsel %vm1772_vm10, %v1765_v7, %v14678_v58 }
 0x234   :  { %v1850_v11 = vpop.permute.xlu0 %1849 }
 0x235   :  { %v14681_v30 = vpop.permute.xlu1 %1851  ;;  %v1870_v18 = vsel %vm1857_vm11, %v1848_v19, %v1850_v11 }
 0x236   :  { %v1871_v26 = vsel %vm1857_vm11, %v1850_v11, %v14681_v30  ;;  %v2347_v31 = vsel %vm2232_vm9, %v1785_v0, %v1870_v18 }
 0x237   :  { %v2351_v17 = vsel %vm2232_vm9, %v1786_v32, %v1871_v26 }
 0x238   :  { %2796 = vmatprep.subr.bf16.mxu0 %v2351_v17  ;;  %v14690_v28 = vpop.permute.xlu0 %936 }
 0x239   :  { %18471 = vst [vmem:[#allocation25_spill] sm:$0xff] %v14690_v28  ;;  %v14692_v29 = vpop.permute.xlu1 %774  ;;  %2797 = vmatpush1.bf16.msra.mxu0 %v2347_v31  ;;  %v14697_v46 = vsel %vm938_vm2, %v18423_v6, %v14690_v28  ;;  %v987_v25 = vmul.bf16 %v14690_v28, %v14657_v1 }
 0x23a   :  { %18472 = vst [vmem:[#allocation27_spill] sm:$0xff] %v14692_v29  ;;  %18473 = vst [vmem:[#allocation28_spill] sm:$0xff] %v14697_v46  ;;  %v14702_v19 = vsel %vm18474_vm7, %v18427_v50, %v14692_v29  ;;  %v825_v48 = vmul.bf16 %v14692_v29, %v14657_v1  ;;  %v986_v11 = vmul.bf16 %v14697_v46, %v14654_v33  ;;  %v18549_v29 = vld [vmem:[#allocation32_spill] sm:$0xff] }
 0x23b   :  { %18475 = vst [vmem:[#allocation111_spill] sm:$0xff] %v14702_v19  ;;  %v824_v7 = vmul.bf16 %v14702_v19, %v14654_v33  ;;  %v1822_v50 = vrot.slane %v987_v25, 4  ;;  %vm18484_vm7 = vmmov %vm18440_vm3  ;;  %v18548_v19 = vld [vmem:[#allocation103_spill] sm:$0xff] }
 0x23c   :  { %1770 = vrot.lane.b32.xlu1 %v825_v48, %s12591_s22  ;;  %v1899_v6 = vpop.permute.xlu0 %1898  ;;  %v1821_v18 = vrot.slane %v986_v11, 4 }
 0x23d   :  { %v1901_v0 = vpop.permute.xlu1 %1900  ;;  %1768 = vrot.lane.b32.xlu0 %v824_v7, %s12591_s22  ;;  %v1921_v26 = vsel %vm1910_vm12, %v14564_v40, %v1899_v6 }
 0x23e   :  { %v1922_v48 = vsel %vm1910_vm12, %v1899_v6, %v1901_v0 }
 0x240   :  { %1855 = vrot.lane.b32.xlu1 %v1822_v50, %s12592_s23  ;;  %v1984_v32 = vpop.permute.xlu0 %1983 }
 0x241   :  { %v1986_v31 = vpop.permute.xlu1 %1985  ;;  %1853 = vrot.lane.b32.xlu0 %v1821_v18, %s12592_s23  ;;  %v2006_v17 = vsel %vm1995_vm13, %v14567_v54, %v1984_v32 }
 0x242   :  { %v2007_v63 = vsel %vm1995_vm13, %v1984_v32, %v1986_v31  ;;  %v2403_v7 = vsel %vm2232_vm9, %v1921_v26, %v2006_v17 }
 0x243   :  { %v2407_v25 = vsel %vm2232_vm9, %v1922_v48, %v2007_v63 }
 0x244   :  { %1908 = vrot.lane.b32.xlu1 %v14657_v1, %s12593_s24  ;;  %2757 = vmatprep.subr.bf16.mxu1 %v2407_v25  ;;  %v1903_v11 = vpop.permute.xlu0 %1902 }
 0x245   :  { %v14726_v40 = vpop.permute.xlu1 %1904  ;;  %1906 = vrot.lane.b32.xlu0 %v14654_v33, %s12593_s24  ;;  %2758 = vmatpush1.bf16.msra.mxu1 %v2403_v7  ;;  %v1923_v6 = vsel %vm1910_vm12, %v1901_v0, %v1903_v11 }
 0x246   :  { %v1924_v63 = vsel %vm1910_vm12, %v1903_v11, %v14726_v40 }
 0x248   :  { %v1988_v54 = vpop.permute.xlu0 %1987 }
 0x249   :  { %v14731_v50 = vpop.permute.xlu1 %1989  ;;  %v2008_v18 = vsel %vm1995_vm13, %v1986_v31, %v1988_v54 }
 0x24a   :  { %v2009_v32 = vsel %vm1995_vm13, %v1988_v54, %v14731_v50  ;;  %v2411_v26 = vsel %vm2232_vm9, %v1923_v6, %v2008_v18 }
 0x24b   :  { %v2415_v17 = vsel %vm2232_vm9, %v1924_v63, %v2009_v32 }
 0x24c   :  { %2798 = vmatprep.subr.bf16.mxu0 %v2415_v17  ;;  %v14740_v48 = vpop.permute.xlu0 %1098 }
 0x24d   :  { %18476 = vst [vmem:[#allocation112_spill] sm:$0xff] %v14740_v48  ;;  %v2052_v7 = vpop.permute.xlu1 %2051  ;;  %2799 = vmatpush1.bf16.msra.mxu0 %v2411_v26  ;;  %v14745_v0 = vsel %vm18477_vm4, %v18434_v61, %v14740_v48  ;;  %v1149_v31 = vmul.bf16 %v14740_v48, %v14657_v1  ;;  %vm18486_vm4 = vmmov %vm18440_vm3 }
 0x24e   :  { %18478 = vst [vmem:[#allocation113_spill] sm:$0xff] %v14745_v0  ;;  %v1148_v25 = vmul.bf16 %v14745_v0, %v14654_v33  ;;  %v2073_v20 = vsel %vm1262_vm6, %v14584_v21, %v2052_v7 }
 0x24f   :  { %v1960_v11 = vrot.slane %v1149_v31, 4 }
 0x250   :  { %v1959_v54 = vrot.slane %v1148_v25, 4  ;;  %v2054_v6 = vpop.permute.xlu0 %2053 }
 0x251   :  { %v2136_v18 = vpop.permute.xlu1 %2135  ;;  %1993 = vrot.lane.b32.xlu1 %v1960_v11, %s12594_s25  ;;  %v2074_v61 = vsel %vm1262_vm6, %v2052_v7, %v2054_v6 }
 0x252   :  { %1991 = vrot.lane.b32.xlu0 %v1959_v54, %s12594_s25  ;;  %v2158_v63 = vsel %vm2147_vm14, %v14587_v49, %v2136_v18 }
 0x253   :  { %v2467_v25 = vsel %vm2232_vm9, %v2073_v20, %v2158_v63 }
 0x254   :  { %v2138_v32 = vpop.permute.xlu0 %2137 }
 0x255   :  { %v2056_v26 = vpop.permute.xlu1 %2055  ;;  %v2159_v17 = vsel %vm2147_vm14, %v2136_v18, %v2138_v32 }
 0x256   :  { %v2471_v31 = vsel %vm2232_vm9, %v2074_v61, %v2159_v17  ;;  %v2075_v7 = vsel %vm1262_vm6, %v2054_v6, %v2056_v26 }
 0x257   :  { %2759 = vmatprep.subr.bf16.mxu1 %v2471_v31 }
 0x258   :  { %2760 = vmatpush1.bf16.msra.mxu1 %v2467_v25  ;;  %v14761_v11 = vpop.permute.xlu0 %2057 }
 0x259   :  { %v2140_v54 = vpop.permute.xlu1 %2139  ;;  %v2076_v48 = vsel %vm1262_vm6, %v2056_v26, %v14761_v11 }
 0x25a   :  { %v2160_v49 = vsel %vm2147_vm14, %v2138_v32, %v2140_v54 }
 0x25b   :  { %v2475_v32 = vsel %vm2232_vm9, %v2075_v7, %v2160_v49 }
 0x25c   :  { %v14764_v0 = vpop.permute.xlu0 %2141 }
 0x25d   :  { %v14768_v18 = vpop.permute.xlu1 %1422  ;;  %v2161_v21 = vsel %vm2147_vm14, %v2140_v54, %v14764_v0 }
 0x25e   :  { %18479 = vst [vmem:[#allocation114_spill] sm:$0xff] %v14768_v18  ;;  %v2479_v20 = vsel %vm2232_vm9, %v2076_v48, %v2161_v21  ;;  %v14777_v63 = vsel %vm1424_vm5, %v18454_v43, %v14768_v18  ;;  %v1473_v17 = vmul.bf16 %v14768_v18, %v14657_v1  ;;  %vm18483_vm5 = vmmov %vm18440_vm3 }
 0x25f   :  { %18480 = vst [vmem:[#allocation115_spill] sm:$0xff] %v14777_v63  ;;  %2800 = vmatprep.subr.bf16.mxu0 %v2479_v20  ;;  %v1472_v43 = vmul.bf16 %v14777_v63, %v14654_v33 }
 0x260   :  { %2801 = vmatpush1.bf16.msra.mxu0 %v2475_v32  ;;  %v14780_v61 = vpop.permute.xlu0 %1260  ;;  %v2112_v49 = vrot.slane %v1473_v17, 4 }
 0x261   :  { %18481 = vst [vmem:[#allocation116_spill] sm:$0xff] %v14780_v61  ;;  %v2204_v31 = vpop.permute.xlu1 %2203  ;;  %v14787_v6 = vsel %vm1262_vm6, %v18456_v23, %v14780_v61  ;;  %v1311_v48 = vmul.bf16 %v14780_v61, %v14657_v1  ;;  %v2111_v7 = vrot.slane %v1472_v43, 4  ;;  %v18546_v61 = vld [vmem:[#allocation33_spill] sm:$0xff] }
 0x262   :  { %18482 = vst [vmem:[#allocation117_spill] sm:$0xff] %v14787_v6  ;;  %v1310_v26 = vmul.bf16 %v14787_v6, %v14654_v33  ;;  %v2226_v25 = vsel %vm18483_vm5, %v14605_v44, %v2204_v31  ;;  %vm18487_vm5 = vcmask 539648  }
 0x263   :  { %2061 = vrot.lane.b32.xlu1 %v1311_v48, %s12588_s19  ;;  %v2531_v20 = vsel %vm2232_vm9, %v2226_v25, 0 }
 0x264   :  { %2059 = vrot.lane.b32.xlu0 %v1310_v26, %s12588_s19  ;;  %v2206_v54 = vpop.permute.xlu0 %2205  ;;  %v14823_v26 = vld [vmem:[%s14020_s30] sm:$0xf] }
 0x265   :  { %v2208_v23 = vpop.permute.xlu1 %2207  ;;  %v2227_v21 = vsel %vm18440_vm3, %v2204_v31, %v2206_v54 }
 0x266   :  { %11138 = vmatprep.subr.msk.bf16.mxu1 %vm2232_vm9, %v2227_v21  ;;  %v2228_v44 = vsel %vm18484_vm7, %v2206_v54, %v2208_v23  ;;  %vm18492_vm7 = vmmov %vm18440_vm3 }
 0x267   :  { %2145 = vrot.lane.b32.xlu1 %v2112_v49, %s12595_s26  ;;  %2762 = vmatpush1.bf16.msra.mxu1 %v2531_v20  ;;  %v2537_v25 = vsel %vm2232_vm9, %v2228_v44, 0  ;;  %v18490_v20 = vld [vmem:[#allocation31_spill] sm:$0xff] }
 0x268   :  { %2143 = vrot.lane.b32.xlu0 %v2111_v7, %s12595_s26  ;;  %v14809_v32 = vpop.permute.xlu0 %2209  ;;  %v14843_v7 = vrot.slane %v14294_v56, %v12674_v13  ;;  %v14847_v44 = vrot.slane %v18490_v20, %v12674_v13 }
 0x269   :  { %v14811_v17 = vpop.permute.xlu1 %1584  ;;  %v2229_v31 = vsel %vm18486_vm4, %v2208_v23, %v14809_v32  ;;  %vm18565_vm4 = vmmov %vm18440_vm3 }
 0x26a   :  { %18485 = vst [vmem:[#allocation118_spill] sm:$0xff] %v14811_v17  ;;  %v14818_v48 = vsel %vm18487_vm5, %v14014_v8, %v14811_v17  ;;  %v1635_v43 = vmul.bf16 %v14811_v17, %v14657_v1  ;;  %11139 = vmatmul.mubr.msk.bf16.vlgmr.msra.gmra.mrb[8].mxu1 %vm2496_vm15, %v14823_v26  ;;  %11140 = vmatprep.subr.msk.bf16.mxu0 %vm2232_vm9, %v2229_v31  ;;  %v2490_v8 = vld [vmem:[%s11059_s3] sm:$0xff]  ;;  %18489 = vst [vmem:[#allocation120_spill] sm:$0xff] %v14843_v7  ;;  %s12613_s3 = smov 10  }
 0x26b   :  { %18488 = vst [vmem:[#allocation119_spill] sm:$0xff] %v14818_v48  ;;  %v1634_v54 = vmul.bf16 %v14818_v48, %v14654_v33  ;;  %2803 = vmatpush1.bf16.msra.mxu0 %v2537_v25  ;;  %2867 = vmatprep.mubr.bf16.mxu1 %v18415_v2  ;;  %18491 = vst [vmem:[#allocation31_spill] sm:$0xff] %v14847_v44  ;;  %v453_v25 = vmul.bf16 %v14843_v7, %v14654_v33 }
 0x26c   :  { %2213 = vrot.lane.b32.xlu1 %v1635_v43, %s12596_s27  ;;  %vm18566_vm5 = vmmov %vm18440_vm3 }
 0x26d   :  { %2211 = vrot.lane.b32.xlu0 %v1634_v54, %s12596_s27  ;;  %v452_v54 = vmul.bf16 %v14847_v44, %v14183_v41 }
 0x26e   :  { %11141 = vmatmul.mubr.msk.bf16.vlgmr.msra.gmra.mrb[12].mxu0 %vm2496_vm15, %v14823_v26 }
 0x26f   :  { %4062 = vmatprep.mubr.bf16.mxu0 %v18415_v2 }
 0x271   :  { %2493 = vperm.xlu0 %12175, %v2490_v8  }
 0x272   :  { %v14837_v1 = vpop.f32.mrb[0].mxu0 }
 0x273   :  { %v14839_v49 = vpop.f32.mrb[1].mxu0 }
 0x274   :  { %v2586_v23 = vpop.f32.mrb[2].mxu0 }
 0x275   :  { %v2587_v21 = vpop.f32.mrb[3].mxu0 }
 0x29c   :  { %v1703_v31 = vpop.permute.xlu1 %1702 }
 0x29d   :  { %v1701_v43 = vpop.permute.xlu0 %1700 }
 0x29e   :  { %v1719_v8 = vsel %vm1704_vm8, %v14641_v38, %v1701_v43  ;;  %v1720_v23 = vsel %vm1704_vm8, %v1701_v43, %v1703_v31 }
 0x29f   :  { %v2295_v56 = vsel %vm2232_vm9, %v453_v25, %v1720_v23  ;;  %v2291_v21 = vsel %vm2232_vm9, %v452_v54, %v1719_v8 }
 0x2a0   :  { %2835 = vmatprep.subr.bf16.mxu1 %v2295_v56 }
 0x2a1   :  { %2836 = vmatpush1.bf16.msra.mxu1 %v2291_v21 }
 0x2ae   :  { %v1771_v20 = vpop.permute.xlu1 %1770 }
 0x2af   :  { %v1769_v13 = vpop.permute.xlu0 %1768  ;;  %v2623_v48 = vpop.f32.mrb[0].mxu1 }
 0x2b0   :  { %v14858_v17 = vpop.f32.mrb[1].mxu1  ;;  %v1787_v38 = vsel %vm1772_vm10, %v14678_v58, %v1769_v13  ;;  %v1788_v31 = vsel %vm1772_vm10, %v1769_v13, %v1771_v20 }
 0x2b1   :  { %v2627_v33 = vpop.f32.mrb[2].mxu1 }
 0x2b2   :  { %v1856_v7 = vpop.permute.xlu1 %1855  ;;  %v2628_v63 = vpop.f32.mrb[3].mxu1 }
 0x2b3   :  { %v1854_v41 = vpop.permute.xlu0 %1853  ;;  %v2664_v44 = vpop.f32.mrb[4].mxu0 }
 0x2b4   :  { %v1872_v43 = vsel %vm1857_vm11, %v14681_v30, %v1854_v41  ;;  %v1873_v25 = vsel %vm1857_vm11, %v1854_v41, %v1856_v7  ;;  %v14866_v54 = vpop.f32.mrb[5].mxu0 }
 0x2b5   :  { %v2359_v8 = vsel %vm2232_vm9, %v1788_v31, %v1873_v25  ;;  %v2355_v23 = vsel %vm2232_vm9, %v1787_v38, %v1872_v43  ;;  %v2668_v56 = vpop.f32.mrb[6].mxu0 }
 0x2b6   :  { %2837 = vmatprep.subr.bf16.mxu1 %v2359_v8  ;;  %v2669_v63 = vpop.f32.mrb[7].mxu0  ;;  %v1909_v21 = vpop.permute.xlu1 %1908 }
 0x2b7   :  { %2838 = vmatpush1.bf16.msra.mxu1 %v2355_v23  ;;  %v1907_v33 = vpop.permute.xlu0 %1906 }
 0x2b8   :  { %v1925_v13 = vsel %vm1910_vm12, %v14726_v40, %v1907_v33  ;;  %v1926_v30 = vsel %vm1910_vm12, %v1907_v33, %v1909_v21 }
 0x2c3   :  { %v1994_v58 = vpop.permute.xlu1 %1993 }
 0x2c4   :  { %v1992_v18 = vpop.permute.xlu0 %1991 }
 0x2c5   :  { %v2010_v7 = vsel %vm1995_vm13, %v14731_v50, %v1992_v18  ;;  %v2011_v20 = vsel %vm1995_vm13, %v1992_v18, %v1994_v58 }
 0x2c6   :  { %v2423_v41 = vsel %vm2232_vm9, %v1926_v30, %v2011_v20  ;;  %v2419_v38 = vsel %vm2232_vm9, %v1925_v13, %v2010_v7 }
 0x2c7   :  { %2839 = vmatprep.subr.bf16.mxu1 %v2423_v41 }
 0x2c8   :  { %2840 = vmatpush1.bf16.msra.mxu1 %v2419_v38 }
 0x2d5   :  { %v2062_v31 = vpop.permute.xlu1 %2061 }
 0x2d6   :  { %v2060_v43 = vpop.permute.xlu0 %2059 }
 0x2d7   :  { %v2077_v40 = vsel %vm1262_vm6, %v14761_v11, %v2060_v43  ;;  %v2078_v23 = vsel %vm1262_vm6, %v2060_v43, %v2062_v31 }
 0x2d9   :  { %v2146_v25 = vpop.permute.xlu1 %2145 }
 0x2da   :  { %v2144_v8 = vpop.permute.xlu0 %2143 }
 0x2db   :  { %v2162_v50 = vsel %vm2147_vm14, %v14764_v0, %v2144_v8  ;;  %v2163_v18 = vsel %vm2147_vm14, %v2144_v8, %v2146_v25 }
 0x2dc   :  { %v2487_v56 = vsel %vm2232_vm9, %v2078_v23, %v2163_v18  ;;  %v2483_v63 = vsel %vm2232_vm9, %v2077_v40, %v2162_v50 }
 0x2dd   :  { %2841 = vmatprep.subr.bf16.mxu1 %v2487_v56 }
 0x2de   :  { %v2214_v21 = vpop.permute.xlu1 %2213  ;;  %2842 = vmatpush1.bf16.msra.mxu1 %v2483_v63 }
 0x2df   :  { %v2212_v33 = vpop.permute.xlu0 %2211 }
 0x2e0   :  { %v2230_v58 = vsel %vm18440_vm3, %v14809_v32, %v2212_v33  ;;  %v2231_v11 = vsel %vm18492_vm7, %v2212_v33, %v2214_v21  ;;  %vm18575_vm7 = vmmov %vm18440_vm3 }
 0x2e1   :  { %11142 = vmatprep.subr.msk.bf16.mxu1 %vm2232_vm9, %v2231_v11  ;;  %v2543_v13 = vsel %vm2232_vm9, %v2230_v58, 0 }
 0x2e2   :  { %2844 = vmatpush1.bf16.msra.mxu1 %v2543_v13 }
 0x2e5   :  { %11143 = vmatmul.mubr.msk.bf16.vlgmr.msra.gmra.mrb[12].mxu1 %vm2496_vm15, %v14823_v26 }
 0x2e6   :  { %4103 = vmatprep.mubr.bf16.mxu1 %v18415_v2 }
 0x2ee   :  { %v2705_v0 = vpop.f32.mrb[4].mxu1 }
 0x2ef   :  { %v2707_v30 = vpop.f32.mrb[5].mxu1 }
 0x2f0   :  { %v14894_v7 = vpop.permute.xlu0 %2493  ;;  %v2709_v20 = vpop.f32.mrb[6].mxu1 }
 0x2f1   :  { %v2624_v41 = vadd.f32 %v2623_v48, %v14894_v7  ;;  %v2583_v32 = vadd.f32 %v14837_v1, %v14894_v7  ;;  %v2665_v38 = vadd.f32 %v2664_v44, %v14894_v7  ;;  %v2585_v31 = vadd.f32 %v14839_v49, %v14894_v7  ;;  %v2710_v43 = vpop.f32.mrb[7].mxu1 }
 0x2f2   :  { %v2746_v25 = vpop.f32.mrb[8].mxu0  ;;  %v2706_v23 = vadd.f32 %v2705_v0, %v14894_v7  ;;  %v2626_v50 = vadd.f32 %v14858_v17, %v14894_v7  ;;  %v2667_v44 = vadd.f32 %v14866_v54, %v14894_v7  ;;  %v2708_v17 = vadd.f32 %v2707_v30, %v14894_v7 }
 0x2f3   :  { %v2748_v26 = vpop.f32.mrb[9].mxu0  ;;  %v2878_v8 = vmax.f32 %v2624_v41, 0.0  ;;  %v2876_v40 = vmax.f32 %v2583_v32, 0.0  ;;  %v2880_v63 = vmax.f32 %v2665_v38, 0.0  ;;  %v2877_v1 = vmax.f32 %v2585_v31, 0.0 }
 0x2f4   :  { %v2750_v18 = vpop.f32.mrb[10].mxu0  ;;  %v2747_v49 = vadd.f32 %v2746_v25, %v14894_v7  ;;  %v2882_v11 = vmax.f32 %v2706_v23, 0.0  ;;  %v2879_v13 = vmax.f32 %v2626_v50, 0.0  ;;  %v2881_v32 = vmax.f32 %v2667_v44, 0.0 }
 0x2f5   :  { %v2894_v48 = vpack.c.bf16 %v2878_v8, %v2878_v8  ;;  %v2892_v56 = vpack.c.bf16 %v2876_v40, %v2876_v40  ;;  %v2751_v21 = vpop.f32.mrb[11].mxu0  ;;  %v2896_v33 = vpack.c.bf16 %v2880_v63, %v2880_v63  ;;  %v2893_v58 = vpack.c.bf16 %v2877_v1, %v2877_v1 }
 0x2f6   :  { %v2884_v0 = vmax.f32 %v2747_v49, 0.0  ;;  %v2898_v20 = vpack.c.bf16 %v2882_v11, %v2882_v11  ;;  %v2895_v41 = vpack.c.bf16 %v2879_v13, %v2879_v13  ;;  %v2749_v54 = vadd.f32 %v2748_v26, %v14894_v7 }
 0x2f7   :  { %2928 = vrot.lane.b32.xlu0 %v2894_v48, %s12583_s14  ;;  %2924 = vrot.lane.b32.xlu1 %v2892_v56, %s12583_s14  ;;  %v2897_v31 = vpack.c.bf16 %v2881_v32, %v2881_v32  ;;  %v2883_v43 = vmax.f32 %v2708_v17, 0.0 }
 0x2f8   :  { %v2900_v38 = vpack.c.bf16 %v2884_v0, %v2884_v0  ;;  %v2885_v25 = vmax.f32 %v2749_v54, 0.0 }
 0x2f9   :  { %v2899_v8 = vpack.c.bf16 %v2883_v43, %v2883_v43  ;;  %v18493_v43 = vld [vmem:[#allocation40_spill] sm:$0xff] }
 0x2fa   :  { %v2901_v30 = vpack.c.bf16 %v2885_v25, %v2885_v25 }
 0x2fb   :  { %2932 = vrot.lane.b32.xlu0 %v2896_v33, %s12583_s14  ;;  %2926 = vrot.lane.b32.xlu1 %v2893_v58, %s12583_s14 }
 0x2ff   :  { %2936 = vrot.lane.b32.xlu0 %v2898_v20, %s12583_s14  ;;  %2930 = vrot.lane.b32.xlu1 %v2895_v41, %s12583_s14 }
 0x303   :  { %2940 = vrot.lane.b32.xlu0 %v2900_v38, %s12583_s14  ;;  %2934 = vrot.lane.b32.xlu1 %v2897_v31, %s12583_s14 }
 0x307   :  { %2938 = vrot.lane.b32.xlu1 %v2899_v8, %s12583_s14 }
 0x30b   :  { %2942 = vrot.lane.b32.xlu1 %v2901_v30, %s12583_s14  ;;  %v18494_v30 = vld [vmem:[#allocation57_spill] sm:$0xff] }
 0x33d   :  { %v2787_v40 = vpop.f32.mrb[8].mxu1 }
 0x33e   :  { %v2788_v23 = vadd.f32 %v2787_v40, %v14894_v7  ;;  %v2789_v50 = vpop.f32.mrb[9].mxu1 }
 0x33f   :  { %v2790_v18 = vadd.f32 %v2789_v50, %v14894_v7  ;;  %v2791_v26 = vpop.f32.mrb[10].mxu1 }
 0x340   :  { %v2886_v48 = vmax.f32 %v2788_v23, 0.0  ;;  %v2792_v56 = vpop.f32.mrb[11].mxu1  ;;  %v18495_v23 = vld [vmem:[#allocation12_spill] sm:$0xff] }
 0x341   :  { %v2887_v63 = vmax.f32 %v2790_v18, 0.0  ;;  %v2828_v1 = vpop.f32.mrb[12].mxu0  ;;  %v18496_v18 = vld [vmem:[#allocation13_spill] sm:$0xff] }
 0x342   :  { %v2902_v21 = vpack.c.bf16 %v2886_v48, %v2886_v48  ;;  %v2829_v49 = vadd.f32 %v2828_v1, %v14894_v7  ;;  %v14923_v44 = vpop.f32.mrb[13].mxu0  ;;  %v18497_v56 = vld [vmem:[#allocation37_spill] sm:$0xff]  ;;  %v18498_v1 = vld [vmem:[#allocation14_spill] sm:$0xff] }
 0x343   :  { %v2903_v33 = vpack.c.bf16 %v2887_v63, %v2887_v63  ;;  %v2832_v58 = vpop.f32.mrb[14].mxu0 }
 0x344   :  { %v2888_v11 = vmax.f32 %v2829_v49, 0.0  ;;  %2944 = vrot.lane.b32.xlu0 %v2902_v21, %s12583_s14  ;;  %v2833_v13 = vpop.f32.mrb[15].mxu0 }
 0x345   :  { %2946 = vrot.lane.b32.xlu1 %v2903_v33, %s12583_s14  ;;  %v18499_v33 = vld [vmem:[#allocation67_spill] sm:$0xff] }
 0x346   :  { %v2904_v17 = vpack.c.bf16 %v2888_v11, %v2888_v11  ;;  %v18500_v11 = vld [vmem:[#allocation19_spill] sm:$0xff] }
 0x348   :  { %2948 = vrot.lane.b32.xlu0 %v2904_v17, %s12583_s14 }
 0x369   :  { %v2925_v0 = vpop.permute.xlu1 %2924  ;;  %v2929_v41 = vpop.permute.xlu0 %2928 }
 0x36a   :  { %v14929_v20 = vsel %vm239_vm1, 0, %v2925_v0 }
 0x36b   :  { %3364 = vrot.lane.b32.xlu0 %v14929_v20, %s12593_s24  ;;  %v3025_v50 = vmul.bf16 %v14929_v20, %v18495_v23  ;;  %v3008_v26 = vmul.bf16 %v14929_v20, %v18496_v18  ;;  %v3042_v21 = vmul.bf16 %v14929_v20, %v18498_v1  ;;  %v3059_v13 = vmul.bf16 %v14929_v20, %v18500_v11  ;;  %v18504_v23 = vld [vmem:[#allocation24_spill] sm:$0xff]  ;;  %v18505_v18 = vld [vmem:[#allocation59_spill] sm:$0xff]  ;;  %v18508_v11 = vld [vmem:[#allocation66_spill] sm:$0xff] }
 0x36d   :  { %v2927_v32 = vpop.permute.xlu1 %2926  ;;  %v3144_v48 = vrot.slane %v3008_v26, 4  ;;  %v3295_v49 = vrot.slane %v3042_v21, 4  ;;  %v3431_v17 = vrot.slane %v3059_v13, 4  ;;  %v18507_v21 = vld [vmem:[#allocation39_spill] sm:$0xff] }
 0x36e   :  { %v14934_v38 = vsel %vm239_vm1, %v2925_v0, %v2927_v32  ;;  %v14937_v54 = vsel %vm239_vm1, %v2927_v32, %v2929_v41  ;;  %v18501_v0 = vld [vmem:[#allocation54_spill] sm:$0xff]  ;;  %v18502_v32 = vld [vmem:[#allocation23_spill] sm:$0xff] }
 0x36f   :  { %3368 = vrot.lane.b32.xlu1 %v14937_v54, %s12593_s24  ;;  %3366 = vrot.lane.b32.xlu0 %v14934_v38, %s12593_s24  ;;  %v3027_v25 = vmul.bf16 %v14937_v54, %v18493_v43  ;;  %v3078_v40 = vmul.bf16 %v14937_v54, %v18494_v30  ;;  %v3026_v63 = vmul.bf16 %v14934_v38, %v18497_v56  ;;  %v18503_v30 = vld [vmem:[#allocation34_spill] sm:$0xff] }
 0x370   :  { %v3009_v43 = vmul.bf16 %v14934_v38, %v18502_v32 }
 0x371   :  { %v14943_v31 = vpop.permute.xlu1 %2930 }
 0x372   :  { %v14949_v8 = vsel %vm239_vm1, %v2929_v41, %v14943_v31  ;;  %v3077_v41 = vmul.bf16 %v14934_v38, %v18501_v0 }
 0x373   :  { %3232 = vrot.lane.b32.xlu1 %v3027_v25, %s12591_s22  ;;  %3370 = vrot.lane.b32.xlu0 %v14949_v8, %s12593_s24  ;;  %v3028_v58 = vmul.bf16 %v14949_v8, %v18499_v33  ;;  %v3145_v25 = vrot.slane %v3009_v43, 4  ;;  %v3011_v26 = vmul.bf16 %v14949_v8, %v18505_v18  ;;  %v3045_v13 = vmul.bf16 %v14949_v8, %v18508_v11  ;;  %v18510_v43 = vld [vmem:[#allocation43_spill] sm:$0xff] }
 0x374   :  { %v18512_v18 = vld [vmem:[#allocation75_spill] sm:$0xff] }
 0x375   :  { %v3147_v56 = vrot.slane %v3011_v26, 4  ;;  %v3062_v26 = vmul.bf16 %v14949_v8, %v18512_v18 }
 0x377   :  { %3519 = vrot.lane.b32.xlu1 %v3078_v40, %s12588_s19  ;;  %3228 = vrot.lane.b32.xlu0 %v3025_v50, %s12591_s22  ;;  %v3079_v40 = vmul.bf16 %v14949_v8, %v18503_v30  ;;  %v3010_v50 = vmul.bf16 %v14937_v54, %v18504_v23  ;;  %v18511_v30 = vld [vmem:[#allocation56_spill] sm:$0xff] }
 0x37b   :  { %3161 = vrot.lane.b32.xlu1 %v3144_v48, %s12590_s21  ;;  %3230 = vrot.lane.b32.xlu0 %v3026_v63, %s12591_s22  ;;  %v3146_v48 = vrot.slane %v3010_v50, 4  ;;  %v18506_v63 = vld [vmem:[#allocation36_spill] sm:$0xff] }
 0x37c   :  { %v3043_v1 = vmul.bf16 %v14934_v38, %v18506_v63  ;;  %v3434_v63 = vrot.slane %v3062_v26, 4  ;;  %v18521_v26 = vld [vmem:[#allocation61_spill] sm:$0xff] }
 0x37e   :  { %v3296_v33 = vrot.slane %v3043_v1, 4 }
 0x37f   :  { %3312 = vrot.lane.b32.xlu1 %v3295_v49, %s12592_s23  ;;  %3234 = vrot.lane.b32.xlu0 %v3028_v58, %s12591_s22  ;;  %v3044_v49 = vmul.bf16 %v14937_v54, %v18507_v21  ;;  %v18514_v21 = vld [vmem:[#allocation53_spill] sm:$0xff] }
 0x381   :  { %v3297_v58 = vrot.slane %v3044_v49, 4  ;;  %v3094_v49 = vmul.bf16 %v14934_v38, %v18514_v21 }
 0x383   :  { %3448 = vrot.lane.b32.xlu1 %v3431_v17, %s12594_s25  ;;  %3517 = vrot.lane.b32.xlu0 %v3077_v41, %s12588_s19  ;;  %v18509_v17 = vld [vmem:[#allocation45_spill] sm:$0xff]  ;;  %v3298_v41 = vrot.slane %v3045_v13, 4 }
 0x384   :  { %v3061_v0 = vmul.bf16 %v14937_v54, %v18509_v17  ;;  %v18516_v13 = vld [vmem:[#allocation29_spill] sm:$0xff] }
 0x385   :  { %v3096_v17 = vmul.bf16 %v14949_v8, %v18516_v13  ;;  %v18524_v13 = vld [vmem:[#allocation62_spill] sm:$0xff] }
 0x386   :  { %v3433_v32 = vrot.slane %v3061_v0, 4  ;;  %v2933_v0 = vpop.permute.xlu0 %2932 }
 0x387   :  { %3163 = vrot.lane.b32.xlu1 %v3145_v25, %s12590_s21  ;;  %3521 = vrot.lane.b32.xlu0 %v3079_v40, %s12588_s19  ;;  %v3060_v25 = vmul.bf16 %v14934_v38, %v18510_v43  ;;  %v3095_v40 = vmul.bf16 %v14937_v54, %v18511_v30  ;;  %v18517_v43 = vld [vmem:[#allocation21_spill] sm:$0xff] }
 0x388   :  { %v18518_v30 = vld [vmem:[#allocation69_spill] sm:$0xff] }
 0x389   :  { %v3432_v23 = vrot.slane %v3060_v25, 4  ;;  %v3584_v50 = vrot.slane %v3095_v40, 4  ;;  %v3076_v25 = vmul.bf16 %v14929_v20, %v18517_v43  ;;  %v18525_v43 = vld [vmem:[#allocation30_spill] sm:$0xff] }
 0x38b   :  { %3165 = vrot.lane.b32.xlu0 %v3146_v48, %s12590_s21  ;;  %3167 = vrot.lane.b32.xlu1 %v3147_v56, %s12590_s21  ;;  %v18513_v48 = vld [vmem:[#allocation20_spill] sm:$0xff] }
 0x38c   :  { %v3093_v56 = vmul.bf16 %v14929_v20, %v18513_v48 }
 0x38e   :  { %v3582_v1 = vrot.slane %v3093_v56, 4  ;;  %v18522_v56 = vld [vmem:[#allocation68_spill] sm:$0xff] }
 0x38f   :  { %3314 = vrot.lane.b32.xlu0 %v3296_v33, %s12592_s23  ;;  %3316 = vrot.lane.b32.xlu1 %v3297_v58, %s12592_s23  ;;  %v3583_v33 = vrot.slane %v3094_v49, 4  ;;  %v18515_v58 = vld [vmem:[#allocation60_spill] sm:$0xff]  ;;  %v18523_v49 = vld [vmem:[#allocation78_spill] sm:$0xff] }
 0x390   :  { %v3111_v11 = vmul.bf16 %v14934_v38, %v18515_v58  ;;  %v2935_v58 = vpop.permute.xlu1 %2934 }
 0x393   :  { %3318 = vrot.lane.b32.xlu0 %v3298_v41, %s12592_s23  ;;  %3452 = vrot.lane.b32.xlu1 %v3433_v32, %s12594_s25  ;;  %v3585_v41 = vrot.slane %v3096_v17, 4  ;;  %v15024_v32 = vsel %vm239_vm1, %v14943_v31, %v2933_v0  ;;  %v18520_v31 = vld [vmem:[#allocation35_spill] sm:$0xff]  ;;  %v3112_v17 = vmul.bf16 %v14937_v54, %v18524_v13 }
 0x394   :  { %v3029_v40 = vmul.bf16 %v15024_v32, %v18518_v30  ;;  %v3080_v18 = vmul.bf16 %v15024_v32, %v18520_v31  ;;  %v3012_v48 = vmul.bf16 %v15024_v32, %v18521_v26  ;;  %v18527_v31 = vld [vmem:[#allocation64_spill] sm:$0xff]  ;;  %v15063_v26 = vsel %vm239_vm1, %v2933_v0, %v2935_v58  ;;  %v18529_v13 = vld [vmem:[#allocation63_spill] sm:$0xff] }
 0x397   :  { %3450 = vrot.lane.b32.xlu0 %v3432_v23, %s12594_s25  ;;  %3603 = vrot.lane.b32.xlu1 %v3584_v50, %s12595_s26  ;;  %v18519_v23 = vld [vmem:[#allocation22_spill] sm:$0xff] }
 0x398   :  { %v3110_v50 = vmul.bf16 %v14929_v20, %v18519_v23 }
 0x39b   :  { %3454 = vrot.lane.b32.xlu0 %v3434_v63, %s12594_s25  ;;  %3599 = vrot.lane.b32.xlu1 %v3582_v1, %s12595_s26  ;;  %v3046_v63 = vmul.bf16 %v15024_v32, %v18522_v56  ;;  %v3148_v1 = vrot.slane %v3012_v48, 4  ;;  %v2939_v48 = vpop.permute.xlu1 %2938 }
 0x39d   :  { %v3299_v21 = vrot.slane %v3046_v63, 4 }
 0x39f   :  { %3601 = vrot.lane.b32.xlu0 %v3583_v33, %s12595_s26  ;;  %3668 = vrot.lane.b32.xlu1 %v3111_v11, %s12596_s27  ;;  %v3063_v33 = vmul.bf16 %v15024_v32, %v18523_v49  ;;  %v2937_v11 = vpop.permute.xlu0 %2936 }
 0x3a0   :  { %v15054_v30 = vsel %vm239_vm1, %v2935_v58, %v2937_v11  ;;  %v15078_v0 = vsel %vm239_vm1, %v2937_v11, %v2939_v48 }
 0x3a1   :  { %v3099_v46 = vmul.bf16 %v15054_v30, %v18546_v61 }
 0x3a3   :  { %3605 = vrot.lane.b32.xlu0 %v3585_v41, %s12595_s26  ;;  %3372 = vrot.lane.b32.xlu1 %v15024_v32, %s12593_s24  ;;  %v3435_v41 = vrot.slane %v3063_v33, 4  ;;  %v15069_v63 = vpop.permute.xlu0 %2940 }
 0x3a4   :  { %v15082_v58 = vsel %vm239_vm1, %v2939_v48, %v15069_v63 }
 0x3a7   :  { %3515 = vrot.lane.b32.xlu0 %v3076_v25, %s12588_s19  ;;  %3236 = vrot.lane.b32.xlu1 %v3029_v40, %s12591_s22  ;;  %v3097_v25 = vmul.bf16 %v15024_v32, %v18525_v43  ;;  %v18526_v40 = vld [vmem:[#allocation88_spill] sm:$0xff] }
 0x3a8   :  { %v3114_v23 = vmul.bf16 %v15024_v32, %v18526_v40 }
 0x3ab   :  { %3666 = vrot.lane.b32.xlu0 %v3110_v50, %s12596_s27  ;;  %3523 = vrot.lane.b32.xlu1 %v3080_v18, %s12588_s19  ;;  %v3586_v50 = vrot.slane %v3097_v25, 4  ;;  %v3014_v18 = vmul.bf16 %v15054_v30, %v18527_v31  ;;  %v18530_v25 = vld [vmem:[#allocation73_spill] sm:$0xff] }
 0x3ac   :  { %v3031_v40 = vmul.bf16 %v15054_v30, %v18530_v25 }
 0x3ad   :  { %v3150_v33 = vrot.slane %v3014_v18, 4  ;;  %v18532_v18 = vld [vmem:[#allocation90_spill] sm:$0xff] }
 0x3ae   :  { %v3015_v11 = vmul.bf16 %v15078_v0, %v18532_v18  ;;  %v18538_v18 = vld [vmem:[#allocation70_spill] sm:$0xff] }
 0x3af   :  { %3169 = vrot.lane.b32.xlu0 %v3148_v1, %s12590_s21  ;;  %3320 = vrot.lane.b32.xlu1 %v3299_v21, %s12592_s23  ;;  %v18528_v21 = vld [vmem:[#allocation86_spill] sm:$0xff] }
 0x3b0   :  { %v3113_v49 = vmul.bf16 %v14949_v8, %v18528_v21  ;;  %v3151_v21 = vrot.slane %v3015_v11, 4  ;;  %v3047_v11 = vmul.bf16 %v15063_v26, %v18538_v18  ;;  %v18542_v18 = vld [vmem:[#allocation26_spill] sm:$0xff] }
 0x3b3   :  { %3670 = vrot.lane.b32.xlu0 %v3112_v17, %s12596_s27  ;;  %3456 = vrot.lane.b32.xlu1 %v3435_v41, %s12594_s25  ;;  %v3013_v17 = vmul.bf16 %v15063_v26, %v18529_v13  ;;  %v18534_v13 = vld [vmem:[#allocation71_spill] sm:$0xff] }
 0x3b7   :  { %3674 = vrot.lane.b32.xlu0 %v3114_v23, %s12596_s27  ;;  %3607 = vrot.lane.b32.xlu1 %v3586_v50, %s12595_s26  ;;  %v3149_v23 = vrot.slane %v3013_v17, 4  ;;  %v18531_v50 = vld [vmem:[#allocation91_spill] sm:$0xff]  ;;  %v3030_v17 = vmul.bf16 %v15063_v26, %v18534_v13 }
 0x3b8   :  { %v15067_v56 = vpop.f32.mrb[12].mxu1  ;;  %v3016_v31 = vmul.bf16 %v15082_v58, %v18531_v50  ;;  %v18537_v50 = vld [vmem:[#allocation95_spill] sm:$0xff] }
 0x3b9   :  { %v15071_v1 = vpop.f32.mrb[13].mxu1 }
 0x3ba   :  { %v2873_v41 = vpop.f32.mrb[14].mxu1  ;;  %v3152_v48 = vrot.slane %v3016_v31, 4  ;;  %v3050_v31 = vmul.bf16 %v15082_v58, %v18537_v50  ;;  %v18541_v50 = vld [vmem:[#allocation98_spill] sm:$0xff] }
 0x3bb   :  { %3672 = vrot.lane.b32.xlu1 %v3113_v49, %s12596_s27  ;;  %3173 = vrot.lane.b32.xlu0 %v3150_v33, %s12590_s21  ;;  %v2874_v43 = vpop.f32.mrb[15].mxu1  ;;  %v18533_v49 = vld [vmem:[#allocation50_spill] sm:$0xff]  ;;  %v18535_v41 = vld [vmem:[#allocation72_spill] sm:$0xff] }
 0x3bc   :  { %v3033_v33 = vmul.bf16 %v15082_v58, %v18533_v49  ;;  %v3048_v43 = vmul.bf16 %v15054_v30, %v18535_v41  ;;  %v18539_v49 = vld [vmem:[#allocation46_spill] sm:$0xff]  ;;  %v18540_v41 = vld [vmem:[#allocation80_spill] sm:$0xff] }
 0x3be   :  { %v3301_v25 = vrot.slane %v3048_v43, 4  ;;  %v3065_v43 = vmul.bf16 %v15054_v30, %v18540_v41 }
 0x3bf   :  { %3240 = vrot.lane.b32.xlu0 %v3031_v40, %s12591_s22  ;;  %3171 = vrot.lane.b32.xlu1 %v3149_v23, %s12590_s21  ;;  %v18536_v40 = vld [vmem:[#allocation94_spill] sm:$0xff] }
 0x3c0   :  { %v3032_v23 = vmul.bf16 %v15078_v0, %v18536_v40 }
 0x3c3   :  { %3177 = vrot.lane.b32.xlu0 %v3152_v48, %s12590_s21  ;;  %3175 = vrot.lane.b32.xlu1 %v3151_v21, %s12590_s21  ;;  %v3303_v48 = vrot.slane %v3050_v31, 4  ;;  %v3300_v21 = vrot.slane %v3047_v11, 4  ;;  %v3067_v31 = vmul.bf16 %v15082_v58, %v18541_v50  ;;  %v3064_v11 = vmul.bf16 %v15063_v26, %v18542_v18 }
 0x3c7   :  { %3244 = vrot.lane.b32.xlu0 %v3033_v33, %s12591_s22  ;;  %3238 = vrot.lane.b32.xlu1 %v3030_v17, %s12591_s22  ;;  %v3049_v33 = vmul.bf16 %v15078_v0, %v18539_v49  ;;  %v15116_v17 = vpop.permute.xlu0 %2944  ;;  %v3439_v49 = vrot.slane %v3067_v31, 4 }
 0x3c9   :  { %v3302_v13 = vrot.slane %v3049_v33, 4  ;;  %v3436_v33 = vrot.slane %v3064_v11, 4 }
 0x3cb   :  { %3324 = vrot.lane.b32.xlu0 %v3301_v25, %s12592_s23  ;;  %3242 = vrot.lane.b32.xlu1 %v3032_v23, %s12591_s22  ;;  %v2943_v25 = vpop.permute.xlu1 %2942  ;;  %v15127_v40 = vpop.permute.xlu0 %2948  ;;  %v3437_v23 = vrot.slane %v3065_v43, 4 }
 0x3cf   :  { %3328 = vrot.lane.b32.xlu0 %v3303_v48, %s12592_s23  ;;  %3322 = vrot.lane.b32.xlu1 %v3300_v21, %s12592_s23  ;;  %v2947_v48 = vpop.permute.xlu1 %2946 }
 0x3d3   :  { %3376 = vrot.lane.b32.xlu0 %v15054_v30, %s12593_s24  ;;  %3326 = vrot.lane.b32.xlu1 %v3302_v13, %s12592_s23  ;;  %v18543_v13 = vld [vmem:[#allocation55_spill] sm:$0xff] }
 0x3d4   :  { %v3066_v41 = vmul.bf16 %v15078_v0, %v18543_v13 }
 0x3d6   :  { %v3438_v6 = vrot.slane %v3066_v41, 4 }
 0x3d7   :  { %3380 = vrot.lane.b32.xlu0 %v15082_v58, %s12593_s24  ;;  %3374 = vrot.lane.b32.xlu1 %v15063_v26, %s12593_s24 }
 0x3db   :  { %3460 = vrot.lane.b32.xlu0 %v3437_v23, %s12594_s25  ;;  %3378 = vrot.lane.b32.xlu1 %v15078_v0, %s12593_s24  ;;  %v18544_v23 = vld [vmem:[#allocation85_spill] sm:$0xff] }
 0x3dc   :  { %v3082_v18 = vmul.bf16 %v15054_v30, %v18544_v23  ;;  %v3588_v23 = vrot.slane %v3099_v46, 4  ;;  %v3100_v46 = vmul.bf16 %v15078_v0, %v18550_v14  ;;  %v15190_v14 = vsel %vm239_vm1, %v15069_v63, %v2943_v25  ;;  %v18554_v63 = vld [vmem:[#allocation41_spill] sm:$0xff] }
 0x3dd   :  { %v15136_v21 = vpop.permute.xlu0 %3364 }
 0x3df   :  { %3464 = vrot.lane.b32.xlu0 %v3439_v49, %s12594_s25  ;;  %3458 = vrot.lane.b32.xlu1 %v3436_v33, %s12594_s25  ;;  %v3084_v49 = vmul.bf16 %v15082_v58, %v13995_v39  ;;  %v18545_v33 = vld [vmem:[#allocation38_spill] sm:$0xff]  ;;  %v3101_v39 = vmul.bf16 %v15082_v58, %v18548_v19 }
 0x3e0   :  { %v3081_v13 = vmul.bf16 %v15063_v26, %v18545_v33  ;;  %v3098_v33 = vmul.bf16 %v15063_v26, %v18549_v29  ;;  %v3116_v29 = vmul.bf16 %v15054_v30, %v18551_v52  ;;  %v3118_v52 = vmul.bf16 %v15082_v58, %v14094_v37 }
 0x3e1   :  { %v15142_v43 = vpop.permute.xlu0 %3366  ;;  %v15144_v50 = vpop.permute.xlu1 %3368  ;;  %v2870_v37 = vadd.f32 %v15067_v56, %v14894_v7  ;;  %v2831_v56 = vadd.f32 %v14923_v44, %v14894_v7 }
 0x3e2   :  { %v3587_v15 = vrot.slane %v3098_v33, 4  ;;  %v18552_v33 = vld [vmem:[#allocation92_spill] sm:$0xff] }
 0x3e3   :  { %3527 = vrot.lane.b32.xlu0 %v3082_v18, %s12588_s19  ;;  %3462 = vrot.lane.b32.xlu1 %v3438_v6, %s12594_s25  ;;  %v18547_v18 = vld [vmem:[#allocation102_spill] sm:$0xff] }
 0x3e4   :  { %v3083_v28 = vmul.bf16 %v15078_v0, %v18547_v18 }
 0x3e5   :  { %v15150_v31 = vpop.permute.xlu0 %3370  ;;  %v15152_v11 = vpop.permute.xlu1 %3232 }
 0x3e7   :  { %3531 = vrot.lane.b32.xlu0 %v3084_v49, %s12588_s19  ;;  %3525 = vrot.lane.b32.xlu1 %v3081_v13, %s12588_s19  ;;  %v3590_v13 = vrot.slane %v3101_v39, 4 }
 0x3e9   :  { %v15162_v41 = vpop.permute.xlu0 %3228  ;;  %v15164_v6 = vpop.permute.xlu1 %3519 }
 0x3eb   :  { %3611 = vrot.lane.b32.xlu0 %v3588_v23, %s12595_s26  ;;  %3529 = vrot.lane.b32.xlu1 %v3083_v28, %s12588_s19  ;;  %v3589_v23 = vrot.slane %v3100_v46, 4  ;;  %v15184_v28 = vsel %vm239_vm1, %v2943_v25, %v15116_v17  ;;  %v18553_v46 = vld [vmem:[#allocation47_spill] sm:$0xff]  ;;  %v3017_v25 = vmul.bf16 %v15190_v14, %v18554_v63  ;;  %v18555_v63 = vld [vmem:[#allocation77_spill] sm:$0xff] }
 0x3ec   :  { %v3018_v5 = vmul.bf16 %v15184_v28, %v18553_v46  ;;  %v3117_v46 = vmul.bf16 %v15078_v0, %v14085_v42  ;;  %v2993_v35 = vmul.bf16 %v14934_v38, %v18555_v63  ;;  %v2890_v42 = vmax.f32 %v2870_v37, 0.0 }
 0x3ed   :  { %v3231_v61 = vpop.permute.xlu0 %3230  ;;  %v3162_v49 = vpop.permute.xlu1 %3161 }
 0x3ee   :  { %v3154_v22 = vrot.slane %v3018_v5, 4 }
 0x3ef   :  { %3615 = vrot.lane.b32.xlu0 %v3590_v13, %s12595_s26  ;;  %3609 = vrot.lane.b32.xlu1 %v3587_v15, %s12595_s26  ;;  %v3115_v13 = vmul.bf16 %v15063_v26, %v18552_v33 }
 0x3f1   :  { %v15178_v18 = vpop.permute.xlu0 %3234  ;;  %v3313_v19 = vpop.permute.xlu1 %3312 }
 0x3f3   :  { %3678 = vrot.lane.b32.xlu0 %v3116_v29, %s12596_s27  ;;  %3613 = vrot.lane.b32.xlu1 %v3589_v23, %s12595_s26  ;;  %v15204_v29 = vsel %vm239_vm1, %v2947_v48, %v15127_v40 }
 0x3f4   :  { %v3020_v36 = vmul.bf16 %v15204_v29, %v14128_v4 }
 0x3f5   :  { %v15192_v15 = vpop.permute.xlu0 %3517  ;;  %v15194_v39 = vpop.permute.xlu1 %3448 }
 0x3f7   :  { %3682 = vrot.lane.b32.xlu0 %v3118_v52, %s12596_s27  ;;  %3676 = vrot.lane.b32.xlu1 %v3115_v13, %s12596_s27  ;;  %v15220_v52 = vsel %vm239_vm1, %v15116_v17, %v2947_v48  ;;  %v3153_v13 = vrot.slane %v3017_v25, 4  ;;  %v3156_v17 = vrot.slane %v3020_v36, 4  ;;  %v2889_v25 = vmax.f32 %v2831_v56, 0.0 }
 0x3f8   :  { %v3019_v48 = vmul.bf16 %v15220_v52, %v14115_v59  ;;  %v2906_v36 = vpack.c.bf16 %v2890_v42, %v2890_v42 }
 0x3f9   :  { %v15212_v23 = vpop.permute.xlu0 %3521  ;;  %v3164_v33 = vpop.permute.xlu1 %3163 }
 0x3fa   :  { %v3195_v5 = vsel %vm1704_vm8, %v3162_v49, %v3164_v33  ;;  %v3155_v63 = vrot.slane %v3019_v48, 4 }
 0x3fb   :  { %3680 = vrot.lane.b32.xlu1 %v3117_v46, %s12596_s27  ;;  %3181 = vrot.lane.b32.xlu0 %v3154_v22, %s12590_s21  ;;  %v18556_v46 = vld [vmem:[#allocation4_spill] sm:$0xff] }
 0x3fc   :  { %v2992_v44 = vmul.bf16 %v14929_v20, %v18556_v46  ;;  %v3263_v20 = vsel %vm1772_vm10, %v3231_v61, %v15152_v11  ;;  %v3037_v46 = vmul.bf16 %v15204_v29, %v14230_v53 }
 0x3fd   :  { %v15229_v62 = vpop.permute.xlu0 %3165  ;;  %v15231_v4 = vpop.permute.xlu1 %3167 }
 0x3fe   :  { %v3196_v22 = vsel %vm1704_vm8, %v3164_v33, %v15229_v62  ;;  %v3718_v49 = vsel %vm2232_vm9, %v2992_v44, %v3195_v5  ;;  %v3262_v33 = vsel %vm1772_vm10, %v15162_v41, %v3231_v61  ;;  %v2905_v5 = vpack.c.bf16 %v2889_v25, %v2889_v25  ;;  %v18557_v61 = vld [vmem:[#allocation52_spill] sm:$0xff]  ;;  %v18558_v44 = vld [vmem:[#allocation51_spill] sm:$0xff] }
 0x3ff   :  { %3179 = vrot.lane.b32.xlu1 %v3153_v13, %s12590_s21  ;;  %3185 = vrot.lane.b32.xlu0 %v3156_v17, %s12590_s21  ;;  %v3722_v38 = vsel %vm2232_vm9, %v2993_v35, %v3196_v22 }
 0x400   :  { %4030 = vmatprep.subr.bf16.mxu0 %v3722_v38  ;;  %v3034_v38 = vmul.bf16 %v15190_v14, %v18558_v44 }
 0x401   :  { %v3315_v37 = vpop.permute.xlu0 %3314  ;;  %4031 = vmatpush1.bf16.msra.mxu0 %v3718_v49  ;;  %v15243_v59 = vpop.permute.xlu1 %3316  ;;  %v18559_v49 = vld [vmem:[#allocation49_spill] sm:$0xff] }
 0x402   :  { %v3346_v13 = vsel %vm1857_vm11, %v3313_v19, %v3315_v37  ;;  %v3347_v35 = vsel %vm1857_vm11, %v3315_v37, %v15243_v59  ;;  %v3035_v19 = vmul.bf16 %v15184_v28, %v18557_v61  ;;  %v3052_v25 = vmul.bf16 %v15184_v28, %v18559_v49 }
 0x403   :  { %2952 = vrot.lane.b32.xlu0 %v2906_v36, %s12583_s14  ;;  %3183 = vrot.lane.b32.xlu1 %v3155_v63, %s12590_s21  ;;  %v3786_v56 = vsel %vm2232_vm9, %v3263_v20, %v3347_v35  ;;  %v3782_v42 = vsel %vm2232_vm9, %v3262_v33, %v3346_v13  ;;  %v3398_v36 = vsel %vm1910_vm12, %v15136_v21, %v15142_v43 }
 0x404   :  { %4032 = vmatprep.subr.bf16.mxu0 %v3786_v56  ;;  %v3399_v37 = vsel %vm1910_vm12, %v15142_v43, %v15144_v50  ;;  %v3305_v43 = vrot.slane %v3052_v25, 4  ;;  %v3054_v35 = vmul.bf16 %v15204_v29, %v14216_v24  ;;  %v18560_v56 = vld [vmem:[#allocation48_spill] sm:$0xff] }
 0x405   :  { %v15256_v17 = vpop.permute.xlu0 %3318  ;;  %4033 = vmatpush1.bf16.msra.mxu0 %v3782_v42  ;;  %v15258_v41 = vpop.permute.xlu1 %3452  ;;  %v3051_v42 = vmul.bf16 %v15190_v14, %v18560_v56  ;;  %v3071_v56 = vmul.bf16 %v15204_v29, %v14320_v47 }
 0x407   :  { %3248 = vrot.lane.b32.xlu0 %v3035_v19, %s12591_s22  ;;  %2950 = vrot.lane.b32.xlu1 %v2905_v5, %s12583_s14  ;;  %v3307_v19 = vrot.slane %v3054_v35, 4  ;;  %v3443_v47 = vrot.slane %v3071_v56, 4 }
 0x409   :  { %v3451_v48 = vpop.permute.xlu0 %3450  ;;  %v15264_v22 = vpop.permute.xlu1 %3603 }
 0x40a   :  { %v3482_v63 = vsel %vm1995_vm13, %v15194_v39, %v3451_v48  ;;  %v3483_v53 = vsel %vm1995_vm13, %v3451_v48, %v15258_v41  ;;  %v3036_v39 = vmul.bf16 %v15220_v52, %v14221_v27  ;;  %v3304_v48 = vrot.slane %v3051_v42, 4 }
 0x40b   :  { %3252 = vrot.lane.b32.xlu0 %v3037_v46, %s12591_s22  ;;  %3246 = vrot.lane.b32.xlu1 %v3034_v38, %s12591_s22  ;;  %v3850_v33 = vsel %vm2232_vm9, %v3399_v37, %v3483_v53  ;;  %v3846_v20 = vsel %vm2232_vm9, %v3398_v36, %v3482_v63  ;;  %v3053_v46 = vmul.bf16 %v15220_v52, %v14211_v51  ;;  %v18561_v37 = vld [vmem:[#allocation58_spill] sm:$0xff] }
 0x40c   :  { %4034 = vmatprep.subr.bf16.mxu0 %v3850_v33  ;;  %v3550_v27 = vsel %vm1262_vm6, %v15192_v15, %v15164_v6  ;;  %v3069_v63 = vmul.bf16 %v15184_v28, %v18561_v37 }
 0x40d   :  { %v15286_v21 = vpop.permute.xlu0 %3454  ;;  %4035 = vmatpush1.bf16.msra.mxu0 %v3846_v20  ;;  %v3600_v13 = vpop.permute.xlu1 %3599  ;;  %v3306_v25 = vrot.slane %v3053_v46, 4 }
 0x40e   :  { %v3441_v35 = vrot.slane %v3069_v63, 4 }
 0x40f   :  { %3332 = vrot.lane.b32.xlu0 %v3305_v43, %s12592_s23  ;;  %3250 = vrot.lane.b32.xlu1 %v3036_v39, %s12591_s22 }
 0x411   :  { %v3602_v5 = vpop.permute.xlu0 %3601  ;;  %v3669_v61 = vpop.permute.xlu1 %3668 }
 0x412   :  { %v3634_v24 = vsel %vm2147_vm14, %v3602_v5, %v15264_v22  ;;  %v3633_v53 = vsel %vm2147_vm14, %v3600_v13, %v3602_v5  ;;  %v18562_v13 = vld [vmem:[#allocation100_spill] sm:$0xff]  ;;  %v3197_v5 = vsel %vm1704_vm8, %v15229_v62, %v15231_v4 }
 0x413   :  { %3336 = vrot.lane.b32.xlu0 %v3307_v19, %s12592_s23  ;;  %3330 = vrot.lane.b32.xlu1 %v3304_v48, %s12592_s23  ;;  %v3914_v44 = vsel %vm2232_vm9, %v3550_v27, %v3634_v24  ;;  %v3068_v42 = vmul.bf16 %v15190_v14, %v18562_v13  ;;  %v3070_v27 = vmul.bf16 %v15220_v52, %v14315_v3 }
 0x414   :  { %4036 = vmatprep.subr.bf16.mxu0 %v3914_v44 }
 0x415   :  { %v15306_v38 = vpop.permute.xlu0 %3605  ;;  %v15308_v49 = vpop.permute.xlu1 %3372  ;;  %v3440_v46 = vrot.slane %v3068_v42, 4 }
 0x416   :  { %v3401_v13 = vsel %vm1910_vm12, %v15150_v31, %v15308_v49 }
 0x417   :  { %3384 = vrot.lane.b32.xlu0 %v15184_v28, %s12593_s24  ;;  %3334 = vrot.lane.b32.xlu1 %v3306_v25, %s12592_s23  ;;  %v18564_v25 = vld [vmem:[#allocation107_spill] sm:$0xff] }
 0x419   :  { %v3516_v51 = vpop.permute.xlu0 %3515  ;;  %v15313_v36 = vpop.permute.xlu1 %3236 }
 0x41a   :  { %v3549_v33 = vsel %vm1262_vm6, %v3516_v51, %v15192_v15  ;;  %v2995_v15 = vmul.bf16 %v14949_v8, %v14061_v12  ;;  %v18563_v8 = vld [vmem:[#allocation5_spill] sm:$0xff]  ;;  %v3265_v44 = vsel %vm1772_vm10, %v15178_v18, %v15313_v36  ;;  %v3086_v51 = vmul.bf16 %v15184_v28, %v18564_v25 }
 0x41b   :  { %3388 = vrot.lane.b32.xlu0 %v15204_v29, %s12593_s24  ;;  %3382 = vrot.lane.b32.xlu1 %v15190_v14, %s12593_s24  ;;  %v3910_v20 = vsel %vm2232_vm9, %v3549_v33, %v3633_v53  ;;  %v2994_v24 = vmul.bf16 %v14937_v54, %v18563_v8  ;;  %v3348_v54 = vsel %vm1857_vm11, %v15243_v59, %v15256_v17 }
 0x41c   :  { %4037 = vmatpush1.bf16.msra.mxu0 %v3910_v20  ;;  %v3442_v20 = vrot.slane %v3070_v27, 4  ;;  %v3264_v59 = vsel %vm1772_vm10, %v15152_v11, %v15178_v18  ;;  %v3484_v18 = vsel %vm1995_vm13, %v15258_v41, %v15286_v21  ;;  %v18569_v27 = vld [vmem:[#allocation106_spill] sm:$0xff]  ;;  %v3400_v41 = vsel %vm1910_vm12, %v15144_v50, %v15150_v31 }
 0x41d   :  { %v3667_v43 = vpop.permute.xlu0 %3666  ;;  %v15325_v39 = vpop.permute.xlu1 %3523  ;;  %v3635_v50 = vsel %vm2147_vm14, %v15264_v22, %v15306_v38 }
 0x41e   :  { %v3700_v37 = vsel %vm18565_vm4, %v3667_v43, %v3669_v61  ;;  %vm18579_vm4 = vmmov %vm18440_vm3 }
 0x41f   :  { %3468 = vrot.lane.b32.xlu0 %v3441_v35, %s12594_s25  ;;  %3386 = vrot.lane.b32.xlu1 %v15220_v52, %s12593_s24  ;;  %v3983_v42 = vsel %vm2232_vm9, %v3700_v37, 0 }
 0x421   :  { %v15339_v19 = vpop.permute.xlu0 %3169  ;;  %v15341_v48 = vpop.permute.xlu1 %3320 }
 0x422   :  { %v3198_v12 = vsel %vm1704_vm8, %v15231_v4, %v15339_v19  ;;  %v3349_v62 = vsel %vm1857_vm11, %v15256_v17, %v15341_v48  ;;  %v3726_v4 = vsel %vm2232_vm9, %v2994_v24, %v3197_v5  ;;  %v18567_v17 = vld [vmem:[#allocation105_spill] sm:$0xff]  ;;  %v3854_v24 = vsel %vm2232_vm9, %v3400_v41, %v3484_v18 }
 0x423   :  { %3472 = vrot.lane.b32.xlu0 %v3443_v47, %s12594_s25  ;;  %3466 = vrot.lane.b32.xlu1 %v3440_v46, %s12594_s25  ;;  %v3730_v3 = vsel %vm2232_vm9, %v2995_v15, %v3198_v12  ;;  %v3794_v33 = vsel %vm2232_vm9, %v3265_v44, %v3349_v62  ;;  %v3085_v43 = vmul.bf16 %v15190_v14, %v18567_v17  ;;  %v18568_v15 = vld [vmem:[#allocation42_spill] sm:$0xff]  ;;  %v18574_v17 = vld [vmem:[#allocation8_spill] sm:$0xff] }
 0x424   :  { %4071 = vmatprep.subr.bf16.mxu1 %v3730_v3  ;;  %v3088_v11 = vmul.bf16 %v15204_v29, %v18568_v15  ;;  %v3103_v12 = vmul.bf16 %v15184_v28, %v18569_v27  ;;  %v15404_v62 = vld [vmem:[%s15348_s7] sm:$0xf]  ;;  %v18570_v3 = vld [vmem:[#allocation87_spill] sm:$0xff]  ;;  %v18576_v15 = vld [vmem:[#allocation84_spill] sm:$0xff]  ;;  %s12606_s7 = smov 110  }
 0x425   :  { %v3671_v63 = vpop.permute.xlu0 %3670  ;;  %4072 = vmatpush1.bf16.msra.mxu1 %v3726_v4  ;;  %v15371_v53 = vpop.permute.xlu1 %3456  ;;  %v3087_v44 = vmul.bf16 %v15220_v52, %v18570_v3  ;;  %v18571_v4 = vld [vmem:[#allocation104_spill] sm:$0xff] }
 0x426   :  { %v3485_v35 = vsel %vm1995_vm13, %v15286_v21, %v15371_v53  ;;  %4073 = vmatprep.subr.bf16.mxu1 %v3794_v33  ;;  %v3701_v56 = vsel %vm18566_vm5, %v3669_v61, %v3671_v63  ;;  %v3790_v61 = vsel %vm2232_vm9, %v3264_v59, %v3348_v54  ;;  %v3552_v21 = vsel %vm1262_vm6, %v15212_v23, %v15325_v39  ;;  %v18572_v33 = vld [vmem:[#allocation89_spill] sm:$0xff]  ;;  %vm18580_vm5 = vmmov %vm18440_vm3 }
 0x427   :  { %3535 = vrot.lane.b32.xlu0 %v3086_v51, %s12588_s19  ;;  %3470 = vrot.lane.b32.xlu1 %v3442_v20, %s12594_s25  ;;  %v3858_v46 = vsel %vm2232_vm9, %v3401_v13, %v3485_v35  ;;  %v3102_v25 = vmul.bf16 %v15190_v14, %v18571_v4  ;;  %v3592_v37 = vrot.slane %v3103_v12, 4  ;;  %v3105_v20 = vmul.bf16 %v15204_v29, %v18572_v33  ;;  %v18577_v12 = vld [vmem:[#allocation108_spill] sm:$0xff] }
 0x428   :  { %11144 = vmatprep.subr.msk.bf16.mxu0 %vm2232_vm9, %v3701_v56  ;;  %v3551_v35 = vsel %vm1262_vm6, %v15164_v6, %v15212_v23  ;;  %v18573_v56 = vld [vmem:[#allocation9_spill] sm:$0xff] }
 0x429   :  { %4039 = vmatpush1.bf16.msra.mxu0 %v3983_v42  ;;  %v15396_v5 = vpop.permute.xlu0 %3674  ;;  %4074 = vmatpush1.bf16.msra.mxu1 %v3790_v61  ;;  %v15398_v47 = vpop.permute.xlu1 %3607  ;;  %v3918_v22 = vsel %vm2232_vm9, %v3551_v35, %v3635_v50  ;;  %v2997_v59 = vmul.bf16 %v15063_v26, %v18573_v56  ;;  %v3594_v23 = vrot.slane %v3105_v20, 4 }
 0x42a   :  { %v3636_v8 = vsel %vm2147_vm14, %v15306_v38, %v15398_v47  ;;  %4075 = vmatprep.subr.bf16.mxu1 %v3858_v46  ;;  %v3591_v38 = vrot.slane %v3102_v25, 4 }
 0x42b   :  { %3539 = vrot.lane.b32.xlu0 %v3088_v11, %s12588_s19  ;;  %3533 = vrot.lane.b32.xlu1 %v3085_v43, %s12588_s19  ;;  %v3922_v54 = vsel %vm2232_vm9, %v3552_v21, %v3636_v8  ;;  %v2996_v43 = vmul.bf16 %v15024_v32, %v18574_v17  ;;  %v3104_v11 = vmul.bf16 %v15220_v52, %v18576_v15 }
 0x42c   :  { %11145 = vmatmul.mubr.msk.bf16.vlgmr.msra.gmra.mrb[16].mxu0 %vm2496_vm15, %v15404_v62  ;;  %v3120_v8 = vmul.bf16 %v15184_v28, %v18577_v12  ;;  %v2999_v21 = vmul.bf16 %v15078_v0, %v14395_v10  ;;  %v18578_v0 = vld [vmem:[#allocation10_spill] sm:$0xff] }
 0x42d   :  { %v3174_v31 = vpop.permute.xlu0 %3173  ;;  %4076 = vmatpush1.bf16.msra.mxu1 %v3854_v24  ;;  %v3673_v51 = vpop.permute.xlu1 %3672  ;;  %4144 = vmatprep.mubr.bf16.mxu0 %v18415_v2  ;;  %v3593_v41 = vrot.slane %v3104_v11, 4  ;;  %v2998_v24 = vmul.bf16 %v15054_v30, %v14399_v55  ;;  %v3122_v30 = vmul.bf16 %v15204_v29, %v14518_v34  ;;  %v3119_v50 = vmul.bf16 %v15190_v14, %v18578_v0 }
 0x42e   :  { %4077 = vmatprep.subr.bf16.mxu1 %v3922_v54  ;;  %v3702_v13 = vsel %vm18440_vm3, %v3671_v63, %v3673_v51  ;;  %v3703_v6 = vsel %vm18575_vm7, %v3673_v51, %v15396_v5  ;;  %v3121_v54 = vmul.bf16 %v15220_v52, %v14505_v57  ;;  %vm18581_vm7 = vmmov %vm18440_vm3 }
 0x42f   :  { %3619 = vrot.lane.b32.xlu0 %v3592_v37, %s12595_s26  ;;  %3537 = vrot.lane.b32.xlu1 %v3087_v44, %s12588_s19  ;;  %v3989_v46 = vsel %vm2232_vm9, %v3702_v13, 0 }
 0x431   :  { %v3241_v42 = vpop.permute.xlu0 %3240  ;;  %4078 = vmatpush1.bf16.msra.mxu1 %v3918_v22  ;;  %v3172_v61 = vpop.permute.xlu1 %3171 }
 0x432   :  { %v3199_v18 = vsel %vm1704_vm8, %v15339_v19, %v3172_v61  ;;  %v3200_v26 = vsel %vm1704_vm8, %v3172_v61, %v3174_v31  ;;  %11146 = vmatprep.subr.msk.bf16.mxu1 %vm2232_vm9, %v3703_v6 }
 0x433   :  { %3623 = vrot.lane.b32.xlu0 %v3594_v23, %s12595_s26  ;;  %3617 = vrot.lane.b32.xlu1 %v3591_v38, %s12595_s26  ;;  %v3738_v32 = vsel %vm2232_vm9, %v2997_v59, %v3200_v26  ;;  %v3734_v63 = vsel %vm2232_vm9, %v2996_v43, %v3199_v18 }
 0x434   :  { %4112 = vmatprep.subr.bf16.mxu0 %v3738_v32 }
 0x435   :  { %v15455_v27 = vpop.permute.xlu0 %3177  ;;  %4080 = vmatpush1.bf16.msra.mxu1 %v3989_v46  ;;  %4113 = vmatpush1.bf16.msra.mxu0 %v3734_v63  ;;  %v3176_v19 = vpop.permute.xlu1 %3175 }
 0x436   :  { %v3201_v3 = vsel %vm1704_vm8, %v3174_v31, %v3176_v19  ;;  %v3202_v44 = vsel %vm1704_vm8, %v3176_v19, %v15455_v27 }
 0x437   :  { %3686 = vrot.lane.b32.xlu0 %v3120_v8, %s12596_s27  ;;  %3621 = vrot.lane.b32.xlu1 %v3593_v41, %s12595_s26  ;;  %v3746_v4 = vsel %vm2232_vm9, %v2999_v21, %v3202_v44  ;;  %v3742_v25 = vsel %vm2232_vm9, %v2998_v24, %v3201_v3 }
 0x438   :  { %4153 = vmatprep.subr.bf16.mxu1 %v3746_v4  ;;  %11147 = vmatmul.mubr.msk.bf16.vlgmr.msra.gmra.mrb[16].mxu1 %vm2496_vm15, %v15404_v62 }
 0x439   :  { %v15472_v10 = vpop.permute.xlu0 %3244  ;;  %4154 = vmatpush1.bf16.msra.mxu1 %v3742_v25  ;;  %v3239_v55 = vpop.permute.xlu1 %3238  ;;  %4185 = vmatprep.mubr.bf16.mxu1 %v18415_v2 }
 0x43a   :  { %v3266_v34 = vsel %vm1772_vm10, %v15313_v36, %v3239_v55  ;;  %v3267_v20 = vsel %vm1772_vm10, %v3239_v55, %v3241_v42 }
 0x43b   :  { %3690 = vrot.lane.b32.xlu0 %v3122_v30, %s12596_s27  ;;  %3684 = vrot.lane.b32.xlu1 %v3119_v50, %s12596_s27 }
 0x43d   :  { %v3325_v31 = vpop.permute.xlu0 %3324  ;;  %v3243_v51 = vpop.permute.xlu1 %3242 }
 0x43e   :  { %v3268_v17 = vsel %vm1772_vm10, %v3241_v42, %v3243_v51  ;;  %v3269_v36 = vsel %vm1772_vm10, %v3243_v51, %v15472_v10 }
 0x43f   :  { %3688 = vrot.lane.b32.xlu1 %v3121_v54, %s12596_s27 }
 0x441   :  { %v15484_v37 = vpop.permute.xlu0 %3328  ;;  %v3323_v33 = vpop.permute.xlu1 %3322 }
 0x442   :  { %v3350_v35 = vsel %vm1857_vm11, %v15341_v48, %v3323_v33  ;;  %v3351_v22 = vsel %vm1857_vm11, %v3323_v33, %v3325_v31 }
 0x443   :  { %v3802_v38 = vsel %vm2232_vm9, %v3267_v20, %v3351_v22  ;;  %v3798_v56 = vsel %vm2232_vm9, %v3266_v34, %v3350_v35 }
 0x444   :  { %4114 = vmatprep.subr.bf16.mxu0 %v3802_v38 }
 0x445   :  { %v3377_v57 = vpop.permute.xlu0 %3376  ;;  %4115 = vmatpush1.bf16.msra.mxu0 %v3798_v56  ;;  %v3327_v59 = vpop.permute.xlu1 %3326 }
 0x446   :  { %v3352_v43 = vsel %vm1857_vm11, %v3325_v31, %v3327_v59  ;;  %v3353_v48 = vsel %vm1857_vm11, %v3327_v59, %v15484_v37 }
 0x447   :  { %v3810_v13 = vsel %vm2232_vm9, %v3269_v36, %v3353_v48  ;;  %v3806_v61 = vsel %vm2232_vm9, %v3268_v17, %v3352_v43 }
 0x448   :  { %4155 = vmatprep.subr.bf16.mxu1 %v3810_v13 }
 0x449   :  { %v15502_v6 = vpop.permute.xlu0 %3380  ;;  %4156 = vmatpush1.bf16.msra.mxu1 %v3806_v61  ;;  %v3375_v23 = vpop.permute.xlu1 %3374 }
 0x44a   :  { %v3402_v26 = vsel %vm1910_vm12, %v15308_v49, %v3375_v23  ;;  %v3403_v32 = vsel %vm1910_vm12, %v3375_v23, %v3377_v57 }
 0x44d   :  { %v3461_v15 = vpop.permute.xlu0 %3460  ;;  %v3379_v11 = vpop.permute.xlu1 %3378 }
 0x44e   :  { %v3404_v21 = vsel %vm1910_vm12, %v3377_v57, %v3379_v11  ;;  %v3405_v49 = vsel %vm1910_vm12, %v3379_v11, %v15502_v6 }
 0x451   :  { %v15504_v42 = vpop.permute.xlu0 %3464  ;;  %v3459_v18 = vpop.permute.xlu1 %3458 }
 0x452   :  { %v3486_v63 = vsel %vm1995_vm13, %v15371_v53, %v3459_v18  ;;  %v3487_v46 = vsel %vm1995_vm13, %v3459_v18, %v3461_v15 }
 0x453   :  { %v3866_v19 = vsel %vm2232_vm9, %v3403_v32, %v3487_v46  ;;  %v3862_v12 = vsel %vm2232_vm9, %v3402_v26, %v3486_v63  ;;  %v3001_v32 = vmul.bf16 %v15190_v14, %v14424_v16  ;;  %v3000_v63 = vmul.bf16 %v15082_v58, %v14428_v45 }
 0x454   :  { %4116 = vmatprep.subr.bf16.mxu0 %v3866_v19  ;;  %v3003_v45 = vmul.bf16 %v15220_v52, %v14610_v60  ;;  %v3002_v58 = vmul.bf16 %v15184_v28, %v14603_v9  ;;  %v18582_v28 = vld [vmem:[#allocation110_spill] sm:$0xff] }
 0x455   :  { %v3528_v8 = vpop.permute.xlu0 %3527  ;;  %4117 = vmatpush1.bf16.msra.mxu0 %v3862_v12  ;;  %v3463_v41 = vpop.permute.xlu1 %3462 }
 0x456   :  { %v3488_v24 = vsel %vm1995_vm13, %v3461_v15, %v3463_v41  ;;  %v3489_v53 = vsel %vm1995_vm13, %v3463_v41, %v15504_v42 }
 0x457   :  { %v3874_v3 = vsel %vm2232_vm9, %v3405_v49, %v3489_v53  ;;  %v3870_v44 = vsel %vm2232_vm9, %v3404_v21, %v3488_v24  ;;  %v2872_v24 = vadd.f32 %v15071_v1, %v14894_v7 }
 0x458   :  { %4157 = vmatprep.subr.bf16.mxu1 %v3874_v3 }
 0x459   :  { %v15522_v4 = vpop.permute.xlu0 %3531  ;;  %4158 = vmatpush1.bf16.msra.mxu1 %v3870_v44  ;;  %v3526_v25 = vpop.permute.xlu1 %3525  ;;  %v18583_v44 = vld [vmem:[#allocation109_spill] sm:$0xff] }
 0x45a   :  { %v3553_v31 = vsel %vm1262_vm6, %v15325_v39, %v3526_v25  ;;  %v3554_v51 = vsel %vm1262_vm6, %v3526_v25, %v3528_v8 }
 0x45d   :  { %v3612_v55 = vpop.permute.xlu0 %3611  ;;  %v3530_v30 = vpop.permute.xlu1 %3529 }
 0x45e   :  { %v3555_v38 = vsel %vm1262_vm6, %v3528_v8, %v3530_v30  ;;  %v3556_v39 = vsel %vm1262_vm6, %v3530_v30, %v15522_v4 }
 0x461   :  { %v15524_v0 = vpop.permute.xlu0 %3615  ;;  %v3610_v50 = vpop.permute.xlu1 %3609 }
 0x462   :  { %v3637_v54 = vsel %vm2147_vm14, %v15398_v47, %v3610_v50  ;;  %v3638_v33 = vsel %vm2147_vm14, %v3610_v50, %v3612_v55 }
 0x463   :  { %v3930_v34 = vsel %vm2232_vm9, %v3554_v51, %v3638_v33  ;;  %v3926_v20 = vsel %vm2232_vm9, %v3553_v31, %v3637_v54  ;;  %v18584_v54 = vld [vmem:[#allocation79_spill] sm:$0xff] }
 0x464   :  { %4118 = vmatprep.subr.bf16.mxu0 %v3930_v34  ;;  %v18585_v34 = vld [vmem:[#allocation74_spill] sm:$0xff] }
 0x465   :  { %v3679_v35 = vpop.permute.xlu0 %3678  ;;  %4119 = vmatpush1.bf16.msra.mxu0 %v3926_v20  ;;  %v3614_v22 = vpop.permute.xlu1 %3613 }
 0x466   :  { %v3639_v56 = vsel %vm2147_vm14, %v3612_v55, %v3614_v22  ;;  %v3640_v47 = vsel %vm2147_vm14, %v3614_v22, %v15524_v0  ;;  %v2891_v55 = vmax.f32 %v2872_v24, 0.0 }
 0x467   :  { %v3938_v57 = vsel %vm2232_vm9, %v3556_v39, %v3640_v47  ;;  %v3934_v59 = vsel %vm2232_vm9, %v3555_v38, %v3639_v56  ;;  %v18586_v39 = vld [vmem:[#allocation81_spill] sm:$0xff]  ;;  %v18587_v47 = vld [vmem:[#allocation76_spill] sm:$0xff] }
 0x468   :  { %4159 = vmatprep.subr.bf16.mxu1 %v3938_v57 }
 0x469   :  { %v15542_v17 = vpop.permute.xlu0 %3682  ;;  %4160 = vmatpush1.bf16.msra.mxu1 %v3934_v59  ;;  %v3677_v36 = vpop.permute.xlu1 %3676 }
 0x46a   :  { %v3704_v43 = vsel %vm18579_vm4, %v15396_v5, %v3677_v36  ;;  %v3705_v48 = vsel %vm18580_vm5, %v3677_v36, %v3679_v35  ;;  %vm18596_vm4 = vmmov %vm18440_vm3 }
 0x46b   :  { %11148 = vmatprep.subr.msk.bf16.mxu0 %vm2232_vm9, %v3705_v48  ;;  %v3995_v13 = vsel %vm2232_vm9, %v3704_v43, 0  ;;  %vm18597_vm5 = vmmov %vm18440_vm3 }
 0x46c   :  { %4121 = vmatpush1.bf16.msra.mxu0 %v3995_v13 }
 0x46d   :  { %v3182_v61 = vpop.permute.xlu0 %3181  ;;  %v3681_v23 = vpop.permute.xlu1 %3680 }
 0x46e   :  { %v3706_v15 = vsel %vm18440_vm3, %v3679_v35, %v3681_v23  ;;  %v3707_v11 = vsel %vm18581_vm7, %v3681_v23, %v15542_v17  ;;  %vm18598_vm7 = vmmov %vm18440_vm3 }
 0x46f   :  { %11150 = vmatprep.subr.msk.bf16.mxu1 %vm2232_vm9, %v3707_v11  ;;  %v4001_v18 = vsel %vm2232_vm9, %v3706_v15, 0  ;;  %11149 = vmatmul.mubr.msk.bf16.vlgmr.msra.gmra.mrb[20].mxu0 %vm2496_vm15, %v15404_v62  ;;  %v18588_v11 = vld [vmem:[#allocation82_spill] sm:$0xff] }
 0x470   :  { %4162 = vmatpush1.bf16.msra.mxu1 %v4001_v18  ;;  %4226 = vmatprep.mubr.bf16.mxu0 %v18415_v2 }
 0x471   :  { %v15557_v5 = vpop.permute.xlu0 %3185  ;;  %v3180_v26 = vpop.permute.xlu1 %3179 }
 0x472   :  { %v3203_v46 = vsel %vm1704_vm8, %v15455_v27, %v3180_v26  ;;  %v3204_v19 = vsel %vm1704_vm8, %v3180_v26, %v3182_v61 }
 0x473   :  { %v3754_v12 = vsel %vm2232_vm9, %v3001_v32, %v3204_v19  ;;  %v3750_v8 = vsel %vm2232_vm9, %v3000_v63, %v3203_v46  ;;  %11151 = vmatmul.mubr.msk.bf16.vlgmr.msra.gmra.mrb[20].mxu1 %vm2496_vm15, %v15404_v62 }
 0x474   :  { %4194 = vmatprep.subr.bf16.mxu0 %v3754_v12  ;;  %4267 = vmatprep.mubr.bf16.mxu1 %v18415_v2 }
 0x475   :  { %v15571_v41 = vpop.permute.xlu0 %2952  ;;  %4195 = vmatpush1.bf16.msra.mxu0 %v3750_v8  ;;  %v3184_v16 = vpop.permute.xlu1 %3183 }
 0x476   :  { %v3205_v14 = vsel %vm1704_vm8, %v3182_v61, %v3184_v16  ;;  %v3206_v27 = vsel %vm1704_vm8, %v3184_v16, %v15557_v5 }
 0x477   :  { %v3762_v21 = vsel %vm2232_vm9, %v3003_v45, %v3206_v27  ;;  %v3758_v49 = vsel %vm2232_vm9, %v3002_v58, %v3205_v14  ;;  %v18589_v45 = vld [vmem:[#allocation83_spill] sm:$0xff] }
 0x478   :  { %4235 = vmatprep.subr.bf16.mxu1 %v3762_v21  ;;  %v18590_v21 = vld [vmem:[#allocation11_spill] sm:$0xff] }
 0x479   :  { %v3249_v53 = vpop.permute.xlu0 %3248  ;;  %4236 = vmatpush1.bf16.msra.mxu1 %v3758_v49  ;;  %v2951_v3 = vpop.permute.xlu1 %2950 }
 0x47a   :  { %v15586_v60 = vsel %vm239_vm1, %v15127_v40, %v2951_v3  ;;  %v15590_v9 = vsel %vm239_vm1, %v2951_v3, %v15571_v41  ;;  %v2907_v40 = vpack.c.bf16 %v2891_v55, %v2891_v55 }
 0x47b   :  { %v3022_v52 = vmul.bf16 %v15590_v9, %v18582_v28  ;;  %v3021_v25 = vmul.bf16 %v15586_v60, %v18583_v44  ;;  %v3038_v33 = vmul.bf16 %v15586_v60, %v18584_v54  ;;  %v3055_v20 = vmul.bf16 %v15586_v60, %v18585_v34 }
 0x47c   :  { %v3039_v56 = vmul.bf16 %v15590_v9, %v18586_v39  ;;  %v3056_v57 = vmul.bf16 %v15590_v9, %v18587_v47  ;;  %v3072_v18 = vmul.bf16 %v15586_v60, %v18588_v11  ;;  %v3073_v58 = vmul.bf16 %v15590_v9, %v18589_v45 }
 0x47d   :  { %v15596_v30 = vpop.permute.xlu0 %3252  ;;  %v3247_v7 = vpop.permute.xlu1 %3246  ;;  %v3158_v1 = vrot.slane %v3022_v52, 4  ;;  %v3157_v50 = vrot.slane %v3021_v25, 4  ;;  %v3308_v38 = vrot.slane %v3055_v20, 4  ;;  %v3089_v49 = vmul.bf16 %v15586_v60, %v18590_v21  ;;  %v18592_v25 = vld [vmem:[#allocation17_spill] sm:$0xff] }
 0x47e   :  { %v3270_v59 = vsel %vm1772_vm10, %v15472_v10, %v3247_v7  ;;  %v3271_v36 = vsel %vm1772_vm10, %v3247_v7, %v3249_v53  ;;  %v3309_v10 = vrot.slane %v3056_v57, 4  ;;  %v3444_v16 = vrot.slane %v3072_v18, 4  ;;  %v18593_v7 = vld [vmem:[#allocation44_spill] sm:$0xff] }
 0x47f   :  { %3189 = vrot.lane.b32.xlu0 %v3158_v1, %s12590_s21  ;;  %3187 = vrot.lane.b32.xlu1 %v3157_v50, %s12590_s21  ;;  %v3445_v24 = vrot.slane %v3073_v58, 4  ;;  %v3090_v55 = vmul.bf16 %v15590_v9, %v18592_v25  ;;  %v3107_v1 = vmul.bf16 %v15590_v9, %v18593_v7 }
 0x481   :  { %v3333_v31 = vpop.permute.xlu0 %3332  ;;  %v3251_v51 = vpop.permute.xlu1 %3250 }
 0x482   :  { %v3273_v26 = vsel %vm1772_vm10, %v3251_v51, %v15596_v30 }
 0x483   :  { %3254 = vrot.lane.b32.xlu0 %v3038_v33, %s12591_s22  ;;  %2954 = vrot.lane.b32.xlu1 %v2907_v40, %s12583_s14 }
 0x485   :  { %v15606_v35 = vpop.permute.xlu0 %3336  ;;  %v3331_v22 = vpop.permute.xlu1 %3330 }
 0x486   :  { %v3354_v43 = vsel %vm1857_vm11, %v15484_v37, %v3331_v22  ;;  %v3355_v48 = vsel %vm1857_vm11, %v3331_v22, %v3333_v31  ;;  %v3272_v37 = vsel %vm1772_vm10, %v3249_v53, %v3251_v51  ;;  %v18591_v53 = vld [vmem:[#allocation15_spill] sm:$0xff] }
 0x487   :  { %3338 = vrot.lane.b32.xlu0 %v3308_v38, %s12592_s23  ;;  %3256 = vrot.lane.b32.xlu1 %v3039_v56, %s12591_s22  ;;  %v3818_v13 = vsel %vm2232_vm9, %v3271_v36, %v3355_v48  ;;  %v3814_v61 = vsel %vm2232_vm9, %v3270_v59, %v3354_v43  ;;  %v3106_v3 = vmul.bf16 %v15586_v60, %v18591_v53  ;;  %v3596_v38 = vrot.slane %v3107_v1, 4  ;;  %v18595_v48 = vld [vmem:[#allocation65_spill] sm:$0xff]  ;;  %v18600_v1 = vld [vmem:[#allocation96_spill] sm:$0xff] }
 0x488   :  { %4196 = vmatprep.subr.bf16.mxu0 %v3818_v13  ;;  %v3124_v13 = vmul.bf16 %v15590_v9, %v18595_v48  ;;  %v18604_v48 = vld [vmem:[#allocation111_spill] sm:$0xff] }
 0x489   :  { %v3385_v23 = vpop.permute.xlu0 %3384  ;;  %4197 = vmatpush1.bf16.msra.mxu0 %v3814_v61  ;;  %v3335_v15 = vpop.permute.xlu1 %3334  ;;  %v3595_v44 = vrot.slane %v3106_v3, 4 }
 0x48a   :  { %v3356_v32 = vsel %vm1857_vm11, %v3333_v31, %v3335_v15  ;;  %v3357_v63 = vsel %vm1857_vm11, %v3335_v15, %v15606_v35 }
 0x48b   :  { %3390 = vrot.lane.b32.xlu0 %v15586_v60, %s12593_s24  ;;  %3340 = vrot.lane.b32.xlu1 %v3309_v10, %s12592_s23  ;;  %v3826_v46 = vsel %vm2232_vm9, %v3273_v26, %v3357_v63  ;;  %v3822_v19 = vsel %vm2232_vm9, %v3272_v37, %v3356_v32 }
 0x48c   :  { %4237 = vmatprep.subr.bf16.mxu1 %v3826_v46 }
 0x48d   :  { %v15635_v12 = vpop.permute.xlu0 %3388  ;;  %4238 = vmatpush1.bf16.msra.mxu1 %v3822_v19  ;;  %v3383_v8 = vpop.permute.xlu1 %3382 }
 0x48e   :  { %v3406_v50 = vsel %vm1910_vm12, %v15502_v6, %v3383_v8  ;;  %v3407_v40 = vsel %vm1910_vm12, %v3383_v8, %v3385_v23  ;;  %v18594_v6 = vld [vmem:[#allocation16_spill] sm:$0xff] }
 0x48f   :  { %3474 = vrot.lane.b32.xlu0 %v3444_v16, %s12594_s25  ;;  %3392 = vrot.lane.b32.xlu1 %v15590_v9, %s12593_s24  ;;  %v3123_v22 = vmul.bf16 %v15586_v60, %v18594_v6  ;;  %v18602_v6 = vld [vmem:[#allocation18_spill] sm:$0xff] }
 0x491   :  { %v3469_v14 = vpop.permute.xlu0 %3468  ;;  %v3387_v27 = vpop.permute.xlu1 %3386 }
 0x492   :  { %v3409_v39 = vsel %vm1910_vm12, %v3387_v27, %v15635_v12 }
 0x493   :  { %3541 = vrot.lane.b32.xlu0 %v3089_v49, %s12588_s19  ;;  %3476 = vrot.lane.b32.xlu1 %v3445_v24, %s12594_s25 }
 0x495   :  { %v15648_v28 = vpop.permute.xlu0 %3472  ;;  %v3467_v52 = vpop.permute.xlu1 %3466 }
 0x496   :  { %v3490_v31 = vsel %vm1995_vm13, %v15504_v42, %v3467_v52  ;;  %v3491_v51 = vsel %vm1995_vm13, %v3467_v52, %v3469_v14  ;;  %v3408_v42 = vsel %vm1910_vm12, %v3385_v23, %v3387_v27 }
 0x497   :  { %3625 = vrot.lane.b32.xlu0 %v3595_v44, %s12595_s26  ;;  %3543 = vrot.lane.b32.xlu1 %v3090_v55, %s12588_s19  ;;  %v3882_v54 = vsel %vm2232_vm9, %v3407_v40, %v3491_v51  ;;  %v3878_v33 = vsel %vm2232_vm9, %v3406_v50, %v3490_v31  ;;  %v18599_v55 = vld [vmem:[#allocation97_spill] sm:$0xff]  ;;  %v3004_v50 = vmul.bf16 %v15204_v29, %v18600_v1 }
 0x498   :  { %4198 = vmatprep.subr.bf16.mxu0 %v3882_v54  ;;  %v3005_v7 = vmul.bf16 %v15586_v60, %v18599_v55 }
 0x499   :  { %v3536_v34 = vpop.permute.xlu0 %3535  ;;  %4199 = vmatpush1.bf16.msra.mxu0 %v3878_v33  ;;  %v3471_v20 = vpop.permute.xlu1 %3470 }
 0x49a   :  { %v3492_v56 = vsel %vm1995_vm13, %v3469_v14, %v3471_v20  ;;  %v3493_v47 = vsel %vm1995_vm13, %v3471_v20, %v15648_v28  ;;  %v18601_v20 = vld [vmem:[#allocation99_spill] sm:$0xff] }
 0x49b   :  { %3692 = vrot.lane.b32.xlu0 %v3123_v22, %s12596_s27  ;;  %3627 = vrot.lane.b32.xlu1 %v3596_v38, %s12595_s26  ;;  %v3890_v57 = vsel %vm2232_vm9, %v3409_v39, %v3493_v47  ;;  %v3886_v59 = vsel %vm2232_vm9, %v3408_v42, %v3492_v56 }
 0x49c   :  { %4239 = vmatprep.subr.bf16.mxu1 %v3890_v57 }
 0x49d   :  { %v15676_v36 = vpop.permute.xlu0 %3539  ;;  %4240 = vmatpush1.bf16.msra.mxu1 %v3886_v59  ;;  %v3534_v43 = vpop.permute.xlu1 %3533 }
 0x49e   :  { %v3557_v11 = vsel %vm1262_vm6, %v15522_v4, %v3534_v43  ;;  %v3558_v18 = vsel %vm1262_vm6, %v3534_v43, %v3536_v34 }
 0x49f   :  { %3694 = vrot.lane.b32.xlu1 %v3124_v13, %s12596_s27 }
 0x4a1   :  { %v3620_v61 = vpop.permute.xlu0 %3619  ;;  %v3538_v23 = vpop.permute.xlu1 %3537 }
 0x4a2   :  { %v3559_v19 = vsel %vm1262_vm6, %v3536_v34, %v3538_v23  ;;  %v3560_v8 = vsel %vm1262_vm6, %v3538_v23, %v15676_v36 }
 0x4a5   :  { %v15681_v15 = vpop.permute.xlu0 %3623  ;;  %v3618_v10 = vpop.permute.xlu1 %3617 }
 0x4a6   :  { %v3641_v37 = vsel %vm2147_vm14, %v15524_v0, %v3618_v10  ;;  %v3642_v26 = vsel %vm2147_vm14, %v3618_v10, %v3620_v61  ;;  %v18606_v10 = vld [vmem:[#allocation28_spill] sm:$0xff] }
 0x4a7   :  { %v3946_v32 = vsel %vm2232_vm9, %v3558_v18, %v3642_v26  ;;  %v3942_v63 = vsel %vm2232_vm9, %v3557_v11, %v3641_v37 }
 0x4a8   :  { %4200 = vmatprep.subr.bf16.mxu0 %v3946_v32 }
 0x4a9   :  { %4201 = vmatpush1.bf16.msra.mxu0 %v3942_v63  ;;  %v3622_v46 = vpop.permute.xlu1 %3621  ;;  %v3687_v0 = vpop.permute.xlu0 %3686 }
 0x4aa   :  { %v3643_v4 = vsel %vm2147_vm14, %v3620_v61, %v3622_v46  ;;  %v3644_v16 = vsel %vm2147_vm14, %v3622_v46, %v15681_v15  ;;  %v18605_v61 = vld [vmem:[#allocation25_spill] sm:$0xff] }
 0x4ab   :  { %v3954_v45 = vsel %vm2232_vm9, %v3560_v8, %v3644_v16  ;;  %v3950_v58 = vsel %vm2232_vm9, %v3559_v19, %v3643_v4 }
 0x4ac   :  { %4241 = vmatprep.subr.bf16.mxu1 %v3954_v45 }
 0x4ad   :  { %4242 = vmatpush1.bf16.msra.mxu1 %v3950_v58  ;;  %v3685_v14 = vpop.permute.xlu1 %3684  ;;  %v15704_v24 = vpop.permute.xlu0 %3690 }
 0x4ae   :  { %v3708_v27 = vsel %vm18596_vm4, %v15542_v17, %v3685_v14  ;;  %v3709_v21 = vsel %vm18597_vm5, %v3685_v14, %v3687_v0  ;;  %vm18613_vm4 = vmmov %vm18440_vm3 }
 0x4af   :  { %11152 = vmatprep.subr.msk.bf16.mxu0 %vm2232_vm9, %v3709_v21  ;;  %v4007_v49 = vsel %vm2232_vm9, %v3708_v27, 0  ;;  %v18607_v27 = vld [vmem:[#allocation112_spill] sm:$0xff]  ;;  %vm18614_vm5 = vmmov %vm18440_vm3 }
 0x4b0   :  { %4203 = vmatpush1.bf16.msra.mxu0 %v4007_v49  ;;  %v18608_v49 = vld [vmem:[#allocation113_spill] sm:$0xff] }
 0x4b1   :  { %v3689_v53 = vpop.permute.xlu1 %3688 }
 0x4b2   :  { %v3710_v3 = vsel %vm18440_vm3, %v3687_v0, %v3689_v53  ;;  %v3711_v52 = vsel %vm18598_vm7, %v3689_v53, %v15704_v24  ;;  %vm18619_vm7 = vmmov %vm18440_vm3 }
 0x4b3   :  { %11154 = vmatprep.subr.msk.bf16.mxu1 %vm2232_vm9, %v3711_v52  ;;  %v4013_v44 = vsel %vm2232_vm9, %v3710_v3, 0  ;;  %11153 = vmatmul.mubr.msk.bf16.vlgmr.msra.gmra.mrb[24].mxu0 %vm2496_vm15, %v15404_v62 }
 0x4b4   :  { %4244 = vmatpush1.bf16.msra.mxu1 %v4013_v44  ;;  %4308 = vmatprep.mubr.bf16.mxu0 %v18415_v2 }
 0x4b7   :  { %11155 = vmatmul.mubr.msk.bf16.vlgmr.msra.gmra.mrb[24].mxu1 %vm2496_vm15, %v15404_v62 }
 0x4b8   :  { %4349 = vmatprep.mubr.bf16.mxu1 %v18415_v2 }
 0x4f1   :  { %v15717_v17 = vpop.permute.xlu0 %3189  ;;  %v3188_v25 = vpop.permute.xlu1 %3187 }
 0x4f2   :  { %v3207_v40 = vsel %vm1704_vm8, %v15557_v5, %v3188_v25  ;;  %v3208_v31 = vsel %vm1704_vm8, %v3188_v25, %v15717_v17 }
 0x4f3   :  { %v3770_v51 = vsel %vm2232_vm9, %v3005_v7, %v3208_v31  ;;  %v3766_v54 = vsel %vm2232_vm9, %v3004_v50, %v3207_v40  ;;  %v18609_v40 = vld [vmem:[#allocation116_spill] sm:$0xff] }
 0x4f4   :  { %4276 = vmatprep.subr.bf16.mxu0 %v3770_v51 }
 0x4f5   :  { %v3255_v33 = vpop.permute.xlu0 %3254  ;;  %4277 = vmatpush1.bf16.msra.mxu0 %v3766_v54  ;;  %v2955_v34 = vpop.permute.xlu1 %2954 }
 0x4f6   :  { %v15731_v60 = vsel %vm239_vm1, %v15571_v41, %v2955_v34  ;;  %v15734_v29 = vsel %vm239_vm1, %v2955_v34, 0  ;;  %v18603_v41 = vld [vmem:[#allocation27_spill] sm:$0xff]  ;;  %v18610_v34 = vld [vmem:[#allocation117_spill] sm:$0xff] }
 0x4f7   :  { %v3024_v5 = vmul.bf16 %v15734_v29, %v18601_v20  ;;  %v3023_v22 = vmul.bf16 %v15731_v60, %v18602_v6  ;;  %v3041_v47 = vmul.bf16 %v15734_v29, %v18603_v41  ;;  %v3040_v13 = vmul.bf16 %v15731_v60, %v18604_v48 }
 0x4f8   :  { %v3058_v23 = vmul.bf16 %v15734_v29, %v18605_v61  ;;  %v3057_v11 = vmul.bf16 %v15731_v60, %v18606_v10  ;;  %v3075_v21 = vmul.bf16 %v15734_v29, %v18607_v27  ;;  %v3074_v53 = vmul.bf16 %v15731_v60, %v18608_v49 }
 0x4f9   :  { %v3339_v38 = vpop.permute.xlu0 %3338  ;;  %v15740_v42 = vpop.permute.xlu1 %3256  ;;  %v3160_v39 = vrot.slane %v3024_v5, 4  ;;  %v3159_v56 = vrot.slane %v3023_v22, 4  ;;  %v3092_v31 = vmul.bf16 %v15734_v29, %v18609_v40  ;;  %v3091_v20 = vmul.bf16 %v15731_v60, %v18610_v34  ;;  %v18611_v5 = vld [vmem:[#allocation114_spill] sm:$0xff]  ;;  %v18612_v22 = vld [vmem:[#allocation115_spill] sm:$0xff] }
 0x4fa   :  { %v3358_v57 = vsel %vm1857_vm11, %v15606_v35, %v3339_v38  ;;  %v3275_v18 = vsel %vm1772_vm10, %v3255_v33, %v15740_v42  ;;  %v3274_v35 = vsel %vm1772_vm10, %v15596_v30, %v3255_v33  ;;  %v3311_v4 = vrot.slane %v3058_v23, 4 }
 0x4fb   :  { %3193 = vrot.lane.b32.xlu1 %v3160_v39, %s12590_s21  ;;  %3191 = vrot.lane.b32.xlu0 %v3159_v56, %s12590_s21  ;;  %v3830_v63 = vsel %vm2232_vm9, %v3274_v35, %v3358_v57  ;;  %v3310_v16 = vrot.slane %v3057_v11, 4  ;;  %v3447_v1 = vrot.slane %v3075_v21, 4  ;;  %v3446_v50 = vrot.slane %v3074_v53, 4  ;;  %v18617_v21 = vld [vmem:[#allocation120_spill] sm:$0xff]  ;;  %v18618_v53 = vld [vmem:[#allocation31_spill] sm:$0xff] }
 0x4fc   :  { %v3109_v6 = vmul.bf16 %v15734_v29, %v18611_v5  ;;  %v3007_v49 = vmul.bf16 %v15731_v60, %v18617_v21 }
 0x4fd   :  { %v3391_v59 = vpop.permute.xlu0 %3390  ;;  %v15748_v43 = vpop.permute.xlu1 %3340 }
 0x4fe   :  { %v3359_v37 = vsel %vm1857_vm11, %v3339_v38, %v15748_v43  ;;  %v3410_v44 = vsel %vm1910_vm12, %v15635_v12, %v3391_v59  ;;  %v3108_v38 = vmul.bf16 %v15731_v60, %v18612_v22  ;;  %v3598_v61 = vrot.slane %v3109_v6, 4 }
 0x4ff   :  { %3260 = vrot.lane.b32.xlu1 %v3041_v47, %s12591_s22  ;;  %3258 = vrot.lane.b32.xlu0 %v3040_v13, %s12591_s22  ;;  %v3834_v26 = vsel %vm2232_vm9, %v3275_v18, %v3359_v37  ;;  %v15765_v32 = vpop.f32.mrb[16].mxu0  ;;  %v18615_v18 = vld [vmem:[#allocation118_spill] sm:$0xff]  ;;  %v18616_v37 = vld [vmem:[#allocation119_spill] sm:$0xff] }
 0x500   :  { %4278 = vmatprep.subr.bf16.mxu0 %v3834_v26  ;;  %v15768_v46 = vpop.f32.mrb[17].mxu0  ;;  %v3597_v23 = vrot.slane %v3108_v38, 4  ;;  %v3125_v35 = vmul.bf16 %v15731_v60, %v18616_v37  ;;  %v3973_v26 = vld [vmem:[%s11061_s12] sm:$0xff]  ;;  %s12616_s12 = smov 118  }
 0x501   :  { %v3475_v19 = vpop.permute.xlu0 %3474  ;;  %4279 = vmatpush1.bf16.msra.mxu0 %v3830_v63  ;;  %v15770_v8 = vpop.permute.xlu1 %3392 }
 0x502   :  { %v4068_v30 = vpop.f32.mrb[18].mxu0  ;;  %v3494_v45 = vsel %vm1995_vm13, %v15648_v28, %v3475_v19  ;;  %v3411_v3 = vsel %vm1910_vm12, %v3391_v59, %v15770_v8 }
 0x503   :  { %3344 = vrot.lane.b32.xlu1 %v3311_v4, %s12592_s23  ;;  %3342 = vrot.lane.b32.xlu0 %v3310_v16, %s12592_s23  ;;  %v4069_v0 = vpop.f32.mrb[19].mxu0  ;;  %v3894_v25 = vsel %vm2232_vm9, %v3410_v44, %v3494_v45 }
 0x505   :  { %v3542_v58 = vpop.permute.xlu0 %3541  ;;  %v15776_v14 = vpop.permute.xlu1 %3476 }
 0x506   :  { %v3495_v52 = vsel %vm1995_vm13, %v3475_v19, %v15776_v14 }
 0x507   :  { %3396 = vrot.lane.b32.xlu1 %v15734_v29, %s12593_s24  ;;  %3394 = vrot.lane.b32.xlu0 %v15731_v60, %s12593_s24  ;;  %v3898_v28 = vsel %vm2232_vm9, %v3411_v3, %v3495_v52  ;;  %v3006_v3 = vmul.bf16 %v15590_v9, %v18618_v53 }
 0x508   :  { %4280 = vmatprep.subr.bf16.mxu0 %v3898_v28 }
 0x509   :  { %v3626_v55 = vpop.permute.xlu0 %3625  ;;  %4281 = vmatpush1.bf16.msra.mxu0 %v3894_v25  ;;  %v15794_v7 = vpop.permute.xlu1 %3543 }
 0x50a   :  { %v3645_v54 = vsel %vm2147_vm14, %v15681_v15, %v3626_v55  ;;  %v3562_v39 = vsel %vm1262_vm6, %v3542_v58, %v15794_v7  ;;  %v3561_v15 = vsel %vm1262_vm6, %v15676_v36, %v3542_v58 }
 0x50b   :  { %3480 = vrot.lane.b32.xlu1 %v3447_v1, %s12594_s25  ;;  %3478 = vrot.lane.b32.xlu0 %v3446_v50, %s12594_s25  ;;  %v15798_v12 = vpop.f32.mrb[16].mxu1  ;;  %v3958_v48 = vsel %vm2232_vm9, %v3561_v15, %v3645_v54 }
 0x50c   :  { %v15802_v51 = vpop.f32.mrb[17].mxu1 }
 0x50d   :  { %v15806_v33 = vpop.permute.xlu1 %3627  ;;  %v3693_v56 = vpop.permute.xlu0 %3692 }
 0x50e   :  { %v3646_v41 = vsel %vm2147_vm14, %v3626_v55, %v15806_v33  ;;  %v4109_v47 = vpop.f32.mrb[18].mxu1  ;;  %v3712_v13 = vsel %vm18613_vm4, %v15704_v24, %v3693_v56  ;;  %v3126_v24 = vmul.bf16 %v15734_v29, %v18615_v18  ;;  %vm18633_vm4 = vcmask 15360  }
 0x50f   :  { %3547 = vrot.lane.b32.xlu1 %v3092_v31, %s12588_s19  ;;  %3545 = vrot.lane.b32.xlu0 %v3091_v20, %s12588_s19  ;;  %v3962_v57 = vsel %vm2232_vm9, %v3562_v39, %v3646_v41  ;;  %v4110_v59 = vpop.f32.mrb[19].mxu1  ;;  %v4019_v11 = vsel %vm2232_vm9, %v3712_v13, 0 }
 0x510   :  { %4282 = vmatprep.subr.bf16.mxu0 %v3962_v57 }
 0x511   :  { %4283 = vmatpush1.bf16.msra.mxu0 %v3958_v48  ;;  %v15830_v36 = vpop.permute.xlu1 %3694 }
 0x512   :  { %v3713_v10 = vsel %vm18614_vm5, %v3693_v56, %v15830_v36  ;;  %vm5882_vm5 = vcmask 130048  }
 0x513   :  { %3631 = vrot.lane.b32.xlu1 %v3598_v61, %s12595_s26  ;;  %3629 = vrot.lane.b32.xlu0 %v3597_v23, %s12595_s26  ;;  %s15944_s26 = sld [smem:[%s18054_s0 + %s12583_s14]]  }
 0x514   :  { %11156 = vmatprep.subr.msk.bf16.mxu0 %vm2232_vm9, %v3713_v10 }
 0x515   :  { %4285 = vmatpush1.bf16.msra.mxu0 %v4019_v11 }
 0x517   :  { %3698 = vrot.lane.b32.xlu1 %v3126_v24, %s12596_s27  ;;  %3696 = vrot.lane.b32.xlu0 %v3125_v35, %s12596_s27  ;;  %s12600_s27 = smov 30  }
 0x518   :  { %11157 = vmatmul.mubr.msk.bf16.vlgmr.msra.gmra.mrb[28].mxu0 %vm2496_vm15, %v15404_v62  ;;  %s11087_s30 = sld [smem:[%s18054_s0 + %s12600_s27]]   ;;  %s12612_s27 = smov 9  }
 0x51b   :  { %3976 = vperm.xlu0 %12175, %v3973_v26  }
 0x542   :  { %v15846_v63 = vpop.f32.mrb[20].mxu0 }
 0x543   :  { %v15848_v19 = vpop.f32.mrb[21].mxu0 }
 0x544   :  { %v4150_v4 = vpop.f32.mrb[22].mxu0 }
 0x545   :  { %v4151_v16 = vpop.f32.mrb[23].mxu0 }
 0x546   :  { %v15850_v30 = vpop.f32.mrb[20].mxu1 }
 0x547   :  { %v15852_v29 = vpop.f32.mrb[21].mxu1 }
 0x548   :  { %v4191_v0 = vpop.f32.mrb[22].mxu1 }
 0x549   :  { %v4192_v45 = vpop.f32.mrb[23].mxu1 }
 0x56d   :  { %v3192_v58 = vpop.permute.xlu0 %3191  ;;  %v3194_v27 = vpop.permute.xlu1 %3193 }
 0x56e   :  { %v3209_v52 = vsel %vm1704_vm8, %v15717_v17, %v3192_v58  ;;  %v3210_v44 = vsel %vm1704_vm8, %v3192_v58, %v3194_v27 }
 0x56f   :  { %v3778_v28 = vsel %vm2232_vm9, %v3007_v49, %v3210_v44  ;;  %v3774_v25 = vsel %vm2232_vm9, %v3006_v3, %v3209_v52 }
 0x570   :  { %4317 = vmatprep.subr.bf16.mxu1 %v3778_v28 }
 0x571   :  { %v3259_v55 = vpop.permute.xlu0 %3258  ;;  %4318 = vmatpush1.bf16.msra.mxu1 %v3774_v25  ;;  %v3261_v1 = vpop.permute.xlu1 %3260 }
 0x572   :  { %v3276_v60 = vsel %vm1772_vm10, %v15740_v42, %v3259_v55  ;;  %v3277_v9 = vsel %vm1772_vm10, %v3259_v55, %v3261_v1 }
 0x575   :  { %v3343_v50 = vpop.permute.xlu0 %3342  ;;  %v3345_v40 = vpop.permute.xlu1 %3344 }
 0x576   :  { %v3360_v17 = vsel %vm1857_vm11, %v15748_v43, %v3343_v50  ;;  %v3361_v31 = vsel %vm1857_vm11, %v3343_v50, %v3345_v40 }
 0x577   :  { %v3842_v54 = vsel %vm2232_vm9, %v3277_v9, %v3361_v31  ;;  %v3838_v34 = vsel %vm2232_vm9, %v3276_v60, %v3360_v17 }
 0x578   :  { %4319 = vmatprep.subr.bf16.mxu1 %v3842_v54 }
 0x579   :  { %v3395_v20 = vpop.permute.xlu0 %3394  ;;  %4320 = vmatpush1.bf16.msra.mxu1 %v3838_v34  ;;  %v3397_v5 = vpop.permute.xlu1 %3396  ;;  %v12244_v34 = vld [vmem:[%s15944_s26] ss:$8 sps:$4 sm:$0xff]  }
 0x57a   :  { %v3412_v42 = vsel %vm1910_vm12, %v15770_v8, %v3395_v20  ;;  %v3413_v38 = vsel %vm1910_vm12, %v3395_v20, %v3397_v5  ;;  %v12246_v20 = vld [vmem:[%s15944_s26 + $0x4] ss:$8 sps:$4 sm:$0xff]   ;;  %v12247_v5 = vld [vmem:[%s15944_s26 + $0x10] ss:$8 sps:$4 sm:$0xff]  }
 0x57b   :  { %5358 = vmatprep.subr.bf16.mxu0 %v12246_v20 }
 0x57c   :  { %5359 = vmatpush1.bf16.msra.mxu0 %v12244_v34 }
 0x57d   :  { %v3479_v6 = vpop.permute.xlu0 %3478  ;;  %v3481_v22 = vpop.permute.xlu1 %3480 }
 0x57e   :  { %v3496_v43 = vsel %vm1995_vm13, %v15776_v14, %v3479_v6  ;;  %v3497_v39 = vsel %vm1995_vm13, %v3479_v6, %v3481_v22  ;;  %v12249_v6 = vld [vmem:[%s15944_s26 + $0x14] ss:$8 sps:$4 sm:$0xff]   ;;  %v12250_v22 = vld [vmem:[%s15944_s26 + $0x20] ss:$8 sps:$4 sm:$0xff]  }
 0x57f   :  { %v3906_v56 = vsel %vm2232_vm9, %v3413_v38, %v3497_v39  ;;  %v3902_v41 = vsel %vm2232_vm9, %v3412_v42, %v3496_v43  ;;  %5360 = vmatprep.subr.bf16.mxu0 %v12249_v6  ;;  %v12252_v42 = vld [vmem:[%s15944_s26 + $0x24] ss:$8 sps:$4 sm:$0xff]   ;;  %v12255_v38 = vld [vmem:[%s15944_s26 + $0x34] ss:$8 sps:$4 sm:$0xff]  }
 0x580   :  { %4321 = vmatprep.subr.bf16.mxu1 %v3906_v56  ;;  %5361 = vmatpush1.bf16.msra.mxu0 %v12247_v5 }
 0x581   :  { %v3546_v47 = vpop.permute.xlu0 %3545  ;;  %4322 = vmatpush1.bf16.msra.mxu1 %v3902_v41  ;;  %v3548_v15 = vpop.permute.xlu1 %3547  ;;  %5362 = vmatprep.subr.bf16.mxu0 %v12252_v42  ;;  %v12253_v41 = vld [vmem:[%s15944_s26 + $0x30] ss:$8 sps:$4 sm:$0xff]  }
 0x582   :  { %v3563_v8 = vsel %vm1262_vm6, %v15794_v7, %v3546_v47  ;;  %v3564_v48 = vsel %vm1262_vm6, %v3546_v47, %v3548_v15 }
 0x584   :  { %5363 = vmatpush1.bf16.msra.mxu0 %v12250_v22 }
 0x585   :  { %v3630_v57 = vpop.permute.xlu0 %3629  ;;  %v3632_v59 = vpop.permute.xlu1 %3631  ;;  %5364 = vmatprep.subr.bf16.mxu0 %v12255_v38 }
 0x586   :  { %v3647_v14 = vsel %vm2147_vm14, %v15806_v33, %v3630_v57  ;;  %v3648_v13 = vsel %vm2147_vm14, %v3630_v57, %v3632_v59  ;;  %v4228_v61 = vpop.f32.mrb[24].mxu0  ;;  %v12258_v57 = vld [vmem:[%s15944_s26 + $0x44] ss:$8 sps:$4 sm:$0xff]   ;;  %vm5702_vm14 = vcmask 138240  }
 0x587   :  { %v3970_v23 = vsel %vm2232_vm9, %v3564_v48, %v3648_v13  ;;  %v3966_v10 = vsel %vm2232_vm9, %v3563_v8, %v3647_v14  ;;  %v4230_v11 = vpop.f32.mrb[25].mxu0  ;;  %v12256_v13 = vld [vmem:[%s15944_s26 + $0x40] ss:$8 sps:$4 sm:$0xff]  }
 0x588   :  { %4323 = vmatprep.subr.bf16.mxu1 %v3970_v23  ;;  %v4232_v18 = vpop.f32.mrb[26].mxu0  ;;  %5365 = vmatpush1.bf16.msra.mxu0 %v12253_v41  ;;  %v12261_v23 = vld [vmem:[%s15944_s26 + $0x54] ss:$8 sps:$4 sm:$0xff]  }
 0x589   :  { %v3697_v24 = vpop.permute.xlu0 %3696  ;;  %4324 = vmatpush1.bf16.msra.mxu1 %v3966_v10  ;;  %v3699_v37 = vpop.permute.xlu1 %3698  ;;  %5366 = vmatprep.subr.bf16.mxu0 %v12258_v57  ;;  %v12259_v10 = vld [vmem:[%s15944_s26 + $0x50] ss:$8 sps:$4 sm:$0xff]   ;;  %v12262_v18 = vld [vmem:[%s15944_s26 + $0x60] ss:$8 sps:$4 sm:$0xff]  }
 0x58a   :  { %v3714_v7 = vsel %vm18440_vm3, %v15830_v36, %v3697_v24  ;;  %v3715_v35 = vsel %vm18619_vm7, %v3697_v24, %v3699_v37  ;;  %v4269_v26 = vpop.f32.mrb[24].mxu1  ;;  %v4233_v33 = vpop.f32.mrb[27].mxu0  ;;  %v12267_v24 = vld [vmem:[%s15944_s26 + $0x74] ss:$8 sps:$4 sm:$0xff]   ;;  %v12265_v37 = vld [vmem:[%s15944_s26 + $0x70] ss:$8 sps:$4 sm:$0xff]   ;;  %vm18639_vm7 = vmmov %vm18633_vm4 }
 0x58b   :  { %11158 = vmatprep.subr.msk.bf16.mxu1 %vm2232_vm9, %v3715_v35  ;;  %v4025_v4 = vsel %vm2232_vm9, %v3714_v7, 0  ;;  %v4271_v16 = vpop.f32.mrb[25].mxu1  ;;  %v12270_v7 = vld [vmem:[%s15944_s26 + $0x84] ss:$8 sps:$4 sm:$0xff]   ;;  %v12268_v35 = vld [vmem:[%s15944_s26 + $0x80] ss:$8 sps:$4 sm:$0xff]  }
 0x58c   :  { %v4273_v0 = vpop.f32.mrb[26].mxu1  ;;  %5367 = vmatpush1.bf16.msra.mxu0 %v12256_v13  ;;  %v12271_v33 = vld [vmem:[%s15944_s26 + $0x90] ss:$8 sps:$4 sm:$0xff]   ;;  %vm5924_vm3 = vcmask 146432  }
 0x58d   :  { %4326 = vmatpush1.bf16.msra.mxu1 %v4025_v4  ;;  %v4274_v45 = vpop.f32.mrb[27].mxu1  ;;  %5368 = vmatprep.subr.bf16.mxu0 %v12261_v23  ;;  %v12276_v4 = vld [vmem:[%s15944_s26 + $0xa4] ss:$8 sps:$4 sm:$0xff]   ;;  %v12279_v0 = vld [vmem:[%s15944_s26 + $0xb4] ss:$8 sps:$4 sm:$0xff]  }
 0x58e   :  { %5522 = vmatprep.subr.bf16.mxu1 %v12246_v20  ;;  %v12277_v45 = vld [vmem:[%s15944_s26 + $0xb0] ss:$8 sps:$4 sm:$0xff]  }
 0x590   :  { %11159 = vmatmul.mubr.msk.bf16.vlgmr.msra.gmra.mrb[28].mxu1 %vm2496_vm15, %v15404_v62  ;;  %5369 = vmatpush1.bf16.msra.mxu0 %v12259_v10 }
 0x591   :  { %5523 = vmatpush1.bf16.msra.mxu1 %v12244_v34 }
 0x592   :  { %5524 = vmatprep.subr.bf16.mxu1 %v12249_v6 }
 0x595   :  { %5525 = vmatpush1.bf16.msra.mxu1 %v12247_v5 }
 0x596   :  { %5526 = vmatprep.subr.bf16.mxu1 %v12252_v42 }
 0x599   :  { %5527 = vmatpush1.bf16.msra.mxu1 %v12250_v22 }
 0x59a   :  { %v15894_v58 = vpop.permute.xlu0 %3976  ;;  %5528 = vmatprep.subr.bf16.mxu1 %v12255_v38 }
 0x59b   :  { %v4106_v36 = vadd.f32 %v15798_v12, %v15894_v58  ;;  %v4067_v27 = vadd.f32 %v15768_v46, %v15894_v58  ;;  %v4231_v21 = vadd.f32 %v4230_v11, %v15894_v58  ;;  %v4108_v49 = vadd.f32 %v15802_v51, %v15894_v58  ;;  %v12264_v11 = vld [vmem:[%s15944_s26 + $0x64] ss:$8 sps:$4 sm:$0xff]  }
 0x59c   :  { %v4272_v52 = vadd.f32 %v4271_v16, %v15894_v58  ;;  %v4270_v44 = vadd.f32 %v4269_v26, %v15894_v58  ;;  %v4229_v46 = vadd.f32 %v4228_v61, %v15894_v58  ;;  %v4065_v51 = vadd.f32 %v15765_v32, %v15894_v58  ;;  %5370 = vmatprep.subr.bf16.mxu0 %v12264_v11  ;;  %v12273_v26 = vld [vmem:[%s15944_s26 + $0x94] ss:$8 sps:$4 sm:$0xff]   ;;  %v12274_v16 = vld [vmem:[%s15944_s26 + $0xa0] ss:$8 sps:$4 sm:$0xff]  }
 0x59d   :  { %v4360_v53 = vmax.f32 %v4106_v36, 0.0  ;;  %v4359_v3 = vmax.f32 %v4067_v27, 0.0  ;;  %v4367_v25 = vmax.f32 %v4231_v21, 0.0  ;;  %v4361_v12 = vmax.f32 %v4108_v49, 0.0  ;;  %5529 = vmatpush1.bf16.msra.mxu1 %v12253_v41  ;;  %5371 = vmatpush1.bf16.msra.mxu0 %v12262_v18  ;;  %v12282_v36 = vld [vmem:[%s15944_s26 + $0xc4] ss:$8 sps:$4 sm:$0xff]  }
 0x59e   :  { %v4369_v50 = vmax.f32 %v4272_v52, 0.0  ;;  %v4368_v40 = vmax.f32 %v4270_v44, 0.0  ;;  %v4366_v17 = vmax.f32 %v4229_v46, 0.0  ;;  %v4358_v31 = vmax.f32 %v4065_v51, 0.0  ;;  %5530 = vmatprep.subr.bf16.mxu1 %v12258_v57  ;;  %5372 = vmatprep.subr.bf16.mxu0 %v12267_v24  ;;  %v12280_v27 = vld [vmem:[%s15944_s26 + $0xc0] ss:$8 sps:$4 sm:$0xff]  }
 0x59f   :  { %v15905_v62 = vpack.c.bf16 %v4360_v53, %v4360_v53  ;;  %v15907_v28 = vpack.c.bf16 %v4359_v3, %v4359_v3  ;;  %v15916_v55 = vpack.c.bf16 %v4367_v25, %v4367_v25  ;;  %v15918_v1 = vpack.c.bf16 %v4361_v12, %v4361_v12  ;;  %v12285_v21 = vld [vmem:[%s15944_s26 + $0xd4] ss:$8 sps:$4 sm:$0xff]   ;;  %v12283_v52 = vld [vmem:[%s15944_s26 + $0xd0] ss:$8 sps:$4 sm:$0xff]   ;;  %v12288_v46 = vld [vmem:[%s15944_s26 + $0xe4] ss:$8 sps:$4 sm:$0xff]  }
 0x5a0   :  { %v15924_v60 = vpack.c.bf16 %v4369_v50, %v4369_v50  ;;  %v15926_v9 = vpack.c.bf16 %v4368_v40, %v4368_v40  ;;  %v15932_v32 = vpack.c.bf16 %v4366_v17, %v4366_v17  ;;  %v15934_v54 = vpack.c.bf16 %v4358_v31, %v4358_v31  ;;  %v12286_v51 = vld [vmem:[%s15944_s26 + $0xe0] ss:$8 sps:$4 sm:$0xff]   ;;  %v12289_v17 = vld [vmem:[%s15944_s26 + $0xf0] ss:$8 sps:$4 sm:$0xff]  }
 0x5a1   :  { %4411 = vrot.lane.b32.xlu1 %v15905_v62, %s12590_s21  ;;  %4409 = vrot.lane.b32.xlu0 %v15907_v28, %s12590_s21  ;;  %v4147_v42 = vadd.f32 %v15846_v63, %v15894_v58 }
 0x5a2   :  { %5531 = vmatpush1.bf16.msra.mxu1 %v12256_v13  ;;  %5373 = vmatpush1.bf16.msra.mxu0 %v12265_v37 }
 0x5a3   :  { %5532 = vmatprep.subr.bf16.mxu1 %v12261_v23  ;;  %5374 = vmatprep.subr.bf16.mxu0 %v12270_v7 }
 0x5a5   :  { %4425 = vrot.lane.b32.xlu1 %v15916_v55, %s12590_s21  ;;  %4413 = vrot.lane.b32.xlu0 %v15918_v1, %s12590_s21 }
 0x5a6   :  { %5533 = vmatpush1.bf16.msra.mxu1 %v12259_v10  ;;  %5375 = vmatpush1.bf16.msra.mxu0 %v12268_v35 }
 0x5a7   :  { %5534 = vmatprep.subr.bf16.mxu1 %v12264_v11  ;;  %5376 = vmatprep.subr.bf16.mxu0 %v12273_v26 }
 0x5a9   :  { %4429 = vrot.lane.b32.xlu1 %v15924_v60, %s12590_s21  ;;  %4427 = vrot.lane.b32.xlu0 %v15926_v9, %s12590_s21 }
 0x5aa   :  { %5535 = vmatpush1.bf16.msra.mxu1 %v12262_v18  ;;  %5377 = vmatpush1.bf16.msra.mxu0 %v12271_v33 }
 0x5ab   :  { %5536 = vmatprep.subr.bf16.mxu1 %v12267_v24  ;;  %5378 = vmatprep.subr.bf16.mxu0 %v12276_v4 }
 0x5ad   :  { %4423 = vrot.lane.b32.xlu1 %v15932_v32, %s12590_s21  ;;  %4407 = vrot.lane.b32.xlu0 %v15934_v54, %s12590_s21 }
 0x5ae   :  { %5537 = vmatpush1.bf16.msra.mxu1 %v12265_v37  ;;  %5379 = vmatpush1.bf16.msra.mxu0 %v12274_v16 }
 0x5af   :  { %5538 = vmatprep.subr.bf16.mxu1 %v12270_v7  ;;  %5380 = vmatprep.subr.bf16.mxu0 %v12279_v0 }
 0x5b2   :  { %5539 = vmatpush1.bf16.msra.mxu1 %v12268_v35  ;;  %5381 = vmatpush1.bf16.msra.mxu0 %v12277_v45 }
 0x5b3   :  { %5540 = vmatprep.subr.bf16.mxu1 %v12273_v26  ;;  %5382 = vmatprep.subr.bf16.mxu0 %v12282_v36  ;;  %v12292_v26 = vld [vmem:[%s15944_s26 + $0x100] ss:$8 sps:$4 sm:$0xff]  }
 0x5b6   :  { %5541 = vmatpush1.bf16.msra.mxu1 %v12271_v33  ;;  %5383 = vmatpush1.bf16.msra.mxu0 %v12280_v27 }
 0x5b7   :  { %5542 = vmatprep.subr.bf16.mxu1 %v12276_v4  ;;  %5384 = vmatprep.subr.bf16.mxu0 %v12285_v21  ;;  %v12297_v4 = vld [vmem:[%s15944_s26 + $0x114] ss:$8 sps:$4 sm:$0xff]  }
 0x5ba   :  { %5543 = vmatpush1.bf16.msra.mxu1 %v12274_v16  ;;  %5385 = vmatpush1.bf16.msra.mxu0 %v12283_v52 }
 0x5bb   :  { %5544 = vmatprep.subr.bf16.mxu1 %v12279_v0  ;;  %5386 = vmatprep.subr.bf16.mxu0 %v12288_v46 }
 0x5be   :  { %5545 = vmatpush1.bf16.msra.mxu1 %v12277_v45  ;;  %5387 = vmatpush1.bf16.msra.mxu0 %v12286_v51 }
 0x5bf   :  { %5546 = vmatprep.subr.bf16.mxu1 %v12282_v36 }
 0x5c2   :  { %5547 = vmatpush1.bf16.msra.mxu1 %v12280_v27 }
 0x5c3   :  { %5548 = vmatprep.subr.bf16.mxu1 %v12285_v21 }
 0x5c6   :  { %5549 = vmatpush1.bf16.msra.mxu1 %v12283_v52  ;;  %v12295_v52 = vld [vmem:[%s15944_s26 + $0x110] ss:$8 sps:$4 sm:$0xff]  }
 0x5c7   :  { %5550 = vmatprep.subr.bf16.mxu1 %v12288_v46 }
 0x5ca   :  { %5551 = vmatpush1.bf16.msra.mxu1 %v12286_v51 }
 0x5eb   :  { %v4310_v43 = vpop.f32.mrb[28].mxu0 }
 0x5ec   :  { %v4311_v39 = vadd.f32 %v4310_v43, %v15894_v58  ;;  %v4312_v56 = vpop.f32.mrb[29].mxu0 }
 0x5ed   :  { %v4313_v47 = vadd.f32 %v4312_v56, %v15894_v58  ;;  %v4314_v15 = vpop.f32.mrb[30].mxu0  ;;  %v4362_v56 = vmax.f32 %v4147_v42, 0.0 }
 0x5ee   :  { %v4370_v59 = vmax.f32 %v4311_v39, 0.0  ;;  %v4315_v8 = vpop.f32.mrb[31].mxu0 }
 0x5ef   :  { %v4371_v48 = vmax.f32 %v4313_v47, 0.0  ;;  %v4378_v47 = vpack.c.bf16 %v4362_v56, %v4362_v56  ;;  %v12307_v56 = vld [vmem:[%s15944_s26 + $0x150] ss:$8 sps:$4 sm:$0xff]  }
 0x5f0   :  { %v15957_v14 = vpack.c.bf16 %v4370_v59, %v4370_v59 }
 0x5f1   :  { %v15960_v61 = vpack.c.bf16 %v4371_v48, %v4371_v48 }
 0x5f2   :  { %4431 = vrot.lane.b32.xlu1 %v15957_v14, %s12590_s21 }
 0x5f3   :  { %4433 = vrot.lane.b32.xlu0 %v15960_v61, %s12590_s21 }
 0x613   :  { %v4410_v49 = vpop.permute.xlu0 %4409  ;;  %v4412_v53 = vpop.permute.xlu1 %4411 }
 0x614   :  { %v4442_v3 = vsel %vm1704_vm8, %v4410_v49, %v4412_v53 }
 0x615   :  { %v15986_v44 = vmax.bf16 %v4442_v3, %v15907_v28  ;;  %v12291_v28 = vld [vmem:[%s15944_s26 + $0xf4] ss:$8 sps:$4 sm:$0xff]  }
 0x616   :  { %5388 = vmatprep.subr.bf16.mxu0 %v12291_v28  ;;  %5552 = vmatprep.subr.bf16.mxu1 %v12291_v28  ;;  %v4188_v28 = vadd.f32 %v15850_v30, %v15894_v58 }
 0x617   :  { %v15988_v25 = vpop.permute.xlu0 %4413  ;;  %4510 = vrot.lane.b32.xlu1 %v15986_v44, %s12592_s23  ;;  %v4426_v12 = vpop.permute.xlu1 %4425  ;;  %5389 = vmatpush1.bf16.msra.mxu0 %v12289_v17 }
 0x618   :  { %5553 = vmatpush1.bf16.msra.mxu1 %v12289_v17  ;;  %v4443_v38 = vsel %vm1704_vm8, %v4412_v53, %v15988_v25  ;;  %v12298_v17 = vld [vmem:[%s15944_s26 + $0x120] ss:$8 sps:$4 sm:$0xff]  }
 0x619   :  { %v16013_v39 = vmax.bf16 %v4443_v38, %v15905_v62  ;;  %v12306_v38 = vld [vmem:[%s15944_s26 + $0x144] ss:$8 sps:$4 sm:$0xff]  }
 0x61b   :  { %v4428_v50 = vpop.permute.xlu0 %4427  ;;  %v15994_v40 = vpop.permute.xlu1 %4429 }
 0x61c   :  { %v4450_v43 = vsel %vm1704_vm8, %v4426_v12, %v4428_v50  ;;  %v4451_v63 = vsel %vm1704_vm8, %v4428_v50, %v15994_v40 }
 0x61d   :  { %v16024_v41 = vmax.bf16 %v4451_v63, %v15926_v9  ;;  %v12310_v63 = vld [vmem:[%s15944_s26 + $0x160] ss:$8 sps:$4 sm:$0xff]  }
 0x61f   :  { %v4408_v31 = vpop.permute.xlu0 %4407  ;;  %v15998_v34 = vpop.permute.xlu1 %4423 }
 0x620   :  { %v4441_v20 = vsel %vm1704_vm8, %v4408_v31, %v4410_v49  ;;  %v4449_v5 = vsel %vm1704_vm8, %v15998_v34, %v4426_v12  ;;  %v12300_v12 = vld [vmem:[%s15944_s26 + $0x124] ss:$8 sps:$4 sm:$0xff]  }
 0x621   :  { %v4473_v6 = vmax.bf16 %v4441_v20, %v15934_v54  ;;  %v4481_v22 = vmax.bf16 %v4449_v5, %v15932_v32  ;;  %v4482_v54 = vmax.bf16 %v4450_v43, %v15916_v55  ;;  %v4149_v32 = vadd.f32 %v15848_v19, %v15894_v58  ;;  %v12294_v19 = vld [vmem:[%s15944_s26 + $0x104] ss:$8 sps:$4 sm:$0xff]   ;;  %v12303_v20 = vld [vmem:[%s15944_s26 + $0x134] ss:$8 sps:$4 sm:$0xff]   ;;  %v12304_v43 = vld [vmem:[%s15944_s26 + $0x140] ss:$8 sps:$4 sm:$0xff]  }
 0x622   :  { %5399 = vmatprep.subr.bf16.mxu0 %v12294_v19  ;;  %5563 = vmatprep.subr.bf16.mxu1 %v12294_v19  ;;  %v12318_v19 = vld [vmem:[%s15944_s26 + $0x184] ss:$8 sps:$4 sm:$0xff]  }
 0x623   :  { %4508 = vrot.lane.b32.xlu0 %v4473_v6, %s12592_s23  ;;  %4524 = vrot.lane.b32.xlu1 %v4481_v22, %s12592_s23  ;;  %v4363_v62 = vmax.f32 %v4149_v32, 0.0  ;;  %v12312_v32 = vld [vmem:[%s15944_s26 + $0x164] ss:$8 sps:$4 sm:$0xff]  }
 0x625   :  { %v16029_v55 = vpack.c.bf16 %v4363_v62, %v4363_v62  ;;  %v12313_v62 = vld [vmem:[%s15944_s26 + $0x170] ss:$8 sps:$4 sm:$0xff]  }
 0x627   :  { %4512 = vrot.lane.b32.xlu0 %v16013_v39, %s12592_s23  ;;  %4526 = vrot.lane.b32.xlu1 %v4482_v54, %s12592_s23 }
 0x62b   :  { %4528 = vrot.lane.b32.xlu0 %v16024_v41, %s12592_s23  ;;  %4415 = vrot.lane.b32.xlu1 %v4378_v47, %s12590_s21 }
 0x62f   :  { %4417 = vrot.lane.b32.xlu0 %v16029_v55, %s12590_s21 }
 0x663   :  { %v4351_v15 = vpop.f32.mrb[28].mxu1 }
 0x664   :  { %v4353_v57 = vpop.f32.mrb[29].mxu1  ;;  %v4432_v8 = vpop.permute.xlu1 %4431  ;;  %v4352_v7 = vadd.f32 %v4351_v15, %v15894_v58  ;;  %v12316_v15 = vld [vmem:[%s15944_s26 + $0x180] ss:$8 sps:$4 sm:$0xff]  }
 0x665   :  { %v4355_v9 = vpop.f32.mrb[30].mxu1  ;;  %v16034_v48 = vpop.permute.xlu0 %4433  ;;  %v4354_v49 = vadd.f32 %v4353_v57, %v15894_v58  ;;  %v4452_v31 = vsel %vm1704_vm8, %v15994_v40, %v4432_v8  ;;  %v12301_v40 = vld [vmem:[%s15944_s26 + $0x130] ss:$8 sps:$4 sm:$0xff]   ;;  %v12321_v57 = vld [vmem:[%s15944_s26 + $0x194] ss:$8 sps:$4 sm:$0xff]  }
 0x666   :  { %v4356_v59 = vpop.f32.mrb[31].mxu1  ;;  %v4372_v21 = vmax.f32 %v4352_v7, 0.0  ;;  %v16084_v30 = vmax.bf16 %v4452_v31, %v15924_v60  ;;  %v4453_v42 = vsel %vm1704_vm8, %v4432_v8, %v16034_v48  ;;  %v12319_v9 = vld [vmem:[%s15944_s26 + $0x190] ss:$8 sps:$4 sm:$0xff]   ;;  %v12322_v8 = vld [vmem:[%s15944_s26 + $0x1a0] ss:$8 sps:$4 sm:$0xff]  }
 0x667   :  { %v4373_v51 = vmax.f32 %v4354_v49, 0.0  ;;  %v16097_v60 = vmax.bf16 %v4453_v42, %v15957_v14  ;;  %v12324_v59 = vld [vmem:[%s15944_s26 + $0x1a4] ss:$8 sps:$4 sm:$0xff]   ;;  %v12331_v7 = vld [vmem:[%s15944_s26 + $0x1d0] ss:$8 sps:$4 sm:$0xff]  }
 0x669   :  { %v16081_v5 = vpack.c.bf16 %v4373_v51, %v4373_v51 }
 0x689   :  { %v4511_v13 = vpop.permute.xlu1 %4510 }
 0x695   :  { %v4509_v23 = vpop.permute.xlu0 %4508  ;;  %v16036_v10 = vpop.permute.xlu1 %4524 }
 0x696   :  { %v4542_v11 = vsel %vm1857_vm11, %v4509_v23, %v4511_v13  ;;  %v12325_v23 = vld [vmem:[%s15944_s26 + $0x1b0] ss:$8 sps:$4 sm:$0xff]  }
 0x697   :  { %v4574_v33 = vmax.bf16 %v4542_v11, %v4473_v6  ;;  %v4364_v6 = vmax.f32 %v4188_v28, 0.0  ;;  %v12330_v11 = vld [vmem:[%s15944_s26 + $0x1c4] ss:$8 sps:$4 sm:$0xff]  }
 0x699   :  { %v16039_v18 = vpop.permute.xlu0 %4512  ;;  %v4527_v24 = vpop.permute.xlu1 %4526 }
 0x69a   :  { %v4543_v37 = vsel %vm1857_vm11, %v4511_v13, %v16039_v18  ;;  %v4550_v16 = vsel %vm1857_vm11, %v16036_v10, %v4527_v24  ;;  %v12327_v13 = vld [vmem:[%s15944_s26 + $0x1b4] ss:$8 sps:$4 sm:$0xff]  }
 0x69b   :  { %v4575_v35 = vmax.bf16 %v4543_v37, %v15986_v44  ;;  %v4582_v44 = vmax.bf16 %v4550_v16, %v4481_v22  ;;  %v4190_v22 = vadd.f32 %v15852_v29, %v15894_v58  ;;  %v16099_v29 = vpack.c.bf16 %v4364_v6, %v4364_v6  ;;  %v12333_v37 = vld [vmem:[%s15944_s26 + $0x1d4] ss:$8 sps:$4 sm:$0xff]   ;;  %v12342_v16 = vld [vmem:[%s15944_s26 + $0x204] ss:$8 sps:$4 sm:$0xff]  }
 0x69d   :  { %v16049_v0 = vpop.permute.xlu0 %4528  ;;  %5390 = vmatprep.mubr.bf16.mxu0 %v4575_v35  ;;  %v4416_v45 = vpop.permute.xlu1 %4415  ;;  %v4365_v58 = vmax.f32 %v4190_v22, 0.0  ;;  %v12336_v35 = vld [vmem:[%s15944_s26 + $0x1e4] ss:$8 sps:$4 sm:$0xff]  }
 0x69e   :  { %v4551_v36 = vsel %vm1857_vm11, %v4527_v24, %v16049_v0  ;;  %v4444_v27 = vsel %vm1704_vm8, %v15988_v25, %v4416_v45  ;;  %5391 = vmatmul.mubr.bf16.vlgmr.msra.gmra.mrb[32].mxu0 %v4574_v33  ;;  %v12328_v24 = vld [vmem:[%s15944_s26 + $0x1c0] ss:$8 sps:$4 sm:$0xff]   ;;  %v12339_v33 = vld [vmem:[%s15944_s26 + $0x1f4] ss:$8 sps:$4 sm:$0xff]  }
 0x69f   :  { %v16057_v53 = vmax.bf16 %v4444_v27, %v15918_v1  ;;  %v4583_v3 = vmax.bf16 %v4551_v36, %v4482_v54  ;;  %5400 = vmatpush1.bf16.msra.mxu0 %v12292_v26  ;;  %v16067_v1 = vpack.c.bf16 %v4372_v21, %v4372_v21  ;;  %v12309_v54 = vld [vmem:[%s15944_s26 + $0x154] ss:$8 sps:$4 sm:$0xff]   ;;  %v16107_v14 = vpack.c.bf16 %v4365_v58, %v4365_v58 }
 0x6a0   :  { %5401 = vmatprep.subr.bf16.mxu0 %v12297_v4  ;;  %v12351_v58 = vld [vmem:[%s15944_s26 + $0x234] ss:$8 sps:$4 sm:$0xff]  }
 0x6a1   :  { %v16061_v46 = vpop.permute.xlu0 %4417  ;;  %5554 = vmatprep.mubr.bf16.mxu1 %v4583_v3  ;;  %4514 = vrot.lane.b32.xlu1 %v16057_v53, %s12592_s23 }
 0x6a2   :  { %v4445_v25 = vsel %vm1704_vm8, %v4416_v45, %v16061_v46  ;;  %5555 = vmatmul.mubr.bf16.vlgmr.msra.gmra.mrb[32].mxu1 %v4582_v44 }
 0x6a3   :  { %v16069_v50 = vmax.bf16 %v4445_v25, %v4378_v47  ;;  %5402 = vmatpush1.bf16.msra.mxu0 %v12295_v52  ;;  %5564 = vmatpush1.bf16.msra.mxu1 %v12292_v26  ;;  %v12315_v47 = vld [vmem:[%s15944_s26 + $0x174] ss:$8 sps:$4 sm:$0xff]   ;;  %v12334_v26 = vld [vmem:[%s15944_s26 + $0x1e0] ss:$8 sps:$4 sm:$0xff]  }
 0x6a4   :  { %5403 = vmatprep.subr.bf16.mxu0 %v12300_v12  ;;  %5565 = vmatprep.subr.bf16.mxu1 %v12297_v4  ;;  %v12337_v4 = vld [vmem:[%s15944_s26 + $0x1f0] ss:$8 sps:$4 sm:$0xff]  }
 0x6a5   :  { %4516 = vrot.lane.b32.xlu0 %v16069_v50, %s12592_s23  ;;  %4435 = vrot.lane.b32.xlu1 %v16067_v1, %s12590_s21 }
 0x6a7   :  { %5404 = vmatpush1.bf16.msra.mxu0 %v12298_v17  ;;  %5566 = vmatpush1.bf16.msra.mxu1 %v12295_v52  ;;  %v12340_v52 = vld [vmem:[%s15944_s26 + $0x200] ss:$8 sps:$4 sm:$0xff]  }
 0x6a8   :  { %5405 = vmatprep.subr.bf16.mxu0 %v12303_v20  ;;  %5567 = vmatprep.subr.bf16.mxu1 %v12300_v12  ;;  %v12345_v12 = vld [vmem:[%s15944_s26 + $0x214] ss:$8 sps:$4 sm:$0xff]  }
 0x6a9   :  { %4437 = vrot.lane.b32.xlu0 %v16081_v5, %s12590_s21  ;;  %4530 = vrot.lane.b32.xlu1 %v16084_v30, %s12592_s23 }
 0x6ab   :  { %5406 = vmatpush1.bf16.msra.mxu0 %v12301_v40  ;;  %5568 = vmatpush1.bf16.msra.mxu1 %v12298_v17  ;;  %v12343_v17 = vld [vmem:[%s15944_s26 + $0x210] ss:$8 sps:$4 sm:$0xff]  }
 0x6ac   :  { %5407 = vmatprep.subr.bf16.mxu0 %v12306_v38  ;;  %5569 = vmatprep.subr.bf16.mxu1 %v12303_v20 }
 0x6ad   :  { %4532 = vrot.lane.b32.xlu0 %v16097_v60, %s12592_s23  ;;  %4419 = vrot.lane.b32.xlu1 %v16099_v29, %s12590_s21 }
 0x6af   :  { %5408 = vmatpush1.bf16.msra.mxu0 %v12304_v43  ;;  %5570 = vmatpush1.bf16.msra.mxu1 %v12301_v40 }
 0x6b0   :  { %5409 = vmatprep.subr.bf16.mxu0 %v12309_v54  ;;  %5571 = vmatprep.subr.bf16.mxu1 %v12306_v38 }
 0x6b1   :  { %4421 = vrot.lane.b32.xlu0 %v16107_v14, %s12590_s21 }
 0x6b3   :  { %5410 = vmatpush1.bf16.msra.mxu0 %v12307_v56  ;;  %5572 = vmatpush1.bf16.msra.mxu1 %v12304_v43 }
 0x6b4   :  { %5411 = vmatprep.subr.bf16.mxu0 %v12312_v32  ;;  %5573 = vmatprep.subr.bf16.mxu1 %v12309_v54  ;;  %v12355_v54 = vld [vmem:[%s15944_s26 + $0x250] ss:$8 sps:$4 sm:$0xff]  }
 0x6b7   :  { %5412 = vmatpush1.bf16.msra.mxu0 %v12310_v63  ;;  %5574 = vmatpush1.bf16.msra.mxu1 %v12307_v56  ;;  %v12360_v56 = vld [vmem:[%s15944_s26 + $0x264] ss:$8 sps:$4 sm:$0xff]  }
 0x6b8   :  { %5413 = vmatprep.subr.bf16.mxu0 %v12315_v47  ;;  %5575 = vmatprep.subr.bf16.mxu1 %v12312_v32  ;;  %v12358_v32 = vld [vmem:[%s15944_s26 + $0x260] ss:$8 sps:$4 sm:$0xff]  }
 0x6bb   :  { %5414 = vmatpush1.bf16.msra.mxu0 %v12313_v62  ;;  %5576 = vmatpush1.bf16.msra.mxu1 %v12310_v63  ;;  %v12363_v63 = vld [vmem:[%s15944_s26 + $0x274] ss:$8 sps:$4 sm:$0xff]  }
 0x6bc   :  { %5415 = vmatprep.subr.bf16.mxu0 %v12318_v19  ;;  %5577 = vmatprep.subr.bf16.mxu1 %v12315_v47  ;;  %v12361_v47 = vld [vmem:[%s15944_s26 + $0x270] ss:$8 sps:$4 sm:$0xff]  }
 0x6bf   :  { %5416 = vmatpush1.bf16.msra.mxu0 %v12316_v15  ;;  %5578 = vmatpush1.bf16.msra.mxu1 %v12313_v62  ;;  %v12366_v62 = vld [vmem:[%s15944_s26 + $0x284] ss:$8 sps:$4 sm:$0xff]  }
 0x6c0   :  { %5417 = vmatprep.subr.bf16.mxu0 %v12321_v57  ;;  %5579 = vmatprep.subr.bf16.mxu1 %v12318_v19  ;;  %v12364_v19 = vld [vmem:[%s15944_s26 + $0x280] ss:$8 sps:$4 sm:$0xff]  }
 0x6c3   :  { %5418 = vmatpush1.bf16.msra.mxu0 %v12319_v9  ;;  %5580 = vmatpush1.bf16.msra.mxu1 %v12316_v15  ;;  %v12369_v15 = vld [vmem:[%s15944_s26 + $0x294] ss:$8 sps:$4 sm:$0xff]  }
 0x6c4   :  { %5419 = vmatprep.subr.bf16.mxu0 %v12324_v59  ;;  %5581 = vmatprep.subr.bf16.mxu1 %v12321_v57  ;;  %v12367_v57 = vld [vmem:[%s15944_s26 + $0x290] ss:$8 sps:$4 sm:$0xff]  }
 0x6c7   :  { %5420 = vmatpush1.bf16.msra.mxu0 %v12322_v8  ;;  %5582 = vmatpush1.bf16.msra.mxu1 %v12319_v9  ;;  %v12372_v9 = vld [vmem:[%s15944_s26 + $0x2a4] ss:$8 sps:$4 sm:$0xff]  }
 0x6c8   :  { %5421 = vmatprep.subr.bf16.mxu0 %v12327_v13  ;;  %5583 = vmatprep.subr.bf16.mxu1 %v12324_v59  ;;  %v12370_v59 = vld [vmem:[%s15944_s26 + $0x2a0] ss:$8 sps:$4 sm:$0xff]  }
 0x6cb   :  { %5422 = vmatpush1.bf16.msra.mxu0 %v12325_v23  ;;  %5584 = vmatpush1.bf16.msra.mxu1 %v12322_v8  ;;  %v12375_v8 = vld [vmem:[%s15944_s26 + $0x2b4] ss:$8 sps:$4 sm:$0xff]  }
 0x6cc   :  { %5423 = vmatprep.subr.bf16.mxu0 %v12330_v11  ;;  %5585 = vmatprep.subr.bf16.mxu1 %v12327_v13  ;;  %v12373_v13 = vld [vmem:[%s15944_s26 + $0x2b0] ss:$8 sps:$4 sm:$0xff]  }
 0x6cf   :  { %5424 = vmatpush1.bf16.msra.mxu0 %v12328_v24  ;;  %5586 = vmatpush1.bf16.msra.mxu1 %v12325_v23  ;;  %v12378_v23 = vld [vmem:[%s15944_s26 + $0x2c4] ss:$8 sps:$4 sm:$0xff]  }
 0x6d0   :  { %5425 = vmatprep.subr.bf16.mxu0 %v12333_v37  ;;  %5587 = vmatprep.subr.bf16.mxu1 %v12330_v11  ;;  %v12376_v11 = vld [vmem:[%s15944_s26 + $0x2c0] ss:$8 sps:$4 sm:$0xff]  }
 0x6d3   :  { %5426 = vmatpush1.bf16.msra.mxu0 %v12331_v7  ;;  %5588 = vmatpush1.bf16.msra.mxu1 %v12328_v24  ;;  %v12381_v24 = vld [vmem:[%s15944_s26 + $0x2d4] ss:$8 sps:$4 sm:$0xff]  }
 0x6d4   :  { %5427 = vmatprep.subr.bf16.mxu0 %v12336_v35  ;;  %5589 = vmatprep.subr.bf16.mxu1 %v12333_v37  ;;  %v12379_v37 = vld [vmem:[%s15944_s26 + $0x2d0] ss:$8 sps:$4 sm:$0xff]  }
 0x6d7   :  { %5428 = vmatpush1.bf16.msra.mxu0 %v12334_v26  ;;  %5590 = vmatpush1.bf16.msra.mxu1 %v12331_v7  ;;  %v12384_v7 = vld [vmem:[%s15944_s26 + $0x2e4] ss:$8 sps:$4 sm:$0xff]  }
 0x6d8   :  { %5429 = vmatprep.subr.bf16.mxu0 %v12339_v33  ;;  %5591 = vmatprep.subr.bf16.mxu1 %v12336_v35  ;;  %v12382_v35 = vld [vmem:[%s15944_s26 + $0x2e0] ss:$8 sps:$4 sm:$0xff]  }
 0x6db   :  { %5430 = vmatpush1.bf16.msra.mxu0 %v12337_v4  ;;  %5592 = vmatpush1.bf16.msra.mxu1 %v12334_v26  ;;  %v12387_v26 = vld [vmem:[%s15944_s26 + $0x2f4] ss:$8 sps:$4 sm:$0xff]  }
 0x6dc   :  { %5593 = vmatprep.subr.bf16.mxu1 %v12339_v33  ;;  %5440 = vmatprep.subr.bf16.mxu0 %v12342_v16  ;;  %v12385_v33 = vld [vmem:[%s15944_s26 + $0x2f0] ss:$8 sps:$4 sm:$0xff]  }
 0x6df   :  { %5594 = vmatpush1.bf16.msra.mxu1 %v12337_v4  ;;  %v12390_v4 = vld [vmem:[%s15944_s26 + $0x304] ss:$8 sps:$4 sm:$0xff]  }
 0x6e0   :  { %5604 = vmatprep.subr.bf16.mxu1 %v12342_v16 }
 0x713   :  { %v4515_v45 = vpop.permute.xlu1 %4514 }
 0x714   :  { %v4544_v36 = vsel %vm1857_vm11, %v16039_v18, %v4515_v45 }
 0x715   :  { %v4576_v44 = vmax.bf16 %v4544_v36, %v16013_v39 }
 0x717   :  { %v16135_v27 = vpop.permute.xlu0 %4516  ;;  %v4436_v21 = vpop.permute.xlu1 %4435 }
 0x718   :  { %v4545_v49 = vsel %vm1857_vm11, %v4515_v45, %v16135_v27  ;;  %v4454_v42 = vsel %vm1704_vm8, %v16034_v48, %v4436_v21 }
 0x719   :  { %v4577_v3 = vmax.bf16 %v4545_v49, %v16057_v53  ;;  %v12348_v53 = vld [vmem:[%s15944_s26 + $0x224] ss:$8 sps:$4 sm:$0xff]  }
 0x71b   :  { %v16143_v25 = vpop.permute.xlu0 %4437  ;;  %5431 = vmatprep.mubr.bf16.mxu0 %v4577_v3  ;;  %v4531_v51 = vpop.permute.xlu1 %4530 }
 0x71c   :  { %v4455_v18 = vsel %vm1704_vm8, %v4436_v21, %v16143_v25  ;;  %5432 = vmatmul.mubr.bf16.vlgmr.msra.gmra.mrb[32].mxu0 %v4576_v44  ;;  %v4552_v39 = vsel %vm1857_vm11, %v16049_v0, %v4531_v51  ;;  %v12346_v0 = vld [vmem:[%s15944_s26 + $0x220] ss:$8 sps:$4 sm:$0xff]  }
 0x71d   :  { %v16148_v28 = vmax.bf16 %v4455_v18, %v16067_v1  ;;  %5441 = vmatpush1.bf16.msra.mxu0 %v12340_v52  ;;  %v4584_v38 = vmax.bf16 %v4552_v39, %v16024_v41  ;;  %v12349_v41 = vld [vmem:[%s15944_s26 + $0x230] ss:$8 sps:$4 sm:$0xff]  }
 0x71e   :  { %5442 = vmatprep.subr.bf16.mxu0 %v12345_v12 }
 0x71f   :  { %v16154_v31 = vpop.permute.xlu0 %4532  ;;  %4536 = vrot.lane.b32.xlu0 %v16148_v28, %s12592_s23  ;;  %v4420_v20 = vpop.permute.xlu1 %4419 }
 0x720   :  { %v4553_v6 = vsel %vm1857_vm11, %v4531_v51, %v16154_v31  ;;  %v4446_v1 = vsel %vm1704_vm8, %v16061_v46, %v4420_v20  ;;  %v16178_v46 = vmax.bf16 %v4454_v42, %v15960_v61  ;;  %v12352_v61 = vld [vmem:[%s15944_s26 + $0x240] ss:$8 sps:$4 sm:$0xff]  }
 0x721   :  { %v16163_v22 = vmax.bf16 %v4446_v1, %v16029_v55  ;;  %v4585_v40 = vmax.bf16 %v4553_v6, %v16084_v30  ;;  %5443 = vmatpush1.bf16.msra.mxu0 %v12343_v17  ;;  %v12354_v30 = vld [vmem:[%s15944_s26 + $0x244] ss:$8 sps:$4 sm:$0xff]  }
 0x722   :  { %5444 = vmatprep.subr.bf16.mxu0 %v12348_v53  ;;  %v12396_v1 = vld [vmem:[%s15944_s26 + $0x324] ss:$8 sps:$4 sm:$0xff]  }
 0x723   :  { %v16171_v43 = vpop.permute.xlu0 %4421  ;;  %5595 = vmatprep.mubr.bf16.mxu1 %v4585_v40  ;;  %4518 = vrot.lane.b32.xlu1 %v16163_v22, %s12592_s23  ;;  %v5716_v40 = vld [vmem:[%s11087_s30] sm:$0xff] }
 0x724   :  { %v4447_v55 = vsel %vm1704_vm8, %v4420_v20, %v16171_v43  ;;  %5596 = vmatmul.mubr.bf16.vlgmr.msra.gmra.mrb[32].mxu1 %v4584_v38  ;;  %v12391_v20 = vld [vmem:[%s15944_s26 + $0x310] ss:$8 sps:$4 sm:$0xff]   ;;  %v4448_v6 = vsel %vm1704_vm8, %v16171_v43, %v15998_v34  ;;  %v12399_v34 = vld [vmem:[%s15944_s26 + $0x334] ss:$8 sps:$4 sm:$0xff]   ;;  %v11289_v38 = vcombine.high %v5716_v40, %v5716_v40 }
 0x725   :  { %v16181_v48 = vmax.bf16 %v4447_v55, %v16099_v29  ;;  %5605 = vmatpush1.bf16.msra.mxu1 %v12340_v52  ;;  %5445 = vmatpush1.bf16.msra.mxu0 %v12346_v0  ;;  %v12357_v29 = vld [vmem:[%s15944_s26 + $0x254] ss:$8 sps:$4 sm:$0xff]  }
 0x726   :  { %5606 = vmatprep.subr.bf16.mxu1 %v12345_v12  ;;  %5446 = vmatprep.subr.bf16.mxu0 %v12351_v58  ;;  %v5767_v55 = vshrl.u32 %v11289_v38, 16 }
 0x727   :  { %4520 = vrot.lane.b32.xlu0 %v16181_v48, %s12592_s23  ;;  %4534 = vrot.lane.b32.xlu1 %v16178_v46, %s12592_s23 }
 0x729   :  { %5607 = vmatpush1.bf16.msra.mxu1 %v12343_v17  ;;  %5447 = vmatpush1.bf16.msra.mxu0 %v12349_v41 }
 0x72a   :  { %5608 = vmatprep.subr.bf16.mxu1 %v12348_v53  ;;  %5448 = vmatprep.subr.bf16.mxu0 %v12354_v30  ;;  %v12393_v53 = vld [vmem:[%s15944_s26 + $0x314] ss:$8 sps:$4 sm:$0xff]  }
 0x72b   :  { %4439 = vrot.lane.b32.xlu1 %v18415_v2, %s12590_s21 }
 0x72d   :  { %5609 = vmatpush1.bf16.msra.mxu1 %v12346_v0  ;;  %5449 = vmatpush1.bf16.msra.mxu0 %v12352_v61 }
 0x72e   :  { %5610 = vmatprep.subr.bf16.mxu1 %v12351_v58  ;;  %5450 = vmatprep.subr.bf16.mxu0 %v12357_v29  ;;  %v11288_v58 = vcombine.low %v5716_v40, %v5716_v40  ;;  %v12426_v40 = vld [vmem:[%s15944_s26 + $0x3c4] ss:$8 sps:$4 sm:$0xff]  }
 0x731   :  { %5611 = vmatpush1.bf16.msra.mxu1 %v12349_v41  ;;  %5451 = vmatpush1.bf16.msra.mxu0 %v12355_v54  ;;  %v5760_v41 = vshrl.u32 %v11288_v58, 16 }
 0x732   :  { %5612 = vmatprep.subr.bf16.mxu1 %v12354_v30  ;;  %5452 = vmatprep.subr.bf16.mxu0 %v12360_v56  ;;  %v12402_v30 = vld [vmem:[%s15944_s26 + $0x344] ss:$8 sps:$4 sm:$0xff]  }
 0x735   :  { %5613 = vmatpush1.bf16.msra.mxu1 %v12352_v61  ;;  %5453 = vmatpush1.bf16.msra.mxu0 %v12358_v32 }
 0x736   :  { %5614 = vmatprep.subr.bf16.mxu1 %v12357_v29  ;;  %5454 = vmatprep.subr.bf16.mxu0 %v12363_v63 }
 0x739   :  { %5615 = vmatpush1.bf16.msra.mxu1 %v12355_v54  ;;  %5455 = vmatpush1.bf16.msra.mxu0 %v12361_v47  ;;  %v16270_v54 = vpack.i.b16 %v5767_v55, %v5767_v55  ;;  %v12427_v55 = vld [vmem:[%s15944_s26 + $0x3d0] ss:$8 sps:$4 sm:$0xff]  }
 0x73a   :  { %5616 = vmatprep.subr.bf16.mxu1 %v12360_v56  ;;  %5456 = vmatprep.subr.bf16.mxu0 %v12366_v62  ;;  %v16272_v56 = vpack.i.b16 %v5760_v41, %v5760_v41 }
 0x73d   :  { %5617 = vmatpush1.bf16.msra.mxu1 %v12358_v32  ;;  %5457 = vmatpush1.bf16.msra.mxu0 %v12364_v19  ;;  %v18622_v32 = vld [vmem:[#allocation3_spill] sm:$0xff] }
 0x73e   :  { %5618 = vmatprep.subr.bf16.mxu1 %v12363_v63  ;;  %5458 = vmatprep.subr.bf16.mxu0 %v12369_v15 }
 0x741   :  { %5619 = vmatpush1.bf16.msra.mxu1 %v12361_v47  ;;  %5459 = vmatpush1.bf16.msra.mxu0 %v12367_v57 }
 0x742   :  { %5620 = vmatprep.subr.bf16.mxu1 %v12366_v62  ;;  %5460 = vmatprep.subr.bf16.mxu0 %v12372_v9  ;;  %v12400_v62 = vld [vmem:[%s15944_s26 + $0x340] ss:$8 sps:$4 sm:$0xff]  }
 0x745   :  { %5621 = vmatpush1.bf16.msra.mxu1 %v12364_v19  ;;  %5461 = vmatpush1.bf16.msra.mxu0 %v12370_v59  ;;  %v12405_v19 = vld [vmem:[%s15944_s26 + $0x354] ss:$8 sps:$4 sm:$0xff]  }
 0x746   :  { %5622 = vmatprep.subr.bf16.mxu1 %v12369_v15  ;;  %5462 = vmatprep.subr.bf16.mxu0 %v12375_v8  ;;  %v5773_v15 = vrot.slane %v16270_v54, %v18622_v32 }
 0x749   :  { %5623 = vmatpush1.bf16.msra.mxu1 %v12367_v57  ;;  %5463 = vmatpush1.bf16.msra.mxu0 %v12373_v13  ;;  %v5766_v57 = vrot.slane %v16272_v56, %v18622_v32 }
 0x74a   :  { %5624 = vmatprep.subr.bf16.mxu1 %v12372_v9  ;;  %5464 = vmatprep.subr.bf16.mxu0 %v12378_v23  ;;  %v12403_v9 = vld [vmem:[%s15944_s26 + $0x350] ss:$8 sps:$4 sm:$0xff]  }
 0x74d   :  { %5625 = vmatpush1.bf16.msra.mxu1 %v12370_v59  ;;  %5465 = vmatpush1.bf16.msra.mxu0 %v12376_v11  ;;  %v12408_v59 = vld [vmem:[%s15944_s26 + $0x364] ss:$8 sps:$4 sm:$0xff]  }
 0x74e   :  { %5626 = vmatprep.subr.bf16.mxu1 %v12375_v8  ;;  %5466 = vmatprep.subr.bf16.mxu0 %v12381_v24  ;;  %v18623_v8 = vld [vmem:[#allocation2_spill] sm:$0xff] }
 0x751   :  { %5627 = vmatpush1.bf16.msra.mxu1 %v12373_v13  ;;  %5467 = vmatpush1.bf16.msra.mxu0 %v12379_v37 }
 0x752   :  { %5628 = vmatprep.subr.bf16.mxu1 %v12378_v23  ;;  %5468 = vmatprep.subr.bf16.mxu0 %v12384_v7 }
 0x755   :  { %5629 = vmatpush1.bf16.msra.mxu1 %v12376_v11  ;;  %5469 = vmatpush1.bf16.msra.mxu0 %v12382_v35  ;;  %v12406_v11 = vld [vmem:[%s15944_s26 + $0x360] ss:$8 sps:$4 sm:$0xff]  }
 0x756   :  { %5630 = vmatprep.subr.bf16.mxu1 %v12381_v24  ;;  %5470 = vmatprep.subr.bf16.mxu0 %v12387_v26  ;;  %v12411_v24 = vld [vmem:[%s15944_s26 + $0x374] ss:$8 sps:$4 sm:$0xff]  }
 0x759   :  { %5631 = vmatpush1.bf16.msra.mxu1 %v12379_v37  ;;  %5471 = vmatpush1.bf16.msra.mxu0 %v12385_v33 }
 0x75a   :  { %5632 = vmatprep.subr.bf16.mxu1 %v12384_v7  ;;  %5481 = vmatprep.subr.bf16.mxu0 %v12390_v4  ;;  %v5861_v7 = vrot.slane %v16270_v54, %v18623_v8 }
 0x75d   :  { %5633 = vmatpush1.bf16.msra.mxu1 %v12382_v35  ;;  %v5857_v35 = vrot.slane %v16272_v56, %v18623_v8 }
 0x75e   :  { %5634 = vmatprep.subr.bf16.mxu1 %v12387_v26 }
 0x761   :  { %5635 = vmatpush1.bf16.msra.mxu1 %v12385_v33  ;;  %v12409_v33 = vld [vmem:[%s15944_s26 + $0x370] ss:$8 sps:$4 sm:$0xff]  }
 0x762   :  { %5645 = vmatprep.subr.bf16.mxu1 %v12390_v4  ;;  %v12414_v4 = vld [vmem:[%s15944_s26 + $0x384] ss:$8 sps:$4 sm:$0xff]  }
 0x791   :  { %v16215_v16 = vpop.permute.xlu0 %4536 }
 0x795   :  { %v4519_v45 = vpop.permute.xlu1 %4518 }
 0x796   :  { %v4546_v36 = vsel %vm1857_vm11, %v16135_v27, %v4519_v45  ;;  %v12388_v27 = vld [vmem:[%s15944_s26 + $0x300] ss:$8 sps:$4 sm:$0xff]  }
 0x797   :  { %v4578_v17 = vmax.bf16 %v4546_v36, %v16069_v50 }
 0x799   :  { %v16219_v21 = vpop.permute.xlu0 %4520  ;;  %v4535_v49 = vpop.permute.xlu1 %4534 }
 0x79a   :  { %v4547_v3 = vsel %vm1857_vm11, %v4519_v45, %v16219_v21  ;;  %v4554_v52 = vsel %vm1857_vm11, %v16154_v31, %v4535_v49  ;;  %v4555_v44 = vsel %vm1857_vm11, %v4535_v49, %v16215_v16  ;;  %v16308_v45 = vpack.i.b16 %v11289_v38, %v11289_v38  ;;  %v12424_v38 = vld [vmem:[%s15944_s26 + $0x3c0] ss:$8 sps:$4 sm:$0xff]  }
 0x79b   :  { %v4586_v12 = vmax.bf16 %v4554_v52, %v16097_v60  ;;  %v4579_v51 = vmax.bf16 %v4547_v3, %v16163_v22  ;;  %v4587_v18 = vmax.bf16 %v4555_v44, %v16178_v46  ;;  %v5717_v22 = vld [vmem:[%s11087_s30 + $0x8] sm:$0xff]  ;;  %v12397_v46 = vld [vmem:[%s15944_s26 + $0x330] ss:$8 sps:$4 sm:$0xff]   ;;  %v16316_v3 = vpack.i.b16 %v11288_v58, %v11288_v58  ;;  %v12417_v44 = vld [vmem:[%s15944_s26 + $0x394] ss:$8 sps:$4 sm:$0xff]   ;;  %s17065_s30 = sld [smem:[%s18054_s0 + %s12612_s27]]  }
 0x79c   :  { %v11291_v0 = vcombine.high %v5717_v22, %v5717_v22  ;;  %v11290_v42 = vcombine.low %v5717_v22, %v5717_v22  ;;  %v12412_v52 = vld [vmem:[%s15944_s26 + $0x380] ss:$8 sps:$4 sm:$0xff]   ;;  %v12421_v22 = vld [vmem:[%s15944_s26 + $0x3b0] ss:$8 sps:$4 sm:$0xff]   ;;  %v12429_v58 = vld [vmem:[%s15944_s26 + $0x3d4] ss:$8 sps:$4 sm:$0xff]  }
 0x79d   :  { %5472 = vmatprep.mubr.bf16.mxu0 %v4579_v51  ;;  %5636 = vmatprep.mubr.bf16.mxu1 %v4587_v18  ;;  %v16233_v39 = vpop.permute.xlu1 %4439  ;;  %v5816_v51 = vrot.slane %v16316_v3, %v18623_v8  ;;  %v12415_v18 = vld [vmem:[%s15944_s26 + $0x390] ss:$8 sps:$4 sm:$0xff]  }
 0x79e   :  { %18620 = vst [vmem:[#allocation40_spill] sm:$0xff] %v16233_v39  ;;  %5473 = vmatmul.mubr.bf16.vlgmr.msra.gmra.mrb[32].mxu0 %v4578_v17  ;;  %5637 = vmatmul.mubr.bf16.vlgmr.msra.gmra.mrb[32].mxu1 %v4586_v12  ;;  %v16240_v60 = vmax.bf16 %v18415_v2, %v16233_v39  ;;  %v4456_v50 = vsel %vm1704_vm8, %v16143_v25, %v16233_v39  ;;  %v12394_v25 = vld [vmem:[%s15944_s26 + $0x320] ss:$8 sps:$4 sm:$0xff]   ;;  %v5781_v43 = vshrl.u32 %v11291_v0, 16 }
 0x79f   :  { %v16246_v31 = vmax.bf16 %v4456_v50, %v16081_v5  ;;  %5646 = vmatpush1.bf16.msra.mxu1 %v12388_v27  ;;  %5482 = vmatpush1.bf16.msra.mxu0 %v12388_v27  ;;  %v16258_v5 = vmax.bf16 %v4448_v6, %v16107_v14  ;;  %v5774_v14 = vshrl.u32 %v11290_v42, 16  ;;  %v16296_v37 = vpack.i.b16 %v11291_v0, %v11291_v0  ;;  %v12420_v27 = vld [vmem:[%s15944_s26 + $0x3a4] ss:$8 sps:$4 sm:$0xff]   ;;  %v12423_v6 = vld [vmem:[%s15944_s26 + $0x3b4] ss:$8 sps:$4 sm:$0xff]  }
 0x7a0   :  { %18621 = vst [vmem:[#allocation57_spill] sm:$0xff] %v16240_v60  ;;  %4540 = vrot.lane.b32.xlu1 %v16240_v60, %s12592_s23  ;;  %5647 = vmatprep.subr.bf16.mxu1 %v12393_v53  ;;  %v16266_v61 = vpack.i.b16 %v5781_v43, %v5781_v43  ;;  %v16304_v26 = vpack.i.b16 %v11290_v42, %v11290_v42  ;;  %v18624_v17 = vld [vmem:[#allocation6_spill] sm:$0xff] }
 0x7a1   :  { %4538 = vrot.lane.b32.xlu0 %v16246_v31, %s12592_s23  ;;  %5483 = vmatprep.subr.bf16.mxu0 %v12393_v53  ;;  %v16268_v29 = vpack.i.b16 %v5774_v14, %v5774_v14  ;;  %v5828_v36 = vrot.slane %v16296_v37, %v18623_v8  ;;  %v5820_v12 = vrot.slane %v16308_v45, %v18623_v8 }
 0x7a2   :  { %v5787_v63 = vrot.slane %v16266_v61, %v18622_v32  ;;  %v5869_v13 = vrot.slane %v16266_v61, %v18623_v8  ;;  %v5824_v49 = vrot.slane %v16304_v26, %v18623_v8  ;;  %v5911_v53 = vrot.slane %v16296_v37, %v18624_v17 }
 0x7a3   :  { %5648 = vmatpush1.bf16.msra.mxu1 %v12391_v20  ;;  %5484 = vmatpush1.bf16.msra.mxu0 %v12391_v20  ;;  %v5780_v47 = vrot.slane %v16268_v29, %v18622_v32  ;;  %v5865_v23 = vrot.slane %v16268_v29, %v18623_v8  ;;  %v5907_v50 = vrot.slane %v16304_v26, %v18624_v17  ;;  %v12418_v20 = vld [vmem:[%s15944_s26 + $0x3a0] ss:$8 sps:$4 sm:$0xff]  }
 0x7a4   :  { %5649 = vmatprep.subr.bf16.mxu1 %v12396_v1  ;;  %5485 = vmatprep.subr.bf16.mxu0 %v12396_v1  ;;  %v5903_v1 = vrot.slane %v16308_v45, %v18624_v17  ;;  %v5953_v41 = vrot.slane %v16266_v61, %v18624_v17 }
 0x7a5   :  { %4522 = vrot.lane.b32.xlu0 %v16258_v5, %s12592_s23  ;;  %5796 = vrot.lane.b32.xlu1 %v5780_v47, %s12585_s16  ;;  %v12435_v47 = vld [vmem:[%s15944_s26 + $0x3f4] ss:$8 sps:$4 sm:$0xff]  }
 0x7a7   :  { %5650 = vmatpush1.bf16.msra.mxu1 %v12394_v25  ;;  %5486 = vmatpush1.bf16.msra.mxu0 %v12394_v25  ;;  %v5899_v25 = vrot.slane %v16316_v3, %v18624_v17 }
 0x7a8   :  { %5651 = vmatprep.subr.bf16.mxu1 %v12399_v34  ;;  %5487 = vmatprep.subr.bf16.mxu0 %v12399_v34  ;;  %v18625_v34 = vld [vmem:[#allocation7_spill] sm:$0xff] }
 0x7a9   :  { %5798 = vrot.lane.b32.xlu0 %v5787_v63, %s12585_s16  ;;  %5792 = vrot.lane.b32.xlu1 %v5766_v57, %s12585_s16  ;;  %v5994_v0 = vrot.slane %v16296_v37, %v18625_v34  ;;  %v5990_v42 = vrot.slane %v16304_v26, %v18625_v34  ;;  %v5986_v43 = vrot.slane %v16308_v45, %v18625_v34  ;;  %v12430_v63 = vld [vmem:[%s15944_s26 + $0x3e0] ss:$8 sps:$4 sm:$0xff]  }
 0x7aa   :  { %v5982_v14 = vrot.slane %v16316_v3, %v18625_v34 }
 0x7ab   :  { %5652 = vmatpush1.bf16.msra.mxu1 %v12397_v46  ;;  %5488 = vmatpush1.bf16.msra.mxu0 %v12397_v46  ;;  %v12432_v46 = vld [vmem:[%s15944_s26 + $0x3e4] ss:$8 sps:$4 sm:$0xff]  }
 0x7ac   :  { %5653 = vmatprep.subr.bf16.mxu1 %v12402_v30  ;;  %5489 = vmatprep.subr.bf16.mxu0 %v12402_v30  ;;  %v5949_v30 = vrot.slane %v16268_v29, %v18624_v17 }
 0x7ad   :  { %5794 = vrot.lane.b32.xlu0 %v5773_v15, %s12585_s16  ;;  %5878 = vrot.lane.b32.xlu1 %v5865_v23, %s12601_s1  ;;  %v12433_v15 = vld [vmem:[%s15944_s26 + $0x3f0] ss:$8 sps:$4 sm:$0xff]   ;;  %s11065_s26 = sld [smem:[%s18054_s0 + %s12610_s11]]  }
 0x7af   :  { %5654 = vmatpush1.bf16.msra.mxu1 %v12400_v62  ;;  %5490 = vmatpush1.bf16.msra.mxu0 %v12400_v62  ;;  %v5945_v62 = vrot.slane %v16270_v54, %v18624_v17 }
 0x7b0   :  { %5655 = vmatprep.subr.bf16.mxu1 %v12405_v19  ;;  %5491 = vmatprep.subr.bf16.mxu0 %v12405_v19  ;;  %v5941_v19 = vrot.slane %v16272_v56, %v18624_v17 }
 0x7b1   :  { %5880 = vrot.lane.b32.xlu0 %v5869_v13, %s12601_s1  ;;  %5874 = vrot.lane.b32.xlu1 %v5857_v35, %s12601_s1 }
 0x7b3   :  { %5656 = vmatpush1.bf16.msra.mxu1 %v12403_v9  ;;  %5492 = vmatpush1.bf16.msra.mxu0 %v12403_v9 }
 0x7b4   :  { %5657 = vmatprep.subr.bf16.mxu1 %v12408_v59  ;;  %5493 = vmatprep.subr.bf16.mxu0 %v12408_v59 }
 0x7b5   :  { %5876 = vrot.lane.b32.xlu0 %v5861_v7, %s12601_s1  ;;  %5837 = vrot.lane.b32.xlu1 %v5824_v49, %s12584_s15 }
 0x7b7   :  { %5658 = vmatpush1.bf16.msra.mxu1 %v12406_v11  ;;  %5494 = vmatpush1.bf16.msra.mxu0 %v12406_v11 }
 0x7b8   :  { %5659 = vmatprep.subr.bf16.mxu1 %v12411_v24  ;;  %5495 = vmatprep.subr.bf16.mxu0 %v12411_v24 }
 0x7b9   :  { %5839 = vrot.lane.b32.xlu0 %v5828_v36, %s12584_s15  ;;  %5833 = vrot.lane.b32.xlu1 %v5816_v51, %s12584_s15  ;;  %v6035_v51 = vrot.slane %v16266_v61, %v18625_v34 }
 0x7bb   :  { %5660 = vmatpush1.bf16.msra.mxu1 %v12409_v33  ;;  %5496 = vmatpush1.bf16.msra.mxu0 %v12409_v33 }
 0x7bc   :  { %5661 = vmatprep.subr.bf16.mxu1 %v12414_v4  ;;  %5497 = vmatprep.subr.bf16.mxu0 %v12414_v4 }
 0x7bd   :  { %5835 = vrot.lane.b32.xlu0 %v5820_v12, %s12584_s15  ;;  %5920 = vrot.lane.b32.xlu1 %v5907_v50, %s12602_s2 }
 0x7bf   :  { %5662 = vmatpush1.bf16.msra.mxu1 %v12412_v52  ;;  %5498 = vmatpush1.bf16.msra.mxu0 %v12412_v52 }
 0x7c0   :  { %5663 = vmatprep.subr.bf16.mxu1 %v12417_v44  ;;  %5499 = vmatprep.subr.bf16.mxu0 %v12417_v44 }
 0x7c1   :  { %5922 = vrot.lane.b32.xlu0 %v5911_v53, %s12602_s2  ;;  %5916 = vrot.lane.b32.xlu1 %v5899_v25, %s12602_s2 }
 0x7c3   :  { %5664 = vmatpush1.bf16.msra.mxu1 %v12415_v18  ;;  %5500 = vmatpush1.bf16.msra.mxu0 %v12415_v18  ;;  %v6023_v18 = vrot.slane %v16272_v56, %v18625_v34 }
 0x7c4   :  { %5665 = vmatprep.subr.bf16.mxu1 %v12420_v27  ;;  %5501 = vmatprep.subr.bf16.mxu0 %v12420_v27 }
 0x7c5   :  { %5918 = vrot.lane.b32.xlu0 %v5903_v1, %s12602_s2  ;;  %6003 = vrot.lane.b32.xlu1 %v5990_v42, %s12583_s14 }
 0x7c7   :  { %5666 = vmatpush1.bf16.msra.mxu1 %v12418_v20  ;;  %5502 = vmatpush1.bf16.msra.mxu0 %v12418_v20 }
 0x7c8   :  { %5667 = vmatprep.subr.bf16.mxu1 %v12423_v6  ;;  %5503 = vmatprep.subr.bf16.mxu0 %v12423_v6 }
 0x7c9   :  { %6005 = vrot.lane.b32.xlu0 %v5994_v0, %s12583_s14  ;;  %5999 = vrot.lane.b32.xlu1 %v5982_v14, %s12583_s14 }
 0x7cb   :  { %5668 = vmatpush1.bf16.msra.mxu1 %v12421_v22  ;;  %5504 = vmatpush1.bf16.msra.mxu0 %v12421_v22 }
 0x7cc   :  { %5669 = vmatprep.subr.bf16.mxu1 %v12426_v40  ;;  %5505 = vmatprep.subr.bf16.mxu0 %v12426_v40 }
 0x7cd   :  { %6001 = vrot.lane.b32.xlu0 %v5986_v43, %s12583_s14  ;;  %5962 = vrot.lane.b32.xlu1 %v5949_v30, %s12586_s17  ;;  %s12603_s14 = smov 17  }
 0x7ce   :  { %s16400_s5 = sld [smem:[%s18054_s0 + %s12603_s14]]  }
 0x7cf   :  { %5670 = vmatpush1.bf16.msra.mxu1 %v12424_v38  ;;  %5506 = vmatpush1.bf16.msra.mxu0 %v12424_v38 }
 0x7d0   :  { %5671 = vmatprep.subr.bf16.mxu1 %v12429_v58  ;;  %5507 = vmatprep.subr.bf16.mxu0 %v12429_v58 }
 0x7d1   :  { %5964 = vrot.lane.b32.xlu0 %v5953_v41, %s12586_s17  ;;  %5958 = vrot.lane.b32.xlu1 %v5941_v19, %s12586_s17 }
 0x7d3   :  { %5672 = vmatpush1.bf16.msra.mxu1 %v12427_v55  ;;  %5508 = vmatpush1.bf16.msra.mxu0 %v12427_v55 }
 0x7d4   :  { %5673 = vmatprep.subr.bf16.mxu1 %v12432_v46  ;;  %5509 = vmatprep.subr.bf16.mxu0 %v12432_v46 }
 0x7d5   :  { %5960 = vrot.lane.b32.xlu0 %v5945_v62, %s12586_s17 }
 0x7d7   :  { %5674 = vmatpush1.bf16.msra.mxu1 %v12430_v63  ;;  %5510 = vmatpush1.bf16.msra.mxu0 %v12430_v63 }
 0x7d8   :  { %5675 = vmatprep.subr.bf16.mxu1 %v12435_v47  ;;  %5511 = vmatprep.subr.bf16.mxu0 %v12435_v47 }
 0x7db   :  { %5676 = vmatpush1.bf16.msra.mxu1 %v12433_v15  ;;  %5512 = vmatpush1.bf16.msra.mxu0 %v12433_v15 }
 0x812   :  { %v4541_v57 = vpop.permute.xlu1 %4540 }
 0x813   :  { %v4539_v9 = vpop.permute.xlu0 %4538 }
 0x814   :  { %v4556_v59 = vsel %vm1857_vm11, %v16215_v16, %v4539_v9  ;;  %v4557_v13 = vsel %vm1857_vm11, %v4539_v9, %v4541_v57  ;;  %v6031_v16 = vrot.slane %v16268_v29, %v18625_v34 }
 0x815   :  { %v4588_v23 = vmax.bf16 %v4556_v59, %v16148_v28  ;;  %v4589_v11 = vmax.bf16 %v4557_v13, %v16246_v31  ;;  %v6027_v28 = vrot.slane %v16270_v54, %v18625_v34 }
 0x816   :  { %6044 = vrot.lane.b32.xlu0 %v6031_v16, %s12582_s10 }
 0x817   :  { %5677 = vmatprep.mubr.bf16.mxu1 %v4589_v11  ;;  %v4523_v24 = vpop.permute.xlu0 %4522  ;;  %6042 = vrot.lane.b32.xlu1 %v6027_v28, %s12582_s10  ;;  %v16412_v27 = vpop.permute.xlu1 %5796 }
 0x818   :  { %v4548_v7 = vsel %vm1857_vm11, %v16219_v21, %v4523_v24  ;;  %v4549_v35 = vsel %vm1857_vm11, %v4523_v24, %v16036_v10  ;;  %5678 = vmatmul.mubr.bf16.vlgmr.msra.gmra.mrb[32].mxu1 %v4588_v23 }
 0x819   :  { %v4580_v33 = vmax.bf16 %v4548_v7, %v16181_v48  ;;  %v4581_v4 = vmax.bf16 %v4549_v35, %v16258_v5  ;;  %6406 = vmatprep.mubr.bf16.mxu1 %v18415_v2 }
 0x81b   :  { %5513 = vmatprep.mubr.bf16.mxu0 %v4581_v4  ;;  %v16414_v53 = vpop.permute.xlu0 %5798  ;;  %v16416_v50 = vpop.permute.xlu1 %5792 }
 0x81c   :  { %5514 = vmatmul.mubr.bf16.vlgmr.msra.gmra.mrb[32].mxu0 %v4580_v33  ;;  %18626 = vst [vmem:[#allocation12_spill] sm:$0xff] %v16416_v50 }
 0x81d   :  { %6363 = vmatprep.mubr.bf16.mxu0 %v18415_v2 }
 0x81f   :  { %v16418_v20 = vpop.permute.xlu0 %5794  ;;  %v16420_v6 = vpop.permute.xlu1 %5878 }
 0x823   :  { %v16422_v61 = vpop.permute.xlu0 %5880  ;;  %v16424_v1 = vpop.permute.xlu1 %5874 }
 0x824   :  { %18627 = vst [vmem:[#allocation13_spill] sm:$0xff] %v16424_v1 }
 0x827   :  { %v16426_v25 = vpop.permute.xlu0 %5876  ;;  %v16428_v56 = vpop.permute.xlu1 %5837 }
 0x82b   :  { %v16430_v22 = vpop.permute.xlu0 %5839  ;;  %v16432_v40 = vpop.permute.xlu1 %5833 }
 0x82c   :  { %18628 = vst [vmem:[#allocation37_spill] sm:$0xff] %v16432_v40 }
 0x82f   :  { %v16434_v0 = vpop.permute.xlu0 %5835  ;;  %v16436_v42 = vpop.permute.xlu1 %5920 }
 0x833   :  { %v16438_v38 = vpop.permute.xlu0 %5922  ;;  %v16440_v58 = vpop.permute.xlu1 %5916 }
 0x834   :  { %18629 = vst [vmem:[#allocation14_spill] sm:$0xff] %v16440_v58 }
 0x837   :  { %v16442_v43 = vpop.permute.xlu0 %5918  ;;  %v16444_v14 = vpop.permute.xlu1 %6003 }
 0x83b   :  { %v16446_v55 = vpop.permute.xlu0 %6005  ;;  %v16448_v46 = vpop.permute.xlu1 %5999 }
 0x83c   :  { %18630 = vst [vmem:[#allocation67_spill] sm:$0xff] %v16448_v46 }
 0x83f   :  { %v16450_v41 = vpop.permute.xlu0 %6001  ;;  %v16452_v30 = vpop.permute.xlu1 %5962 }
 0x843   :  { %v16454_v63 = vpop.permute.xlu0 %5964  ;;  %v16456_v47 = vpop.permute.xlu1 %5958 }
 0x844   :  { %18631 = vst [vmem:[#allocation19_spill] sm:$0xff] %v16456_v47 }
 0x847   :  { %v16458_v62 = vpop.permute.xlu0 %5960 }
 0x888   :  { %v16462_v15 = vpop.permute.xlu0 %6044 }
 0x889   :  { %v16460_v19 = vpop.permute.xlu1 %6042 }
 0x8eb   :  { %v5679_v10 = vpop.f32.mrb[32].mxu1 }
 0x8ec   :  { %v5681_v48 = vpop.f32.mrb[33].mxu1  ;;  %v5688_v44 = vpack.c.bf16 %v5679_v10, %v5679_v10  ;;  %v16494_v10 = vsel %vm614_vm0, %v16416_v50, %v16418_v20 }
 0x8ed   :  { %v5683_v21 = vpop.f32.mrb[34].mxu1  ;;  %v5689_v12 = vpack.c.bf16 %v5681_v48, %v5681_v48  ;;  %18632 = vst [vmem:[#allocation54_spill] sm:$0xff] %v16494_v10  ;;  %v16499_v48 = vsel %vm18633_vm4, %v16432_v40, %v16434_v0  ;;  %vm18640_vm4 = vcmask 277504  }
 0x8ee   :  { %v5684_v31 = vpop.f32.mrb[35].mxu1  ;;  %18634 = vst [vmem:[#allocation23_spill] sm:$0xff] %v16499_v48 }
 0x8ef   :  { %v5515_v5 = vpop.f32.mrb[32].mxu0 }
 0x8f0   :  { %v5686_v54 = vpack.c.bf16 %v5515_v5, %v5515_v5  ;;  %v5517_v36 = vpop.f32.mrb[33].mxu0 }
 0x8f1   :  { %v5687_v49 = vpack.c.bf16 %v5517_v36, %v5517_v36  ;;  %v5519_v29 = vpop.f32.mrb[34].mxu0  ;;  %v16515_v36 = vsel %vm938_vm2, %v16456_v47, %v16458_v62 }
 0x8f2   :  { %5694 = vrot.lane.b32.xlu1 %v5686_v54, %s12603_s14  ;;  %v5520_v52 = vpop.f32.mrb[35].mxu0  ;;  %v16510_v54 = vsel %vm5882_vm5, %v16424_v1, %v16426_v25  ;;  %18636 = vst [vmem:[#allocation24_spill] sm:$0xff] %v16515_v36 }
 0x8f3   :  { %5696 = vrot.lane.b32.xlu0 %v5687_v49, %s12603_s14  ;;  %18635 = vst [vmem:[#allocation34_spill] sm:$0xff] %v16510_v54 }
 0x8f6   :  { %5698 = vrot.lane.b32.xlu1 %v5688_v44, %s12603_s14 }
 0x8f7   :  { %5700 = vrot.lane.b32.xlu0 %v5689_v12, %s12603_s14  ;;  %v16526_v12 = vsel %vm5924_vm3, %v16440_v58, %v16442_v43 }
 0x8f8   :  { %18637 = vst [vmem:[#allocation59_spill] sm:$0xff] %v16526_v12 }
 0x8fa   :  { %6046 = vrot.lane.b32.xlu1 %v6035_v51, %s12582_s10 }
 0x8fb   :  { %6040 = vrot.lane.b32.xlu0 %v6023_v18, %s12582_s10  ;;  %s12604_s10 = smov 111  }
 0x964   :  { %v5695_v57 = vpop.permute.xlu1 %5694 }
 0x965   :  { %v16465_v9 = vsel %vm5702_vm14, 0, %v5695_v57  ;;  %v5697_v59 = vpop.permute.xlu0 %5696 }
 0x966   :  { %6131 = vrot.lane.b32.xlu0 %v16465_v9, %s12604_s10  ;;  %v5808_v13 = vmul.bf16 %v16416_v50, %v16465_v9  ;;  %v5891_v11 = vmul.bf16 %v16424_v1, %v16465_v9  ;;  %v16474_v24 = vsel %vm5702_vm14, %v5695_v57, %v5697_v59  ;;  %v5849_v35 = vmul.bf16 %v16432_v40, %v16465_v9 }
 0x967   :  { %v5933_v33 = vmul.bf16 %v16440_v58, %v16465_v9  ;;  %v5974_v28 = vmul.bf16 %v16456_v47, %v16465_v9  ;;  %v6015_v16 = vmul.bf16 %v16448_v46, %v16465_v9  ;;  %v5850_v31 = vmul.bf16 %v16499_v48, %v16474_v24 }
 0x968   :  { %v6066_v23 = vrot.slane %v5808_v13, 4  ;;  %v6109_v7 = vrot.slane %v5891_v11, 4  ;;  %v5809_v5 = vmul.bf16 %v16494_v10, %v16474_v24  ;;  %v5975_v49 = vmul.bf16 %v16515_v36, %v16474_v24  ;;  %v5699_v44 = vpop.permute.xlu1 %5698 }
 0x969   :  { %v6151_v4 = vrot.slane %v5933_v33, 4  ;;  %v6195_v21 = vrot.slane %v6015_v16, 4  ;;  %v5892_v52 = vmul.bf16 %v16510_v54, %v16474_v24  ;;  %v5934_v18 = vmul.bf16 %v16526_v12, %v16474_v24  ;;  %v5701_v13 = vpop.permute.xlu0 %5700 }
 0x96a   :  { %6071 = vrot.lane.b32.xlu1 %v6066_v23, %s12590_s21  ;;  %6133 = vrot.lane.b32.xlu0 %v16474_v24, %s12604_s10  ;;  %v6067_v29 = vrot.slane %v5809_v5, 4  ;;  %v16531_v57 = vsel %vm5702_vm14, %v5697_v59, %v5699_v44  ;;  %v16539_v23 = vsel %vm239_vm1, %v16448_v46, %v16450_v41  ;;  %v16552_v59 = vsel %vm18639_vm7, %v16434_v0, %v16428_v56 }
 0x96b   :  { %v6110_v51 = vrot.slane %v5892_v52, 4  ;;  %18638 = vst [vmem:[#allocation36_spill] sm:$0xff] %v16539_v23  ;;  %v6152_v11 = vrot.slane %v5934_v18, 4  ;;  %v16574_v0 = vsel %vm18640_vm4, %v16460_v19, %v16462_v15  ;;  %v16585_v5 = vsel %vm5882_vm5, %v16426_v25, %v16420_v6 }
 0x96c   :  { %18641 = vst [vmem:[#allocation39_spill] sm:$0xff] %v16574_v0  ;;  %v16603_v25 = vsel %vm614_vm0, %v16418_v20, %v16412_v27  ;;  %v16741_v36 = vrot.slane %v16308_v45, %v18622_v32  ;;  %v16745_v58 = vrot.slane %v16316_v3, %v18622_v32 }
 0x96d   :  { %v5810_v20 = vmul.bf16 %v16603_v25, %v16531_v57 }
 0x96e   :  { %6114 = vrot.lane.b32.xlu1 %v6109_v7, %s12605_s6  ;;  %6090 = vrot.lane.b32.xlu0 %v5849_v35, %s12591_s22  ;;  %v6016_v7 = vmul.bf16 %v16539_v23, %v16474_v24  ;;  %v16544_v35 = vsel %vm5702_vm14, %v5701_v13, 0  ;;  %v5757_v40 = vmul.bf16 %v16741_v36, %v16474_v24  ;;  %v5756_v45 = vmul.bf16 %v16745_v58, %v16465_v9 }
 0x970   :  { %v6196_v33 = vrot.slane %v6016_v7, 4  ;;  %v6068_v7 = vrot.slane %v5810_v20, 4 }
 0x972   :  { %6156 = vrot.lane.b32.xlu1 %v6151_v4, %s12606_s7  ;;  %6176 = vrot.lane.b32.xlu0 %v5974_v28, %s12592_s23  ;;  %v5851_v4 = vmul.bf16 %v16552_v59, %v16531_v57  ;;  %v16561_v28 = vsel %vm938_vm2, %v16458_v62, %v16452_v30  ;;  %v5853_v62 = vmul.bf16 %v16430_v22, %v16544_v35 }
 0x973   :  { %v5976_v16 = vmul.bf16 %v16561_v28, %v16531_v57 }
 0x976   :  { %6200 = vrot.lane.b32.xlu1 %v6195_v21, %s12593_s24  ;;  %6092 = vrot.lane.b32.xlu0 %v5850_v31, %s12591_s22  ;;  %v16566_v21 = vsel %vm5702_vm14, %v5699_v44, %v5701_v13  ;;  %v6058_v31 = vmul.bf16 %v16574_v0, %v16531_v57  ;;  %v5893_v44 = vmul.bf16 %v16585_v5, %v16531_v57 }
 0x977   :  { %v16760_v0 = vrot.slane %v16304_v26, %v18622_v32 }
 0x978   :  { %v6111_v18 = vrot.slane %v5893_v44, 4 }
 0x97a   :  { %6178 = vrot.lane.b32.xlu0 %v5975_v49, %s12592_s23  ;;  %6073 = vrot.lane.b32.xlu1 %v6067_v29, %s12590_s21  ;;  %v16590_v49 = vsel %vm18639_vm7, %v16428_v56, %v16430_v22  ;;  %v5978_v29 = vmul.bf16 %v16454_v63, %v16544_v35  ;;  %v16608_v56 = vsel %vm5924_vm3, %v16442_v43, %v16436_v42  ;;  %vm6141_vm7 = vcmask 908288  }
 0x97b   :  { %v5852_v52 = vmul.bf16 %v16590_v49, %v16566_v21  ;;  %v16626_v43 = vsel %vm239_vm1, %v16450_v41, %v16444_v14  ;;  %v16642_v41 = vsel %vm5882_vm5, %v16420_v6, %v16422_v61 }
 0x97e   :  { %6116 = vrot.lane.b32.xlu0 %v6110_v51, %s12605_s6  ;;  %6135 = vrot.lane.b32.xlu1 %v16531_v57, %s12604_s10  ;;  %v16613_v51 = vsel %vm938_vm2, %v16452_v30, %v16454_v63 }
 0x97f   :  { %v5977_v13 = vmul.bf16 %v16613_v51, %v16566_v21 }
 0x982   :  { %6158 = vrot.lane.b32.xlu0 %v6152_v11, %s12606_s7  ;;  %6139 = vrot.lane.b32.xlu1 %v16544_v35, %s12604_s10  ;;  %v5935_v11 = vmul.bf16 %v16608_v56, %v16531_v57 }
 0x984   :  { %v6153_v30 = vrot.slane %v5935_v11, 4  ;;  %v16664_v11 = vsel %vm239_vm1, %v16444_v14, %v16446_v55  ;;  %v16676_v14 = vpop.permute.xlu0 %6040 }
 0x985   :  { %18643 = vst [vmem:[#allocation45_spill] sm:$0xff] %v16676_v14 }
 0x986   :  { %6202 = vrot.lane.b32.xlu0 %v6196_v33, %s12593_s24  ;;  %6094 = vrot.lane.b32.xlu1 %v5851_v4, %s12591_s22  ;;  %v6017_v33 = vmul.bf16 %v16626_v43, %v16531_v57  ;;  %v5812_v4 = vmul.bf16 %v16414_v53, %v16544_v35 }
 0x98a   :  { %6180 = vrot.lane.b32.xlu1 %v5976_v16, %s12592_s23  ;;  %6137 = vrot.lane.b32.xlu0 %v16566_v21, %s12604_s10  ;;  %v16637_v16 = vsel %vm614_vm0, %v16412_v27, %v16414_v53  ;;  %v16653_v27 = vsel %vm5924_vm3, %v16436_v42, %v16438_v38  ;;  %vm18644_vm0 = vmmov %vm18640_vm4  ;;  %vm6124_vm3 = vcmask 916480   ;;  %vm6166_vm4 = vcmask 900096  }
 0x98b   :  { %vm18645_vm1 = vmmov %vm18644_vm0 }
 0x98e   :  { %6098 = vrot.lane.b32.xlu1 %v5853_v62, %s12591_s22  ;;  %6223 = vrot.lane.b32.xlu0 %v6058_v31, %s12594_s25  ;;  %v6197_v62 = vrot.slane %v6017_v33, 4  ;;  %v6070_v31 = vrot.slane %v5812_v4, 4 }
 0x992   :  { %6184 = vrot.lane.b32.xlu1 %v5978_v29, %s12592_s23  ;;  %6096 = vrot.lane.b32.xlu0 %v5852_v52, %s12591_s22  ;;  %v5894_v29 = vmul.bf16 %v16642_v41, %v16566_v21  ;;  %v5811_v52 = vmul.bf16 %v16637_v16, %v16566_v21 }
 0x994   :  { %v6112_v44 = vrot.slane %v5894_v29, 4  ;;  %v6069_v6 = vrot.slane %v5811_v52, 4 }
 0x996   :  { %6118 = vrot.lane.b32.xlu1 %v6111_v18, %s12605_s6  ;;  %6182 = vrot.lane.b32.xlu0 %v5977_v13, %s12592_s23  ;;  %v5936_v18 = vmul.bf16 %v16653_v27, %v16566_v21  ;;  %v5895_v13 = vmul.bf16 %v16422_v61, %v16544_v35 }
 0x998   :  { %v6154_v20 = vrot.slane %v5936_v18, 4  ;;  %v6113_v42 = vrot.slane %v5895_v13, 4  ;;  %v6056_v13 = vmul.bf16 %v16676_v14, %v16465_v9 }
 0x99a   :  { %6160 = vrot.lane.b32.xlu1 %v6153_v30, %s12606_s7  ;;  %6075 = vrot.lane.b32.xlu0 %v6068_v7, %s12590_s21  ;;  %v6018_v30 = vmul.bf16 %v16664_v11, %v16566_v21  ;;  %v5937_v7 = vmul.bf16 %v16438_v38, %v16544_v35 }
 0x99c   :  { %v6198_v33 = vrot.slane %v6018_v30, 4  ;;  %v6155_v4 = vrot.slane %v5937_v7, 4 }
 0x99e   :  { %6204 = vrot.lane.b32.xlu1 %v6197_v62, %s12593_s24  ;;  %6079 = vrot.lane.b32.xlu0 %v6070_v31, %s12590_s21  ;;  %v6019_v62 = vmul.bf16 %v16446_v55, %v16544_v35  ;;  %v16674_v31 = vpop.permute.xlu1 %6046 }
 0x99f   :  { %18642 = vst [vmem:[#allocation66_spill] sm:$0xff] %v16674_v31  ;;  %v6060_v29 = vmul.bf16 %v16674_v31, %v16544_v35 }
 0x9a0   :  { %v6199_v52 = vrot.slane %v6019_v62, 4 }
 0x9a2   :  { %6120 = vrot.lane.b32.xlu0 %v6112_v44, %s12605_s6  ;;  %6077 = vrot.lane.b32.xlu1 %v6069_v6, %s12590_s21  ;;  %v16695_v44 = vsel %vm18644_vm0, %v16462_v15, %v16674_v31  ;;  %v16700_v6 = vsel %vm18645_vm1, %v16676_v14, %v16460_v19  ;;  %v6300_v15 = vld [vmem:[%s11063_s18 + $0x8] sm:$0xff]  ;;  %v6299_v19 = vld [vmem:[%s11063_s18] sm:$0xff]  ;;  %s12635_s18 = smov 23  }
 0x9a3   :  { %18646 = vst [vmem:[#allocation43_spill] sm:$0xff] %v16700_v6  ;;  %v6059_v35 = vmul.bf16 %v16695_v44, %v16566_v21  ;;  %v6057_v18 = vmul.bf16 %v16700_v6, %v16474_v24 }
 0x9a6   :  { %6162 = vrot.lane.b32.xlu0 %v6154_v20, %s12606_s7  ;;  %6122 = vrot.lane.b32.xlu1 %v6113_v42, %s12605_s6 }
 0x9aa   :  { %6206 = vrot.lane.b32.xlu0 %v6198_v33, %s12593_s24  ;;  %6164 = vrot.lane.b32.xlu1 %v6155_v4, %s12606_s7 }
 0x9ae   :  { %6227 = vrot.lane.b32.xlu0 %v6060_v29, %s12594_s25  ;;  %6208 = vrot.lane.b32.xlu1 %v6199_v52, %s12593_s24 }
 0x9b2   :  { %6225 = vrot.lane.b32.xlu1 %v6059_v35, %s12594_s25  ;;  %6221 = vrot.lane.b32.xlu0 %v6057_v18, %s12594_s25 }
 0x9b6   :  { %6219 = vrot.lane.b32.xlu1 %v6056_v13, %s12594_s25  ;;  %6308 = vperm.xlu0 %12175, %v6300_v15  }
 0x9ba   :  { %6303 = vperm.xlu1 %12176, %v6299_v19  }
 0x9d8   :  { %v16713_v20 = vpop.permute.xlu0 %6131 }
 0x9dc   :  { %v6072_v42 = vpop.permute.xlu1 %6071  ;;  %v16715_v30 = vpop.permute.xlu0 %6133 }
 0x9e0   :  { %v6115_v7 = vpop.permute.xlu1 %6114  ;;  %v6091_v33 = vpop.permute.xlu0 %6090 }
 0x9e4   :  { %v6157_v4 = vpop.permute.xlu1 %6156  ;;  %v16717_v62 = vpop.permute.xlu0 %6176 }
 0x9e8   :  { %v16719_v29 = vpop.permute.xlu1 %6200  ;;  %v6093_v52 = vpop.permute.xlu0 %6092 }
 0x9ec   :  { %v6074_v35 = vpop.permute.xlu1 %6073  ;;  %v16721_v18 = vpop.permute.xlu0 %6178 }
 0x9ed   :  { %v6081_v12 = vsel %vm1704_vm8, %v6072_v42, %v6074_v35 }
 0x9ee   :  { %v6235_v42 = vsel %vm2232_vm9, %v5756_v45, %v6081_v12 }
 0x9f0   :  { %v16723_v13 = vpop.permute.xlu1 %6135  ;;  %v6117_v15 = vpop.permute.xlu0 %6116 }
 0x9f1   :  { %v6125_v24 = vsel %vm6124_vm3, %v6115_v7, %v6117_v15  ;;  %v6143_v26 = vsel %vm6141_vm7, %v16715_v30, %v16723_v13 }
 0x9f4   :  { %v16725_v19 = vpop.permute.xlu1 %6139  ;;  %v6159_v34 = vpop.permute.xlu0 %6158 }
 0x9f5   :  { %v6167_v7 = vsel %vm6166_vm4, %v6157_v4, %v6159_v34 }
 0x9f8   :  { %v16727_v17 = vpop.permute.xlu1 %6094  ;;  %v6203_v8 = vpop.permute.xlu0 %6202 }
 0x9f9   :  { %v6101_v3 = vsel %vm1772_vm10, %v6093_v52, %v16727_v17 }
 0x9fc   :  { %v16729_v39 = vpop.permute.xlu1 %6180  ;;  %v16731_v2 = vpop.permute.xlu0 %6137 }
 0xa00   :  { %v6099_v60 = vpop.permute.xlu1 %6098  ;;  %v16733_v14 = vpop.permute.xlu0 %6223 }
 0xa04   :  { %v16735_v6 = vpop.permute.xlu1 %6184  ;;  %v6097_v46 = vpop.permute.xlu0 %6096 }
 0xa08   :  { %v6119_v23 = vpop.permute.xlu1 %6118  ;;  %v16737_v47 = vpop.permute.xlu0 %6182 }
 0xa09   :  { %v6126_v48 = vsel %vm6124_vm3, %v6117_v15, %v6119_v23 }
 0xa0a   :  { %v6255_v9 = vsel %vm2232_vm9, %v6101_v3, %v6126_v48  ;;  %v5758_v3 = vmul.bf16 %v16760_v0, %v16531_v57 }
 0xa0c   :  { %v6161_v1 = vpop.permute.xlu1 %6160  ;;  %v6076_v54 = vpop.permute.xlu0 %6075 }
 0xa0d   :  { %v6082_v50 = vsel %vm1704_vm8, %v6074_v35, %v6076_v54 }
 0xa0e   :  { %v6239_v10 = vsel %vm2232_vm9, %v5757_v40, %v6082_v50  ;;  %v16766_v50 = vrot.slane %v16296_v37, %v18622_v32  ;;  %v6168_v40 = vsel %vm6166_vm4, %v6159_v34, %v6161_v1  ;;  %v6142_v34 = vsel %vm6141_vm7, %v16713_v20, %v16715_v30 }
 0xa0f   :  { %6331 = vmatprep.subr.bf16.mxu0 %v6239_v10  ;;  %v6100_v10 = vsel %vm1772_vm10, %v6091_v33, %v6093_v52  ;;  %v6271_v37 = vsel %vm2232_vm9, %v6143_v26, %v6168_v40  ;;  %v6267_v57 = vsel %vm2232_vm9, %v6142_v34, %v6167_v7  ;;  %v6103_v40 = vsel %vm1772_vm10, %v6097_v46, %v6099_v60 }
 0xa10   :  { %v6205_v31 = vpop.permute.xlu1 %6204  ;;  %6332 = vmatpush1.bf16.msra.mxu0 %v6235_v42  ;;  %v6080_v35 = vpop.permute.xlu0 %6079  ;;  %v6251_v12 = vsel %vm2232_vm9, %v6100_v10, %v6125_v24  ;;  %v5759_v45 = vmul.bf16 %v16766_v50, %v16566_v21  ;;  %v6187_v21 = vsel %vm1857_vm11, %v16721_v18, %v16729_v39  ;;  %v6186_v26 = vsel %vm1857_vm11, %v16717_v62, %v16721_v18 }
 0xa11   :  { %6333 = vmatprep.subr.bf16.mxu0 %v6255_v9  ;;  %v6211_v33 = vsel %vm1910_vm12, %v6203_v8, %v6205_v31  ;;  %v6145_v62 = vsel %vm6141_vm7, %v16731_v2, %v16725_v19  ;;  %v6189_v19 = vsel %vm1857_vm11, %v16737_v47, %v16735_v6 }
 0xa12   :  { %v6287_v30 = vsel %vm2232_vm9, %v6187_v21, %v6211_v33 }
 0xa14   :  { %v6078_v15 = vpop.permute.xlu1 %6077  ;;  %6334 = vmatpush1.bf16.msra.mxu0 %v6251_v12  ;;  %v6121_v48 = vpop.permute.xlu0 %6120 }
 0xa15   :  { %v6083_v52 = vsel %vm1704_vm8, %v6076_v54, %v6078_v15  ;;  %v6084_v42 = vsel %vm1704_vm8, %v6078_v15, %v6080_v35  ;;  %6335 = vmatprep.subr.bf16.mxu0 %v6271_v37  ;;  %v6210_v54 = vsel %vm1910_vm12, %v16719_v29, %v6203_v8  ;;  %v6127_v35 = vsel %vm6124_vm3, %v6119_v23, %v6121_v48 }
 0xa16   :  { %v6247_v4 = vsel %vm2232_vm9, %v5759_v45, %v6084_v42  ;;  %v6243_v24 = vsel %vm2232_vm9, %v5758_v3, %v6083_v52  ;;  %v6102_v8 = vsel %vm1772_vm10, %v16727_v17, %v6097_v46  ;;  %v6283_v29 = vsel %vm2232_vm9, %v6186_v26, %v6210_v54 }
 0xa17   :  { %6374 = vmatprep.subr.bf16.mxu1 %v6247_v4  ;;  %v6259_v12 = vsel %vm2232_vm9, %v6102_v8, %v6127_v35  ;;  %v6144_v17 = vsel %vm6141_vm7, %v16723_v13, %v16731_v2  ;;  %v6188_v2 = vsel %vm1857_vm11, %v16729_v39, %v16737_v47  ;;  %v12440_v47 = vld [vmem:[%s16690_s28] sm:$0xff]  }
 0xa18   :  { %v6123_v9 = vpop.permute.xlu1 %6122  ;;  %6336 = vmatpush1.bf16.msra.mxu0 %v6267_v57  ;;  %6375 = vmatpush1.bf16.msra.mxu1 %v6243_v24  ;;  %v6163_v20 = vpop.permute.xlu0 %6162 }
 0xa19   :  { %v6128_v10 = vsel %vm6124_vm3, %v6121_v48, %v6123_v9  ;;  %6337 = vmatprep.subr.bf16.mxu0 %v6287_v30  ;;  %v6169_v7 = vsel %vm6166_vm4, %v6161_v1, %v6163_v20 }
 0xa1a   :  { %v6263_v23 = vsel %vm2232_vm9, %v6103_v40, %v6128_v10  ;;  %v6275_v48 = vsel %vm2232_vm9, %v6144_v17, %v6169_v7 }
 0xa1b   :  { %6376 = vmatprep.subr.bf16.mxu1 %v6263_v23 }
 0xa1c   :  { %v6165_v60 = vpop.permute.xlu1 %6164  ;;  %6338 = vmatpush1.bf16.msra.mxu0 %v6283_v29  ;;  %6377 = vmatpush1.bf16.msra.mxu1 %v6259_v12  ;;  %v6207_v15 = vpop.permute.xlu0 %6206 }
 0xa1d   :  { %v6170_v18 = vsel %vm6166_vm4, %v6163_v20, %v6165_v60  ;;  %v6212_v1 = vsel %vm1910_vm12, %v6205_v31, %v6207_v15 }
 0xa1e   :  { %v6279_v46 = vsel %vm2232_vm9, %v6145_v62, %v6170_v18  ;;  %v6291_v33 = vsel %vm2232_vm9, %v6188_v2, %v6212_v1 }
 0xa1f   :  { %6378 = vmatprep.subr.bf16.mxu1 %v6279_v46 }
 0xa20   :  { %v6209_v37 = vpop.permute.xlu1 %6208  ;;  %6379 = vmatpush1.bf16.msra.mxu1 %v6275_v48  ;;  %v6228_v45 = vpop.permute.xlu0 %6227 }
 0xa21   :  { %v6213_v3 = vsel %vm1910_vm12, %v6207_v15, %v6209_v37 }
 0xa22   :  { %v6295_v13 = vsel %vm2232_vm9, %v6189_v19, %v6213_v3 }
 0xa23   :  { %6380 = vmatprep.subr.bf16.mxu1 %v6295_v13 }
 0xa24   :  { %v6226_v31 = vpop.permute.xlu1 %6225  ;;  %6381 = vmatpush1.bf16.msra.mxu1 %v6291_v33  ;;  %v6222_v52 = vpop.permute.xlu0 %6221 }
 0xa25   :  { %v6231_v42 = vsel %vm1995_vm13, %v16733_v14, %v6226_v31  ;;  %v6230_v6 = vsel %vm1995_vm13, %v6222_v52, %v16733_v14  ;;  %v6232_v34 = vsel %vm1995_vm13, %v6226_v31, %v6228_v45 }
 0xa26   :  { %11293 = vmatprep.subr.msk.bf16.mxu0 %vm2232_vm9, %v6230_v6  ;;  %11295 = vmatprep.subr.msk.bf16.mxu1 %vm2232_vm9, %v6232_v34  ;;  %v6326_v39 = vsel %vm2232_vm9, %v6231_v42, 0 }
 0xa28   :  { %v6220_v4 = vpop.permute.xlu1 %6219  ;;  %6383 = vmatpush1.bf16.msra.mxu1 %v6326_v39 }
 0xa29   :  { %v6229_v24 = vsel %vm1995_vm13, %v6220_v4, %v6222_v52 }
 0xa2a   :  { %v6320_v21 = vsel %vm2232_vm9, %v6229_v24, 0 }
 0xa2b   :  { %6340 = vmatpush1.bf16.msra.mxu0 %v6320_v21  ;;  %11296 = vmatmul.mubr.msk.bf16.vlgmr.msra.gmra.mrb[36].mxu1 %vm2496_vm15, %v12440_v47 }
 0xa2e   :  { %11294 = vmatmul.mubr.msk.bf16.vlgmr.msra.gmra.mrb[36].mxu0 %vm2496_vm15, %v12440_v47  ;;  %vm7201_vm15 = vcmask 965632  }
 0xa35   :  { %v6309_v9 = vpop.permute.xlu0 %6308 }
 0xa39   :  { %v6304_v14 = vpop.permute.xlu1 %6303 }
 0xafe   :  { %v6408_v57 = vpop.f32.mrb[36].mxu1 }
 0xaff   :  { %v6409_v54 = vadd.f32 %v6408_v57, %v6304_v14  ;;  %v6410_v35 = vpop.f32.mrb[37].mxu1 }
 0xb00   :  { %v6411_v20 = vadd.f32 %v6410_v35, %v6304_v14  ;;  %v6412_v30 = vpop.f32.mrb[38].mxu1 }
 0xb01   :  { %v6413_v40 = vadd.f32 %v6412_v30, %v6309_v9  ;;  %v6365_v10 = vpop.f32.mrb[36].mxu0  ;;  %v6414_v26 = vpop.f32.mrb[39].mxu1  ;;  %v6419_v12 = vmax.f32 %v6409_v54, 0.0 }
 0xb02   :  { %v6366_v8 = vadd.f32 %v6365_v10, %v6304_v14  ;;  %v6415_v23 = vadd.f32 %v6414_v26, %v6309_v9  ;;  %v6367_v29 = vpop.f32.mrb[37].mxu0  ;;  %v6420_v62 = vmax.f32 %v6411_v20, 0.0  ;;  %v18651_v10 = vld [vmem:[#allocation23_spill] sm:$0xff] }
 0xb03   :  { %v6423_v7 = vmax.f32 %v6413_v40, 0.0  ;;  %v6368_v60 = vadd.f32 %v6367_v29, %v6304_v14  ;;  %v6369_v15 = vpop.f32.mrb[38].mxu0  ;;  %v18653_v29 = vld [vmem:[#allocation34_spill] sm:$0xff] }
 0xb04   :  { %v6424_v18 = vmax.f32 %v6415_v23, 0.0  ;;  %v6370_v17 = vadd.f32 %v6369_v15, %v6309_v9  ;;  %v6371_v46 = vpop.f32.mrb[39].mxu0  ;;  %v6417_v37 = vmax.f32 %v6366_v8, 0.0  ;;  %v18652_v8 = vld [vmem:[#allocation37_spill] sm:$0xff]  ;;  %v18655_v15 = vld [vmem:[#allocation59_spill] sm:$0xff] }
 0xb05   :  { %v6427_v48 = vpack.c.bf16 %v6423_v7, %v6419_v12  ;;  %v6372_v1 = vadd.f32 %v6371_v46, %v6309_v9  ;;  %v6418_v3 = vmax.f32 %v6368_v60, 0.0  ;;  %v18648_v9 = vld [vmem:[#allocation39_spill] sm:$0xff]  ;;  %v18654_v7 = vld [vmem:[#allocation13_spill] sm:$0xff]  ;;  %v18657_v46 = vld [vmem:[#allocation24_spill] sm:$0xff] }
 0xb06   :  { %v6428_v45 = vpack.c.bf16 %v6424_v18, %v6420_v62  ;;  %v6421_v19 = vmax.f32 %v6370_v17, 0.0  ;;  %v18656_v18 = vld [vmem:[#allocation14_spill] sm:$0xff] }
 0xb07   :  { %v6422_v2 = vmax.f32 %v6372_v1, 0.0  ;;  %6437 = vrot.lane.b32.xlu1 %v6427_v48, %s12603_s14  ;;  %v18658_v1 = vld [vmem:[#allocation19_spill] sm:$0xff] }
 0xb08   :  { %v6425_v13 = vpack.c.bf16 %v6421_v19, %v6417_v37  ;;  %6439 = vrot.lane.b32.xlu0 %v6428_v45, %s12603_s14  ;;  %v18659_v45 = vld [vmem:[#allocation36_spill] sm:$0xff] }
 0xb09   :  { %v6426_v33 = vpack.c.bf16 %v6422_v2, %v6418_v3  ;;  %v18660_v3 = vld [vmem:[#allocation67_spill] sm:$0xff] }
 0xb0b   :  { %6435 = vrot.lane.b32.xlu1 %v6426_v33, %s12603_s14 }
 0xb0c   :  { %6433 = vrot.lane.b32.xlu0 %v6425_v13, %s12603_s14  ;;  %v18661_v13 = vld [vmem:[#allocation43_spill] sm:$0xff] }
 0xb79   :  { %v6438_v31 = vpop.permute.xlu1 %6437 }
 0xb7a   :  { %v6440_v52 = vpop.permute.xlu0 %6439 }
 0xb7b   :  { %v6443_v42 = vsel %vm5702_vm14, %v6438_v31, %v6440_v52  ;;  %v6451_v6 = vsel %vm5702_vm14, %v6440_v52, 0 }
 0xb7c   :  { %6571 = vrot.lane.b32.xlu1 %v6451_v6, %s12604_s10  ;;  %v6456_v34 = vmul.bf16 %v6443_v42, %v16766_v50 }
 0xb7d   :  { %v6436_v39 = vpop.permute.xlu1 %6435 }
 0xb7e   :  { %v6442_v47 = vsel %vm5702_vm14, %v6436_v39, %v6438_v31  ;;  %6743 = vmatprep.subr.bf16.mxu1 %v6456_v34  ;;  %v6434_v4 = vpop.permute.xlu0 %6433  ;;  %v18662_v31 = vld [vmem:[#allocation45_spill] sm:$0xff] }
 0xb7f   :  { %v16849_v24 = vsel %vm5702_vm14, %v6434_v4, %v6436_v39  ;;  %v16852_v21 = vsel %vm5702_vm14, 0, %v6434_v4  ;;  %6567 = vrot.lane.b32.xlu0 %v6442_v47, %s12604_s10  ;;  %v6459_v14 = vmul.bf16 %v6442_v47, %v16603_v25  ;;  %v6455_v57 = vmul.bf16 %v6442_v47, %v16760_v0 }
 0xb80   :  { %v6454_v50 = vmul.bf16 %v16849_v24, %v16741_v36  ;;  %v6453_v54 = vmul.bf16 %v16852_v21, %v16745_v58  ;;  %v6469_v35 = vmul.bf16 %v6442_v47, %v16585_v5  ;;  %v6464_v25 = vmul.bf16 %v6442_v47, %v16552_v59 }
 0xb81   :  { %6501 = vrot.lane.b32.xlu1 %v6459_v14, %s12590_s21  ;;  %6744 = vmatpush1.bf16.msra.mxu1 %v6455_v57  ;;  %v6474_v36 = vmul.bf16 %v6442_v47, %v16608_v56  ;;  %v6461_v58 = vmul.bf16 %v6451_v6, %v16414_v53  ;;  %v6460_v0 = vmul.bf16 %v6443_v42, %v16637_v16  ;;  %vm11052_vm14 = vcmask 9216  }
 0xb82   :  { %6700 = vmatprep.subr.bf16.mxu0 %v6454_v50  ;;  %v6465_v5 = vmul.bf16 %v6443_v42, %v16590_v49  ;;  %v6466_v59 = vmul.bf16 %v6451_v6, %v16430_v22  ;;  %v6471_v56 = vmul.bf16 %v6451_v6, %v16422_v61  ;;  %v6470_v53 = vmul.bf16 %v6443_v42, %v16642_v41 }
 0xb83   :  { %6569 = vrot.lane.b32.xlu0 %v6443_v42, %s12604_s10  ;;  %6701 = vmatpush1.bf16.msra.mxu0 %v6453_v54  ;;  %v6479_v16 = vmul.bf16 %v6442_v47, %v16561_v28  ;;  %v6484_v49 = vmul.bf16 %v6442_v47, %v16626_v43  ;;  %v6476_v22 = vmul.bf16 %v6451_v6, %v16438_v38 }
 0xb84   :  { %v6475_v61 = vmul.bf16 %v6443_v42, %v16653_v27  ;;  %v6480_v41 = vmul.bf16 %v6443_v42, %v16613_v51  ;;  %v6481_v28 = vmul.bf16 %v6451_v6, %v16454_v63  ;;  %v6486_v43 = vmul.bf16 %v6451_v6, %v16446_v55  ;;  %v18647_v63 = vld [vmem:[#allocation66_spill] sm:$0xff] }
 0xb85   :  { %6547 = vrot.lane.b32.xlu1 %v6469_v35, %s12605_s6  ;;  %v6485_v38 = vmul.bf16 %v6443_v42, %v16664_v11  ;;  %v6490_v51 = vmul.bf16 %v6443_v42, %v16695_v44  ;;  %v6491_v27 = vmul.bf16 %v6451_v6, %v18647_v63  ;;  %v12441_v55 = vld [vmem:[%s16897_s4 + $0x4] ss:$8 sps:$4 sm:$0xff]   ;;  %v6489_v20 = vmul.bf16 %v6442_v47, %v18648_v9  ;;  %v18650_v44 = vld [vmem:[#allocation12_spill] sm:$0xff] }
 0xb86   :  { %11300 = vmatprep.mubr.msk.bf16.mxu1 %vm5882_vm5, %v12441_v55  ;;  %11299 = vmatprep.mubr.msk.bf16.mxu0 %vm5882_vm5, %v12441_v55  ;;  %v18649_v11 = vld [vmem:[#allocation54_spill] sm:$0xff]  ;;  %v6457_v40 = vmul.bf16 %v16852_v21, %v18650_v44  ;;  %v6463_v26 = vmul.bf16 %v16849_v24, %v18651_v10  ;;  %v6462_v23 = vmul.bf16 %v16852_v21, %v18652_v8  ;;  %v6676_v6 = vld [vmem:[%s11065_s26 + $0x8] sm:$0xff] }
 0xb87   :  { %6524 = vrot.lane.b32.xlu0 %v6464_v25, %s12591_s22  ;;  %v6458_v30 = vmul.bf16 %v16849_v24, %v18649_v11  ;;  %v6468_v12 = vmul.bf16 %v16849_v24, %v18653_v29  ;;  %v6467_v60 = vmul.bf16 %v16852_v21, %v18654_v7  ;;  %v6473_v62 = vmul.bf16 %v16849_v24, %v18655_v15  ;;  %v6675_v42 = vld [vmem:[%s11065_s26] sm:$0xff]  ;;  %s11069_s26 = sld [smem:[%s18054_s0 + %s12618_s29]]   ;;  %s12633_s29 = smov 28  }
 0xb88   :  { %v6472_v17 = vmul.bf16 %v16852_v21, %v18656_v18  ;;  %v6478_v48 = vmul.bf16 %v16849_v24, %v18657_v46  ;;  %v6477_v37 = vmul.bf16 %v16852_v21, %v18658_v1  ;;  %v6483_v19 = vmul.bf16 %v16849_v24, %v18659_v45 }
 0xb89   :  { %6590 = vrot.lane.b32.xlu1 %v6474_v36, %s12606_s7  ;;  %v6482_v2 = vmul.bf16 %v16852_v21, %v18660_v3  ;;  %v6488_v33 = vmul.bf16 %v16849_v24, %v18661_v13  ;;  %v6487_v52 = vmul.bf16 %v16852_v21, %v18662_v31 }
 0xb8b   :  { %6505 = vrot.lane.b32.xlu0 %v6461_v58, %s12590_s21 }
 0xb8d   :  { %6503 = vrot.lane.b32.xlu1 %v6460_v0, %s12590_s21 }
 0xb8f   :  { %6526 = vrot.lane.b32.xlu0 %v6465_v5, %s12591_s22 }
 0xb91   :  { %6528 = vrot.lane.b32.xlu1 %v6466_v59, %s12591_s22 }
 0xb93   :  { %6551 = vrot.lane.b32.xlu0 %v6471_v56, %s12605_s6 }
 0xb95   :  { %6549 = vrot.lane.b32.xlu1 %v6470_v53, %s12605_s6 }
 0xb97   :  { %6613 = vrot.lane.b32.xlu0 %v6479_v16, %s12592_s23 }
 0xb99   :  { %6636 = vrot.lane.b32.xlu1 %v6484_v49, %s12593_s24 }
 0xb9b   :  { %6594 = vrot.lane.b32.xlu0 %v6476_v22, %s12606_s7 }
 0xb9d   :  { %6592 = vrot.lane.b32.xlu1 %v6475_v61, %s12606_s7 }
 0xb9f   :  { %6615 = vrot.lane.b32.xlu0 %v6480_v41, %s12592_s23 }
 0xba1   :  { %6617 = vrot.lane.b32.xlu1 %v6481_v28, %s12592_s23 }
 0xba3   :  { %6640 = vrot.lane.b32.xlu0 %v6486_v43, %s12593_s24 }
 0xba5   :  { %6638 = vrot.lane.b32.xlu1 %v6485_v38, %s12593_s24 }
 0xba7   :  { %6661 = vrot.lane.b32.xlu0 %v6490_v51, %s12594_s25 }
 0xba9   :  { %6663 = vrot.lane.b32.xlu1 %v6491_v27, %s12594_s25 }
 0xbab   :  { %6659 = vrot.lane.b32.xlu0 %v6489_v20, %s12594_s25 }
 0xbad   :  { %6499 = vrot.lane.b32.xlu1 %v6458_v30, %s12590_s21 }
 0xbaf   :  { %6497 = vrot.lane.b32.xlu0 %v6457_v40, %s12590_s21 }
 0xbb1   :  { %6522 = vrot.lane.b32.xlu1 %v6463_v26, %s12591_s22 }
 0xbb3   :  { %6520 = vrot.lane.b32.xlu0 %v6462_v23, %s12591_s22  ;;  %v12443_v23 = vld [vmem:[%s16897_s4] ss:$8 sps:$4 sm:$0xff]   ;;  %s12615_s4 = smov 119  }
 0xbb5   :  { %6545 = vrot.lane.b32.xlu1 %v6468_v12, %s12605_s6 }
 0xbb7   :  { %6543 = vrot.lane.b32.xlu0 %v6467_v60, %s12605_s6 }
 0xbb9   :  { %6565 = vrot.lane.b32.xlu1 %v16849_v24, %s12604_s10 }
 0xbbb   :  { %6563 = vrot.lane.b32.xlu0 %v16852_v21, %s12604_s10 }
 0xbbd   :  { %6588 = vrot.lane.b32.xlu1 %v6473_v62, %s12606_s7 }
 0xbbf   :  { %6586 = vrot.lane.b32.xlu0 %v6472_v17, %s12606_s7 }
 0xbc1   :  { %6611 = vrot.lane.b32.xlu1 %v6478_v48, %s12592_s23 }
 0xbc3   :  { %6609 = vrot.lane.b32.xlu0 %v6477_v37, %s12592_s23  ;;  %s12617_s23 = smov 11  }
 0xbc4   :  { %s17234_s28 = sld [smem:[%s18054_s0 + %s12617_s23]]   ;;  %s12639_s23 = smov 27  }
 0xbc5   :  { %6634 = vrot.lane.b32.xlu1 %v6483_v19, %s12593_s24 }
 0xbc7   :  { %6632 = vrot.lane.b32.xlu0 %v6482_v2, %s12593_s24  ;;  %s11089_s24 = sld [smem:[%s18054_s0 + %s12586_s17]]   ;;  %s12624_s17 = smov 15  }
 0xbc9   :  { %6657 = vrot.lane.b32.xlu1 %v6488_v33, %s12594_s25 }
 0xbcb   :  { %6655 = vrot.lane.b32.xlu0 %v6487_v52, %s12594_s25 }
 0xbcd   :  { %6679 = vperm.xlu1 %12176, %v6675_v42  }
 0xbcf   :  { %6684 = vperm.xlu0 %12175, %v6676_v6  }
 0xbee   :  { %v6572_v34 = vpop.permute.xlu1 %6571 }
 0xbf1   :  { %v16961_v39 = vpop.permute.xlu0 %6567 }
 0xbf3   :  { %v6502_v47 = vpop.permute.xlu1 %6501 }
 0xbf5   :  { %v6570_v4 = vpop.permute.xlu0 %6569 }
 0xbf6   :  { %v6576_v49 = vsel %vm6141_vm7, %v6570_v4, %v6572_v34  ;;  %v6575_v41 = vsel %vm6141_vm7, %v16961_v39, %v6570_v4 }
 0xbf7   :  { %v16963_v14 = vpop.permute.xlu1 %6547 }
 0xbf9   :  { %v6525_v57 = vpop.permute.xlu0 %6524 }
 0xbfb   :  { %v16965_v24 = vpop.permute.xlu1 %6590 }
 0xbfd   :  { %v6506_v50 = vpop.permute.xlu0 %6505 }
 0xbff   :  { %v6504_v54 = vpop.permute.xlu1 %6503 }
 0xc00   :  { %v6510_v21 = vsel %vm1704_vm8, %v6504_v54, %v6506_v50  ;;  %v6509_v35 = vsel %vm1704_vm8, %v6502_v47, %v6504_v54 }
 0xc01   :  { %6745 = vmatprep.subr.bf16.mxu1 %v6510_v21  ;;  %v6527_v25 = vpop.permute.xlu0 %6526 }
 0xc02   :  { %6746 = vmatpush1.bf16.msra.mxu1 %v6509_v35  ;;  %v6532_v5 = vsel %vm1772_vm10, %v6525_v57, %v6527_v25 }
 0xc03   :  { %v6529_v36 = vpop.permute.xlu1 %6528 }
 0xc04   :  { %v6533_v58 = vsel %vm1772_vm10, %v6527_v25, %v6529_v36 }
 0xc05   :  { %6747 = vmatprep.subr.bf16.mxu1 %v6533_v58  ;;  %v6552_v0 = vpop.permute.xlu0 %6551 }
 0xc06   :  { %6748 = vmatpush1.bf16.msra.mxu1 %v6532_v5 }
 0xc07   :  { %v6550_v59 = vpop.permute.xlu1 %6549 }
 0xc08   :  { %v6556_v56 = vsel %vm6124_vm3, %v6550_v59, %v6552_v0  ;;  %v6555_v53 = vsel %vm6124_vm3, %v16963_v14, %v6550_v59 }
 0xc09   :  { %6749 = vmatprep.subr.bf16.mxu1 %v6556_v56  ;;  %v16974_v16 = vpop.permute.xlu0 %6613 }
 0xc0a   :  { %6750 = vmatpush1.bf16.msra.mxu1 %v6555_v53 }
 0xc0b   :  { %v16977_v22 = vpop.permute.xlu1 %6636  ;;  %6751 = vmatprep.subr.bf16.mxu1 %v6576_v49 }
 0xc0d   :  { %v6595_v61 = vpop.permute.xlu0 %6594 }
 0xc0e   :  { %6752 = vmatpush1.bf16.msra.mxu1 %v6575_v41 }
 0xc0f   :  { %v6593_v28 = vpop.permute.xlu1 %6592 }
 0xc10   :  { %v6599_v43 = vsel %vm6166_vm4, %v6593_v28, %v6595_v61  ;;  %v6598_v38 = vsel %vm6166_vm4, %v16965_v24, %v6593_v28 }
 0xc11   :  { %6753 = vmatprep.subr.bf16.mxu1 %v6599_v43  ;;  %v6616_v51 = vpop.permute.xlu0 %6615 }
 0xc12   :  { %6754 = vmatpush1.bf16.msra.mxu1 %v6598_v38  ;;  %v6621_v9 = vsel %vm1857_vm11, %v16974_v16, %v6616_v51 }
 0xc13   :  { %v6618_v63 = vpop.permute.xlu1 %6617 }
 0xc14   :  { %v6622_v27 = vsel %vm1857_vm11, %v6616_v51, %v6618_v63  ;;  %v12444_v51 = vld [vmem:[%s12660_s13 + $0x40] sm:$0xff]  }
 0xc15   :  { %6755 = vmatprep.subr.bf16.mxu1 %v6622_v27  ;;  %v6641_v55 = vpop.permute.xlu0 %6640  ;;  %v12445_v63 = vld [vmem:[%s12660_s13] sm:$0xff]   ;;  %v12446_v27 = vld [vmem:[%s12660_s13 + $0x48] sm:$0xff]  }
 0xc16   :  { %6756 = vmatpush1.bf16.msra.mxu1 %v6621_v9 }
 0xc17   :  { %v6639_v20 = vpop.permute.xlu1 %6638 }
 0xc18   :  { %v6645_v11 = vsel %vm1910_vm12, %v6639_v20, %v6641_v55  ;;  %v6644_v30 = vsel %vm1910_vm12, %v16977_v22, %v6639_v20 }
 0xc19   :  { %6757 = vmatprep.subr.bf16.mxu1 %v6645_v11  ;;  %v6662_v44 = vpop.permute.xlu0 %6661 }
 0xc1a   :  { %6758 = vmatpush1.bf16.msra.mxu1 %v6644_v30 }
 0xc1b   :  { %v6664_v40 = vpop.permute.xlu1 %6663 }
 0xc1c   :  { %v6668_v10 = vsel %vm1995_vm13, %v6662_v44, %v6664_v40  ;;  %v12447_v40 = vld [vmem:[%s12660_s13 + $0x8] sm:$0xff]  }
 0xc1d   :  { %6759 = vmatprep.subr.bf16.mxu1 %v6668_v10  ;;  %v6660_v26 = vpop.permute.xlu0 %6659 }
 0xc1e   :  { %v6667_v8 = vsel %vm1995_vm13, %v6660_v26, %v6662_v44 }
 0xc1f   :  { %v6500_v29 = vpop.permute.xlu1 %6499  ;;  %6760 = vmatpush1.bf16.msra.mxu1 %v6667_v8 }
 0xc20   :  { %v6508_v12 = vsel %vm1704_vm8, %v6500_v29, %v6502_v47  ;;  %11474 = vmatprep.subr.bf16.mxu1 %v12444_v51 }
 0xc21   :  { %6702 = vmatprep.subr.bf16.mxu0 %v6508_v12  ;;  %v6498_v7 = vpop.permute.xlu0 %6497 }
 0xc22   :  { %v6507_v60 = vsel %vm1704_vm8, %v6498_v7, %v6500_v29  ;;  %6776 = vmatmul.mubr.bf16.vlgmr.msra.gmra.mrb[40].mxu1 %v12443_v23 }
 0xc23   :  { %v6523_v15 = vpop.permute.xlu1 %6522  ;;  %6703 = vmatpush1.bf16.msra.mxu0 %v6507_v60  ;;  %11475 = vmatpush3.bf16.msra.mxu1 %v12445_v63  ;;  %v12449_v60 = vld [vmem:[%s12660_s13 + $0x10] sm:$0xff]  }
 0xc24   :  { %v6531_v62 = vsel %vm1772_vm10, %v6523_v15, %v6525_v57  ;;  %11476 = vmatprep.subr.bf16.mxu1 %v12446_v27 }
 0xc25   :  { %6704 = vmatprep.subr.bf16.mxu0 %v6531_v62  ;;  %v6521_v18 = vpop.permute.xlu0 %6520  ;;  %v12450_v62 = vld [vmem:[%s12660_s13 + $0x58] sm:$0xff]  }
 0xc26   :  { %v6530_v17 = vsel %vm1772_vm10, %v6521_v18, %v6523_v15  ;;  %v12451_v18 = vld [vmem:[%s12660_s13 + $0x18] sm:$0xff]  }
 0xc27   :  { %v6546_v46 = vpop.permute.xlu1 %6545  ;;  %6705 = vmatpush1.bf16.msra.mxu0 %v6530_v17  ;;  %11477 = vmatpush3.bf16.msra.mxu1 %v12447_v40  ;;  %v12452_v17 = vld [vmem:[%s12660_s13 + $0x60] sm:$0xff]  }
 0xc28   :  { %v6554_v48 = vsel %vm6124_vm3, %v6546_v46, %v16963_v14 }
 0xc29   :  { %6706 = vmatprep.subr.bf16.mxu0 %v6554_v48  ;;  %v6544_v1 = vpop.permute.xlu0 %6543  ;;  %v12453_v48 = vld [vmem:[%s12660_s13 + $0x20] sm:$0xff]  }
 0xc2a   :  { %v6553_v37 = vsel %vm6124_vm3, %v6544_v1, %v6546_v46  ;;  %v18663_v46 = vld [vmem:[#allocation57_spill] sm:$0xff]  ;;  %v12454_v1 = vld [vmem:[%s12660_s13 + $0x68] sm:$0xff]  }
 0xc2b   :  { %v6566_v45 = vpop.permute.xlu1 %6565  ;;  %6707 = vmatpush1.bf16.msra.mxu0 %v6553_v37  ;;  %v12455_v37 = vld [vmem:[%s12660_s13 + $0x28] sm:$0xff]  }
 0xc2c   :  { %v6574_v19 = vsel %vm6141_vm7, %v6566_v45, %v16961_v39 }
 0xc2d   :  { %6708 = vmatprep.subr.bf16.mxu0 %v6574_v19  ;;  %v6564_v3 = vpop.permute.xlu0 %6563  ;;  %v12457_v19 = vld [vmem:[%s12660_s13 + $0x30] sm:$0xff]  }
 0xc2e   :  { %v6573_v2 = vsel %vm6141_vm7, %v6564_v3, %v6566_v45  ;;  %v12456_v45 = vld [vmem:[%s12660_s13 + $0x70] sm:$0xff]   ;;  %v12458_v3 = vld [vmem:[%s12660_s13 + $0x78] sm:$0xff]  }
 0xc2f   :  { %v6589_v13 = vpop.permute.xlu1 %6588  ;;  %6709 = vmatpush1.bf16.msra.mxu0 %v6573_v2  ;;  %v12459_v2 = vld [vmem:[%s12660_s13 + $0x38] sm:$0xff]  }
 0xc30   :  { %v6597_v33 = vsel %vm6166_vm4, %v6589_v13, %v16965_v24 }
 0xc31   :  { %6710 = vmatprep.subr.bf16.mxu0 %v6597_v33  ;;  %v6587_v31 = vpop.permute.xlu0 %6586 }
 0xc32   :  { %v6596_v52 = vsel %vm6166_vm4, %v6587_v31, %v6589_v13  ;;  %v18664_v13 = vmov 0  }
 0xc33   :  { %v6612_v42 = vpop.permute.xlu1 %6611  ;;  %6711 = vmatpush1.bf16.msra.mxu0 %v6596_v52  ;;  %v18665_v52 = vld [vmem:[#allocation40_spill] sm:$0xff] }
 0xc34   :  { %v6620_v6 = vsel %vm1857_vm11, %v6612_v42, %v16974_v16 }
 0xc35   :  { %6712 = vmatprep.subr.bf16.mxu0 %v6620_v6  ;;  %v6610_v34 = vpop.permute.xlu0 %6609 }
 0xc36   :  { %v6619_v39 = vsel %vm1857_vm11, %v6610_v34, %v6612_v42  ;;  %vm7073_vm11 = vcmask 72704  }
 0xc37   :  { %v6635_v47 = vpop.permute.xlu1 %6634  ;;  %6713 = vmatpush1.bf16.msra.mxu0 %v6619_v39 }
 0xc38   :  { %v6643_v4 = vsel %vm1910_vm12, %v6635_v47, %v16977_v22 }
 0xc39   :  { %6714 = vmatprep.subr.bf16.mxu0 %v6643_v4  ;;  %v6633_v14 = vpop.permute.xlu0 %6632 }
 0xc3a   :  { %v6642_v57 = vsel %vm1910_vm12, %v6633_v14, %v6635_v47  ;;  %vm7183_vm12 = vcmask 982016  }
 0xc3b   :  { %v6658_v24 = vpop.permute.xlu1 %6657  ;;  %6715 = vmatpush1.bf16.msra.mxu0 %v6642_v57 }
 0xc3c   :  { %v6666_v50 = vsel %vm1995_vm13, %v6658_v24, %v6660_v26  ;;  %v12448_v26 = vld [vmem:[%s12660_s13 + $0x50] sm:$0xff]   ;;  %s12611_s13 = smov 31  }
 0xc3d   :  { %6716 = vmatprep.subr.bf16.mxu0 %v6666_v50  ;;  %v6656_v54 = vpop.permute.xlu0 %6655  ;;  %11478 = vmatprep.subr.bf16.mxu1 %v12448_v26  ;;  %s11088_s25 = sld [smem:[%s18054_s0 + %s12611_s13]]  }
 0xc3e   :  { %v6665_v21 = vsel %vm1995_vm13, %v6656_v54, %v6658_v24  ;;  %11479 = vmatpush3.bf16.msra.mxu1 %v12449_v60  ;;  %s11067_s13 = sld [smem:[%s18054_s0 + %s12613_s3]]   ;;  %vm7192_vm13 = vcmask 973824  }
 0xc3f   :  { %6717 = vmatpush1.bf16.msra.mxu0 %v6665_v21  ;;  %11480 = vmatprep.subr.bf16.mxu1 %v12450_v62 }
 0xc40   :  { %11452 = vmatprep.subr.bf16.mxu0 %v12444_v51 }
 0xc42   :  { %6733 = vmatmul.mubr.bf16.vlgmr.msra.gmra.mrb[40].mxu0 %v12443_v23  ;;  %11481 = vmatpush3.bf16.msra.mxu1 %v12451_v18 }
 0xc43   :  { %11453 = vmatpush3.bf16.msra.mxu0 %v12445_v63  ;;  %11482 = vmatprep.subr.bf16.mxu1 %v12452_v17 }
 0xc44   :  { %11454 = vmatprep.subr.bf16.mxu0 %v12446_v27 }
 0xc46   :  { %11483 = vmatpush3.bf16.msra.mxu1 %v12453_v48 }
 0xc47   :  { %11455 = vmatpush3.bf16.msra.mxu0 %v12447_v40  ;;  %11484 = vmatprep.subr.bf16.mxu1 %v12454_v1  ;;  %v18668_v40 = vld [vmem:[#allocation7_spill] sm:$0xff] }
 0xc48   :  { %11456 = vmatprep.subr.bf16.mxu0 %v12448_v26 }
 0xc4a   :  { %11485 = vmatpush3.bf16.msra.mxu1 %v12455_v37 }
 0xc4b   :  { %11457 = vmatpush3.bf16.msra.mxu0 %v12449_v60  ;;  %11486 = vmatprep.subr.bf16.mxu1 %v12456_v45 }
 0xc4c   :  { %v6680_v35 = vpop.permute.xlu1 %6679  ;;  %11458 = vmatprep.subr.bf16.mxu0 %v12450_v62 }
 0xc4e   :  { %v6685_v0 = vpop.permute.xlu0 %6684  ;;  %11487 = vmatpush3.bf16.msra.mxu1 %v12457_v19 }
 0xc4f   :  { %11459 = vmatpush3.bf16.msra.mxu0 %v12451_v18  ;;  %11488 = vmatprep.subr.bf16.mxu1 %v12458_v3 }
 0xc50   :  { %11460 = vmatprep.subr.bf16.mxu0 %v12452_v17 }
 0xc52   :  { %11489 = vmatpush3.bf16.msra.mxu1 %v12459_v2 }
 0xc53   :  { %11461 = vmatpush3.bf16.msra.mxu0 %v12453_v48 }
 0xc54   :  { %11462 = vmatprep.subr.bf16.mxu0 %v12454_v1 }
 0xc57   :  { %11463 = vmatpush3.bf16.msra.mxu0 %v12455_v37 }
 0xc58   :  { %11464 = vmatprep.subr.bf16.mxu0 %v12456_v45 }
 0xc5b   :  { %11465 = vmatpush3.bf16.msra.mxu0 %v12457_v19 }
 0xc5c   :  { %11466 = vmatprep.subr.bf16.mxu0 %v12458_v3 }
 0xc5f   :  { %11467 = vmatpush3.bf16.msra.mxu0 %v12459_v2 }
 0xc60   :  { %7280 = vmatprep.subr.bf16.mxu0 %v18664_v13 }
 0xcf5   :  { %v6777_v25 = vpop.f32.mrb[40].mxu1 }
 0xcf6   :  { %v6778_v36 = vadd.f32 %v6777_v25, %v6680_v35  ;;  %v6779_v58 = vpop.f32.mrb[41].mxu1 }
 0xcf7   :  { %v6780_v5 = vadd.f32 %v6779_v58, %v6680_v35  ;;  %v6781_v59 = vpop.f32.mrb[42].mxu1 }
 0xcf8   :  { %v6782_v56 = vadd.f32 %v6781_v59, %v6685_v0  ;;  %v6783_v53 = vpop.f32.mrb[43].mxu1  ;;  %v6788_v49 = vmax.f32 %v6778_v36, 0.0 }
 0xcf9   :  { %v6784_v16 = vadd.f32 %v6783_v53, %v6685_v0  ;;  %v6789_v61 = vmax.f32 %v6780_v5, 0.0 }
 0xcfa   :  { %v6792_v22 = vmax.f32 %v6782_v56, 0.0 }
 0xcfb   :  { %v6793_v41 = vmax.f32 %v6784_v16, 0.0 }
 0xcfc   :  { %v17014_v28 = vpack.c.bf16 %v6792_v22, %v6788_v49  ;;  %v7079_v22 = vld [vmem:[%s11088_s25] sm:$0xf] }
 0xcfd   :  { %v17016_v43 = vpack.c.bf16 %v6793_v41, %v6789_v61  ;;  %v7088_v41 = vshrl.u32 %v7079_v22, 16  ;;  %v7081_v18 = vpack.i.b16 %v7079_v22, %v7079_v22  ;;  %v7233_v22 = vld [vmem:[%s11067_s13 + $0x8] sm:$0xff] }
 0xcfe   :  { %6806 = vrot.lane.b32.xlu0 %v17014_v28, %s12590_s21 }
 0xcff   :  { %6808 = vrot.lane.b32.xlu1 %v17016_v43, %s12590_s21  ;;  %v7089_v27 = vpack.i.b16 %v7088_v41, %v7088_v41  ;;  %v7144_v19 = vrot.slane %v7081_v18, %v18668_v40  ;;  %v17086_v3 = vrot.slane %v7081_v18, %v18622_v32  ;;  %v7235_v41 = vld [vmem:[%s11067_s13 + $0x18] sm:$0xff] }
 0xd15   :  { %v6734_v38 = vpop.f32.mrb[40].mxu0 }
 0xd16   :  { %v6735_v55 = vadd.f32 %v6734_v38, %v6680_v35  ;;  %v6736_v9 = vpop.f32.mrb[41].mxu0 }
 0xd17   :  { %v6737_v20 = vadd.f32 %v6736_v9, %v6680_v35  ;;  %v6738_v11 = vpop.f32.mrb[42].mxu0  ;;  %v7094_v9 = vrot.slane %v7089_v27, %v18622_v32 }
 0xd18   :  { %v6739_v30 = vadd.f32 %v6738_v11, %v6685_v0  ;;  %v6740_v44 = vpop.f32.mrb[43].mxu0  ;;  %v6786_v8 = vmax.f32 %v6735_v55, 0.0 }
 0xd19   :  { %v6741_v10 = vadd.f32 %v6740_v44, %v6685_v0  ;;  %v6787_v29 = vmax.f32 %v6737_v20, 0.0  ;;  %v18666_v20 = vld [vmem:[#allocation2_spill] sm:$0xff] }
 0xd1a   :  { %v6790_v23 = vmax.f32 %v6739_v30, 0.0  ;;  %v7114_v11 = vrot.slane %v7089_v27, %v18666_v20  ;;  %v18667_v30 = vld [vmem:[#allocation6_spill] sm:$0xff]  ;;  %v7104_v37 = vrot.slane %v7081_v18, %v18666_v20 }
 0xd1b   :  { %v6791_v12 = vmax.f32 %v6741_v10, 0.0  ;;  %v7134_v44 = vrot.slane %v7089_v27, %v18667_v30  ;;  %v7154_v10 = vrot.slane %v7089_v27, %v18668_v40  ;;  %v7124_v45 = vrot.slane %v7081_v18, %v18667_v30 }
 0xd1c   :  { %v6794_v7 = vpack.c.bf16 %v6790_v23, %v6786_v8 }
 0xd1d   :  { %v6795_v15 = vpack.c.bf16 %v6791_v12, %v6787_v29 }
 0xd1e   :  { %6802 = vrot.lane.b32.xlu0 %v6794_v7, %s12590_s21 }
 0xd1f   :  { %6804 = vrot.lane.b32.xlu1 %v6795_v15, %s12590_s21 }
 0xd22   :  { %6834 = vrot.lane.b32.xlu0 %v18663_v46, %s12605_s6 }
 0xd70   :  { %v6807_v33 = vpop.permute.xlu0 %6806 }
 0xd71   :  { %v6809_v31 = vpop.permute.xlu1 %6808 }
 0xd72   :  { %v6813_v42 = vsel %vm1704_vm8, %v6809_v31, %v18665_v52  ;;  %v6812_v34 = vsel %vm1704_vm8, %v6807_v33, %v6809_v31 }
 0xd73   :  { %v6821_v6 = vmax.bf16 %v6813_v42, %v17016_v43  ;;  %v6820_v39 = vmax.bf16 %v6812_v34, %v17014_v28 }
 0xd75   :  { %6832 = vrot.lane.b32.xlu1 %v6821_v6, %s12605_s6 }
 0xd79   :  { %6830 = vrot.lane.b32.xlu1 %v6820_v39, %s12605_s6 }
 0xd90   :  { %v6803_v47 = vpop.permute.xlu0 %6802 }
 0xd91   :  { %v6805_v4 = vpop.permute.xlu1 %6804 }
 0xd92   :  { %v6810_v14 = vsel %vm1704_vm8, %v6803_v47, %v6805_v4  ;;  %v6811_v57 = vsel %vm1704_vm8, %v6805_v4, %v6807_v33 }
 0xd93   :  { %v6818_v24 = vmax.bf16 %v6810_v14, %v6794_v7  ;;  %v6819_v50 = vmax.bf16 %v6811_v57, %v6795_v15 }
 0xd94   :  { %v6835_v54 = vpop.permute.xlu0 %6834 }
 0xd95   :  { %6828 = vrot.lane.b32.xlu0 %v6819_v50, %s12605_s6  ;;  %6826 = vrot.lane.b32.xlu1 %v6818_v24, %s12605_s6 }
 0xde7   :  { %v6833_v21 = vpop.permute.xlu1 %6832 }
 0xde8   :  { %v6839_v35 = vsel %vm6124_vm3, %v6833_v21, %v6835_v54 }
 0xde9   :  { %v6847_v25 = vmax.bf16 %v6839_v35, %v6821_v6 }
 0xdeb   :  { %v6831_v36 = vpop.permute.xlu1 %6830  ;;  %7049 = vmatprep.mubr.bf16.mxu1 %v6847_v25  ;;  %v12460_v25 = vld [vmem:[%s17065_s30 + $0x4] ss:$8 sps:$4 sm:$0xff]  }
 0xdec   :  { %v6838_v58 = vsel %vm6124_vm3, %v6831_v36, %v6833_v21 }
 0xded   :  { %v6846_v0 = vmax.bf16 %v6838_v58, %v6820_v39 }
 0xdef   :  { %7050 = vmatmul.mubr.bf16.vlgmr.msra.gmra.mrb[44].mxu1 %v6846_v0 }
 0xe07   :  { %v6827_v5 = vpop.permute.xlu1 %6826  ;;  %v6829_v59 = vpop.permute.xlu0 %6828 }
 0xe08   :  { %v6836_v56 = vsel %vm6124_vm3, %v6827_v5, %v6829_v59  ;;  %v6837_v53 = vsel %vm6124_vm3, %v6829_v59, %v6831_v36 }
 0xe09   :  { %v6844_v16 = vmax.bf16 %v6836_v56, %v6818_v24  ;;  %v6845_v49 = vmax.bf16 %v6837_v53, %v6819_v50 }
 0xe0b   :  { %7008 = vmatprep.mubr.bf16.mxu0 %v6845_v49 }
 0xe0c   :  { %7009 = vmatmul.mubr.bf16.vlgmr.msra.gmra.mrb[44].mxu0 %v6844_v16 }
 0xe0d   :  { %11321 = vmatprep.mubr.msk.bf16.mxu0 %vm5882_vm5, %v12460_v25 }
 0xec2   :  { %v11490_v61 = vpop.f32.mrb[44].mxu1 }
 0xec3   :  { %v11491_v28 = vpop.f32.mrb[45].mxu1 }
 0xec4   :  { %v11492_v43 = vadd.f32 %v11491_v28, %v11490_v61  ;;  %v11493_v38 = vpop.f32.mrb[46].mxu1  ;;  %v7232_v61 = vld [vmem:[%s11067_s13] sm:$0xff]  ;;  %v7234_v28 = vld [vmem:[%s11067_s13 + $0x10] sm:$0xff]  ;;  %s12619_s13 = smov 13  }
 0xec5   :  { %v11494_v51 = vpop.f32.mrb[47].mxu1  ;;  %s17365_s25 = sld [smem:[%s18054_s0 + %s12619_s13]]  }
 0xec6   :  { %v11495_v63 = vadd.f32 %v11494_v51, %v11493_v38 }
 0xec8   :  { %v12177_v55 = vpack.i.bf16 %v11495_v63, %v11492_v43 }
 0xeca   :  { %12178 = vrot.lane.b32.xlu0 %v12177_v55, %s12588_s19 }
 0xece   :  { %7096 = vrot.lane.b32.xlu0 %v7094_v9, %s12585_s16 }
 0xed2   :  { %7116 = vrot.lane.b32.xlu0 %v7114_v11, %s12610_s11 }
 0xed6   :  { %7136 = vrot.lane.b32.xlu0 %v7134_v44, %s12601_s1 }
 0xeda   :  { %7156 = vrot.lane.b32.xlu0 %v7154_v10, %s12602_s2 }
 0xedf   :  { %v11468_v26 = vpop.f32.mrb[44].mxu0 }
 0xee0   :  { %v11469_v8 = vpop.f32.mrb[45].mxu0 }
 0xee1   :  { %v11470_v23 = vadd.f32 %v11469_v8, %v11468_v26  ;;  %v11471_v29 = vpop.f32.mrb[46].mxu0 }
 0xee2   :  { %v11472_v12 = vpop.f32.mrb[47].mxu0 }
 0xee3   :  { %v11473_v7 = vadd.f32 %v11472_v12, %v11471_v29 }
 0xf3c   :  { %v12179_v60 = vpop.permute.xlu0 %12178 }
 0xf3d   :  { %v12181_v15 = vunpack.i.h.bf16 %v12179_v60  ;;  %v12180_v62 = vunpack.i.l.bf16 %v12179_v60 }
 0xf3f   :  { %v7068_v17 = vsel %vm1262_vm6, %v11473_v7, %v12181_v15  ;;  %v7067_v48 = vsel %vm1262_vm6, %v11470_v23, %v12180_v62 }
 0xf40   :  { %v7069_v1 = vpack.c.bf16 %v7068_v17, %v7067_v48  ;;  %v17088_v33 = vpop.permute.xlu0 %7096 }
 0xf42   :  { %7071 = vrot.lane.b32.xlu1 %v7069_v1, %s12612_s27 }
 0xf44   :  { %v17104_v57 = vpop.permute.xlu0 %7116 }
 0xf46   :  { %7106 = vrot.lane.b32.xlu1 %v7104_v37, %s12584_s15 }
 0xf48   :  { %v17119_v36 = vpop.permute.xlu0 %7136 }
 0xf4a   :  { %7126 = vrot.lane.b32.xlu1 %v7124_v45, %s12613_s3  ;;  %v12462_v45 = vld [vmem:[%s17065_s30] ss:$8 sps:$4 sm:$0xff]  }
 0xf4c   :  { %v17134_v53 = vpop.permute.xlu0 %7156 }
 0xf4e   :  { %7146 = vrot.lane.b32.xlu1 %v7144_v19, %s12603_s14  ;;  %s12614_s14 = smov 120   ;;  %v12463_v19 = vld [vmem:[%s17065_s30 + $0x14] ss:$8 sps:$4 sm:$0xff]  }
 0xfb4   :  { %v7072_v2 = vpop.permute.xlu1 %7071 }
 0xfb5   :  { %v7075_v31 = vsel %vm7073_vm11, 0, %v7072_v2  ;;  %v7077_v42 = vsel %vm7073_vm11, %v7072_v2, 0  ;;  %v12465_v2 = vld [vmem:[%s17065_s30 + $0x10] ss:$8 sps:$4 sm:$0xff]  }
 0xfb6   :  { %v7100_v6 = vmul.bf16 %v17088_v33, %v7077_v42  ;;  %v7099_v34 = vmul.bf16 %v17088_v33, %v7075_v31  ;;  %v7087_v39 = vmul.bf16 %v17086_v3, %v7075_v31  ;;  %v7120_v24 = vmul.bf16 %v17104_v57, %v7077_v42 }
 0xfb7   :  { %v7119_v50 = vmul.bf16 %v17104_v57, %v7075_v31  ;;  %v7140_v58 = vmul.bf16 %v17119_v36, %v7077_v42  ;;  %v7139_v0 = vmul.bf16 %v17119_v36, %v7075_v31  ;;  %v7160_v16 = vmul.bf16 %v17134_v53, %v7077_v42 }
 0xfb8   :  { %7165 = vrot.lane.b32.xlu0 %v7100_v6, %s12590_s21  ;;  %7163 = vrot.lane.b32.xlu1 %v7099_v34, %s12590_s21  ;;  %v17097_v47 = vpop.permute.xlu1 %7106  ;;  %v7159_v49 = vmul.bf16 %v17134_v53, %v7075_v31 }
 0xfb9   :  { %7281 = vmatpush1.bf16.msra.mxu0 %v7087_v39  ;;  %v7110_v4 = vmul.bf16 %v17097_v47, %v7077_v42  ;;  %v7109_v14 = vmul.bf16 %v17097_v47, %v7075_v31 }
 0xfba   :  { %7282 = vmatprep.subr.bf16.mxu0 %v18664_v13 }
 0xfbc   :  { %7173 = vrot.lane.b32.xlu0 %v7110_v4, %s12591_s22  ;;  %7171 = vrot.lane.b32.xlu1 %v7109_v14, %s12591_s22  ;;  %v17110_v54 = vpop.permute.xlu1 %7126 }
 0xfbd   :  { %v7130_v21 = vmul.bf16 %v17110_v54, %v7077_v42  ;;  %v7129_v35 = vmul.bf16 %v17110_v54, %v7075_v31 }
 0xfc0   :  { %7181 = vrot.lane.b32.xlu0 %v7120_v24, %s12614_s14  ;;  %7179 = vrot.lane.b32.xlu1 %v7119_v50, %s12614_s14  ;;  %v17124_v5 = vpop.permute.xlu1 %7146 }
 0xfc1   :  { %v7150_v59 = vmul.bf16 %v17124_v5, %v7077_v42  ;;  %v7149_v56 = vmul.bf16 %v17124_v5, %v7075_v31 }
 0xfc4   :  { %7190 = vrot.lane.b32.xlu0 %v7077_v42, %s12615_s4  ;;  %7188 = vrot.lane.b32.xlu1 %v7075_v31, %s12615_s4 }
 0xfc8   :  { %7199 = vrot.lane.b32.xlu0 %v7130_v21, %s12616_s12  ;;  %7197 = vrot.lane.b32.xlu1 %v7129_v35, %s12616_s12 }
 0xfcc   :  { %7208 = vrot.lane.b32.xlu0 %v7140_v58, %s12605_s6  ;;  %7206 = vrot.lane.b32.xlu1 %v7139_v0, %s12605_s6 }
 0xfd0   :  { %7216 = vrot.lane.b32.xlu0 %v7150_v59, %s12604_s10  ;;  %7214 = vrot.lane.b32.xlu1 %v7149_v56, %s12604_s10 }
 0xfd4   :  { %7224 = vrot.lane.b32.xlu0 %v7160_v16, %s12606_s7  ;;  %7222 = vrot.lane.b32.xlu1 %v7159_v49, %s12606_s7 }
 0xfd8   :  { %7243 = vperm.xlu0 %12175, %v7233_v22   ;;  %7238 = vperm.xlu1 %12176, %v7232_v61  }
 0xfdc   :  { %7253 = vperm.xlu0 %12175, %v7235_v41   ;;  %7248 = vperm.xlu1 %12176, %v7234_v28  }
0x102a   :  { %v7166_v43 = vpop.permute.xlu0 %7165  ;;  %v7164_v38 = vpop.permute.xlu1 %7163 }
0x102b   :  { %v7167_v51 = vsel %vm1704_vm8, %v7164_v38, %v7166_v43 }
0x102c   :  { %7283 = vmatpush1.bf16.msra.mxu0 %v7167_v51 }
0x102d   :  { %7284 = vmatprep.subr.bf16.mxu0 %v18664_v13 }
0x102e   :  { %v7174_v63 = vpop.permute.xlu0 %7173  ;;  %v7172_v27 = vpop.permute.xlu1 %7171 }
0x102f   :  { %v7175_v55 = vsel %vm1772_vm10, %v7172_v27, %v7174_v63 }
0x1030   :  { %7285 = vmatpush1.bf16.msra.mxu0 %v7175_v55 }
0x1031   :  { %7286 = vmatprep.subr.bf16.mxu0 %v18664_v13 }
0x1032   :  { %v7182_v9 = vpop.permute.xlu0 %7181  ;;  %v7180_v11 = vpop.permute.xlu1 %7179 }
0x1033   :  { %v7184_v44 = vsel %vm7183_vm12, %v7180_v11, %v7182_v9 }
0x1034   :  { %7287 = vmatpush1.bf16.msra.mxu0 %v7184_v44 }
0x1035   :  { %7288 = vmatprep.subr.bf16.mxu0 %v18664_v13 }
0x1036   :  { %v7191_v10 = vpop.permute.xlu0 %7190  ;;  %v7189_v26 = vpop.permute.xlu1 %7188 }
0x1037   :  { %v7193_v8 = vsel %vm7192_vm13, %v7189_v26, %v7191_v10 }
0x1038   :  { %7289 = vmatpush1.bf16.msra.mxu0 %v7193_v8 }
0x1039   :  { %7290 = vmatprep.subr.bf16.mxu0 %v18664_v13 }
0x103a   :  { %v7200_v23 = vpop.permute.xlu0 %7199  ;;  %v7198_v29 = vpop.permute.xlu1 %7197 }
0x103b   :  { %v7202_v12 = vsel %vm7201_vm15, %v7198_v29, %v7200_v23 }
0x103c   :  { %7291 = vmatpush1.bf16.msra.mxu0 %v7202_v12 }
0x103d   :  { %7292 = vmatprep.subr.bf16.mxu0 %v18664_v13 }
0x103e   :  { %v7209_v7 = vpop.permute.xlu0 %7208  ;;  %v7207_v60 = vpop.permute.xlu1 %7206 }
0x103f   :  { %v7210_v15 = vsel %vm6124_vm3, %v7207_v60, %v7209_v7 }
0x1040   :  { %7293 = vmatpush1.bf16.msra.mxu0 %v7210_v15 }
0x1041   :  { %7294 = vmatprep.subr.bf16.mxu0 %v18664_v13 }
0x1042   :  { %v7217_v62 = vpop.permute.xlu0 %7216  ;;  %v7215_v18 = vpop.permute.xlu1 %7214 }
0x1043   :  { %v7218_v17 = vsel %vm6141_vm7, %v7215_v18, %v7217_v62 }
0x1044   :  { %7295 = vmatpush1.bf16.msra.mxu0 %v7218_v17 }
0x1045   :  { %7296 = vmatprep.subr.bf16.mxu0 %v18664_v13 }
0x1046   :  { %v7225_v48 = vpop.permute.xlu0 %7224  ;;  %v7223_v1 = vpop.permute.xlu1 %7222 }
0x1047   :  { %v7226_v37 = vsel %vm6166_vm4, %v7223_v1, %v7225_v48 }
0x1048   :  { %7297 = vmatpush1.bf16.msra.mxu0 %v7226_v37 }
0x104b   :  { %7313 = vmatmul.mubr.bf16.vlgmr.msra.gmra.mrb[48].mxu0 %v12462_v45 }
0x104c   :  { %11322 = vmatprep.mubr.msk.bf16.mxu0 %vm5882_vm5, %v12463_v19 }
0x1053   :  { %7321 = vmatmul.mubr.bf16.gmra.mrb[52].mxu0 %v12465_v2 }
0x1057   :  { %v7239_v31 = vpop.permute.xlu1 %7238  ;;  %v7244_v39 = vpop.permute.xlu0 %7243 }
0x105b   :  { %v7249_v35 = vpop.permute.xlu1 %7248  ;;  %v7254_v59 = vpop.permute.xlu0 %7253 }
0x111e   :  { %v7314_v42 = vpop.f32.mrb[48].mxu0 }
0x111f   :  { %v7315_v6 = vadd.f32 %v7314_v42, %v7239_v31  ;;  %v7316_v34 = vpop.f32.mrb[49].mxu0  ;;  %v12468_v31 = vld [vmem:[%s17234_s28 + $0x4] ss:$12 sps:$4 sm:$0xff]  }
0x1120   :  { %v7317_v4 = vpop.f32.mrb[50].mxu0  ;;  %7610 = vmatprep.mubr.bf16.mxu1 %v12468_v31 }
0x1121   :  { %v7318_v14 = vadd.f32 %v7317_v4, %v7244_v39  ;;  %v7319_v13 = vpop.f32.mrb[51].mxu0  ;;  %v7329_v24 = vmax.f32 %v7315_v6, 0.0 }
0x1122   :  { %v7518_v13 = vld [vmem:[%s11069_s26 + $0x8] sm:$0xff] }
0x1123   :  { %v7330_v50 = vmax.f32 %v7318_v14, 0.0 }
0x1125   :  { %v7333_v21 = vpack.c.bf16 %v7330_v50, %v7329_v24  ;;  %v7517_v24 = vld [vmem:[%s11069_s26] sm:$0xff]  ;;  %v7520_v50 = vld [vmem:[%s11069_s26 + $0x18] sm:$0xff] }
0x1126   :  { %v7322_v25 = vpop.f32.mrb[52].mxu0 }
0x1127   :  { %v7323_v58 = vadd.f32 %v7322_v25, %v7249_v35  ;;  %v7324_v0 = vpop.f32.mrb[53].mxu0  ;;  %7337 = vrot.lane.b32.xlu1 %v7333_v21, %s12612_s27  ;;  %v7519_v21 = vld [vmem:[%s11069_s26 + $0x10] sm:$0xff] }
0x1128   :  { %v7325_v56 = vpop.f32.mrb[54].mxu0 }
0x1129   :  { %v7326_v16 = vadd.f32 %v7325_v56, %v7254_v59  ;;  %v7327_v49 = vpop.f32.mrb[55].mxu0  ;;  %v7331_v22 = vmax.f32 %v7323_v58, 0.0 }
0x112b   :  { %v7332_v61 = vmax.f32 %v7326_v16, 0.0 }
0x112d   :  { %v7334_v41 = vpack.c.bf16 %v7332_v61, %v7331_v22 }
0x112f   :  { %7339 = vrot.lane.b32.xlu0 %v7334_v41, %s12612_s27 }
0x1199   :  { %v7338_v28 = vpop.permute.xlu1 %7337 }
0x119a   :  { %v17164_v43 = vsel %vm7073_vm11, 0, %v7338_v28  ;;  %v17167_v38 = vsel %vm7073_vm11, %v7338_v28, 0 }
0x119b   :  { %7435 = vrot.lane.b32.xlu0 %v17167_v38, %s12615_s4  ;;  %7433 = vrot.lane.b32.xlu1 %v17164_v43, %s12615_s4  ;;  %v7366_v51 = vmul.bf16 %v17167_v38, %v17110_v54  ;;  %v7365_v63 = vmul.bf16 %v17164_v43, %v17110_v54  ;;  %v7354_v27 = vmul.bf16 %v17167_v38, %v17088_v33 }
0x119c   :  { %v7353_v55 = vmul.bf16 %v17164_v43, %v17088_v33  ;;  %v7370_v9 = vmul.bf16 %v17167_v38, %v17119_v36  ;;  %v7369_v11 = vmul.bf16 %v17164_v43, %v17119_v36  ;;  %v7358_v44 = vmul.bf16 %v17167_v38, %v17097_v47 }
0x119d   :  { %v7357_v10 = vmul.bf16 %v17164_v43, %v17097_v47  ;;  %v7374_v26 = vmul.bf16 %v17167_v38, %v17124_v5  ;;  %v7373_v8 = vmul.bf16 %v17164_v43, %v17124_v5  ;;  %v7362_v7 = vmul.bf16 %v17167_v38, %v17104_v57 }
0x119e   :  { %v7361_v60 = vmul.bf16 %v17164_v43, %v17104_v57  ;;  %v7378_v34 = vmul.bf16 %v17167_v38, %v17134_v53  ;;  %v7377_v39 = vmul.bf16 %v17164_v43, %v17134_v53  ;;  %v7351_v0 = vmul.bf16 %v17164_v43, %v17086_v3 }
0x119f   :  { %7451 = vrot.lane.b32.xlu0 %v7366_v51, %s12616_s12  ;;  %7449 = vrot.lane.b32.xlu1 %v7365_v63, %s12616_s12 }
0x11a1   :  { %v7340_v23 = vpop.permute.xlu0 %7339 }
0x11a2   :  { %v17204_v29 = vsel %vm7073_vm11, 0, %v7340_v23  ;;  %v7349_v12 = vsel %vm7073_vm11, %v7340_v23, 0 }
0x11a3   :  { %7387 = vrot.lane.b32.xlu0 %v7354_v27, %s12590_s21  ;;  %7385 = vrot.lane.b32.xlu1 %v7353_v55, %s12590_s21  ;;  %v7368_v15 = vmul.bf16 %v7349_v12, %v17110_v54  ;;  %v7367_v62 = vmul.bf16 %v17204_v29, %v17110_v54  ;;  %v7356_v18 = vmul.bf16 %v7349_v12, %v17088_v33 }
0x11a4   :  { %v7355_v17 = vmul.bf16 %v17204_v29, %v17088_v33  ;;  %v7372_v48 = vmul.bf16 %v7349_v12, %v17119_v36  ;;  %v7371_v1 = vmul.bf16 %v17204_v29, %v17119_v36  ;;  %v7360_v37 = vmul.bf16 %v7349_v12, %v17097_v47 }
0x11a5   :  { %v7359_v45 = vmul.bf16 %v17204_v29, %v17097_v47  ;;  %v7376_v19 = vmul.bf16 %v7349_v12, %v17124_v5  ;;  %v7375_v2 = vmul.bf16 %v17204_v29, %v17124_v5  ;;  %v7364_v42 = vmul.bf16 %v7349_v12, %v17104_v57 }
0x11a6   :  { %v7363_v6 = vmul.bf16 %v17204_v29, %v17104_v57  ;;  %v7380_v4 = vmul.bf16 %v7349_v12, %v17134_v53  ;;  %v7379_v14 = vmul.bf16 %v17204_v29, %v17134_v53 }
0x11a7   :  { %7467 = vrot.lane.b32.xlu0 %v7370_v9, %s12605_s6  ;;  %7465 = vrot.lane.b32.xlu1 %v7369_v11, %s12605_s6  ;;  %v7352_v9 = vmul.bf16 %v17204_v29, %v17086_v3 }
0x11ab   :  { %7403 = vrot.lane.b32.xlu0 %v7358_v44, %s12591_s22  ;;  %7401 = vrot.lane.b32.xlu1 %v7357_v10, %s12591_s22 }
0x11af   :  { %7483 = vrot.lane.b32.xlu0 %v7374_v26, %s12604_s10  ;;  %7481 = vrot.lane.b32.xlu1 %v7373_v8, %s12604_s10 }
0x11b3   :  { %7439 = vrot.lane.b32.xlu0 %v7349_v12, %s12615_s4  ;;  %7437 = vrot.lane.b32.xlu1 %v17204_v29, %s12615_s4 }
0x11b7   :  { %7419 = vrot.lane.b32.xlu0 %v7362_v7, %s12614_s14  ;;  %7417 = vrot.lane.b32.xlu1 %v7361_v60, %s12614_s14 }
0x11bb   :  { %7455 = vrot.lane.b32.xlu0 %v7368_v15, %s12616_s12  ;;  %7453 = vrot.lane.b32.xlu1 %v7367_v62, %s12616_s12 }
0x11bf   :  { %7391 = vrot.lane.b32.xlu0 %v7356_v18, %s12590_s21  ;;  %7389 = vrot.lane.b32.xlu1 %v7355_v17, %s12590_s21 }
0x11c3   :  { %7471 = vrot.lane.b32.xlu0 %v7372_v48, %s12605_s6  ;;  %7469 = vrot.lane.b32.xlu1 %v7371_v1, %s12605_s6 }
0x11c7   :  { %7407 = vrot.lane.b32.xlu0 %v7360_v37, %s12591_s22  ;;  %7405 = vrot.lane.b32.xlu1 %v7359_v45, %s12591_s22 }
0x11cb   :  { %7487 = vrot.lane.b32.xlu0 %v7376_v19, %s12604_s10  ;;  %7485 = vrot.lane.b32.xlu1 %v7375_v2, %s12604_s10 }
0x11cf   :  { %7423 = vrot.lane.b32.xlu0 %v7364_v42, %s12614_s14  ;;  %7421 = vrot.lane.b32.xlu1 %v7363_v6, %s12614_s14 }
0x11d3   :  { %7499 = vrot.lane.b32.xlu0 %v7378_v34, %s12606_s7  ;;  %7497 = vrot.lane.b32.xlu1 %v7377_v39, %s12606_s7 }
0x11d7   :  { %7503 = vrot.lane.b32.xlu0 %v7380_v4, %s12606_s7  ;;  %7501 = vrot.lane.b32.xlu1 %v7379_v14, %s12606_s7  ;;  %v12466_v4 = vld [vmem:[%s17234_s28] ss:$12 sps:$4 sm:$0xff]   ;;  %v12469_v14 = vld [vmem:[%s17234_s28 + $0x1c] ss:$12 sps:$4 sm:$0xff]  }
0x11db   :  { %7528 = vperm.xlu0 %12175, %v7518_v13   ;;  %7523 = vperm.xlu1 %12176, %v7517_v24  }
0x11df   :  { %7538 = vperm.xlu0 %12175, %v7520_v50   ;;  %7533 = vperm.xlu1 %12176, %v7519_v21  }
0x120d   :  { %v7436_v35 = vpop.permute.xlu0 %7435  ;;  %v7434_v25 = vpop.permute.xlu1 %7433 }
0x120e   :  { %v7441_v58 = vsel %vm7192_vm13, %v7434_v25, %v7436_v35 }
0x120f   :  { %11496 = vmatprep.subr.bf16.mxu1 %v7441_v58  ;;  %v12471_v58 = vld [vmem:[%s17234_s28 + $0x18] ss:$12 sps:$4 sm:$0xff]  }
0x1210   :  { %11497 = vmatpush3.bf16.msra.mxu1 %v7351_v0  ;;  %v12472_v0 = vld [vmem:[%s17234_s28 + $0x8] ss:$12 sps:$4 sm:$0xff]  }
0x1211   :  { %v7452_v59 = vpop.permute.xlu0 %7451  ;;  %v7450_v56 = vpop.permute.xlu1 %7449 }
0x1212   :  { %v7457_v43 = vsel %vm7201_vm15, %v7450_v56, %v7452_v59  ;;  %v12473_v59 = vld [vmem:[%s17234_s28 + $0x20] ss:$12 sps:$4 sm:$0xff]   ;;  %s11073_s28 = sld [smem:[%s18054_s0 + %s12601_s1]]  }
0x1215   :  { %v7388_v16 = vpop.permute.xlu0 %7387  ;;  %v7386_v49 = vpop.permute.xlu1 %7385 }
0x1216   :  { %v7393_v10 = vsel %vm1704_vm8, %v7386_v49, %v7388_v16 }
0x1219   :  { %v7468_v22 = vpop.permute.xlu0 %7467  ;;  %v7466_v61 = vpop.permute.xlu1 %7465 }
0x121a   :  { %v7473_v29 = vsel %vm6124_vm3, %v7466_v61, %v7468_v22 }
0x121d   :  { %v7404_v41 = vpop.permute.xlu0 %7403  ;;  %v7402_v28 = vpop.permute.xlu1 %7401 }
0x121e   :  { %v7409_v18 = vsel %vm1772_vm10, %v7402_v28, %v7404_v41 }
0x1221   :  { %v7484_v38 = vpop.permute.xlu0 %7483  ;;  %v7482_v51 = vpop.permute.xlu1 %7481 }
0x1222   :  { %v7489_v45 = vsel %vm6141_vm7, %v7482_v51, %v7484_v38 }
0x1225   :  { %v7440_v63 = vpop.permute.xlu0 %7439  ;;  %v7438_v27 = vpop.permute.xlu1 %7437 }
0x1226   :  { %v7442_v55 = vsel %vm7192_vm13, %v7438_v27, %v7440_v63 }
0x1227   :  { %11498 = vmatprep.subr.bf16.mxu1 %v7442_v55 }
0x1228   :  { %11499 = vmatpush3.bf16.msra.mxu1 %v7352_v9 }
0x1229   :  { %v7420_v11 = vpop.permute.xlu0 %7419  ;;  %v7418_v44 = vpop.permute.xlu1 %7417  ;;  %11500 = vmatprep.subr.bf16.mxu1 %v7457_v43 }
0x122a   :  { %v7425_v31 = vsel %vm7183_vm12, %v7418_v44, %v7420_v11 }
0x122c   :  { %11501 = vmatpush3.bf16.msra.mxu1 %v7393_v10 }
0x122d   :  { %v7456_v26 = vpop.permute.xlu0 %7455  ;;  %v7454_v8 = vpop.permute.xlu1 %7453 }
0x122e   :  { %v7458_v23 = vsel %vm7201_vm15, %v7454_v8, %v7456_v26 }
0x122f   :  { %11502 = vmatprep.subr.bf16.mxu1 %v7458_v23 }
0x1231   :  { %v7392_v12 = vpop.permute.xlu0 %7391  ;;  %v7390_v7 = vpop.permute.xlu1 %7389 }
0x1232   :  { %v7394_v60 = vsel %vm1704_vm8, %v7390_v7, %v7392_v12 }
0x1233   :  { %11503 = vmatpush3.bf16.msra.mxu1 %v7394_v60 }
0x1234   :  { %11504 = vmatprep.subr.bf16.mxu1 %v7473_v29 }
0x1235   :  { %v7472_v15 = vpop.permute.xlu0 %7471  ;;  %v7470_v62 = vpop.permute.xlu1 %7469 }
0x1236   :  { %v7474_v17 = vsel %vm6124_vm3, %v7470_v62, %v7472_v15 }
0x1237   :  { %11505 = vmatpush3.bf16.msra.mxu1 %v7409_v18 }
0x1238   :  { %11506 = vmatprep.subr.bf16.mxu1 %v7474_v17 }
0x1239   :  { %v7408_v48 = vpop.permute.xlu0 %7407  ;;  %v7406_v1 = vpop.permute.xlu1 %7405 }
0x123a   :  { %v7410_v37 = vsel %vm1772_vm10, %v7406_v1, %v7408_v48 }
0x123b   :  { %11507 = vmatpush3.bf16.msra.mxu1 %v7410_v37 }
0x123c   :  { %11508 = vmatprep.subr.bf16.mxu1 %v7489_v45 }
0x123d   :  { %v7488_v19 = vpop.permute.xlu0 %7487  ;;  %v7486_v2 = vpop.permute.xlu1 %7485 }
0x123e   :  { %v7490_v42 = vsel %vm6141_vm7, %v7486_v2, %v7488_v19 }
0x123f   :  { %11509 = vmatpush3.bf16.msra.mxu1 %v7425_v31 }
0x1240   :  { %11510 = vmatprep.subr.bf16.mxu1 %v7490_v42 }
0x1241   :  { %v7424_v6 = vpop.permute.xlu0 %7423  ;;  %v7422_v34 = vpop.permute.xlu1 %7421 }
0x1242   :  { %v7426_v39 = vsel %vm7183_vm12, %v7422_v34, %v7424_v6 }
0x1243   :  { %11511 = vmatpush3.bf16.msra.mxu1 %v7426_v39 }
0x1245   :  { %v7500_v13 = vpop.permute.xlu0 %7499  ;;  %v7498_v24 = vpop.permute.xlu1 %7497 }
0x1246   :  { %7611 = vmatmul.mubr.bf16.vlgmr.msra.gmra.mrb[48].mxu1 %v12466_v4  ;;  %v7505_v50 = vsel %vm6166_vm4, %v7498_v24, %v7500_v13 }
0x1247   :  { %11863 = vmatprep.subr.bf16.mxu1 %v7505_v50  ;;  %7618 = vmatprep.mubr.bf16.mxu1 %v12469_v14 }
0x1248   :  { %11864 = vmatpush3.bf16.msra.mxu1 %v7505_v50 }
0x1249   :  { %v7504_v21 = vpop.permute.xlu0 %7503  ;;  %v7502_v35 = vpop.permute.xlu1 %7501 }
0x124a   :  { %v7506_v25 = vsel %vm6166_vm4, %v7502_v35, %v7504_v21 }
0x124b   :  { %11865 = vmatprep.subr.bf16.mxu1 %v7506_v25 }
0x124c   :  { %11866 = vmatpush3.bf16.msra.mxu1 %v7506_v25 }
0x124e   :  { %7619 = vmatmul.mubr.bf16.gmra.mrb[52].mxu1 %v12471_v58 }
0x124f   :  { %11867 = vmatprep.mubr.msk.bf16.mxu1 %vm938_vm2, %v12472_v0 }
0x1256   :  { %11868 = vmatmul.mubr.msk.bf16.vlgmr.msra.gmra.mrb[56].mxu1 %vm938_vm2, %v12473_v59 }
0x125a   :  { %v7524_v28 = vpop.permute.xlu1 %7523  ;;  %v7529_v63 = vpop.permute.xlu0 %7528 }
0x125e   :  { %v7534_v11 = vpop.permute.xlu1 %7533  ;;  %v7539_v10 = vpop.permute.xlu0 %7538 }
0x1319   :  { %v11512_v56 = vpop.f32.mrb[48].mxu1 }
0x131a   :  { %v11513_v16 = vpop.f32.mrb[49].mxu1 }
0x131b   :  { %v11514_v49 = vadd.f32 %v11513_v16, %v11512_v56  ;;  %v11515_v22 = vpop.f32.mrb[50].mxu1 }
0x131c   :  { %v11516_v61 = vpop.f32.mrb[51].mxu1 }
0x131d   :  { %v11517_v41 = vadd.f32 %v11516_v61, %v11515_v22  ;;  %v7613_v8 = vadd.f32 %v11514_v49, %v7524_v28 }
0x131f   :  { %v7616_v15 = vadd.f32 %v11517_v41, %v7529_v63 }
0x1321   :  { %v11518_v38 = vpop.f32.mrb[52].mxu1 }
0x1322   :  { %v11519_v51 = vpop.f32.mrb[53].mxu1 }
0x1323   :  { %v11520_v27 = vadd.f32 %v11519_v51, %v11518_v38  ;;  %v11521_v55 = vpop.f32.mrb[54].mxu1  ;;  %v12476_v51 = vld [vmem:[%s17365_s25 + $0x4] ss:$12 sps:$4 sm:$0xff]  }
0x1324   :  { %v11522_v9 = vpop.f32.mrb[55].mxu1  ;;  %7956 = vmatprep.mubr.bf16.mxu0 %v12476_v51 }
0x1325   :  { %v11523_v43 = vadd.f32 %v11522_v9, %v11521_v55  ;;  %v7621_v44 = vadd.f32 %v11520_v27, %v7534_v11  ;;  %v12480_v27 = vld [vmem:[%s17365_s25 + $0x8] ss:$12 sps:$4 sm:$0xff]  }
0x1326   :  { %11875 = vmatprep.mubr.msk.bf16.mxu1 %vm938_vm2, %v12480_v27 }
0x1327   :  { %v7624_v7 = vadd.f32 %v11523_v43, %v7539_v10 }
0x1329   :  { %v11869_v26 = vpop.f32.mrb[56].mxu1 }
0x132a   :  { %v7670_v23 = vadd.f32 %v11869_v26, %v7621_v44  ;;  %v7661_v12 = vpop.f32.mrb[57].mxu1 }
0x132b   :  { %v7662_v60 = vadd.f32 %v7661_v12, %v7613_v8  ;;  %v11870_v29 = vpop.f32.mrb[58].mxu1 }
0x132c   :  { %v7673_v62 = vadd.f32 %v11870_v29, %v7624_v7  ;;  %v7664_v18 = vpop.f32.mrb[59].mxu1  ;;  %v7678_v48 = vmax.f32 %v7670_v23, 0.0 }
0x132d   :  { %v7665_v17 = vadd.f32 %v7664_v18, %v7616_v15  ;;  %v7676_v37 = vmax.f32 %v7662_v60, 0.0 }
0x132e   :  { %v7679_v1 = vmax.f32 %v7673_v62, 0.0 }
0x132f   :  { %v7677_v45 = vmax.f32 %v7665_v17, 0.0 }
0x1330   :  { %v7681_v19 = vpack.c.bf16 %v7679_v1, %v7678_v48 }
0x1331   :  { %v7680_v2 = vpack.c.bf16 %v7677_v45, %v7676_v37 }
0x1332   :  { %7686 = vrot.lane.b32.xlu0 %v7681_v19, %s12612_s27 }
0x1333   :  { %7684 = vrot.lane.b32.xlu1 %v7680_v2, %s12612_s27 }
0x13a4   :  { %v7687_v31 = vpop.permute.xlu0 %7686 }
0x13a5   :  { %v17296_v42 = vsel %vm7073_vm11, 0, %v7687_v31  ;;  %v17299_v6 = vsel %vm7073_vm11, %v7687_v31, 0  ;;  %v7685_v34 = vpop.permute.xlu1 %7684 }
0x13a6   :  { %7786 = vrot.lane.b32.xlu0 %v17299_v6, %s12615_s4  ;;  %7784 = vrot.lane.b32.xlu1 %v17296_v42, %s12615_s4  ;;  %v17306_v39 = vsel %vm7073_vm11, 0, %v7685_v34  ;;  %v7694_v4 = vsel %vm7073_vm11, %v7685_v34, 0  ;;  %v7715_v14 = vmul.bf16 %v17299_v6, %v17110_v54  ;;  %v7714_v13 = vmul.bf16 %v17296_v42, %v17110_v54 }
0x13a7   :  { %v7703_v24 = vmul.bf16 %v17299_v6, %v17088_v33  ;;  %v7702_v50 = vmul.bf16 %v17296_v42, %v17088_v33  ;;  %v7719_v21 = vmul.bf16 %v17299_v6, %v17119_v36  ;;  %v7718_v35 = vmul.bf16 %v17296_v42, %v17119_v36 }
0x13a8   :  { %v7707_v25 = vmul.bf16 %v17299_v6, %v17097_v47  ;;  %v7706_v58 = vmul.bf16 %v17296_v42, %v17097_v47  ;;  %v7723_v0 = vmul.bf16 %v17299_v6, %v17124_v5  ;;  %v7722_v59 = vmul.bf16 %v17296_v42, %v17124_v5 }
0x13a9   :  { %v7713_v56 = vmul.bf16 %v7694_v4, %v17110_v54  ;;  %v7712_v16 = vmul.bf16 %v17306_v39, %v17110_v54  ;;  %v7701_v49 = vmul.bf16 %v7694_v4, %v17088_v33  ;;  %v7700_v22 = vmul.bf16 %v17306_v39, %v17088_v33 }
0x13aa   :  { %7782 = vrot.lane.b32.xlu0 %v7694_v4, %s12615_s4  ;;  %7780 = vrot.lane.b32.xlu1 %v17306_v39, %s12615_s4  ;;  %v7717_v61 = vmul.bf16 %v7694_v4, %v17119_v36  ;;  %v7716_v41 = vmul.bf16 %v17306_v39, %v17119_v36  ;;  %v7705_v54 = vmul.bf16 %v7694_v4, %v17097_v47 }
0x13ab   :  { %v7704_v28 = vmul.bf16 %v17306_v39, %v17097_v47  ;;  %v7721_v33 = vmul.bf16 %v7694_v4, %v17124_v5  ;;  %v7720_v36 = vmul.bf16 %v17306_v39, %v17124_v5  ;;  %v7709_v47 = vmul.bf16 %v7694_v4, %v17104_v57 }
0x13ac   :  { %v7708_v38 = vmul.bf16 %v17306_v39, %v17104_v57  ;;  %v7711_v63 = vmul.bf16 %v17299_v6, %v17104_v57  ;;  %v7710_v5 = vmul.bf16 %v17296_v42, %v17104_v57  ;;  %v7725_v55 = vmul.bf16 %v7694_v4, %v17134_v53 }
0x13ad   :  { %v7724_v9 = vmul.bf16 %v17306_v39, %v17134_v53  ;;  %v7727_v57 = vmul.bf16 %v17299_v6, %v17134_v53  ;;  %v7726_v43 = vmul.bf16 %v17296_v42, %v17134_v53  ;;  %v7698_v53 = vmul.bf16 %v17306_v39, %v17086_v3 }
0x13ae   :  { %7802 = vrot.lane.b32.xlu0 %v7715_v14, %s12616_s12  ;;  %7800 = vrot.lane.b32.xlu1 %v7714_v13, %s12616_s12  ;;  %v7699_v18 = vmul.bf16 %v17296_v42, %v17086_v3 }
0x13b2   :  { %7738 = vrot.lane.b32.xlu0 %v7703_v24, %s12590_s21  ;;  %7736 = vrot.lane.b32.xlu1 %v7702_v50, %s12590_s21 }
0x13b6   :  { %7818 = vrot.lane.b32.xlu0 %v7719_v21, %s12605_s6  ;;  %7816 = vrot.lane.b32.xlu1 %v7718_v35, %s12605_s6 }
0x13ba   :  { %7754 = vrot.lane.b32.xlu0 %v7707_v25, %s12591_s22  ;;  %7752 = vrot.lane.b32.xlu1 %v7706_v58, %s12591_s22 }
0x13be   :  { %7834 = vrot.lane.b32.xlu0 %v7723_v0, %s12604_s10  ;;  %7832 = vrot.lane.b32.xlu1 %v7722_v59, %s12604_s10 }
0x13c2   :  { %7798 = vrot.lane.b32.xlu0 %v7713_v56, %s12616_s12  ;;  %7796 = vrot.lane.b32.xlu1 %v7712_v16, %s12616_s12 }
0x13c6   :  { %7734 = vrot.lane.b32.xlu0 %v7701_v49, %s12590_s21  ;;  %7732 = vrot.lane.b32.xlu1 %v7700_v22, %s12590_s21 }
0x13ca   :  { %7814 = vrot.lane.b32.xlu0 %v7717_v61, %s12605_s6  ;;  %7812 = vrot.lane.b32.xlu1 %v7716_v41, %s12605_s6 }
0x13ce   :  { %7750 = vrot.lane.b32.xlu0 %v7705_v54, %s12591_s22  ;;  %7748 = vrot.lane.b32.xlu1 %v7704_v28, %s12591_s22 }
0x13d2   :  { %7830 = vrot.lane.b32.xlu0 %v7721_v33, %s12604_s10  ;;  %7828 = vrot.lane.b32.xlu1 %v7720_v36, %s12604_s10  ;;  %s12620_s10 = smov 14  }
0x13d3   :  { %s11071_s30 = sld [smem:[%s18054_s0 + %s12620_s10]]  }
0x13d6   :  { %7766 = vrot.lane.b32.xlu0 %v7709_v47, %s12614_s14  ;;  %7764 = vrot.lane.b32.xlu1 %v7708_v38, %s12614_s14  ;;  %v12474_v47 = vld [vmem:[%s17365_s25] ss:$12 sps:$4 sm:$0xff]   ;;  %v12477_v38 = vld [vmem:[%s17365_s25 + $0x1c] ss:$12 sps:$4 sm:$0xff]  }
0x13d9   :  { %v7865_v11 = vld [vmem:[%s11071_s30 + $0x8] sm:$0xff]  ;;  %v7864_v44 = vld [vmem:[%s11071_s30] sm:$0xff]  ;;  %v7867_v10 = vld [vmem:[%s11071_s30 + $0x18] sm:$0xff] }
0x13da   :  { %7770 = vrot.lane.b32.xlu0 %v7711_v63, %s12614_s14  ;;  %7768 = vrot.lane.b32.xlu1 %v7710_v5, %s12614_s14  ;;  %v7866_v26 = vld [vmem:[%s11071_s30 + $0x10] sm:$0xff]  ;;  %s11075_s30 = sld [smem:[%s18054_s0 + %s12602_s2]]   ;;  %s12626_s2 = smov 19  }
0x13de   :  { %7846 = vrot.lane.b32.xlu0 %v7725_v55, %s12606_s7  ;;  %7844 = vrot.lane.b32.xlu1 %v7724_v9, %s12606_s7 }
0x13e2   :  { %7850 = vrot.lane.b32.xlu0 %v7727_v57, %s12606_s7  ;;  %7848 = vrot.lane.b32.xlu1 %v7726_v43, %s12606_s7  ;;  %v12479_v57 = vld [vmem:[%s17365_s25 + $0x18] ss:$12 sps:$4 sm:$0xff]   ;;  %v12481_v43 = vld [vmem:[%s17365_s25 + $0x20] ss:$12 sps:$4 sm:$0xff]   ;;  %s12621_s7 = smov 35  }
0x13e3   :  { %s11092_s13 = sld [smem:[%s18054_s0 + %s12621_s7]]  }
0x13e6   :  { %7875 = vperm.xlu0 %12175, %v7865_v11   ;;  %7870 = vperm.xlu1 %12176, %v7864_v44  }
0x13ea   :  { %7885 = vperm.xlu0 %12175, %v7867_v10   ;;  %7880 = vperm.xlu1 %12176, %v7866_v26  }
0x1418   :  { %v7787_v8 = vpop.permute.xlu0 %7786  ;;  %v7785_v23 = vpop.permute.xlu1 %7784 }
0x1419   :  { %v7789_v29 = vsel %vm7192_vm13, %v7785_v23, %v7787_v8 }
0x141c   :  { %v7783_v12 = vpop.permute.xlu0 %7782  ;;  %v7781_v7 = vpop.permute.xlu1 %7780 }
0x141d   :  { %v7788_v60 = vsel %vm7192_vm13, %v7781_v7, %v7783_v12 }
0x141e   :  { %11528 = vmatprep.subr.bf16.mxu0 %v7788_v60 }
0x141f   :  { %11529 = vmatpush3.bf16.msra.mxu0 %v7698_v53 }
0x1420   :  { %v7803_v15 = vpop.permute.xlu0 %7802  ;;  %11530 = vmatprep.subr.bf16.mxu0 %v7789_v29  ;;  %v7801_v62 = vpop.permute.xlu1 %7800 }
0x1421   :  { %v7805_v3 = vsel %vm7201_vm15, %v7801_v62, %v7803_v15 }
0x1423   :  { %11531 = vmatpush3.bf16.msra.mxu0 %v7699_v18 }
0x1424   :  { %v7739_v17 = vpop.permute.xlu0 %7738  ;;  %v7737_v48 = vpop.permute.xlu1 %7736 }
0x1425   :  { %v7741_v50 = vsel %vm1704_vm8, %v7737_v48, %v7739_v17 }
0x1428   :  { %v7819_v1 = vpop.permute.xlu0 %7818  ;;  %v7817_v37 = vpop.permute.xlu1 %7816 }
0x1429   :  { %v7821_v0 = vsel %vm6124_vm3, %v7817_v37, %v7819_v1 }
0x142c   :  { %v7755_v45 = vpop.permute.xlu0 %7754  ;;  %v7753_v19 = vpop.permute.xlu1 %7752 }
0x142d   :  { %v7757_v16 = vsel %vm1772_vm10, %v7753_v19, %v7755_v45 }
0x1430   :  { %v7835_v2 = vpop.permute.xlu0 %7834  ;;  %v7833_v31 = vpop.permute.xlu1 %7832 }
0x1431   :  { %v7837_v54 = vsel %vm6141_vm7, %v7833_v31, %v7835_v2 }
0x1434   :  { %v7799_v6 = vpop.permute.xlu0 %7798  ;;  %v7797_v34 = vpop.permute.xlu1 %7796 }
0x1435   :  { %v7804_v39 = vsel %vm7201_vm15, %v7797_v34, %v7799_v6 }
0x1436   :  { %11532 = vmatprep.subr.bf16.mxu0 %v7804_v39 }
0x1438   :  { %v7735_v4 = vpop.permute.xlu0 %7734  ;;  %v7733_v14 = vpop.permute.xlu1 %7732 }
0x1439   :  { %v7740_v13 = vsel %vm1704_vm8, %v7733_v14, %v7735_v4 }
0x143a   :  { %11533 = vmatpush3.bf16.msra.mxu0 %v7740_v13 }
0x143b   :  { %11534 = vmatprep.subr.bf16.mxu0 %v7805_v3 }
0x143c   :  { %v7815_v42 = vpop.permute.xlu0 %7814  ;;  %v7813_v24 = vpop.permute.xlu1 %7812 }
0x143d   :  { %v7820_v21 = vsel %vm6124_vm3, %v7813_v24, %v7815_v42 }
0x143e   :  { %11535 = vmatpush3.bf16.msra.mxu0 %v7741_v50 }
0x143f   :  { %11536 = vmatprep.subr.bf16.mxu0 %v7820_v21 }
0x1440   :  { %v7751_v35 = vpop.permute.xlu0 %7750  ;;  %v7749_v25 = vpop.permute.xlu1 %7748 }
0x1441   :  { %v7756_v58 = vsel %vm1772_vm10, %v7749_v25, %v7751_v35  ;;  %v12482_v25 = vld [vmem:[%s11092_s13] sm:$0xff]   ;;  %vm8235_vm10 = vcmask 302080  }
0x1442   :  { %11537 = vmatpush3.bf16.msra.mxu0 %v7756_v58  ;;  %v12483_v58 = vld [vmem:[%s11092_s13 + $0x8] sm:$0xff]  }
0x1443   :  { %11538 = vmatprep.subr.bf16.mxu0 %v7821_v0  ;;  %v12484_v0 = vld [vmem:[%s11092_s13 + $0x10] sm:$0xff]  }
0x1444   :  { %v7831_v59 = vpop.permute.xlu0 %7830  ;;  %v7829_v56 = vpop.permute.xlu1 %7828 }
0x1445   :  { %v7836_v49 = vsel %vm6141_vm7, %v7829_v56, %v7831_v59  ;;  %v12485_v59 = vld [vmem:[%s11092_s13 + $0x18] sm:$0xff]   ;;  %s12636_s13 = smov 25  }
0x1446   :  { %11539 = vmatpush3.bf16.msra.mxu0 %v7757_v16 }
0x1447   :  { %11540 = vmatprep.subr.bf16.mxu0 %v7836_v49 }
0x1448   :  { %v7767_v22 = vpop.permute.xlu0 %7766  ;;  %v7765_v61 = vpop.permute.xlu1 %7764 }
0x1449   :  { %v7772_v41 = vsel %vm7183_vm12, %v7765_v61, %v7767_v22 }
0x144a   :  { %11541 = vmatpush3.bf16.msra.mxu0 %v7772_v41 }
0x144b   :  { %11542 = vmatprep.subr.bf16.mxu0 %v7837_v54 }
0x144c   :  { %v7771_v28 = vpop.permute.xlu0 %7770  ;;  %v7769_v33 = vpop.permute.xlu1 %7768 }
0x144d   :  { %v7773_v36 = vsel %vm7183_vm12, %v7769_v33, %v7771_v28 }
0x144e   :  { %11543 = vmatpush3.bf16.msra.mxu0 %v7773_v36 }
0x144f   :  { %11891 = vmatprep.subr.bf16.mxu0 %v12482_v25 }
0x1450   :  { %v7847_v51 = vpop.permute.xlu0 %7846  ;;  %v7845_v63 = vpop.permute.xlu1 %7844 }
0x1451   :  { %7957 = vmatmul.mubr.bf16.vlgmr.msra.gmra.mrb[56].mxu0 %v12474_v47  ;;  %v7852_v5 = vsel %vm6166_vm4, %v7845_v63, %v7847_v51 }
0x1452   :  { %11871 = vmatprep.subr.bf16.mxu1 %v7852_v5  ;;  %7964 = vmatprep.mubr.bf16.mxu0 %v12477_v38 }
0x1453   :  { %11872 = vmatpush3.bf16.msra.mxu1 %v7852_v5  ;;  %11892 = vmatpush3.bf16.msra.mxu0 %v12482_v25 }
0x1454   :  { %v7851_v27 = vpop.permute.xlu0 %7850  ;;  %v7849_v55 = vpop.permute.xlu1 %7848  ;;  %11893 = vmatprep.subr.bf16.mxu0 %v12483_v58 }
0x1455   :  { %v7853_v9 = vsel %vm6166_vm4, %v7849_v55, %v7851_v27 }
0x1456   :  { %11873 = vmatprep.subr.bf16.mxu1 %v7853_v9 }
0x1457   :  { %11874 = vmatpush3.bf16.msra.mxu1 %v7853_v9  ;;  %11894 = vmatpush3.bf16.msra.mxu0 %v12483_v58 }
0x1458   :  { %11879 = vmatprep.subr.bf16.mxu1 %v12482_v25  ;;  %11895 = vmatprep.subr.bf16.mxu0 %v12484_v0 }
0x1459   :  { %7965 = vmatmul.mubr.bf16.gmra.mrb[60].mxu0 %v12479_v57 }
0x145a   :  { %11876 = vmatmul.mubr.msk.bf16.vlgmr.msra.gmra.mrb[60].mxu1 %vm938_vm2, %v12481_v43 }
0x145b   :  { %11880 = vmatpush3.bf16.msra.mxu1 %v12482_v25  ;;  %11896 = vmatpush3.bf16.msra.mxu0 %v12484_v0 }
0x145c   :  { %11881 = vmatprep.subr.bf16.mxu1 %v12483_v58  ;;  %11897 = vmatprep.subr.bf16.mxu0 %v12485_v59 }
0x145f   :  { %11882 = vmatpush3.bf16.msra.mxu1 %v12483_v58  ;;  %11898 = vmatpush3.bf16.msra.mxu0 %v12485_v59 }
0x1460   :  { %11883 = vmatprep.subr.bf16.mxu1 %v12484_v0 }
0x1463   :  { %11884 = vmatpush3.bf16.msra.mxu1 %v12484_v0 }
0x1464   :  { %11885 = vmatprep.subr.bf16.mxu1 %v12485_v59 }
0x1465   :  { %v7871_v10 = vpop.permute.xlu1 %7870  ;;  %v7876_v7 = vpop.permute.xlu0 %7875 }
0x1467   :  { %11886 = vmatpush3.bf16.msra.mxu1 %v12485_v59 }
0x1469   :  { %v7881_v60 = vpop.permute.xlu1 %7880  ;;  %v7886_v34 = vpop.permute.xlu0 %7885 }
0x1524   :  { %v11544_v11 = vpop.f32.mrb[56].mxu0 }
0x1525   :  { %v11545_v44 = vpop.f32.mrb[57].mxu0 }
0x1526   :  { %v11546_v26 = vadd.f32 %v11545_v44, %v11544_v11  ;;  %v11547_v8 = vpop.f32.mrb[58].mxu0 }
0x1527   :  { %v11548_v23 = vpop.f32.mrb[59].mxu0 }
0x1528   :  { %v11549_v12 = vadd.f32 %v11548_v23, %v11547_v8  ;;  %v7959_v62 = vadd.f32 %v11546_v26, %v7871_v10  ;;  %v8240_v26 = vld [vmem:[%s11089_s24] sm:$0xf] }
0x1529   :  { %v8250_v8 = vshrl.u32 %v8240_v26, 16 }
0x152a   :  { %v7962_v19 = vadd.f32 %v11549_v12, %v7876_v7 }
0x152c   :  { %v11550_v53 = vpop.f32.mrb[60].mxu0 }
0x152d   :  { %v11551_v29 = vpop.f32.mrb[61].mxu0  ;;  %v11877_v15 = vpop.f32.mrb[60].mxu1 }
0x152e   :  { %v11552_v18 = vadd.f32 %v11551_v29, %v11550_v53  ;;  %v11553_v17 = vpop.f32.mrb[62].mxu0  ;;  %v8007_v48 = vpop.f32.mrb[61].mxu1 }
0x152f   :  { %v8008_v1 = vadd.f32 %v8007_v48, %v7959_v62  ;;  %v11554_v37 = vpop.f32.mrb[63].mxu0  ;;  %v11878_v45 = vpop.f32.mrb[62].mxu1 }
0x1530   :  { %v7967_v2 = vadd.f32 %v11552_v18, %v7881_v60  ;;  %v11555_v31 = vadd.f32 %v11554_v37, %v11553_v17  ;;  %v8010_v6 = vpop.f32.mrb[63].mxu1  ;;  %v17454_v17 = vpack.i.b16 %v8240_v26, %v8240_v26 }
0x1531   :  { %v8011_v39 = vadd.f32 %v8010_v6, %v7962_v19  ;;  %v8022_v13 = vmax.f32 %v8008_v1, 0.0 }
0x1532   :  { %v8016_v4 = vadd.f32 %v11877_v15, %v7967_v2  ;;  %v7970_v14 = vadd.f32 %v11555_v31, %v7886_v34  ;;  %v8251_v15 = vpack.i.b16 %v8250_v8, %v8250_v8  ;;  %v8286_v2 = vrot.slane %v17454_v17, %v18667_v30 }
0x1533   :  { %v8023_v3 = vmax.f32 %v8011_v39, 0.0  ;;  %v8266_v31 = vrot.slane %v17454_v17, %v18666_v20  ;;  %v8306_v39 = vrot.slane %v17454_v17, %v18668_v40 }
0x1534   :  { %v8019_v42 = vadd.f32 %v11878_v45, %v7970_v14  ;;  %v8024_v50 = vmax.f32 %v8016_v4, 0.0  ;;  %v8256_v19 = vrot.slane %v8251_v15, %v18622_v32  ;;  %v8296_v6 = vrot.slane %v8251_v15, %v18667_v30 }
0x1535   :  { %v8026_v24 = vpack.c.bf16 %v8023_v3, %v8022_v13  ;;  %v8276_v34 = vrot.slane %v8251_v15, %v18666_v20  ;;  %v8316_v4 = vrot.slane %v8251_v15, %v18668_v40 }
0x1536   :  { %v8025_v21 = vmax.f32 %v8019_v42, 0.0 }
0x1537   :  { %8030 = vrot.lane.b32.xlu1 %v8026_v24, %s12590_s21 }
0x1538   :  { %v8027_v35 = vpack.c.bf16 %v8025_v21, %v8024_v50 }
0x153a   :  { %8032 = vrot.lane.b32.xlu0 %v8027_v35, %s12590_s21 }
0x153e   :  { %8044 = vrot.lane.b32.xlu0 %v18663_v46, %s12614_s14 }
0x15a9   :  { %v8031_v56 = vpop.permute.xlu1 %8030 }
0x15aa   :  { %v8034_v16 = vsel %vm1704_vm8, %v8031_v56, %v18665_v52 }
0x15ab   :  { %v8038_v49 = vmax.bf16 %v8034_v16, %v8026_v24 }
0x15ac   :  { %v8033_v22 = vpop.permute.xlu0 %8032 }
0x15ad   :  { %v8035_v46 = vsel %vm1704_vm8, %v8033_v22, %v18665_v52  ;;  %8042 = vrot.lane.b32.xlu1 %v8038_v49, %s12614_s14  ;;  %vm8230_vm8 = vcmask 39936  }
0x15ae   :  { %v8039_v61 = vmax.bf16 %v8035_v46, %v8027_v35 }
0x15b0   :  { %v8045_v41 = vpop.permute.xlu0 %8044 }
0x15b1   :  { %8046 = vrot.lane.b32.xlu1 %v8039_v61, %s12614_s14 }
0x161f   :  { %v8043_v54 = vpop.permute.xlu1 %8042 }
0x1620   :  { %v8048_v28 = vsel %vm7183_vm12, %v8043_v54, %v8045_v41 }
0x1621   :  { %v8052_v33 = vmax.bf16 %v8048_v28, %v8038_v49 }
0x1623   :  { %8143 = vrot.lane.b32.xlu0 %v8052_v33, %s12588_s19  ;;  %11887 = vmatprep.mubr.msk.bf16.mxu1 %vm1262_vm6, %v8052_v33  ;;  %v8047_v36 = vpop.permute.xlu1 %8046 }
0x1624   :  { %v8049_v47 = vsel %vm7183_vm12, %v8047_v36, %v8045_v41 }
0x1625   :  { %v8053_v38 = vmax.bf16 %v8049_v47, %v8039_v61 }
0x1627   :  { %8145 = vrot.lane.b32.xlu1 %v8053_v38, %s12588_s19  ;;  %11888 = vmatmul.mubr.msk.bf16.vlgmr.msra.gmra.mrb[64].mxu1 %vm1262_vm6, %v8053_v38 }
0x1695   :  { %v8144_v52 = vpop.permute.xlu0 %8143 }
0x1696   :  { %11899 = vmatprep.mubr.msk.bf16.mxu0 %vm1262_vm6, %v8144_v52 }
0x1699   :  { %v8146_v51 = vpop.permute.xlu1 %8145 }
0x169a   :  { %11900 = vmatmul.mubr.msk.bf16.vlgmr.msra.gmra.mrb[64].mxu0 %vm1262_vm6, %v8146_v51  ;;  %v8404_v51 = vld [vmem:[%s11073_s28 + $0x8] sm:$0xff] }
0x16fa   :  { %v11889_v63 = vpop.f32.mrb[64].mxu1 }
0x16fb   :  { %v8126_v5 = vpop.f32.mrb[65].mxu1 }
0x16fc   :  { %v11890_v27 = vpop.f32.mrb[66].mxu1 }
0x16fd   :  { %v8129_v55 = vpop.f32.mrb[67].mxu1 }
0x176d   :  { %v11901_v9 = vpop.f32.mrb[64].mxu0 }
0x176e   :  { %v8187_v57 = vpop.f32.mrb[65].mxu0 }
0x176f   :  { %v11902_v43 = vpop.f32.mrb[66].mxu0 }
0x1770   :  { %v12187_v11 = vpack.i.bf16 %v11902_v43, %v11901_v9  ;;  %v8190_v44 = vpop.f32.mrb[67].mxu0  ;;  %v8407_v9 = vld [vmem:[%s11073_s28 + $0x20] sm:$0xff]  ;;  %v8409_v43 = vld [vmem:[%s11073_s28 + $0x30] sm:$0xff] }
0x1771   :  { %v12182_v10 = vpack.i.bf16 %v8190_v44, %v8187_v57  ;;  %v8410_v57 = vld [vmem:[%s11073_s28 + $0x38] sm:$0xff] }
0x1772   :  { %12188 = vrot.lane.b32.xlu1 %v12187_v11, %s12601_s1  ;;  %v17559_v11 = vrot.slane %v17454_v17, %v18622_v32 }
0x1773   :  { %12183 = vrot.lane.b32.xlu0 %v12182_v10, %s12601_s1 }
0x17e4   :  { %v12189_v23 = vpop.permute.xlu1 %12188 }
0x17e5   :  { %v12191_v12 = vunpack.i.h.bf16 %v12189_v23  ;;  %v12190_v7 = vunpack.i.l.bf16 %v12189_v23  ;;  %v12184_v60 = vpop.permute.xlu0 %12183 }
0x17e6   :  { %v12186_v53 = vunpack.i.h.bf16 %v12184_v60  ;;  %v12185_v29 = vunpack.i.l.bf16 %v12184_v60 }
0x17e7   :  { %v8220_v62 = vsel %vm5882_vm5, %v11889_v63, %v12190_v7  ;;  %v8221_v18 = vsel %vm5882_vm5, %v11890_v27, %v12191_v12  ;;  %v8403_v63 = vld [vmem:[%s11073_s28] sm:$0xff]  ;;  %v8405_v27 = vld [vmem:[%s11073_s28 + $0x10] sm:$0xff] }
0x17e8   :  { %v8218_v48 = vsel %vm5882_vm5, %v8126_v5, %v12185_v29  ;;  %v8219_v1 = vsel %vm5882_vm5, %v8129_v55, %v12186_v53  ;;  %v8223_v37 = vpack.c.bf16 %v8221_v18, %v8220_v62  ;;  %v8406_v5 = vld [vmem:[%s11073_s28 + $0x18] sm:$0xff]  ;;  %v8408_v55 = vld [vmem:[%s11073_s28 + $0x28] sm:$0xff] }
0x17e9   :  { %v8222_v45 = vpack.c.bf16 %v8219_v1, %v8218_v48 }
0x17ea   :  { %8228 = vrot.lane.b32.xlu1 %v8223_v37, %s12608_s20 }
0x17eb   :  { %8226 = vrot.lane.b32.xlu0 %v8222_v45, %s12608_s20 }
0x17ee   :  { %8258 = vrot.lane.b32.xlu1 %v8256_v19, %s12585_s16  ;;  %s12623_s16 = smov 122  }
0x17ef   :  { %8288 = vrot.lane.b32.xlu0 %v8286_v2, %s12607_s9 }
0x17f2   :  { %8268 = vrot.lane.b32.xlu1 %v8266_v31, %s12584_s15  ;;  %s12622_s15 = smov 123  }
0x17f3   :  { %8298 = vrot.lane.b32.xlu0 %v8296_v6, %s12610_s11  ;;  %s12631_s11 = smov 24  }
0x17f4   :  { %s17936_s25 = sld [smem:[%s18054_s0 + %s12631_s11]]  }
0x17f6   :  { %8278 = vrot.lane.b32.xlu1 %v8276_v34, %s12599_s8 }
0x17f7   :  { %8308 = vrot.lane.b32.xlu0 %v8306_v39, %s12612_s27  ;;  %s17532_s27 = sld [smem:[%s18054_s0 + %s12624_s17]]   ;;  %s12640_s17 = smov 38  }
0x17fb   :  { %8318 = vrot.lane.b32.xlu0 %v8316_v4, %s12613_s3  ;;  %s12625_s3 = smov 124  }
0x17fd   :  { %v12488_v47 = vld [vmem:[%s17532_s27 + $0x4] ss:$12 sps:$4 sm:$0xff]   ;;  %v12489_v52 = vld [vmem:[%s17532_s27 + $0x8] ss:$12 sps:$4 sm:$0xff]   ;;  %v12486_v37 = vld [vmem:[%s17532_s27] ss:$12 sps:$4 sm:$0xff]  }
0x17fe   :  { %8555 = vmatprep.mubr.bf16.mxu1 %v12488_v47  ;;  %11907 = vmatprep.mubr.msk.bf16.mxu0 %vm938_vm2, %v12489_v52  ;;  %v12491_v19 = vld [vmem:[%s17532_s27 + $0x1c] ss:$12 sps:$4 sm:$0xff]   ;;  %v12490_v2 = vld [vmem:[%s17532_s27 + $0x20] ss:$12 sps:$4 sm:$0xff]   ;;  %v12497_v31 = vld [vmem:[%s17532_s27 + $0x38] ss:$12 sps:$4 sm:$0xff]  }
0x17ff   :  { %v12493_v6 = vld [vmem:[%s17532_s27 + $0x18] ss:$12 sps:$4 sm:$0xff]   ;;  %v12494_v34 = vld [vmem:[%s17532_s27 + $0x34] ss:$12 sps:$4 sm:$0xff]   ;;  %v12498_v39 = vld [vmem:[%s17532_s27 + $0x50] ss:$12 sps:$4 sm:$0xff]  }
0x1800   :  { %v12496_v4 = vld [vmem:[%s17532_s27 + $0x30] ss:$12 sps:$4 sm:$0xff]  }
0x185c   :  { %v8229_v30 = vpop.permute.xlu1 %8228 }
0x185d   :  { %v8234_v14 = vsel %vm8230_vm8, 0, %v8229_v30  ;;  %v8227_v13 = vpop.permute.xlu0 %8226  ;;  %v12499_v30 = vld [vmem:[%s17532_s27 + $0x4c] ss:$12 sps:$4 sm:$0xff]  }
0x185e   :  { %v17479_v20 = vsel %vm8235_vm10, %v8234_v14, 0  ;;  %v8232_v3 = vsel %vm8230_vm8, 0, %v8227_v13  ;;  %v12501_v14 = vld [vmem:[%s17532_s27 + $0x48] ss:$12 sps:$4 sm:$0xff]   ;;  %s11095_s27 = sld [smem:[%s18054_s0 + %s12640_s17]]  }
0x185f   :  { %v17483_v42 = vsel %vm8235_vm10, %v8232_v3, 0  ;;  %8351 = vrot.lane.b32.xlu0 %v17479_v20, %s12622_s15  ;;  %v8249_v12 = vmul.bf16 %v17559_v11, %v17479_v20 }
0x1860   :  { %v17487_v40 = vpop.permute.xlu1 %8258  ;;  %8349 = vrot.lane.b32.xlu1 %v17483_v42, %s12622_s15  ;;  %v8248_v26 = vmul.bf16 %v17559_v11, %v17483_v42 }
0x1861   :  { %v17491_v24 = vpop.permute.xlu0 %8288  ;;  %v8261_v50 = vmul.bf16 %v17487_v40, %v17483_v42  ;;  %v8262_v35 = vmul.bf16 %v17487_v40, %v17479_v20 }
0x1862   :  { %v8291_v21 = vmul.bf16 %v17491_v24, %v17483_v42  ;;  %v8292_v58 = vmul.bf16 %v17491_v24, %v17479_v20 }
0x1863   :  { %8325 = vrot.lane.b32.xlu0 %v8261_v50, %s12590_s21 }
0x1864   :  { %8357 = vrot.lane.b32.xlu1 %v8291_v21, %s12623_s16  ;;  %v17501_v25 = vpop.permute.xlu1 %8268 }
0x1865   :  { %v17505_v0 = vpop.permute.xlu0 %8298  ;;  %v8271_v59 = vmul.bf16 %v17501_v25, %v17483_v42  ;;  %v8272_v16 = vmul.bf16 %v17501_v25, %v17479_v20 }
0x1866   :  { %v8301_v56 = vmul.bf16 %v17505_v0, %v17483_v42  ;;  %v8302_v22 = vmul.bf16 %v17505_v0, %v17479_v20 }
0x1867   :  { %8327 = vrot.lane.b32.xlu0 %v8262_v35, %s12590_s21 }
0x1868   :  { %8359 = vrot.lane.b32.xlu1 %v8292_v58, %s12623_s16  ;;  %v17517_v49 = vpop.permute.xlu1 %8278 }
0x1869   :  { %v17521_v46 = vpop.permute.xlu0 %8308  ;;  %v8281_v61 = vmul.bf16 %v17517_v49, %v17483_v42  ;;  %v8282_v54 = vmul.bf16 %v17517_v49, %v17479_v20 }
0x186a   :  { %v8311_v41 = vmul.bf16 %v17521_v46, %v17483_v42  ;;  %v8312_v33 = vmul.bf16 %v17521_v46, %v17479_v20 }
0x186b   :  { %8333 = vrot.lane.b32.xlu0 %v8271_v59, %s12591_s22 }
0x186c   :  { %8365 = vrot.lane.b32.xlu1 %v8301_v56, %s12614_s14 }
0x186d   :  { %v17542_v28 = vpop.permute.xlu0 %8318 }
0x186e   :  { %v8322_v36 = vmul.bf16 %v17542_v28, %v17479_v20  ;;  %v8321_v38 = vmul.bf16 %v17542_v28, %v17483_v42 }
0x186f   :  { %8335 = vrot.lane.b32.xlu0 %v8272_v16, %s12591_s22 }
0x1870   :  { %8367 = vrot.lane.b32.xlu1 %v8302_v22, %s12614_s14 }
0x1873   :  { %8341 = vrot.lane.b32.xlu0 %v8281_v61, %s12625_s3 }
0x1874   :  { %8373 = vrot.lane.b32.xlu1 %v8311_v41, %s12615_s4 }
0x1877   :  { %8343 = vrot.lane.b32.xlu0 %v8282_v54, %s12625_s3 }
0x1878   :  { %8375 = vrot.lane.b32.xlu1 %v8312_v33, %s12615_s4 }
0x187b   :  { %8383 = vrot.lane.b32.xlu0 %v8322_v36, %s12616_s12 }
0x187c   :  { %8381 = vrot.lane.b32.xlu1 %v8321_v38, %s12616_s12 }
0x187f   :  { %8418 = vperm.xlu0 %12175, %v8404_v51  }
0x1880   :  { %8413 = vperm.xlu1 %12176, %v8403_v63  }
0x1883   :  { %8428 = vperm.xlu0 %12175, %v8406_v5  }
0x1884   :  { %8423 = vperm.xlu1 %12176, %v8405_v27  }
0x1887   :  { %8438 = vperm.xlu0 %12175, %v8408_v55  }
0x1888   :  { %8433 = vperm.xlu1 %12176, %v8407_v9  }
0x188b   :  { %8448 = vperm.xlu0 %12175, %v8410_v57  }
0x188c   :  { %8443 = vperm.xlu1 %12176, %v8409_v43  }
0x18d1   :  { %v8352_v44 = vpop.permute.xlu0 %8351 }
0x18d2   :  { %v8350_v10 = vpop.permute.xlu1 %8349 }
0x18d3   :  { %11572 = vmatprep.subr.bf16.mxu1 %v8350_v10 }
0x18d4   :  { %11573 = vmatpush3.bf16.msra.mxu1 %v8248_v26 }
0x18d5   :  { %11574 = vmatprep.subr.bf16.mxu1 %v8352_v44  ;;  %v8326_v8 = vpop.permute.xlu0 %8325 }
0x18d6   :  { %v8358_v23 = vpop.permute.xlu1 %8357 }
0x18d8   :  { %11575 = vmatpush3.bf16.msra.mxu1 %v8249_v12 }
0x18d9   :  { %11576 = vmatprep.subr.bf16.mxu1 %v8358_v23  ;;  %v8328_v7 = vpop.permute.xlu0 %8327 }
0x18da   :  { %v8360_v60 = vpop.permute.xlu1 %8359 }
0x18dc   :  { %11577 = vmatpush3.bf16.msra.mxu1 %v8326_v8 }
0x18dd   :  { %11578 = vmatprep.subr.bf16.mxu1 %v8360_v60  ;;  %v8334_v32 = vpop.permute.xlu0 %8333 }
0x18de   :  { %v8366_v53 = vpop.permute.xlu1 %8365 }
0x18e0   :  { %11579 = vmatpush3.bf16.msra.mxu1 %v8328_v7 }
0x18e1   :  { %11580 = vmatprep.subr.bf16.mxu1 %v8366_v53  ;;  %v8336_v29 = vpop.permute.xlu0 %8335 }
0x18e2   :  { %v8368_v15 = vpop.permute.xlu1 %8367 }
0x18e4   :  { %11581 = vmatpush3.bf16.msra.mxu1 %v8334_v32 }
0x18e5   :  { %11582 = vmatprep.subr.bf16.mxu1 %v8368_v15  ;;  %v8342_v62 = vpop.permute.xlu0 %8341 }
0x18e6   :  { %v8374_v18 = vpop.permute.xlu1 %8373 }
0x18e8   :  { %11583 = vmatpush3.bf16.msra.mxu1 %v8336_v29 }
0x18e9   :  { %11584 = vmatprep.subr.bf16.mxu1 %v8374_v18  ;;  %v8344_v17 = vpop.permute.xlu0 %8343 }
0x18ea   :  { %v8376_v48 = vpop.permute.xlu1 %8375 }
0x18ec   :  { %11585 = vmatpush3.bf16.msra.mxu1 %v8342_v62 }
0x18ed   :  { %11586 = vmatprep.subr.bf16.mxu1 %v8376_v48  ;;  %v8384_v45 = vpop.permute.xlu0 %8383 }
0x18ee   :  { %v8382_v1 = vpop.permute.xlu1 %8381 }
0x18ef   :  { %11903 = vmatprep.subr.bf16.mxu0 %v8382_v1 }
0x18f0   :  { %11587 = vmatpush3.bf16.msra.mxu1 %v8344_v17  ;;  %11904 = vmatpush3.bf16.msra.mxu0 %v8382_v1 }
0x18f1   :  { %11905 = vmatprep.subr.bf16.mxu0 %v8384_v45 }
0x18f3   :  { %8556 = vmatmul.mubr.bf16.vlgmr.msra.gmra.mrb[68].mxu1 %v12486_v37 }
0x18f4   :  { %11906 = vmatpush3.bf16.msra.mxu0 %v8384_v45  ;;  %8563 = vmatprep.mubr.bf16.mxu1 %v12491_v19 }
0x18f7   :  { %11908 = vmatmul.mubr.msk.bf16.vlgmr.msra.gmra.mrb[68].mxu0 %vm938_vm2, %v12490_v2 }
0x18f8   :  { %11911 = vmatprep.mubr.msk.bf16.mxu0 %vm938_vm2, %v12497_v31 }
0x18fb   :  { %8564 = vmatmul.mubr.bf16.gmra.mrb[72].mxu1 %v12493_v6 }
0x18fc   :  { %8571 = vmatprep.mubr.bf16.mxu1 %v12494_v34 }
0x18fe   :  { %v8419_v56 = vpop.permute.xlu0 %8418 }
0x18ff   :  { %11912 = vmatmul.mubr.msk.bf16.gmra.mrb[72].mxu0 %vm938_vm2, %v12498_v39  ;;  %v8414_v50 = vpop.permute.xlu1 %8413 }
0x1902   :  { %v8429_v44 = vpop.permute.xlu0 %8428 }
0x1903   :  { %8572 = vmatmul.mubr.bf16.gmra.mrb[76].mxu1 %v12496_v4  ;;  %v8424_v5 = vpop.permute.xlu1 %8423 }
0x1904   :  { %8579 = vmatprep.mubr.bf16.mxu1 %v12499_v30 }
0x1906   :  { %v8439_v45 = vpop.permute.xlu0 %8438 }
0x1907   :  { %v8434_v18 = vpop.permute.xlu1 %8433 }
0x190b   :  { %8580 = vmatmul.mubr.bf16.gmra.mrb[80].mxu1 %v12501_v14 }
0x19c6   :  { %v11588_v13 = vpop.f32.mrb[68].mxu1 }
0x19c7   :  { %v11589_v20 = vpop.f32.mrb[69].mxu1 }
0x19c8   :  { %v11590_v3 = vadd.f32 %v11589_v20, %v11588_v13  ;;  %v11591_v42 = vpop.f32.mrb[70].mxu1  ;;  %v8444_v13 = vpop.permute.xlu1 %8443 }
0x19c9   :  { %v11592_v21 = vpop.f32.mrb[71].mxu1 }
0x19ca   :  { %v11593_v35 = vadd.f32 %v11592_v21, %v11591_v42  ;;  %v11909_v58 = vpop.f32.mrb[68].mxu0  ;;  %v8558_v59 = vadd.f32 %v11590_v3, %v8414_v50  ;;  %v8449_v21 = vpop.permute.xlu0 %8448 }
0x19cb   :  { %v8622_v16 = vpop.f32.mrb[69].mxu0 }
0x19cc   :  { %v8623_v22 = vadd.f32 %v8622_v16, %v8558_v59  ;;  %v11910_v61 = vpop.f32.mrb[70].mxu0  ;;  %v8561_v41 = vadd.f32 %v11593_v35, %v8419_v56 }
0x19cd   :  { %v8625_v54 = vpop.f32.mrb[71].mxu0 }
0x19ce   :  { %v8626_v33 = vadd.f32 %v8625_v54, %v8561_v41  ;;  %v11594_v36 = vpop.f32.mrb[72].mxu1  ;;  %v8653_v38 = vmax.f32 %v8623_v22, 0.0 }
0x19cf   :  { %v11595_v47 = vpop.f32.mrb[73].mxu1 }
0x19d0   :  { %v8654_v52 = vmax.f32 %v8626_v33, 0.0  ;;  %v11596_v51 = vadd.f32 %v11595_v47, %v11594_v36  ;;  %v11597_v63 = vpop.f32.mrb[74].mxu1 }
0x19d1   :  { %v11598_v27 = vpop.f32.mrb[75].mxu1 }
0x19d2   :  { %v8661_v55 = vpack.c.bf16 %v8654_v52, %v8653_v38  ;;  %v8566_v9 = vadd.f32 %v11596_v51, %v8424_v5  ;;  %v11599_v57 = vadd.f32 %v11598_v27, %v11597_v63  ;;  %v11913_v43 = vpop.f32.mrb[72].mxu0 }
0x19d3   :  { %v8638_v10 = vpop.f32.mrb[73].mxu0 }
0x19d4   :  { %v8631_v26 = vadd.f32 %v11909_v58, %v8566_v9  ;;  %v8569_v8 = vadd.f32 %v11599_v57, %v8429_v44  ;;  %8669 = vrot.lane.b32.xlu1 %v8661_v55, %s12608_s20  ;;  %v11914_v23 = vpop.f32.mrb[74].mxu0 }
0x19d5   :  { %v8641_v12 = vpop.f32.mrb[75].mxu0 }
0x19d6   :  { %v8634_v7 = vadd.f32 %v11910_v61, %v8569_v8  ;;  %v11600_v60 = vpop.f32.mrb[76].mxu1  ;;  %v8655_v53 = vmax.f32 %v8631_v26, 0.0 }
0x19d7   :  { %v11601_v32 = vpop.f32.mrb[77].mxu1 }
0x19d8   :  { %v8656_v29 = vmax.f32 %v8634_v7, 0.0  ;;  %v11602_v15 = vadd.f32 %v11601_v32, %v11600_v60  ;;  %v11603_v62 = vpop.f32.mrb[78].mxu1  ;;  %v12504_v32 = vld [vmem:[%s16400_s5 + $0x4] ss:$20 sps:$4 sm:$0xff]  }
0x19d9   :  { %v11604_v17 = vpop.f32.mrb[79].mxu1  ;;  %9069 = vmatprep.mubr.bf16.mxu0 %v12504_v32  ;;  %v12507_v32 = vld [vmem:[%s16400_s5 + $0x28] ss:$20 sps:$4 sm:$0xff]  }
0x19da   :  { %v8662_v48 = vpack.c.bf16 %v8656_v29, %v8655_v53  ;;  %v11605_v1 = vadd.f32 %v11604_v17, %v11603_v62  ;;  %v8574_v37 = vadd.f32 %v11602_v15, %v8434_v18 }
0x19dc   :  { %v8639_v19 = vadd.f32 %v8638_v10, %v8574_v37  ;;  %v8577_v2 = vadd.f32 %v11605_v1, %v8439_v45  ;;  %8671 = vrot.lane.b32.xlu0 %v8662_v48, %s12608_s20  ;;  %v12513_v37 = vld [vmem:[%s16400_s5 + $0xc] ss:$20 sps:$4 sm:$0xff]  }
0x19dd   :  { %9134 = vmatprep.mubr.bf16.mxu1 %v12513_v37  ;;  %v12511_v37 = vld [vmem:[%s16400_s5 + $0x8] ss:$20 sps:$4 sm:$0xff]  }
0x19de   :  { %v8642_v31 = vadd.f32 %v8641_v12, %v8577_v2  ;;  %v11606_v6 = vpop.f32.mrb[80].mxu1  ;;  %v8657_v39 = vmax.f32 %v8639_v19, 0.0 }
0x19df   :  { %v11607_v34 = vpop.f32.mrb[81].mxu1 }
0x19e0   :  { %v8658_v4 = vmax.f32 %v8642_v31, 0.0  ;;  %v11608_v30 = vadd.f32 %v11607_v34, %v11606_v6  ;;  %v11609_v14 = vpop.f32.mrb[82].mxu1 }
0x19e1   :  { %v11610_v20 = vpop.f32.mrb[83].mxu1 }
0x19e2   :  { %v8663_v3 = vpack.c.bf16 %v8658_v4, %v8657_v39  ;;  %v8582_v42 = vadd.f32 %v11608_v30, %v8444_v13  ;;  %v11611_v50 = vadd.f32 %v11610_v20, %v11609_v14  ;;  %v8877_v39 = vld [vmem:[%s11075_s30] sm:$0xff]  ;;  %v8879_v30 = vld [vmem:[%s11075_s30 + $0x10] sm:$0xff]  ;;  %v8878_v13 = vld [vmem:[%s11075_s30 + $0x8] sm:$0xff] }
0x19e3   :  { %v8881_v20 = vld [vmem:[%s11075_s30 + $0x20] sm:$0xff] }
0x19e4   :  { %v8647_v35 = vadd.f32 %v11913_v43, %v8582_v42  ;;  %v8585_v58 = vadd.f32 %v11611_v50, %v8449_v21  ;;  %8673 = vrot.lane.b32.xlu1 %v8663_v3, %s12608_s20  ;;  %v8880_v3 = vld [vmem:[%s11075_s30 + $0x18] sm:$0xff]  ;;  %v8883_v42 = vld [vmem:[%s11075_s30 + $0x30] sm:$0xff]  ;;  %v8882_v50 = vld [vmem:[%s11075_s30 + $0x28] sm:$0xff] }
0x19e5   :  { %v8884_v21 = vld [vmem:[%s11075_s30 + $0x38] sm:$0xff] }
0x19e6   :  { %v8650_v59 = vadd.f32 %v11914_v23, %v8585_v58  ;;  %v8659_v56 = vmax.f32 %v8647_v35, 0.0 }
0x19e8   :  { %v8660_v16 = vmax.f32 %v8650_v59, 0.0 }
0x19ea   :  { %v8664_v22 = vpack.c.bf16 %v8660_v16, %v8659_v56 }
0x19ec   :  { %8675 = vrot.lane.b32.xlu0 %v8664_v22, %s12608_s20 }
0x1a46   :  { %v8670_v61 = vpop.permute.xlu1 %8669 }
0x1a47   :  { %v8678_v41 = vsel %vm8230_vm8, 0, %v8670_v61 }
0x1a48   :  { %v17584_v54 = vsel %vm8235_vm10, %v8678_v41, 0 }
0x1a49   :  { %8777 = vrot.lane.b32.xlu0 %v17584_v54, %s12622_s15  ;;  %v8701_v33 = vmul.bf16 %v17584_v54, %v17501_v25  ;;  %v8713_v36 = vmul.bf16 %v17584_v54, %v17505_v0  ;;  %v8705_v47 = vmul.bf16 %v17584_v54, %v17517_v49  ;;  %v8697_v63 = vmul.bf16 %v17584_v54, %v17487_v40 }
0x1a4a   :  { %v8717_v18 = vmul.bf16 %v17584_v54, %v17521_v46  ;;  %v8709_v48 = vmul.bf16 %v17584_v54, %v17491_v24  ;;  %v8721_v31 = vmul.bf16 %v17584_v54, %v17542_v28  ;;  %v8693_v59 = vmul.bf16 %v17584_v54, %v17559_v11 }
0x1a4b   :  { %8745 = vrot.lane.b32.xlu1 %v8701_v33, %s12591_s22 }
0x1a4d   :  { %8809 = vrot.lane.b32.xlu0 %v8713_v36, %s12614_s14 }
0x1a4e   :  { %v8672_v38 = vpop.permute.xlu0 %8671 }
0x1a4f   :  { %v8680_v52 = vsel %vm8230_vm8, 0, %v8672_v38  ;;  %8761 = vrot.lane.b32.xlu1 %v8705_v47, %s12625_s3 }
0x1a50   :  { %v17599_v51 = vsel %vm8235_vm10, %v8680_v52, 0 }
0x1a51   :  { %v8702_v5 = vmul.bf16 %v17599_v51, %v17501_v25  ;;  %v8706_v27 = vmul.bf16 %v17599_v51, %v17517_v49  ;;  %v8714_v55 = vmul.bf16 %v17599_v51, %v17505_v0  ;;  %v8698_v10 = vmul.bf16 %v17599_v51, %v17487_v40 }
0x1a52   :  { %v8718_v17 = vmul.bf16 %v17599_v51, %v17521_v46  ;;  %v8710_v45 = vmul.bf16 %v17599_v51, %v17491_v24  ;;  %v8722_v4 = vmul.bf16 %v17599_v51, %v17542_v28  ;;  %v8694_v41 = vmul.bf16 %v17599_v51, %v17559_v11 }
0x1a53   :  { %8729 = vrot.lane.b32.xlu1 %v8697_v63, %s12590_s21  ;;  %8747 = vrot.lane.b32.xlu0 %v8702_v5, %s12591_s22 }
0x1a56   :  { %v8674_v9 = vpop.permute.xlu1 %8673 }
0x1a57   :  { %v8682_v57 = vsel %vm8230_vm8, 0, %v8674_v9  ;;  %8763 = vrot.lane.b32.xlu1 %v8706_v27, %s12625_s3  ;;  %8811 = vrot.lane.b32.xlu0 %v8714_v55, %s12614_s14 }
0x1a58   :  { %v17615_v43 = vsel %vm8235_vm10, %v8682_v57, 0 }
0x1a59   :  { %v8703_v44 = vmul.bf16 %v17615_v43, %v17501_v25  ;;  %v8707_v12 = vmul.bf16 %v17615_v43, %v17517_v49  ;;  %v8699_v60 = vmul.bf16 %v17615_v43, %v17487_v40  ;;  %v8715_v29 = vmul.bf16 %v17615_v43, %v17505_v0 }
0x1a5a   :  { %v8719_v1 = vmul.bf16 %v17615_v43, %v17521_v46  ;;  %v8711_v2 = vmul.bf16 %v17615_v43, %v17491_v24  ;;  %v8723_v34 = vmul.bf16 %v17615_v43, %v17542_v28  ;;  %v8695_v54 = vmul.bf16 %v17615_v43, %v17559_v11 }
0x1a5b   :  { %8749 = vrot.lane.b32.xlu1 %v8703_v44, %s12591_s22 }
0x1a5e   :  { %v8676_v26 = vpop.permute.xlu0 %8675 }
0x1a5f   :  { %v8684_v8 = vsel %vm8230_vm8, 0, %v8676_v26  ;;  %8731 = vrot.lane.b32.xlu1 %v8698_v10, %s12590_s21  ;;  %v12502_v26 = vld [vmem:[%s16400_s5] ss:$20 sps:$4 sm:$0xff]  }
0x1a60   :  { %v17625_v23 = vsel %vm8235_vm10, %v8684_v8, 0  ;;  %v12505_v8 = vld [vmem:[%s16400_s5 + $0x2c] ss:$20 sps:$4 sm:$0xff]  }
0x1a61   :  { %v8704_v7 = vmul.bf16 %v17625_v23, %v17501_v25  ;;  %v8708_v53 = vmul.bf16 %v17625_v23, %v17517_v49  ;;  %v8700_v15 = vmul.bf16 %v17625_v23, %v17487_v40  ;;  %v8716_v62 = vmul.bf16 %v17625_v23, %v17505_v0 }
0x1a62   :  { %v8720_v19 = vmul.bf16 %v17625_v23, %v17521_v46  ;;  %v8712_v6 = vmul.bf16 %v17625_v23, %v17491_v24  ;;  %v8724_v14 = vmul.bf16 %v17625_v23, %v17542_v28  ;;  %v8696_v5 = vmul.bf16 %v17625_v23, %v17559_v11 }
0x1a63   :  { %8765 = vrot.lane.b32.xlu1 %v8707_v12, %s12625_s3  ;;  %8751 = vrot.lane.b32.xlu0 %v8704_v7, %s12591_s22 }
0x1a67   :  { %8733 = vrot.lane.b32.xlu1 %v8699_v60, %s12590_s21  ;;  %8779 = vrot.lane.b32.xlu0 %v17599_v51, %s12622_s15 }
0x1a6b   :  { %8767 = vrot.lane.b32.xlu1 %v8708_v53, %s12625_s3  ;;  %8813 = vrot.lane.b32.xlu0 %v8715_v29, %s12614_s14  ;;  %v12508_v53 = vld [vmem:[%s16400_s5 + $0x54] ss:$20 sps:$4 sm:$0xff]  }
0x1a6f   :  { %8781 = vrot.lane.b32.xlu0 %v17615_v43, %s12622_s15  ;;  %8735 = vrot.lane.b32.xlu1 %v8700_v15, %s12590_s21 }
0x1a73   :  { %8815 = vrot.lane.b32.xlu0 %v8716_v62, %s12614_s14  ;;  %8825 = vrot.lane.b32.xlu1 %v8717_v18, %s12615_s4 }
0x1a77   :  { %8783 = vrot.lane.b32.xlu0 %v17625_v23, %s12622_s15  ;;  %8827 = vrot.lane.b32.xlu1 %v8718_v17, %s12615_s4  ;;  %v12510_v17 = vld [vmem:[%s16400_s5 + $0x50] ss:$20 sps:$4 sm:$0xff]  }
0x1a7b   :  { %8793 = vrot.lane.b32.xlu0 %v8709_v48, %s12623_s16  ;;  %8829 = vrot.lane.b32.xlu1 %v8719_v1, %s12615_s4  ;;  %v12514_v48 = vld [vmem:[%s16400_s5 + $0x7c] ss:$20 sps:$4 sm:$0xff]  }
0x1a7f   :  { %8795 = vrot.lane.b32.xlu0 %v8710_v45, %s12623_s16  ;;  %8831 = vrot.lane.b32.xlu1 %v8720_v19, %s12615_s4  ;;  %v12517_v45 = vld [vmem:[%s16400_s5 + $0x34] ss:$20 sps:$4 sm:$0xff]  }
0x1a83   :  { %8797 = vrot.lane.b32.xlu0 %v8711_v2, %s12623_s16  ;;  %8841 = vrot.lane.b32.xlu1 %v8721_v31, %s12616_s12  ;;  %v12516_v2 = vld [vmem:[%s16400_s5 + $0x78] ss:$20 sps:$4 sm:$0xff]  }
0x1a87   :  { %8799 = vrot.lane.b32.xlu0 %v8712_v6, %s12623_s16  ;;  %8845 = vrot.lane.b32.xlu1 %v8723_v34, %s12616_s12  ;;  %v12520_v6 = vld [vmem:[%s16400_s5 + $0x10] ss:$20 sps:$4 sm:$0xff]  }
0x1a88   :  { %v12519_v34 = vld [vmem:[%s16400_s5 + $0x30] ss:$20 sps:$4 sm:$0xff]  }
0x1a8b   :  { %8843 = vrot.lane.b32.xlu0 %v8722_v4, %s12616_s12  ;;  %8887 = vperm.xlu1 %12176, %v8877_v39   ;;  %v12522_v39 = vld [vmem:[%s16400_s5 + $0x5c] ss:$20 sps:$4 sm:$0xff]  }
0x1a8f   :  { %8847 = vrot.lane.b32.xlu0 %v8724_v14, %s12616_s12  ;;  %8897 = vperm.xlu1 %12176, %v8879_v30   ;;  %v12521_v30 = vld [vmem:[%s16400_s5 + $0x38] ss:$20 sps:$4 sm:$0xff]   ;;  %v12525_v14 = vld [vmem:[%s16400_s5 + $0x60] ss:$20 sps:$4 sm:$0xff]  }
0x1a93   :  { %8892 = vperm.xlu0 %12175, %v8878_v13   ;;  %8907 = vperm.xlu1 %12176, %v8881_v20   ;;  %v12524_v13 = vld [vmem:[%s16400_s5 + $0x58] ss:$20 sps:$4 sm:$0xff]  }
0x1a94   :  { %v12527_v20 = vld [vmem:[%s16400_s5 + $0x84] ss:$20 sps:$4 sm:$0xff]  }
0x1a97   :  { %8902 = vperm.xlu0 %12175, %v8880_v3   ;;  %8917 = vperm.xlu1 %12176, %v8883_v42   ;;  %v12526_v3 = vld [vmem:[%s16400_s5 + $0x88] ss:$20 sps:$4 sm:$0xff]   ;;  %v12529_v42 = vld [vmem:[%s16400_s5 + $0x80] ss:$20 sps:$4 sm:$0xff]   ;;  %s12634_s5 = smov 37  }
0x1a98   :  { %s11094_s7 = sld [smem:[%s18054_s0 + %s12634_s5]]  }
0x1a9b   :  { %8912 = vperm.xlu0 %12175, %v8882_v50  }
0x1a9f   :  { %8922 = vperm.xlu0 %12175, %v8884_v21  }
0x1abb   :  { %v8778_v35 = vpop.permute.xlu0 %8777 }
0x1abd   :  { %v8746_v58 = vpop.permute.xlu1 %8745 }
0x1abe   :  { %11618 = vmatprep.subr.bf16.mxu0 %v8746_v58 }
0x1abf   :  { %11619 = vmatpush3.bf16.msra.mxu0 %v8693_v59  ;;  %v8810_v56 = vpop.permute.xlu0 %8809 }
0x1ac0   :  { %11658 = vmatprep.subr.bf16.mxu1 %v8810_v56 }
0x1ac1   :  { %v8762_v16 = vpop.permute.xlu1 %8761  ;;  %11659 = vmatpush3.bf16.msra.mxu1 %v8778_v35 }
0x1ac5   :  { %v8730_v22 = vpop.permute.xlu1 %8729  ;;  %v8748_v61 = vpop.permute.xlu0 %8747 }
0x1ac6   :  { %11620 = vmatprep.subr.bf16.mxu0 %v8748_v61 }
0x1ac7   :  { %11621 = vmatpush3.bf16.msra.mxu0 %v8694_v41 }
0x1ac9   :  { %v8764_v33 = vpop.permute.xlu1 %8763  ;;  %v8812_v36 = vpop.permute.xlu0 %8811 }
0x1aca   :  { %11660 = vmatprep.subr.bf16.mxu1 %v8812_v36 }
0x1acd   :  { %v8750_v47 = vpop.permute.xlu1 %8749 }
0x1ace   :  { %11622 = vmatprep.subr.bf16.mxu0 %v8750_v47 }
0x1acf   :  { %11623 = vmatpush3.bf16.msra.mxu0 %v8695_v54 }
0x1ad1   :  { %v8732_v38 = vpop.permute.xlu1 %8731 }
0x1ad5   :  { %v8766_v52 = vpop.permute.xlu1 %8765  ;;  %v8752_v63 = vpop.permute.xlu0 %8751 }
0x1ad6   :  { %11624 = vmatprep.subr.bf16.mxu0 %v8752_v63 }
0x1ad7   :  { %11625 = vmatpush3.bf16.msra.mxu0 %v8696_v5 }
0x1ad8   :  { %11626 = vmatprep.subr.bf16.mxu0 %v8762_v16 }
0x1ad9   :  { %v8734_v51 = vpop.permute.xlu1 %8733  ;;  %v8780_v27 = vpop.permute.xlu0 %8779 }
0x1ada   :  { %11661 = vmatpush3.bf16.msra.mxu1 %v8780_v27 }
0x1adb   :  { %11627 = vmatpush3.bf16.msra.mxu0 %v8730_v22 }
0x1adc   :  { %11628 = vmatprep.subr.bf16.mxu0 %v8764_v33 }
0x1add   :  { %v8768_v55 = vpop.permute.xlu1 %8767  ;;  %v8814_v9 = vpop.permute.xlu0 %8813 }
0x1ade   :  { %11662 = vmatprep.subr.bf16.mxu1 %v8814_v9 }
0x1adf   :  { %11629 = vmatpush3.bf16.msra.mxu0 %v8732_v38 }
0x1ae0   :  { %11630 = vmatprep.subr.bf16.mxu0 %v8766_v52 }
0x1ae1   :  { %v8736_v57 = vpop.permute.xlu1 %8735  ;;  %v8782_v43 = vpop.permute.xlu0 %8781 }
0x1ae2   :  { %11663 = vmatpush3.bf16.msra.mxu1 %v8782_v43 }
0x1ae3   :  { %11631 = vmatpush3.bf16.msra.mxu0 %v8734_v51 }
0x1ae4   :  { %11632 = vmatprep.subr.bf16.mxu0 %v8768_v55 }
0x1ae5   :  { %v8826_v44 = vpop.permute.xlu1 %8825  ;;  %v8816_v10 = vpop.permute.xlu0 %8815 }
0x1ae6   :  { %11664 = vmatprep.subr.bf16.mxu1 %v8816_v10 }
0x1ae7   :  { %11633 = vmatpush3.bf16.msra.mxu0 %v8736_v57 }
0x1ae9   :  { %v8828_v23 = vpop.permute.xlu1 %8827  ;;  %v8784_v12 = vpop.permute.xlu0 %8783 }
0x1aea   :  { %9070 = vmatmul.mubr.bf16.vlgmr.msra.gmra.mrb[76].mxu0 %v12502_v26  ;;  %11665 = vmatpush3.bf16.msra.mxu1 %v8784_v12 }
0x1aeb   :  { %11666 = vmatprep.subr.bf16.mxu1 %v8826_v44  ;;  %9077 = vmatprep.mubr.bf16.mxu0 %v12505_v8 }
0x1aed   :  { %v8830_v7 = vpop.permute.xlu1 %8829  ;;  %v8794_v60 = vpop.permute.xlu0 %8793 }
0x1aee   :  { %11667 = vmatpush3.bf16.msra.mxu1 %v8794_v60 }
0x1aef   :  { %11668 = vmatprep.subr.bf16.mxu1 %v8828_v23 }
0x1af1   :  { %v8832_v29 = vpop.permute.xlu1 %8831  ;;  %v8796_v15 = vpop.permute.xlu0 %8795 }
0x1af2   :  { %9078 = vmatmul.mubr.bf16.gmra.mrb[80].mxu0 %v12507_v32  ;;  %11669 = vmatpush3.bf16.msra.mxu1 %v8796_v15 }
0x1af3   :  { %11670 = vmatprep.subr.bf16.mxu1 %v8830_v7  ;;  %9085 = vmatprep.mubr.bf16.mxu0 %v12508_v53 }
0x1af5   :  { %v8842_v62 = vpop.permute.xlu1 %8841  ;;  %v8798_v18 = vpop.permute.xlu0 %8797 }
0x1af6   :  { %11671 = vmatpush3.bf16.msra.mxu1 %v8798_v18  ;;  %11915 = vmatprep.subr.bf16.mxu0 %v8842_v62 }
0x1af7   :  { %11672 = vmatprep.subr.bf16.mxu1 %v8832_v29  ;;  %11916 = vmatpush3.bf16.msra.mxu0 %v8842_v62 }
0x1af9   :  { %v8800_v1 = vpop.permute.xlu0 %8799  ;;  %v8846_v31 = vpop.permute.xlu1 %8845 }
0x1afa   :  { %9086 = vmatmul.mubr.bf16.gmra.mrb[84].mxu0 %v12510_v17  ;;  %11673 = vmatpush3.bf16.msra.mxu1 %v8800_v1 }
0x1afb   :  { %9093 = vmatprep.mubr.bf16.mxu0 %v12514_v48 }
0x1afd   :  { %9135 = vmatmul.mubr.bf16.vlgmr.msra.gmra.mrb[84].mxu1 %v12511_v37  ;;  %v8844_v19 = vpop.permute.xlu0 %8843 }
0x1afe   :  { %11917 = vmatprep.subr.bf16.mxu0 %v8844_v19  ;;  %9142 = vmatprep.mubr.bf16.mxu1 %v12517_v45 }
0x1aff   :  { %11918 = vmatpush3.bf16.msra.mxu0 %v8844_v19 }
0x1b00   :  { %11919 = vmatprep.subr.bf16.mxu0 %v8846_v31 }
0x1b01   :  { %v8848_v4 = vpop.permute.xlu0 %8847 }
0x1b02   :  { %9094 = vmatmul.mubr.bf16.gmra.mrb[88].mxu0 %v12516_v2 }
0x1b03   :  { %11920 = vmatpush3.bf16.msra.mxu0 %v8846_v31  ;;  %11923 = vmatprep.mubr.msk.bf16.mxu0 %vm1262_vm6, %v12520_v6 }
0x1b04   :  { %11921 = vmatprep.subr.bf16.mxu0 %v8848_v4 }
0x1b05   :  { %9143 = vmatmul.mubr.bf16.gmra.mrb[88].mxu1 %v12519_v34 }
0x1b06   :  { %9150 = vmatprep.mubr.bf16.mxu1 %v12522_v39 }
0x1b07   :  { %11922 = vmatpush3.bf16.msra.mxu0 %v8848_v4 }
0x1b0a   :  { %11924 = vmatmul.mubr.msk.bf16.vlgmr.msra.gmra.mrb[92].mxu0 %vm1262_vm6, %v12521_v30  ;;  %v8888_v51 = vpop.permute.xlu1 %8887 }
0x1b0b   :  { %11927 = vmatprep.mubr.msk.bf16.mxu0 %vm1262_vm6, %v12525_v14 }
0x1b0d   :  { %9151 = vmatmul.mubr.bf16.gmra.mrb[92].mxu1 %v12524_v13 }
0x1b0e   :  { %9158 = vmatprep.mubr.bf16.mxu1 %v12527_v20  ;;  %v8898_v62 = vpop.permute.xlu1 %8897 }
0x1b12   :  { %11928 = vmatmul.mubr.msk.bf16.gmra.mrb[96].mxu0 %vm1262_vm6, %v12526_v3  ;;  %v8893_v44 = vpop.permute.xlu0 %8892 }
0x1b15   :  { %9159 = vmatmul.mubr.bf16.gmra.mrb[96].mxu1 %v12529_v42 }
0x1b16   :  { %v8903_v45 = vpop.permute.xlu0 %8902 }
0x1bbd   :  { %v11634_v50 = vpop.f32.mrb[76].mxu0 }
0x1bbe   :  { %v11635_v21 = vpop.f32.mrb[77].mxu0 }
0x1bbf   :  { %v11636_v35 = vadd.f32 %v11635_v21, %v11634_v50  ;;  %v11637_v58 = vpop.f32.mrb[78].mxu0  ;;  %v8908_v50 = vpop.permute.xlu1 %8907 }
0x1bc0   :  { %v11638_v59 = vpop.f32.mrb[79].mxu0 }
0x1bc1   :  { %v11639_v56 = vadd.f32 %v11638_v59, %v11637_v58  ;;  %v9072_v9 = vadd.f32 %v11636_v35, %v8888_v51 }
0x1bc3   :  { %v9075_v26 = vadd.f32 %v11639_v56, %v8893_v44 }
0x1bc5   :  { %v11640_v16 = vpop.f32.mrb[80].mxu0 }
0x1bc6   :  { %v11641_v22 = vpop.f32.mrb[81].mxu0 }
0x1bc7   :  { %v11642_v61 = vadd.f32 %v11641_v22, %v11640_v16  ;;  %v11643_v41 = vpop.f32.mrb[82].mxu0 }
0x1bc8   :  { %v11644_v33 = vpop.f32.mrb[83].mxu0 }
0x1bc9   :  { %v11645_v36 = vadd.f32 %v11644_v33, %v11643_v41  ;;  %v9080_v48 = vadd.f32 %v11642_v61, %v8898_v62  ;;  %v8913_v61 = vpop.permute.xlu0 %8912 }
0x1bcb   :  { %v9083_v2 = vadd.f32 %v11645_v36, %v8903_v45 }
0x1bcd   :  { %v11646_v47 = vpop.f32.mrb[84].mxu0 }
0x1bce   :  { %v11647_v54 = vpop.f32.mrb[85].mxu0 }
0x1bcf   :  { %v11648_v38 = vadd.f32 %v11647_v54, %v11646_v47  ;;  %v11649_v52 = vpop.f32.mrb[86].mxu0 }
0x1bd0   :  { %v11650_v63 = vpop.f32.mrb[87].mxu0  ;;  %v11674_v5 = vpop.f32.mrb[84].mxu1 }
0x1bd1   :  { %v11651_v27 = vadd.f32 %v11650_v63, %v11649_v52  ;;  %v11675_v55 = vpop.f32.mrb[85].mxu1  ;;  %v9088_v58 = vadd.f32 %v11648_v38, %v8908_v50 }
0x1bd2   :  { %v11676_v57 = vadd.f32 %v11675_v55, %v11674_v5  ;;  %v11677_v43 = vpop.f32.mrb[86].mxu1 }
0x1bd3   :  { %v11678_v10 = vpop.f32.mrb[87].mxu1  ;;  %v9091_v47 = vadd.f32 %v11651_v27, %v8913_v61 }
0x1bd4   :  { %v11679_v8 = vadd.f32 %v11678_v10, %v11677_v43  ;;  %v9137_v23 = vadd.f32 %v11676_v57, %v9072_v9  ;;  %v8918_v10 = vpop.permute.xlu1 %8917 }
0x1bd5   :  { %v11652_v12 = vpop.f32.mrb[88].mxu0 }
0x1bd6   :  { %v11653_v7 = vpop.f32.mrb[89].mxu0  ;;  %v9140_v60 = vadd.f32 %v11679_v8, %v9075_v26 }
0x1bd7   :  { %v11654_v32 = vadd.f32 %v11653_v7, %v11652_v12  ;;  %v11655_v53 = vpop.f32.mrb[90].mxu0  ;;  %v8923_v7 = vpop.permute.xlu0 %8922 }
0x1bd8   :  { %v11656_v29 = vpop.f32.mrb[91].mxu0  ;;  %v11680_v15 = vpop.f32.mrb[88].mxu1 }
0x1bd9   :  { %v11657_v18 = vadd.f32 %v11656_v29, %v11655_v53  ;;  %v11681_v17 = vpop.f32.mrb[89].mxu1 }
0x1bda   :  { %v11682_v1 = vadd.f32 %v11681_v17, %v11680_v15  ;;  %v11683_v37 = vpop.f32.mrb[90].mxu1 }
0x1bdb   :  { %v11684_v19 = vpop.f32.mrb[91].mxu1  ;;  %v9099_v15 = vadd.f32 %v11657_v18, %v8923_v7 }
0x1bdc   :  { %v11685_v31 = vadd.f32 %v11684_v19, %v11683_v37  ;;  %v9145_v6 = vadd.f32 %v11682_v1, %v9080_v48 }
0x1bdd   :  { %v11925_v34 = vpop.f32.mrb[92].mxu0 }
0x1bde   :  { %v9210_v39 = vadd.f32 %v11925_v34, %v9145_v6  ;;  %v9201_v4 = vpop.f32.mrb[93].mxu0  ;;  %v9148_v30 = vadd.f32 %v11685_v31, %v9083_v2 }
0x1bdf   :  { %v9202_v14 = vadd.f32 %v9201_v4, %v9137_v23  ;;  %v11926_v13 = vpop.f32.mrb[94].mxu0  ;;  %v9096_v23 = vadd.f32 %v11654_v32, %v8918_v10 }
0x1be0   :  { %v9213_v20 = vadd.f32 %v11926_v13, %v9148_v30  ;;  %v11686_v3 = vpop.f32.mrb[92].mxu1  ;;  %v9204_v42 = vpop.f32.mrb[95].mxu0  ;;  %v9234_v59 = vmax.f32 %v9210_v39, 0.0 }
0x1be1   :  { %v9205_v21 = vadd.f32 %v9204_v42, %v9140_v60  ;;  %v11687_v35 = vpop.f32.mrb[93].mxu1  ;;  %v9232_v41 = vmax.f32 %v9202_v14, 0.0 }
0x1be2   :  { %v9235_v56 = vmax.f32 %v9213_v20, 0.0  ;;  %v11688_v16 = vadd.f32 %v11687_v35, %v11686_v3  ;;  %v11689_v22 = vpop.f32.mrb[94].mxu1 }
0x1be3   :  { %v9233_v33 = vmax.f32 %v9205_v21, 0.0  ;;  %v11690_v36 = vpop.f32.mrb[95].mxu1 }
0x1be4   :  { %v9241_v54 = vpack.c.bf16 %v9235_v56, %v9234_v59  ;;  %v11691_v52 = vadd.f32 %v11690_v36, %v11689_v22  ;;  %v9153_v63 = vadd.f32 %v11688_v16, %v9088_v58 }
0x1be5   :  { %v9240_v5 = vpack.c.bf16 %v9233_v33, %v9232_v41  ;;  %v11929_v51 = vpop.f32.mrb[96].mxu0 }
0x1be6   :  { %v9217_v55 = vpop.f32.mrb[97].mxu0  ;;  %9250 = vrot.lane.b32.xlu0 %v9241_v54, %s12608_s20  ;;  %v9156_v9 = vadd.f32 %v11691_v52, %v9091_v47 }
0x1be7   :  { %v9218_v57 = vadd.f32 %v9217_v55, %v9153_v63  ;;  %v11930_v38 = vpop.f32.mrb[98].mxu0  ;;  %9248 = vrot.lane.b32.xlu1 %v9240_v5, %s12608_s20 }
0x1be8   :  { %v11692_v43 = vpop.f32.mrb[96].mxu1  ;;  %v9220_v44 = vpop.f32.mrb[99].mxu0 }
0x1be9   :  { %v9221_v26 = vadd.f32 %v9220_v44, %v9156_v9  ;;  %v11693_v8 = vpop.f32.mrb[97].mxu1  ;;  %v9236_v60 = vmax.f32 %v9218_v57, 0.0 }
0x1bea   :  { %v11694_v27 = vadd.f32 %v11693_v8, %v11692_v43  ;;  %v11695_v12 = vpop.f32.mrb[98].mxu1 }
0x1beb   :  { %v9237_v53 = vmax.f32 %v9221_v26, 0.0  ;;  %v11696_v29 = vpop.f32.mrb[99].mxu1 }
0x1bec   :  { %v9161_v62 = vadd.f32 %v11694_v27, %v9096_v23  ;;  %v11697_v17 = vadd.f32 %v11696_v29, %v11695_v12 }
0x1bed   :  { %v9242_v48 = vpack.c.bf16 %v9237_v53, %v9236_v60 }
0x1bee   :  { %v9226_v1 = vadd.f32 %v11929_v51, %v9161_v62  ;;  %v9164_v37 = vadd.f32 %v11697_v17, %v9099_v15 }
0x1bef   :  { %9252 = vrot.lane.b32.xlu1 %v9242_v48, %s12608_s20 }
0x1bf0   :  { %v9229_v45 = vadd.f32 %v11930_v38, %v9164_v37  ;;  %v9238_v19 = vmax.f32 %v9226_v1, 0.0 }
0x1bf2   :  { %v9239_v2 = vmax.f32 %v9229_v45, 0.0 }
0x1bf4   :  { %v9243_v31 = vpack.c.bf16 %v9239_v2, %v9238_v19 }
0x1bf6   :  { %9254 = vrot.lane.b32.xlu0 %v9243_v31, %s12608_s20  ;;  %s17788_s20 = sld [smem:[%s18054_s0 + %s12626_s2]]  }
0x1bfc   :  { %v12532_v54 = vld [vmem:[%s17788_s20 + $0x4] ss:$20 sps:$4 sm:$0xff]   ;;  %v12538_v51 = vld [vmem:[%s17788_s20 + $0xc] ss:$20 sps:$4 sm:$0xff]  }
0x1bfd   :  { %9648 = vmatprep.mubr.bf16.mxu1 %v12532_v54  ;;  %9713 = vmatprep.mubr.bf16.mxu0 %v12538_v51  ;;  %v12550_v51 = vld [vmem:[%s17788_s20 + $0x10] ss:$20 sps:$4 sm:$0xff]  }
0x1c58   :  { %v9251_v32 = vpop.permute.xlu0 %9250 }
0x1c59   :  { %v9259_v6 = vsel %vm8230_vm8, 0, %v9251_v32  ;;  %v9249_v34 = vpop.permute.xlu1 %9248 }
0x1c5a   :  { %v17732_v39 = vsel %vm8235_vm10, %v9259_v6, 0  ;;  %v9257_v18 = vsel %vm8230_vm8, 0, %v9249_v34 }
0x1c5b   :  { %9358 = vrot.lane.b32.xlu0 %v17732_v39, %s12622_s15  ;;  %v9293_v4 = vmul.bf16 %v17732_v39, %v17505_v0  ;;  %v17740_v30 = vsel %vm8235_vm10, %v9257_v18, 0  ;;  %v9281_v13 = vmul.bf16 %v17732_v39, %v17501_v25  ;;  %v9285_v61 = vmul.bf16 %v17732_v39, %v17517_v49 }
0x1c5c   :  { %v9280_v14 = vmul.bf16 %v17740_v30, %v17501_v25  ;;  %v9292_v3 = vmul.bf16 %v17740_v30, %v17505_v0  ;;  %v9276_v50 = vmul.bf16 %v17740_v30, %v17487_v40  ;;  %v9284_v21 = vmul.bf16 %v17740_v30, %v17517_v49 }
0x1c5d   :  { %9390 = vrot.lane.b32.xlu1 %v9293_v4, %s12614_s14  ;;  %v9277_v41 = vmul.bf16 %v17732_v39, %v17487_v40  ;;  %v9296_v63 = vmul.bf16 %v17740_v30, %v17521_v46  ;;  %v9288_v5 = vmul.bf16 %v17740_v30, %v17491_v24  ;;  %v9300_v43 = vmul.bf16 %v17740_v30, %v17542_v28 }
0x1c5e   :  { %v9301_v44 = vmul.bf16 %v17732_v39, %v17542_v28  ;;  %v9272_v62 = vmul.bf16 %v17740_v30, %v17559_v11  ;;  %v9273_v1 = vmul.bf16 %v17732_v39, %v17559_v11 }
0x1c5f   :  { %9356 = vrot.lane.b32.xlu0 %v17740_v30, %s12622_s15 }
0x1c61   :  { %9324 = vrot.lane.b32.xlu1 %v9280_v14, %s12591_s22  ;;  %v9253_v20 = vpop.permute.xlu1 %9252 }
0x1c62   :  { %v9261_v42 = vsel %vm8230_vm8, 0, %v9253_v20 }
0x1c63   :  { %9326 = vrot.lane.b32.xlu0 %v9281_v13, %s12591_s22  ;;  %v17761_v35 = vsel %vm8235_vm10, %v9261_v42, 0  ;;  %v12533_v42 = vld [vmem:[%s17788_s20 + $0x2c] ss:$20 sps:$4 sm:$0xff]  }
0x1c64   :  { %v9282_v16 = vmul.bf16 %v17761_v35, %v17501_v25  ;;  %v9286_v36 = vmul.bf16 %v17761_v35, %v17517_v49  ;;  %v9278_v47 = vmul.bf16 %v17761_v35, %v17487_v40  ;;  %v9298_v55 = vmul.bf16 %v17761_v35, %v17521_v46 }
0x1c65   :  { %9388 = vrot.lane.b32.xlu1 %v9292_v3, %s12614_s14  ;;  %v9290_v9 = vmul.bf16 %v17761_v35, %v17491_v24  ;;  %v9274_v31 = vmul.bf16 %v17761_v35, %v17559_v11  ;;  %v12530_v3 = vld [vmem:[%s17788_s20] ss:$20 sps:$4 sm:$0xff]  }
0x1c67   :  { %9308 = vrot.lane.b32.xlu0 %v9276_v50, %s12590_s21 }
0x1c68   :  { %v9255_v58 = vpop.permute.xlu0 %9254 }
0x1c69   :  { %v9263_v59 = vsel %vm8230_vm8, 0, %v9255_v58  ;;  %9340 = vrot.lane.b32.xlu1 %v9284_v21, %s12625_s3 }
0x1c6a   :  { %v17766_v56 = vsel %vm8235_vm10, %v9263_v59, 0  ;;  %v12535_v59 = vld [vmem:[%s17788_s20 + $0x28] ss:$20 sps:$4 sm:$0xff]  }
0x1c6b   :  { %v9283_v22 = vmul.bf16 %v17766_v56, %v17501_v25  ;;  %v9295_v33 = vmul.bf16 %v17766_v56, %v17505_v0  ;;  %v9294_v25 = vmul.bf16 %v17761_v35, %v17505_v0  ;;  %v9287_v0 = vmul.bf16 %v17766_v56, %v17517_v49 }
0x1c6c   :  { %v9279_v52 = vmul.bf16 %v17766_v56, %v17487_v40  ;;  %v9297_v49 = vmul.bf16 %v17732_v39, %v17521_v46  ;;  %v9289_v40 = vmul.bf16 %v17732_v39, %v17491_v24  ;;  %v9299_v57 = vmul.bf16 %v17766_v56, %v17521_v46 }
0x1c6d   :  { %9328 = vrot.lane.b32.xlu1 %v9282_v16, %s12591_s22  ;;  %9330 = vrot.lane.b32.xlu0 %v9283_v22, %s12591_s22  ;;  %v9291_v38 = vmul.bf16 %v17766_v56, %v17491_v24  ;;  %v9302_v24 = vmul.bf16 %v17761_v35, %v17542_v28  ;;  %v9303_v46 = vmul.bf16 %v17766_v56, %v17542_v28  ;;  %s11085_s22 = sld [smem:[%s18054_s0 + %s12633_s29]]  }
0x1c6e   :  { %v9275_v34 = vmul.bf16 %v17766_v56, %v17559_v11 }
0x1c71   :  { %9342 = vrot.lane.b32.xlu1 %v9285_v61, %s12625_s3  ;;  %9310 = vrot.lane.b32.xlu0 %v9277_v41, %s12590_s21 }
0x1c75   :  { %9394 = vrot.lane.b32.xlu1 %v9295_v33, %s12614_s14  ;;  %9360 = vrot.lane.b32.xlu0 %v17761_v35, %s12622_s15  ;;  %v12536_v33 = vld [vmem:[%s17788_s20 + $0x8] ss:$20 sps:$4 sm:$0xff]  }
0x1c79   :  { %9392 = vrot.lane.b32.xlu1 %v9294_v25, %s12614_s14  ;;  %9362 = vrot.lane.b32.xlu0 %v17766_v56, %s12622_s15  ;;  %s12627_s14 = smov 20   ;;  %v12539_v56 = vld [vmem:[%s17788_s20 + $0x54] ss:$20 sps:$4 sm:$0xff]   ;;  %v12541_v25 = vld [vmem:[%s17788_s20 + $0x50] ss:$20 sps:$4 sm:$0xff]   ;;  %s12630_s15 = smov 21  }
0x1c7a   :  { %s11077_s26 = sld [smem:[%s18054_s0 + %s12627_s14]]  }
0x1c7b   :  { %s17929_s9 = sld [smem:[%s18054_s0 + %s12630_s15]]  }
0x1c7d   :  { %9344 = vrot.lane.b32.xlu1 %v9286_v36, %s12625_s3  ;;  %9312 = vrot.lane.b32.xlu0 %v9278_v47, %s12590_s21  ;;  %v12542_v36 = vld [vmem:[%s17788_s20 + $0x7c] ss:$20 sps:$4 sm:$0xff]   ;;  %v12544_v47 = vld [vmem:[%s17788_s20 + $0x34] ss:$20 sps:$4 sm:$0xff]  }
0x1c80   :  { %v9456_v10 = vld [vmem:[%s11077_s26] sm:$0xff]  ;;  %v9457_v26 = vld [vmem:[%s11077_s26 + $0x8] sm:$0xff]  ;;  %v9458_v8 = vld [vmem:[%s11077_s26 + $0x10] sm:$0xff] }
0x1c81   :  { %9346 = vrot.lane.b32.xlu1 %v9287_v0, %s12625_s3  ;;  %9314 = vrot.lane.b32.xlu0 %v9279_v52, %s12590_s21  ;;  %v9459_v23 = vld [vmem:[%s11077_s26 + $0x18] sm:$0xff]  ;;  %v9460_v27 = vld [vmem:[%s11077_s26 + $0x20] sm:$0xff] }
0x1c82   :  { %v9461_v12 = vld [vmem:[%s11077_s26 + $0x28] sm:$0xff]  ;;  %v9462_v7 = vld [vmem:[%s11077_s26 + $0x30] sm:$0xff]  ;;  %v9463_v60 = vld [vmem:[%s11077_s26 + $0x38] sm:$0xff] }
0x1c83   :  { %v12546_v52 = vld [vmem:[%s17788_s20 + $0x78] ss:$20 sps:$4 sm:$0xff]  }
0x1c85   :  { %9404 = vrot.lane.b32.xlu1 %v9296_v63, %s12615_s4  ;;  %9372 = vrot.lane.b32.xlu0 %v9288_v5, %s12623_s16  ;;  %v12547_v63 = vld [vmem:[%s17788_s20 + $0x30] ss:$20 sps:$4 sm:$0xff]  }
0x1c86   :  { %v12548_v5 = vld [vmem:[%s17788_s20 + $0x5c] ss:$20 sps:$4 sm:$0xff]  }
0x1c89   :  { %9406 = vrot.lane.b32.xlu1 %v9297_v49, %s12615_s4  ;;  %9374 = vrot.lane.b32.xlu0 %v9289_v40, %s12623_s16 }
0x1c8d   :  { %9408 = vrot.lane.b32.xlu1 %v9298_v55, %s12615_s4  ;;  %9376 = vrot.lane.b32.xlu0 %v9290_v9, %s12623_s16  ;;  %v12551_v55 = vld [vmem:[%s17788_s20 + $0x58] ss:$20 sps:$4 sm:$0xff]  }
0x1c8e   :  { %v12552_v9 = vld [vmem:[%s17788_s20 + $0x38] ss:$20 sps:$4 sm:$0xff]  }
0x1c91   :  { %9410 = vrot.lane.b32.xlu1 %v9299_v57, %s12615_s4  ;;  %9378 = vrot.lane.b32.xlu0 %v9291_v38, %s12623_s16  ;;  %v12553_v57 = vld [vmem:[%s17788_s20 + $0x84] ss:$20 sps:$4 sm:$0xff]   ;;  %v12555_v38 = vld [vmem:[%s17788_s20 + $0x60] ss:$20 sps:$4 sm:$0xff]   ;;  %s12628_s4 = smov 36   ;;  %s18040_s16 = sld [smem:[%s18054_s0 + %s12639_s23]]  }
0x1c92   :  { %s11093_s19 = sld [smem:[%s18054_s0 + %s12628_s4]]  }
0x1c95   :  { %9420 = vrot.lane.b32.xlu1 %v9300_v43, %s12616_s12  ;;  %9422 = vrot.lane.b32.xlu0 %v9301_v44, %s12616_s12  ;;  %v12556_v43 = vld [vmem:[%s17788_s20 + $0x80] ss:$20 sps:$4 sm:$0xff]   ;;  %v12557_v44 = vld [vmem:[%s17788_s20 + $0x88] ss:$20 sps:$4 sm:$0xff]  }
0x1c99   :  { %9424 = vrot.lane.b32.xlu1 %v9302_v24, %s12616_s12  ;;  %9426 = vrot.lane.b32.xlu0 %v9303_v46, %s12616_s12  ;;  %s18012_s12 = sld [smem:[%s18054_s0 + %s12635_s18]]  }
0x1c9d   :  { %9466 = vperm.xlu1 %12176, %v9456_v10   ;;  %9471 = vperm.xlu0 %12175, %v9457_v26  }
0x1ca1   :  { %9476 = vperm.xlu1 %12176, %v9458_v8   ;;  %9481 = vperm.xlu0 %12175, %v9459_v23  }
0x1ca5   :  { %9486 = vperm.xlu1 %12176, %v9460_v27   ;;  %9491 = vperm.xlu0 %12175, %v9461_v12  }
0x1ca9   :  { %9496 = vperm.xlu1 %12176, %v9462_v7   ;;  %9501 = vperm.xlu0 %12175, %v9463_v60  }
0x1ccd   :  { %v9359_v28 = vpop.permute.xlu0 %9358 }
0x1ccf   :  { %v9391_v53 = vpop.permute.xlu1 %9390 }
0x1cd1   :  { %v9357_v29 = vpop.permute.xlu0 %9356 }
0x1cd3   :  { %v9325_v15 = vpop.permute.xlu1 %9324 }
0x1cd4   :  { %11706 = vmatprep.subr.bf16.mxu1 %v9325_v15 }
0x1cd5   :  { %11707 = vmatpush3.bf16.msra.mxu1 %v9272_v62  ;;  %v9327_v17 = vpop.permute.xlu0 %9326 }
0x1cd6   :  { %11708 = vmatprep.subr.bf16.mxu1 %v9327_v17 }
0x1cd7   :  { %v9389_v48 = vpop.permute.xlu1 %9388 }
0x1cd8   :  { %11746 = vmatprep.subr.bf16.mxu0 %v9389_v48 }
0x1cd9   :  { %11709 = vmatpush3.bf16.msra.mxu1 %v9273_v1  ;;  %11747 = vmatpush3.bf16.msra.mxu0 %v9357_v29  ;;  %v9309_v37 = vpop.permute.xlu0 %9308 }
0x1cda   :  { %11748 = vmatprep.subr.bf16.mxu0 %v9391_v53 }
0x1cdb   :  { %v9341_v45 = vpop.permute.xlu1 %9340 }
0x1cdd   :  { %11749 = vmatpush3.bf16.msra.mxu0 %v9359_v28 }
0x1cdf   :  { %v9329_v19 = vpop.permute.xlu1 %9328  ;;  %v9331_v2 = vpop.permute.xlu0 %9330 }
0x1ce0   :  { %11710 = vmatprep.subr.bf16.mxu1 %v9329_v19 }
0x1ce1   :  { %11711 = vmatpush3.bf16.msra.mxu1 %v9274_v31 }
0x1ce2   :  { %11712 = vmatprep.subr.bf16.mxu1 %v9331_v2 }
0x1ce3   :  { %v9343_v32 = vpop.permute.xlu1 %9342  ;;  %v9311_v6 = vpop.permute.xlu0 %9310 }
0x1ce5   :  { %11713 = vmatpush3.bf16.msra.mxu1 %v9275_v34 }
0x1ce6   :  { %11714 = vmatprep.subr.bf16.mxu1 %v9341_v45 }
0x1ce7   :  { %v9395_v39 = vpop.permute.xlu1 %9394  ;;  %v9361_v18 = vpop.permute.xlu0 %9360 }
0x1ce9   :  { %11715 = vmatpush3.bf16.msra.mxu1 %v9309_v37 }
0x1cea   :  { %11716 = vmatprep.subr.bf16.mxu1 %v9343_v32 }
0x1ceb   :  { %v9393_v4 = vpop.permute.xlu1 %9392  ;;  %v9363_v30 = vpop.permute.xlu0 %9362 }
0x1cec   :  { %11750 = vmatprep.subr.bf16.mxu0 %v9393_v4 }
0x1ced   :  { %11717 = vmatpush3.bf16.msra.mxu1 %v9311_v6  ;;  %11751 = vmatpush3.bf16.msra.mxu0 %v9361_v18 }
0x1cee   :  { %11752 = vmatprep.subr.bf16.mxu0 %v9395_v39 }
0x1cef   :  { %v9345_v14 = vpop.permute.xlu1 %9344  ;;  %v9313_v13 = vpop.permute.xlu0 %9312 }
0x1cf0   :  { %11718 = vmatprep.subr.bf16.mxu1 %v9345_v14 }
0x1cf1   :  { %11719 = vmatpush3.bf16.msra.mxu1 %v9313_v13  ;;  %11753 = vmatpush3.bf16.msra.mxu0 %v9363_v30 }
0x1cf3   :  { %v9347_v11 = vpop.permute.xlu1 %9346  ;;  %v9315_v20 = vpop.permute.xlu0 %9314 }
0x1cf4   :  { %11720 = vmatprep.subr.bf16.mxu1 %v9347_v11 }
0x1cf5   :  { %11721 = vmatpush3.bf16.msra.mxu1 %v9315_v20 }
0x1cf7   :  { %v9405_v50 = vpop.permute.xlu1 %9404  ;;  %v9373_v21 = vpop.permute.xlu0 %9372 }
0x1cf8   :  { %9649 = vmatmul.mubr.bf16.vlgmr.msra.gmra.mrb[100].mxu1 %v12530_v3  ;;  %11754 = vmatprep.subr.bf16.mxu0 %v9405_v50 }
0x1cf9   :  { %11755 = vmatpush3.bf16.msra.mxu0 %v9373_v21  ;;  %9656 = vmatprep.mubr.bf16.mxu1 %v12533_v42 }
0x1cfb   :  { %v9407_v35 = vpop.permute.xlu1 %9406  ;;  %v9375_v58 = vpop.permute.xlu0 %9374 }
0x1cfc   :  { %11756 = vmatprep.subr.bf16.mxu0 %v9407_v35 }
0x1cfd   :  { %11757 = vmatpush3.bf16.msra.mxu0 %v9375_v58 }
0x1cff   :  { %v9409_v16 = vpop.permute.xlu1 %9408  ;;  %v9377_v22 = vpop.permute.xlu0 %9376 }
0x1d00   :  { %9657 = vmatmul.mubr.bf16.gmra.mrb[104].mxu1 %v12535_v59  ;;  %11758 = vmatprep.subr.bf16.mxu0 %v9409_v16 }
0x1d01   :  { %11759 = vmatpush3.bf16.msra.mxu0 %v9377_v22  ;;  %9664 = vmatprep.mubr.bf16.mxu1 %v12539_v56 }
0x1d03   :  { %v9411_v61 = vpop.permute.xlu1 %9410  ;;  %v9379_v41 = vpop.permute.xlu0 %9378 }
0x1d04   :  { %11760 = vmatprep.subr.bf16.mxu0 %v9411_v61 }
0x1d05   :  { %11761 = vmatpush3.bf16.msra.mxu0 %v9379_v41 }
0x1d07   :  { %v9421_v54 = vpop.permute.xlu1 %9420  ;;  %v9423_v0 = vpop.permute.xlu0 %9422 }
0x1d08   :  { %9665 = vmatmul.mubr.bf16.gmra.mrb[108].mxu1 %v12541_v25  ;;  %9714 = vmatmul.mubr.bf16.vlgmr.msra.gmra.mrb[100].mxu0 %v12536_v33 }
0x1d09   :  { %11931 = vmatprep.subr.bf16.mxu1 %v9421_v54  ;;  %9672 = vmatprep.mubr.bf16.mxu1 %v12542_v36 }
0x1d0a   :  { %11932 = vmatpush3.bf16.msra.mxu1 %v9421_v54  ;;  %9721 = vmatprep.mubr.bf16.mxu0 %v12544_v47 }
0x1d0b   :  { %11933 = vmatprep.subr.bf16.mxu1 %v9423_v0  ;;  %v9425_v49 = vpop.permute.xlu1 %9424  ;;  %v9427_v40 = vpop.permute.xlu0 %9426 }
0x1d0e   :  { %11934 = vmatpush3.bf16.msra.mxu1 %v9423_v0 }
0x1d0f   :  { %11935 = vmatprep.subr.bf16.mxu1 %v9425_v49 }
0x1d10   :  { %9673 = vmatmul.mubr.bf16.gmra.mrb[112].mxu1 %v12546_v52  ;;  %9722 = vmatmul.mubr.bf16.gmra.mrb[104].mxu0 %v12547_v63 }
0x1d11   :  { %9729 = vmatprep.mubr.bf16.mxu0 %v12548_v5  ;;  %11939 = vmatprep.mubr.msk.bf16.mxu1 %vm1262_vm6, %v12550_v51 }
0x1d12   :  { %11936 = vmatpush3.bf16.msra.mxu1 %v9425_v49 }
0x1d13   :  { %11937 = vmatprep.subr.bf16.mxu1 %v9427_v40 }
0x1d16   :  { %11938 = vmatpush3.bf16.msra.mxu1 %v9427_v40 }
0x1d18   :  { %9730 = vmatmul.mubr.bf16.gmra.mrb[108].mxu0 %v12551_v55 }
0x1d19   :  { %11940 = vmatmul.mubr.msk.bf16.vlgmr.msra.gmra.mrb[116].mxu1 %vm1262_vm6, %v12552_v9  ;;  %9737 = vmatprep.mubr.bf16.mxu0 %v12553_v57 }
0x1d1a   :  { %11943 = vmatprep.mubr.msk.bf16.mxu1 %vm1262_vm6, %v12555_v38 }
0x1d1c   :  { %v9467_v29 = vpop.permute.xlu1 %9466  ;;  %v9472_v15 = vpop.permute.xlu0 %9471 }
0x1d20   :  { %9738 = vmatmul.mubr.bf16.gmra.mrb[112].mxu0 %v12556_v43  ;;  %v9477_v14 = vpop.permute.xlu1 %9476  ;;  %v9482_v13 = vpop.permute.xlu0 %9481 }
0x1d21   :  { %11944 = vmatmul.mubr.msk.bf16.gmra.mrb[120].mxu1 %vm1262_vm6, %v12557_v44 }
0x1d24   :  { %v9487_v36 = vpop.permute.xlu1 %9486  ;;  %v9492_v47 = vpop.permute.xlu0 %9491 }
0x1dcb   :  { %v11722_v24 = vpop.f32.mrb[100].mxu1 }
0x1dcc   :  { %v11723_v46 = vpop.f32.mrb[101].mxu1 }
0x1dcd   :  { %v11724_v10 = vadd.f32 %v11723_v46, %v11722_v24  ;;  %v11725_v26 = vpop.f32.mrb[102].mxu1 }
0x1dce   :  { %v11726_v8 = vpop.f32.mrb[103].mxu1 }
0x1dcf   :  { %v11727_v23 = vadd.f32 %v11726_v8, %v11725_v26  ;;  %v9651_v37 = vadd.f32 %v11724_v10, %v9467_v29 }
0x1dd1   :  { %v9654_v34 = vadd.f32 %v11727_v23, %v9472_v15 }
0x1dd3   :  { %v11728_v27 = vpop.f32.mrb[104].mxu1 }
0x1dd4   :  { %v11729_v12 = vpop.f32.mrb[105].mxu1 }
0x1dd5   :  { %v11730_v7 = vadd.f32 %v11729_v12, %v11728_v27  ;;  %v11731_v60 = vpop.f32.mrb[106].mxu1  ;;  %v9497_v27 = vpop.permute.xlu1 %9496 }
0x1dd6   :  { %v11732_v28 = vpop.f32.mrb[107].mxu1 }
0x1dd7   :  { %v11733_v53 = vadd.f32 %v11732_v28, %v11731_v60  ;;  %v9659_v50 = vadd.f32 %v11730_v7, %v9477_v14  ;;  %v9502_v60 = vpop.permute.xlu0 %9501 }
0x1dd9   :  { %v9662_v22 = vadd.f32 %v11733_v53, %v9482_v13 }
0x1ddb   :  { %v11734_v62 = vpop.f32.mrb[108].mxu1  ;;  %v11762_v17 = vpop.f32.mrb[100].mxu0 }
0x1ddc   :  { %v11735_v48 = vpop.f32.mrb[109].mxu1  ;;  %v11763_v1 = vpop.f32.mrb[101].mxu0 }
0x1ddd   :  { %v11736_v45 = vadd.f32 %v11735_v48, %v11734_v62  ;;  %v11764_v19 = vadd.f32 %v11763_v1, %v11762_v17  ;;  %v11737_v2 = vpop.f32.mrb[110].mxu1  ;;  %v11765_v31 = vpop.f32.mrb[102].mxu0 }
0x1dde   :  { %v11738_v32 = vpop.f32.mrb[111].mxu1  ;;  %v11766_v6 = vpop.f32.mrb[103].mxu0 }
0x1ddf   :  { %v11739_v39 = vadd.f32 %v11738_v32, %v11737_v2  ;;  %v11767_v18 = vadd.f32 %v11766_v6, %v11765_v31  ;;  %v9716_v4 = vadd.f32 %v11764_v19, %v9651_v37  ;;  %v9667_v63 = vadd.f32 %v11736_v45, %v9487_v36 }
0x1de1   :  { %v9719_v30 = vadd.f32 %v11767_v18, %v9654_v34  ;;  %v9670_v38 = vadd.f32 %v11739_v39, %v9492_v47 }
0x1de3   :  { %v11740_v11 = vpop.f32.mrb[112].mxu1  ;;  %v11768_v20 = vpop.f32.mrb[104].mxu0 }
0x1de4   :  { %v11741_v3 = vpop.f32.mrb[113].mxu1  ;;  %v11769_v42 = vpop.f32.mrb[105].mxu0 }
0x1de5   :  { %v11742_v21 = vadd.f32 %v11741_v3, %v11740_v11  ;;  %v11770_v35 = vadd.f32 %v11769_v42, %v11768_v20  ;;  %v11743_v58 = vpop.f32.mrb[114].mxu1  ;;  %v11771_v59 = vpop.f32.mrb[106].mxu0 }
0x1de6   :  { %v11744_v56 = vpop.f32.mrb[115].mxu1  ;;  %v11772_v16 = vpop.f32.mrb[107].mxu0 }
0x1de7   :  { %v11745_v61 = vadd.f32 %v11744_v56, %v11743_v58  ;;  %v11773_v41 = vadd.f32 %v11772_v16, %v11771_v59  ;;  %v9724_v33 = vadd.f32 %v11770_v35, %v9659_v50  ;;  %v9675_v17 = vadd.f32 %v11742_v21, %v9497_v27  ;;  %v12558_v59 = vld [vmem:[%s11093_s19] sm:$0xff]  }
0x1de8   :  { %11947 = vmatprep.subr.bf16.mxu1 %v12558_v59  ;;  %11957 = vmatprep.subr.bf16.mxu0 %v12558_v59 }
0x1de9   :  { %v9727_v25 = vadd.f32 %v11773_v41, %v9662_v22  ;;  %v9678_v6 = vadd.f32 %v11745_v61, %v9502_v60  ;;  %11948 = vmatpush3.bf16.msra.mxu1 %v12558_v59  ;;  %11958 = vmatpush3.bf16.msra.mxu0 %v12558_v59  ;;  %v10458_v59 = vld [vmem:[%s17936_s25 + $0x78] sm:$0xff] }
0x1deb   :  { %v11774_v54 = vpop.f32.mrb[108].mxu0 }
0x1dec   :  { %v11941_v0 = vpop.f32.mrb[116].mxu1  ;;  %v11775_v52 = vpop.f32.mrb[109].mxu0 }
0x1ded   :  { %v9789_v5 = vadd.f32 %v11941_v0, %v9724_v33  ;;  %v11776_v51 = vadd.f32 %v11775_v52, %v11774_v54  ;;  %v9780_v49 = vpop.f32.mrb[117].mxu1  ;;  %v11777_v40 = vpop.f32.mrb[110].mxu0 }
0x1dee   :  { %v9781_v55 = vadd.f32 %v9780_v49, %v9716_v4  ;;  %v11942_v9 = vpop.f32.mrb[118].mxu1  ;;  %v11778_v57 = vpop.f32.mrb[111].mxu0 }
0x1def   :  { %v9792_v43 = vadd.f32 %v11942_v9, %v9727_v25  ;;  %v11779_v44 = vadd.f32 %v11778_v57, %v11777_v40  ;;  %v9783_v24 = vpop.f32.mrb[119].mxu1  ;;  %v9732_v46 = vadd.f32 %v11776_v51, %v9667_v63  ;;  %v9813_v26 = vmax.f32 %v9789_v5, 0.0 }
0x1df0   :  { %v9784_v10 = vadd.f32 %v9783_v24, %v9719_v30  ;;  %v9811_v12 = vmax.f32 %v9781_v55, 0.0 }
0x1df1   :  { %v9814_v8 = vmax.f32 %v9792_v43, 0.0  ;;  %v9735_v23 = vadd.f32 %v11779_v44, %v9670_v38 }
0x1df2   :  { %v9812_v7 = vmax.f32 %v9784_v10, 0.0 }
0x1df3   :  { %v9820_v28 = vpack.c.bf16 %v9814_v8, %v9813_v26  ;;  %v11780_v53 = vpop.f32.mrb[112].mxu0 }
0x1df4   :  { %v9819_v29 = vpack.c.bf16 %v9812_v7, %v9811_v12  ;;  %v11945_v15 = vpop.f32.mrb[120].mxu1  ;;  %v11781_v62 = vpop.f32.mrb[113].mxu0 }
0x1df5   :  { %v11782_v48 = vadd.f32 %v11781_v62, %v11780_v53  ;;  %v9796_v1 = vpop.f32.mrb[121].mxu1  ;;  %v11783_v37 = vpop.f32.mrb[114].mxu0  ;;  %v9827_v45 = vsel %vm938_vm2, %v9820_v28, 0 }
0x1df6   :  { %v9797_v19 = vadd.f32 %v9796_v1, %v9732_v46  ;;  %v11946_v2 = vpop.f32.mrb[122].mxu1  ;;  %9841 = vrot.lane.b32.xlu0 %v9827_v45, %s12590_s21  ;;  %v11784_v31 = vpop.f32.mrb[115].mxu0  ;;  %v9824_v32 = vsel %vm938_vm2, %v9819_v29, 0 }
0x1df7   :  { %v9740_v34 = vadd.f32 %v11782_v48, %v9675_v17  ;;  %v11785_v39 = vadd.f32 %v11784_v31, %v11783_v37  ;;  %v9799_v18 = vpop.f32.mrb[123].mxu1  ;;  %9839 = vrot.lane.b32.xlu1 %v9824_v32, %s12590_s21 }
0x1df8   :  { %v9800_v4 = vadd.f32 %v9799_v18, %v9735_v23  ;;  %v9815_v13 = vmax.f32 %v9797_v19, 0.0  ;;  %v10443_v18 = vld [vmem:[%s17936_s25] sm:$0xff] }
0x1df9   :  { %v9805_v30 = vadd.f32 %v11945_v15, %v9740_v34  ;;  %v9743_v14 = vadd.f32 %v11785_v39, %v9678_v6  ;;  %v12559_v6 = vld [vmem:[%s17929_s9] sm:$0xff]   ;;  %v10444_v39 = vld [vmem:[%s17936_s25 + $0x8] sm:$0xff] }
0x1dfa   :  { %v9816_v11 = vmax.f32 %v9800_v4, 0.0  ;;  %v10446_v4 = vld [vmem:[%s17936_s25 + $0x18] sm:$0xff] }
0x1dfb   :  { %v9808_v20 = vadd.f32 %v11946_v2, %v9743_v14  ;;  %v9817_v42 = vmax.f32 %v9805_v30, 0.0  ;;  %v10445_v30 = vld [vmem:[%s17936_s25 + $0x10] sm:$0xff]  ;;  %v10448_v14 = vld [vmem:[%s17936_s25 + $0x28] sm:$0xff] }
0x1dfc   :  { %v9821_v3 = vpack.c.bf16 %v9816_v11, %v9815_v13  ;;  %v10447_v13 = vld [vmem:[%s17936_s25 + $0x20] sm:$0xff]  ;;  %v10450_v11 = vld [vmem:[%s17936_s25 + $0x38] sm:$0xff] }
0x1dfd   :  { %v9818_v50 = vmax.f32 %v9808_v20, 0.0  ;;  %v10449_v20 = vld [vmem:[%s17936_s25 + $0x30] sm:$0xff] }
0x1dfe   :  { %v9830_v21 = vsel %vm938_vm2, %v9821_v3, 0 }
0x1dff   :  { %9843 = vrot.lane.b32.xlu1 %v9830_v21, %s12590_s21  ;;  %v9822_v35 = vpack.c.bf16 %v9818_v50, %v9817_v42  ;;  %v10451_v42 = vld [vmem:[%s17936_s25 + $0x40] sm:$0xff]  ;;  %v10454_v50 = vld [vmem:[%s17936_s25 + $0x58] sm:$0xff] }
0x1e01   :  { %v9833_v58 = vsel %vm938_vm2, %v9822_v35, 0  ;;  %vm10085_vm2 = vcmask 31744  }
0x1e02   :  { %9845 = vrot.lane.b32.xlu0 %v9833_v58, %s12590_s21  ;;  %s12629_s21 = smov 22  }
0x1e03   :  { %s11079_s24 = sld [smem:[%s18054_s0 + %s12629_s21]]  }
0x1e09   :  { %v10103_v2 = vld [vmem:[%s11079_s24 + $0x8] sm:$0xff]  ;;  %v10102_v31 = vld [vmem:[%s11079_s24] sm:$0xff]  ;;  %v10104_v34 = vld [vmem:[%s11079_s24 + $0x10] sm:$0xff] }
0x1e68   :  { %v9842_v56 = vpop.permute.xlu0 %9841 }
0x1e69   :  { %v9856_v16 = vmax.bf16 %v9842_v56, %v9827_v45  ;;  %v9840_v22 = vpop.permute.xlu1 %9839  ;;  %v9852_v47 = vmax.bf16 %v9842_v56, %v9820_v28  ;;  %v10457_v56 = vld [vmem:[%s17936_s25 + $0x70] sm:$0xff] }
0x1e6a   :  { %v9855_v61 = vmax.bf16 %v9840_v22, %v9824_v32  ;;  %v9851_v54 = vmax.bf16 %v9840_v22, %v9819_v29  ;;  %v10105_v32 = vld [vmem:[%s11079_s24 + $0x18] sm:$0xff] }
0x1e6b   :  { %9865 = vrot.lane.b32.xlu0 %v9856_v16, %s12625_s3 }
0x1e6c   :  { %9863 = vrot.lane.b32.xlu1 %v9855_v61, %s12625_s3 }
0x1e71   :  { %v9844_v41 = vpop.permute.xlu1 %9843 }
0x1e72   :  { %v9857_v33 = vmax.bf16 %v9844_v41, %v9830_v21  ;;  %v9853_v51 = vmax.bf16 %v9844_v41, %v9821_v3  ;;  %v10452_v3 = vld [vmem:[%s17936_s25 + $0x48] sm:$0xff]  ;;  %v10453_v21 = vld [vmem:[%s17936_s25 + $0x50] sm:$0xff] }
0x1e74   :  { %9867 = vrot.lane.b32.xlu1 %v9857_v33, %s12625_s3  ;;  %v9846_v25 = vpop.permute.xlu0 %9845 }
0x1e75   :  { %v9858_v36 = vmax.bf16 %v9846_v25, %v9833_v58  ;;  %v9854_v55 = vmax.bf16 %v9846_v25, %v9822_v35  ;;  %v10456_v35 = vld [vmem:[%s17936_s25 + $0x68] sm:$0xff]  ;;  %v10455_v58 = vld [vmem:[%s17936_s25 + $0x60] sm:$0xff] }
0x1e77   :  { %9869 = vrot.lane.b32.xlu0 %v9858_v36, %s12625_s3 }
0x1edd   :  { %v9866_v0 = vpop.permute.xlu0 %9865 }
0x1ede   :  { %v9876_v52 = vmax.bf16 %v9866_v0, %v9852_v47  ;;  %v9864_v63 = vpop.permute.xlu1 %9863 }
0x1edf   :  { %v9875_v5 = vmax.bf16 %v9864_v63, %v9851_v54 }
0x1ee0   :  { %9970 = vrot.lane.b32.xlu0 %v9876_v52, %s12605_s6 }
0x1ee1   :  { %9968 = vrot.lane.b32.xlu1 %v9875_v5, %s12605_s6  ;;  %11949 = vmatprep.mubr.msk.bf16.mxu1 %vm5882_vm5, %v9875_v5 }
0x1ee2   :  { %11950 = vmatmul.mubr.msk.bf16.vlgmr.msra.gmra.mrb[124].mxu1 %vm5882_vm5, %v9876_v52 }
0x1ee6   :  { %v9868_v49 = vpop.permute.xlu1 %9867 }
0x1ee7   :  { %v9877_v40 = vmax.bf16 %v9868_v49, %v9853_v51 }
0x1ee9   :  { %9972 = vrot.lane.b32.xlu1 %v9877_v40, %s12605_s6  ;;  %11953 = vmatprep.mubr.msk.bf16.mxu1 %vm5882_vm5, %v9877_v40  ;;  %v9870_v9 = vpop.permute.xlu0 %9869 }
0x1eea   :  { %v9878_v57 = vmax.bf16 %v9870_v9, %v9854_v55  ;;  %v10992_v55 = vld [vmem:[%s11085_s22 + $0x8] sm:$0x3]  ;;  %v10991_v9 = vld [vmem:[%s11085_s22] sm:$0xff] }
0x1eec   :  { %9974 = vrot.lane.b32.xlu0 %v9878_v57, %s12605_s6  ;;  %11954 = vmatmul.mubr.msk.bf16.gmra.mrb[128].mxu1 %vm5882_vm5, %v9878_v57  ;;  %s18025_s6 = sld [smem:[%s18054_s0 + %s12636_s13]]  }
0x1eed   :  { %11975 = vmatprep.mubr.msk.bf16.mxu1 %vm1262_vm6, %v12559_v6  ;;  %v12560_v6 = vld [vmem:[%s17929_s9 + $0x8] sm:$0xff]  }
0x1f52   :  { %v9971_v43 = vpop.permute.xlu0 %9970 }
0x1f53   :  { %v9969_v38 = vpop.permute.xlu1 %9968 }
0x1f54   :  { %11959 = vmatprep.mubr.msk.bf16.mxu0 %vm5882_vm5, %v9969_v38 }
0x1f55   :  { %11960 = vmatmul.mubr.msk.bf16.vlgmr.msra.gmra.mrb[116].mxu0 %vm5882_vm5, %v9971_v43 }
0x1f5b   :  { %v9973_v44 = vpop.permute.xlu1 %9972 }
0x1f5c   :  { %11963 = vmatprep.mubr.msk.bf16.mxu0 %vm5882_vm5, %v9973_v44 }
0x1f5e   :  { %v9975_v24 = vpop.permute.xlu0 %9974 }
0x1f5f   :  { %11964 = vmatmul.mubr.msk.bf16.gmra.mrb[120].mxu0 %vm5882_vm5, %v9975_v24  ;;  %vm18669_vm5 = vcmask 15360  }
0x1fb5   :  { %v17905_v46 = vpop.f32.mrb[124].mxu1 }
0x1fb6   :  { %v17907_v10 = vpop.f32.mrb[125].mxu1 }
0x1fb7   :  { %v17909_v26 = vpop.f32.mrb[126].mxu1 }
0x1fb8   :  { %v17911_v8 = vpop.f32.mrb[127].mxu1 }
0x1fbf   :  { %v17913_v23 = vpop.f32.mrb[128].mxu1 }
0x1fc0   :  { %v17915_v27 = vpop.f32.mrb[129].mxu1 }
0x1fc1   :  { %v17917_v12 = vpop.f32.mrb[130].mxu1 }
0x1fc2   :  { %v17919_v7 = vpop.f32.mrb[131].mxu1 }
0x2028   :  { %v11961_v60 = vpop.f32.mrb[116].mxu0 }
0x2029   :  { %v10022_v28 = vpop.f32.mrb[117].mxu0 }
0x202a   :  { %v11962_v53 = vpop.f32.mrb[118].mxu0 }
0x202b   :  { %v12197_v29 = vpack.i.bf16 %v11962_v53, %v11961_v60  ;;  %v10025_v15 = vpop.f32.mrb[119].mxu0 }
0x202c   :  { %v12192_v62 = vpack.i.bf16 %v10025_v15, %v10022_v28 }
0x202d   :  { %12198 = vrot.lane.b32.xlu0 %v12197_v29, %s12599_s8 }
0x202e   :  { %12193 = vrot.lane.b32.xlu1 %v12192_v62, %s12599_s8 }
0x2032   :  { %v11965_v17 = vpop.f32.mrb[120].mxu0 }
0x2033   :  { %v10038_v48 = vpop.f32.mrb[121].mxu0 }
0x2034   :  { %v11966_v1 = vpop.f32.mrb[122].mxu0 }
0x2035   :  { %v12207_v37 = vpack.i.bf16 %v11966_v1, %v11965_v17  ;;  %v10041_v45 = vpop.f32.mrb[123].mxu0 }
0x2036   :  { %v12202_v19 = vpack.i.bf16 %v10041_v45, %v10038_v48 }
0x2037   :  { %12208 = vrot.lane.b32.xlu0 %v12207_v37, %s12599_s8 }
0x2038   :  { %12203 = vrot.lane.b32.xlu1 %v12202_v19, %s12599_s8  ;;  %s12632_s8 = smov 26  }
0x2039   :  { %s17956_s1 = sld [smem:[%s18054_s0 + %s12632_s8]]  }
0x203b   :  { %10113 = vperm.xlu0 %12175, %v10103_v2  }
0x203c   :  { %10108 = vperm.xlu1 %12176, %v10102_v31  }
0x203f   :  { %10123 = vperm.xlu0 %12175, %v10105_v32   ;;  %v10725_v16 = vld [vmem:[%s17956_s1 + $0x8] sm:$0xff]  ;;  %v10724_v22 = vld [vmem:[%s17956_s1] sm:$0xff]  ;;  %v10727_v61 = vld [vmem:[%s17956_s1 + $0x18] sm:$0xff] }
0x2040   :  { %10118 = vperm.xlu1 %12176, %v10104_v34   ;;  %v10726_v41 = vld [vmem:[%s17956_s1 + $0x10] sm:$0xff]  ;;  %v10729_v33 = vld [vmem:[%s17956_s1 + $0x28] sm:$0xff]  ;;  %v10728_v25 = vld [vmem:[%s17956_s1 + $0x20] sm:$0xff] }
0x2041   :  { %v10731_v36 = vld [vmem:[%s17956_s1 + $0x38] sm:$0xff]  ;;  %v10730_v47 = vld [vmem:[%s17956_s1 + $0x30] sm:$0xff]  ;;  %v10733_v54 = vld [vmem:[%s17956_s1 + $0x48] sm:$0xff] }
0x2042   :  { %v10732_v0 = vld [vmem:[%s17956_s1 + $0x40] sm:$0xff]  ;;  %v10735_v52 = vld [vmem:[%s17956_s1 + $0x58] sm:$0xff]  ;;  %v10734_v63 = vld [vmem:[%s17956_s1 + $0x50] sm:$0xff] }
0x2043   :  { %10466 = vperm.xlu0 %12175, %v10444_v39   ;;  %v10737_v5 = vld [vmem:[%s17956_s1 + $0x68] sm:$0xff]  ;;  %v10736_v51 = vld [vmem:[%s17956_s1 + $0x60] sm:$0xff]  ;;  %v10739_v49 = vld [vmem:[%s17956_s1 + $0x78] sm:$0xff] }
0x2044   :  { %10461 = vperm.xlu1 %12176, %v10443_v18   ;;  %v10738_v40 = vld [vmem:[%s17956_s1 + $0x70] sm:$0xff]  ;;  %v11432_v39 = vld [vmem:[%s11094_s7 + $0xc] sm:$0xf] }
0x2047   :  { %10476 = vperm.xlu0 %12175, %v10446_v4  }
0x2048   :  { %10471 = vperm.xlu1 %12176, %v10445_v30  }
0x204b   :  { %10486 = vperm.xlu0 %12175, %v10448_v14  }
0x204c   :  { %10481 = vperm.xlu1 %12176, %v10447_v13  }
0x204f   :  { %10496 = vperm.xlu0 %12175, %v10450_v11  }
0x2050   :  { %10491 = vperm.xlu1 %12176, %v10449_v20  }
0x2053   :  { %10506 = vperm.xlu0 %12175, %v10452_v3  }
0x2054   :  { %10501 = vperm.xlu1 %12176, %v10451_v42  }
0x2057   :  { %10516 = vperm.xlu0 %12175, %v10454_v50  }
0x2058   :  { %10511 = vperm.xlu1 %12176, %v10453_v21  }
0x205b   :  { %10526 = vperm.xlu0 %12175, %v10456_v35  }
0x205c   :  { %10521 = vperm.xlu1 %12176, %v10455_v58  }
0x205f   :  { %10536 = vperm.xlu0 %12175, %v10458_v59  }
0x2060   :  { %10531 = vperm.xlu1 %12176, %v10457_v56  }
0x2063   :  { %10747 = vperm.xlu0 %12175, %v10725_v16  }
0x2064   :  { %10742 = vperm.xlu1 %12176, %v10724_v22  }
0x2067   :  { %10757 = vperm.xlu0 %12175, %v10727_v61  }
0x2068   :  { %10752 = vperm.xlu1 %12176, %v10726_v41  }
0x206b   :  { %10767 = vperm.xlu0 %12175, %v10729_v33   ;;  %v10368_v33 = vsel %vm2232_vm9, %v11432_v39, 0 }
0x206c   :  { %10762 = vperm.xlu1 %12176, %v10728_v25   ;;  %v12561_v25 = vld [vmem:[%s18012_s12] sm:$0xff]  }
0x206f   :  { %10777 = vperm.xlu0 %12175, %v10731_v36  }
0x2070   :  { %10772 = vperm.xlu1 %12176, %v10730_v47  }
0x2073   :  { %10787 = vperm.xlu0 %12175, %v10733_v54  }
0x2074   :  { %10782 = vperm.xlu1 %12176, %v10732_v0  }
0x2077   :  { %10797 = vperm.xlu0 %12175, %v10735_v52  }
0x2078   :  { %10792 = vperm.xlu1 %12176, %v10734_v63  }
0x207b   :  { %10807 = vperm.xlu0 %12175, %v10737_v5  }
0x207c   :  { %10802 = vperm.xlu1 %12176, %v10736_v51  }
0x207f   :  { %10817 = vperm.xlu0 %12175, %v10739_v49  }
0x2080   :  { %10812 = vperm.xlu1 %12176, %v10738_v40  }
0x2083   :  { %11000 = vperm.xlu0 %12175, %v10992_v55  }
0x2084   :  { %10995 = vperm.xlu1 %12176, %v10991_v9  }
0x209f   :  { %v12199_v57 = vpop.permute.xlu0 %12198 }
0x20a0   :  { %v12201_v38 = vunpack.i.h.bf16 %v12199_v57  ;;  %v12200_v43 = vunpack.i.l.bf16 %v12199_v57  ;;  %v12194_v44 = vpop.permute.xlu1 %12193 }
0x20a1   :  { %v12196_v24 = vunpack.i.h.bf16 %v12194_v44  ;;  %v12195_v60 = vunpack.i.l.bf16 %v12194_v44 }
0x20a2   :  { %v10088_v28 = vsel %vm10085_vm2, %v17905_v46, %v12200_v43  ;;  %v10089_v53 = vsel %vm10085_vm2, %v17909_v26, %v12201_v38 }
0x20a3   :  { %v10086_v29 = vsel %vm10085_vm2, %v17907_v10, %v12195_v60  ;;  %v10087_v15 = vsel %vm10085_vm2, %v17911_v8, %v12196_v24  ;;  %v10095_v62 = vpack.c.bf16 %v10089_v53, %v10088_v28 }
0x20a4   :  { %v10094_v17 = vpack.c.bf16 %v10087_v15, %v10086_v29 }
0x20a6   :  { %11967 = vmatprep.subr.bf16.mxu1 %v10094_v17 }
0x20a7   :  { %11968 = vmatpush3.bf16.msra.mxu1 %v10094_v17 }
0x20a8   :  { %11969 = vmatprep.subr.bf16.mxu1 %v10095_v62 }
0x20a9   :  { %v12209_v48 = vpop.permute.xlu0 %12208 }
0x20aa   :  { %v12211_v1 = vunpack.i.h.bf16 %v12209_v48  ;;  %v12210_v37 = vunpack.i.l.bf16 %v12209_v48  ;;  %v12204_v45 = vpop.permute.xlu1 %12203  ;;  %v12562_v48 = vld [vmem:[%s18012_s12 + $0x8] sm:$0xff]  }
0x20ab   :  { %v12206_v46 = vunpack.i.h.bf16 %v12204_v45  ;;  %v12205_v19 = vunpack.i.l.bf16 %v12204_v45  ;;  %11970 = vmatpush3.bf16.msra.mxu1 %v10095_v62  ;;  %v12565_v45 = vld [vmem:[%s18012_s12 + $0x20] sm:$0xff]  }
0x20ac   :  { %v10092_v26 = vsel %vm10085_vm2, %v17913_v23, %v12210_v37  ;;  %v10093_v10 = vsel %vm10085_vm2, %v17917_v12, %v12211_v1  ;;  %v10197_v23 = vld [vmem:[%s11094_s7] sm:$0xf]  ;;  %v11426_v12 = vld [vmem:[%s11094_s7 + $0x4] sm:$0xf]  ;;  %v12563_v1 = vld [vmem:[%s18012_s12 + $0x10] sm:$0xff]  }
0x20ad   :  { %v10090_v8 = vsel %vm10085_vm2, %v17915_v27, %v12205_v19  ;;  %v10091_v2 = vsel %vm10085_vm2, %v17919_v7, %v12206_v46  ;;  %v10097_v31 = vpack.c.bf16 %v10093_v10, %v10092_v26  ;;  %v11429_v27 = vld [vmem:[%s11094_s7 + $0x8] sm:$0xf]  ;;  %12111 = vmatprep.subr.msk.bf16.mxu0 %vm2232_vm9, %v10197_v23  ;;  %v10206_v7 = vsel %vm2232_vm9, %v10197_v23, 0  ;;  %v12564_v37 = vld [vmem:[%s18012_s12 + $0x18] sm:$0xff]   ;;  %v12567_v19 = vld [vmem:[%s18012_s12 + $0x30] sm:$0xff]  }
0x20ae   :  { %v10096_v32 = vpack.c.bf16 %v10091_v2, %v10090_v8  ;;  %v10260_v34 = vsel %vm2232_vm9, %v11426_v12, 0  ;;  %11980 = vmatpush3.bf16.msra.mxu0 %v10206_v7  ;;  %v10314_v41 = vsel %vm2232_vm9, %v11429_v27, 0  ;;  %v12566_v46 = vld [vmem:[%s18012_s12 + $0x28] sm:$0xff]   ;;  %v12568_v26 = vld [vmem:[%s18012_s12 + $0x38] sm:$0xff]   ;;  %v12569_v10 = vld [vmem:[%s18025_s6] sm:$0xff]  }
0x20af   :  { %12113 = vmatprep.subr.msk.bf16.mxu0 %vm2232_vm9, %v11429_v27 }
0x20b0   :  { %11971 = vmatprep.subr.bf16.mxu1 %v10096_v32 }
0x20b1   :  { %11972 = vmatpush3.bf16.msra.mxu1 %v10096_v32 }
0x20b2   :  { %11973 = vmatprep.subr.bf16.mxu1 %v10097_v31 }
0x20b5   :  { %11974 = vmatpush3.bf16.msra.mxu1 %v10097_v31 }
0x20b6   :  { %12112 = vmatprep.subr.msk.bf16.mxu1 %vm2232_vm9, %v11426_v12 }
0x20b8   :  { %11976 = vmatmul.mubr.msk.bf16.vlgmr.msra.gmra.mrb[132].mxu1 %vm1262_vm6, %v12560_v6  ;;  %vm10198_vm6 = vcmask 64512  }
0x20b9   :  { %11986 = vmatpush3.bf16.msra.mxu1 %v10260_v34 }
0x20ba   :  { %12114 = vmatprep.subr.msk.bf16.mxu1 %vm2232_vm9, %v11432_v39  ;;  %v10114_v4 = vpop.permute.xlu0 %10113  ;;  %vm12638_vm9 = vmmov 0  }
0x20bb   :  { %v10109_v18 = vpop.permute.xlu1 %10108 }
0x20be   :  { %v10124_v20 = vpop.permute.xlu0 %10123 }
0x20bf   :  { %v10119_v30 = vpop.permute.xlu1 %10118 }
0x20c2   :  { %v10467_v2 = vpop.permute.xlu0 %10466 }
0x20c3   :  { %v10462_v8 = vpop.permute.xlu1 %10461 }
0x20c6   :  { %v10477_v32 = vpop.permute.xlu0 %10476 }
0x20c7   :  { %v10472_v31 = vpop.permute.xlu1 %10471 }
0x20ca   :  { %v10487_v23 = vpop.permute.xlu0 %10486 }
0x20cb   :  { %v10482_v6 = vpop.permute.xlu1 %10481 }
0x20ce   :  { %v10497_v39 = vpop.permute.xlu0 %10496 }
0x20cf   :  { %v10492_v12 = vpop.permute.xlu1 %10491 }
0x218b   :  { %v11977_v14 = vpop.f32.mrb[132].mxu1 }
0x218c   :  { %v10185_v13 = vadd.f32 %v11977_v14, %v10119_v30  ;;  %v10176_v11 = vpop.f32.mrb[133].mxu1 }
0x218d   :  { %v10177_v3 = vadd.f32 %v10176_v11, %v10109_v18  ;;  %v11978_v42 = vpop.f32.mrb[134].mxu1 }
0x218e   :  { %v10188_v50 = vadd.f32 %v11978_v42, %v10124_v20  ;;  %v10179_v21 = vpop.f32.mrb[135].mxu1  ;;  %v10193_v58 = vmax.f32 %v10185_v13, 0.0 }
0x218f   :  { %v10180_v35 = vadd.f32 %v10179_v21, %v10114_v4  ;;  %v10191_v56 = vmax.f32 %v10177_v3, 0.0  ;;  %v10502_v3 = vpop.permute.xlu1 %10501 }
0x2190   :  { %v10194_v59 = vmax.f32 %v10188_v50, 0.0 }
0x2191   :  { %v10192_v16 = vmax.f32 %v10180_v35, 0.0  ;;  %v10507_v35 = vpop.permute.xlu0 %10506 }
0x2192   :  { %v10196_v22 = vpack.c.bf16 %v10194_v59, %v10193_v58 }
0x2193   :  { %v10195_v61 = vpack.c.bf16 %v10192_v16, %v10191_v56 }
0x2195   :  { %11981 = vmatprep.mubr.msk.bf16.mxu0 %vm10198_vm6, %v10195_v61  ;;  %11987 = vmatprep.mubr.msk.bf16.mxu1 %vm10198_vm6, %v10195_v61 }
0x2196   :  { %11982 = vmatmul.mubr.msk.bf16.vlgmr.msra.gmra.mrb[124].mxu0 %vm10198_vm6, %v10196_v22  ;;  %11988 = vmatmul.mubr.msk.bf16.vlgmr.msra.gmra.mrb[136].mxu1 %vm10198_vm6, %v10196_v22 }
0x2197   :  { %11993 = vmatprep.mubr.msk.bf16.mxu0 %vm10198_vm6, %v10195_v61  ;;  %11999 = vmatprep.mubr.msk.bf16.mxu1 %vm10198_vm6, %v10195_v61 }
0x2198   :  { %11992 = vmatpush3.bf16.msra.mxu0 %v10314_v41  ;;  %11998 = vmatpush3.bf16.msra.mxu1 %v10368_v33 }
0x219e   :  { %11994 = vmatmul.mubr.msk.bf16.vlgmr.msra.gmra.mrb[128].mxu0 %vm10198_vm6, %v10196_v22  ;;  %12000 = vmatmul.mubr.msk.bf16.vlgmr.msra.gmra.mrb[140].mxu1 %vm10198_vm6, %v10196_v22 }
0x219f   :  { %12019 = vmatprep.mubr.bf16.mxu0 %v12561_v25  ;;  %12051 = vmatprep.mubr.bf16.mxu1 %v12569_v10  ;;  %v10512_v25 = vpop.permute.xlu1 %10511 }
0x2269   :  { %v11983_v36 = vpop.f32.mrb[124].mxu0  ;;  %v11989_v47 = vpop.f32.mrb[136].mxu1 }
0x226a   :  { %v10242_v54 = vpop.f32.mrb[125].mxu0  ;;  %v10296_v0 = vpop.f32.mrb[137].mxu1 }
0x226b   :  { %v11984_v52 = vpop.f32.mrb[126].mxu0  ;;  %v11990_v63 = vpop.f32.mrb[138].mxu1 }
0x226c   :  { %v10420_v5 = vpack.c.bf16 %v11984_v52, %v11983_v36  ;;  %v10422_v51 = vpack.c.bf16 %v11990_v63, %v11989_v47  ;;  %v10245_v49 = vpop.f32.mrb[127].mxu0  ;;  %v10299_v40 = vpop.f32.mrb[139].mxu1 }
0x226d   :  { %v10419_v55 = vpack.c.bf16 %v10245_v49, %v10242_v54  ;;  %v10421_v9 = vpack.c.bf16 %v10299_v40, %v10296_v0  ;;  %v10517_v0 = vpop.permute.xlu0 %10516 }
0x226f   :  { %12003 = vmatprep.subr.bf16.mxu0 %v10419_v55 }
0x2270   :  { %12004 = vmatpush3.bf16.msra.mxu0 %v10419_v55 }
0x2271   :  { %v11995_v57 = vpop.f32.mrb[128].mxu0  ;;  %v12001_v38 = vpop.f32.mrb[140].mxu1  ;;  %12005 = vmatprep.subr.bf16.mxu0 %v10420_v5 }
0x2272   :  { %v10350_v43 = vpop.f32.mrb[129].mxu0  ;;  %v10404_v44 = vpop.f32.mrb[141].mxu1 }
0x2273   :  { %v11996_v24 = vpop.f32.mrb[130].mxu0  ;;  %v12002_v60 = vpop.f32.mrb[142].mxu1 }
0x2274   :  { %v10424_v28 = vpack.c.bf16 %v11996_v24, %v11995_v57  ;;  %v10426_v53 = vpack.c.bf16 %v12002_v60, %v12001_v38  ;;  %v10353_v29 = vpop.f32.mrb[131].mxu0  ;;  %v10407_v15 = vpop.f32.mrb[143].mxu1  ;;  %12006 = vmatpush3.bf16.msra.mxu0 %v10420_v5 }
0x2275   :  { %v10423_v62 = vpack.c.bf16 %v10353_v29, %v10350_v43  ;;  %v10425_v17 = vpack.c.bf16 %v10407_v15, %v10404_v44  ;;  %12007 = vmatprep.subr.bf16.mxu0 %v10421_v9  ;;  %v10527_v24 = vpop.permute.xlu0 %10526 }
0x2278   :  { %12008 = vmatpush3.bf16.msra.mxu0 %v10421_v9  ;;  %v10522_v9 = vpop.permute.xlu1 %10521 }
0x2279   :  { %12009 = vmatprep.subr.bf16.mxu0 %v10422_v51 }
0x227c   :  { %12010 = vmatpush3.bf16.msra.mxu0 %v10422_v51 }
0x227d   :  { %12011 = vmatprep.subr.bf16.mxu0 %v10423_v62 }
0x2280   :  { %12012 = vmatpush3.bf16.msra.mxu0 %v10423_v62 }
0x2281   :  { %12013 = vmatprep.subr.bf16.mxu0 %v10424_v28 }
0x2284   :  { %12014 = vmatpush3.bf16.msra.mxu0 %v10424_v28 }
0x2285   :  { %12015 = vmatprep.subr.bf16.mxu0 %v10425_v17 }
0x2288   :  { %12016 = vmatpush3.bf16.msra.mxu0 %v10425_v17  ;;  %v10532_v17 = vpop.permute.xlu1 %10531 }
0x2289   :  { %12017 = vmatprep.subr.bf16.mxu0 %v10426_v53 }
0x228c   :  { %12018 = vmatpush3.bf16.msra.mxu0 %v10426_v53 }
0x228f   :  { %12020 = vmatmul.mubr.bf16.vlgmr.msra.gmra.mrb[132].mxu0 %v12562_v48 }
0x2290   :  { %12023 = vmatprep.mubr.bf16.mxu0 %v12563_v1 }
0x2297   :  { %12024 = vmatmul.mubr.bf16.gmra.mrb[136].mxu0 %v12564_v37 }
0x2298   :  { %12027 = vmatprep.mubr.bf16.mxu0 %v12565_v45 }
0x229f   :  { %12028 = vmatmul.mubr.bf16.gmra.mrb[140].mxu0 %v12566_v46  ;;  %v10537_v46 = vpop.permute.xlu0 %10536 }
0x22a0   :  { %12031 = vmatprep.mubr.bf16.mxu0 %v12567_v19 }
0x22a7   :  { %12032 = vmatmul.mubr.bf16.gmra.mrb[144].mxu0 %v12568_v26 }
0x2362   :  { %v12021_v27 = vpop.f32.mrb[132].mxu0 }
0x2363   :  { %v10630_v7 = vadd.f32 %v12021_v27, %v10472_v31  ;;  %v10621_v34 = vpop.f32.mrb[133].mxu0 }
0x2364   :  { %v10622_v18 = vadd.f32 %v10621_v34, %v10462_v8  ;;  %v12022_v4 = vpop.f32.mrb[134].mxu0  ;;  %v12571_v34 = vld [vmem:[%s18025_s6 + $0x10] sm:$0xff]  }
0x2365   :  { %v10633_v30 = vadd.f32 %v12022_v4, %v10477_v32  ;;  %v10624_v14 = vpop.f32.mrb[135].mxu0  ;;  %v10686_v11 = vmax.f32 %v10630_v7, 0.0  ;;  %v12570_v7 = vld [vmem:[%s18025_s6 + $0x8] sm:$0xff]  }
0x2366   :  { %v10625_v13 = vadd.f32 %v10624_v14, %v10467_v2  ;;  %v10684_v42 = vmax.f32 %v10622_v18, 0.0  ;;  %v12573_v18 = vld [vmem:[%s18025_s6 + $0x20] sm:$0xff]   ;;  %v12574_v4 = vld [vmem:[%s18025_s6 + $0x28] sm:$0xff]   ;;  %v12576_v14 = vld [vmem:[%s18025_s6 + $0x38] sm:$0xff]  }
0x2367   :  { %v10687_v20 = vmax.f32 %v10633_v30, 0.0  ;;  %v12575_v30 = vld [vmem:[%s18025_s6 + $0x30] sm:$0xff]  }
0x2368   :  { %v10685_v50 = vmax.f32 %v10625_v13, 0.0  ;;  %v12637_v13 = vmov 0.0  }
0x2369   :  { %v10701_v21 = vpack.c.bf16 %v10687_v20, %v10686_v11  ;;  %12067 = vmatprep.subr.bf16.mxu0 %v12637_v13  ;;  %12083 = vmatprep.mubr.msk.bf16.mxu0 %vm12638_vm9, %v12637_v13  ;;  %v10743_v11 = vpop.permute.xlu1 %10742  ;;  %v10748_v20 = vpop.permute.xlu0 %10747 }
0x236a   :  { %v10700_v58 = vpack.c.bf16 %v10685_v50, %v10684_v42  ;;  %v12025_v59 = vpop.f32.mrb[136].mxu0 }
0x236b   :  { %v10646_v56 = vadd.f32 %v12025_v59, %v10492_v12  ;;  %v10637_v16 = vpop.f32.mrb[137].mxu0 }
0x236c   :  { %v10638_v22 = vadd.f32 %v10637_v16, %v10482_v6  ;;  %v12026_v61 = vpop.f32.mrb[138].mxu0  ;;  %12035 = vmatprep.subr.bf16.mxu1 %v10700_v58 }
0x236d   :  { %v10649_v41 = vadd.f32 %v12026_v61, %v10497_v39  ;;  %v10640_v33 = vpop.f32.mrb[139].mxu0  ;;  %12036 = vmatpush3.bf16.msra.mxu1 %v10700_v58  ;;  %v10690_v47 = vmax.f32 %v10646_v56, 0.0  ;;  %v12572_v39 = vld [vmem:[%s18025_s6 + $0x18] sm:$0xff]   ;;  %v10758_v42 = vpop.permute.xlu0 %10757 }
0x236e   :  { %v10641_v36 = vadd.f32 %v10640_v33, %v10487_v23  ;;  %12037 = vmatprep.subr.bf16.mxu1 %v10701_v21  ;;  %v10688_v52 = vmax.f32 %v10638_v22, 0.0 }
0x236f   :  { %v10691_v54 = vmax.f32 %v10649_v41, 0.0 }
0x2370   :  { %v10689_v63 = vmax.f32 %v10641_v36, 0.0 }
0x2371   :  { %v10703_v5 = vpack.c.bf16 %v10691_v54, %v10690_v47  ;;  %12038 = vmatpush3.bf16.msra.mxu1 %v10701_v21  ;;  %v10768_v21 = vpop.permute.xlu0 %10767 }
0x2372   :  { %v10702_v51 = vpack.c.bf16 %v10689_v63, %v10688_v52  ;;  %v12029_v49 = vpop.f32.mrb[140].mxu0 }
0x2373   :  { %v10662_v40 = vadd.f32 %v12029_v49, %v10512_v25  ;;  %v10653_v55 = vpop.f32.mrb[141].mxu0 }
0x2374   :  { %v10654_v57 = vadd.f32 %v10653_v55, %v10502_v3  ;;  %v12030_v38 = vpop.f32.mrb[142].mxu0  ;;  %12039 = vmatprep.subr.bf16.mxu1 %v10702_v51  ;;  %v10753_v3 = vpop.permute.xlu1 %10752 }
0x2375   :  { %v10665_v43 = vadd.f32 %v12030_v38, %v10517_v0  ;;  %v10656_v44 = vpop.f32.mrb[143].mxu0  ;;  %12040 = vmatpush3.bf16.msra.mxu1 %v10702_v51  ;;  %v10694_v28 = vmax.f32 %v10662_v40, 0.0  ;;  %v10778_v16 = vpop.permute.xlu0 %10777 }
0x2376   :  { %v10657_v60 = vadd.f32 %v10656_v44, %v10507_v35  ;;  %12041 = vmatprep.subr.bf16.mxu1 %v10703_v5  ;;  %v10692_v29 = vmax.f32 %v10654_v57, 0.0 }
0x2377   :  { %v10695_v53 = vmax.f32 %v10665_v43, 0.0 }
0x2378   :  { %v10693_v15 = vmax.f32 %v10657_v60, 0.0  ;;  %v10763_v50 = vpop.permute.xlu1 %10762 }
0x2379   :  { %v10705_v62 = vpack.c.bf16 %v10695_v53, %v10694_v28  ;;  %12042 = vmatpush3.bf16.msra.mxu1 %v10703_v5  ;;  %v10788_v5 = vpop.permute.xlu0 %10787 }
0x237a   :  { %v10704_v48 = vpack.c.bf16 %v10693_v15, %v10692_v29  ;;  %v12033_v1 = vpop.f32.mrb[144].mxu0 }
0x237b   :  { %v10678_v37 = vadd.f32 %v12033_v1, %v10532_v17  ;;  %v10669_v45 = vpop.f32.mrb[145].mxu0 }
0x237c   :  { %v10670_v19 = vadd.f32 %v10669_v45, %v10522_v9  ;;  %v12034_v26 = vpop.f32.mrb[146].mxu0  ;;  %12043 = vmatprep.subr.bf16.mxu1 %v10704_v48  ;;  %v10773_v35 = vpop.permute.xlu1 %10772 }
0x237d   :  { %v10681_v10 = vadd.f32 %v12034_v26, %v10537_v46  ;;  %v10672_v8 = vpop.f32.mrb[147].mxu0  ;;  %12044 = vmatpush3.bf16.msra.mxu1 %v10704_v48  ;;  %v10698_v31 = vmax.f32 %v10678_v37, 0.0  ;;  %v10798_v53 = vpop.permute.xlu0 %10797 }
0x237e   :  { %v10673_v2 = vadd.f32 %v10672_v8, %v10527_v24  ;;  %12045 = vmatprep.subr.bf16.mxu1 %v10705_v62  ;;  %v10696_v6 = vmax.f32 %v10670_v19, 0.0 }
0x237f   :  { %v10699_v32 = vmax.f32 %v10681_v10, 0.0 }
0x2380   :  { %v10697_v23 = vmax.f32 %v10673_v2, 0.0  ;;  %v10783_v54 = vpop.permute.xlu1 %10782 }
0x2381   :  { %v10707_v12 = vpack.c.bf16 %v10699_v32, %v10698_v31  ;;  %12046 = vmatpush3.bf16.msra.mxu1 %v10705_v62  ;;  %v10808_v8 = vpop.permute.xlu0 %10807 }
0x2382   :  { %v10706_v27 = vpack.c.bf16 %v10697_v23, %v10696_v6 }
0x2384   :  { %12047 = vmatprep.subr.bf16.mxu1 %v10706_v27  ;;  %v10793_v44 = vpop.permute.xlu1 %10792 }
0x2385   :  { %12048 = vmatpush3.bf16.msra.mxu1 %v10706_v27 }
0x2386   :  { %12049 = vmatprep.subr.bf16.mxu1 %v10707_v12 }
0x2388   :  { %v10803_v45 = vpop.permute.xlu1 %10802 }
0x2389   :  { %12050 = vmatpush3.bf16.msra.mxu1 %v10707_v12 }
0x238c   :  { %12052 = vmatmul.mubr.bf16.vlgmr.msra.gmra.mrb[144].mxu1 %v12570_v7  ;;  %v10813_v27 = vpop.permute.xlu1 %10812 }
0x238d   :  { %12055 = vmatprep.mubr.bf16.mxu1 %v12571_v34 }
0x2394   :  { %12056 = vmatmul.mubr.bf16.gmra.mrb[148].mxu1 %v12572_v39 }
0x2395   :  { %12059 = vmatprep.mubr.bf16.mxu1 %v12573_v18 }
0x239c   :  { %12060 = vmatmul.mubr.bf16.gmra.mrb[152].mxu1 %v12574_v4  ;;  %v10818_v4 = vpop.permute.xlu0 %10817 }
0x239d   :  { %12063 = vmatprep.mubr.bf16.mxu1 %v12575_v30 }
0x23a4   :  { %12064 = vmatmul.mubr.bf16.gmra.mrb[156].mxu1 %v12576_v14 }
0x245f   :  { %v12053_v58 = vpop.f32.mrb[144].mxu1 }
0x2460   :  { %v10911_v59 = vadd.f32 %v12053_v58, %v10753_v3  ;;  %v10902_v56 = vpop.f32.mrb[145].mxu1 }
0x2461   :  { %v10903_v22 = vadd.f32 %v10902_v56, %v10743_v11  ;;  %v12054_v61 = vpop.f32.mrb[146].mxu1  ;;  %v12577_v56 = vld [vmem:[%s18040_s16] sm:$0x1f]  }
0x2462   :  { %v10914_v41 = vadd.f32 %v12054_v61, %v10758_v42  ;;  %v10905_v33 = vpop.f32.mrb[147].mxu1  ;;  %v10967_v36 = vmax.f32 %v10911_v59, 0.0 }
0x2463   :  { %v10906_v25 = vadd.f32 %v10905_v33, %v10748_v20  ;;  %v10965_v0 = vmax.f32 %v10903_v22, 0.0  ;;  %v11001_v33 = vpop.permute.xlu0 %11000 }
0x2464   :  { %v10968_v47 = vmax.f32 %v10914_v41, 0.0 }
0x2465   :  { %v10966_v52 = vmax.f32 %v10906_v25, 0.0 }
0x2466   :  { %v10982_v63 = vpack.c.bf16 %v10968_v47, %v10967_v36 }
0x2467   :  { %v10981_v51 = vpack.c.bf16 %v10966_v52, %v10965_v0  ;;  %v12057_v49 = vpop.f32.mrb[148].mxu1 }
0x2468   :  { %v10927_v40 = vadd.f32 %v12057_v49, %v10773_v35  ;;  %v10918_v55 = vpop.f32.mrb[149].mxu1 }
0x2469   :  { %v10919_v9 = vadd.f32 %v10918_v55, %v10763_v50  ;;  %v12058_v57 = vpop.f32.mrb[150].mxu1  ;;  %12068 = vmatpush3.bf16.msra.mxu0 %v10981_v51 }
0x246a   :  { %v10930_v38 = vadd.f32 %v12058_v57, %v10778_v16  ;;  %v10921_v43 = vpop.f32.mrb[151].mxu1  ;;  %12069 = vmatprep.subr.bf16.mxu0 %v12637_v13  ;;  %v10971_v60 = vmax.f32 %v10927_v40, 0.0  ;;  %v10996_v16 = vpop.permute.xlu1 %10995 }
0x246b   :  { %v10922_v24 = vadd.f32 %v10921_v43, %v10768_v21  ;;  %v10969_v29 = vmax.f32 %v10919_v9, 0.0 }
0x246c   :  { %v10972_v28 = vmax.f32 %v10930_v38, 0.0 }
0x246d   :  { %v10970_v15 = vmax.f32 %v10922_v24, 0.0  ;;  %12070 = vmatpush3.bf16.msra.mxu0 %v10982_v63 }
0x246e   :  { %v10984_v62 = vpack.c.bf16 %v10972_v28, %v10971_v60  ;;  %12071 = vmatprep.subr.bf16.mxu0 %v12637_v13 }
0x246f   :  { %v10983_v17 = vpack.c.bf16 %v10970_v15, %v10969_v29  ;;  %v12061_v48 = vpop.f32.mrb[152].mxu1 }
0x2470   :  { %v10943_v1 = vadd.f32 %v12061_v48, %v10793_v44  ;;  %v10934_v37 = vpop.f32.mrb[153].mxu1 }
0x2471   :  { %v10935_v46 = vadd.f32 %v10934_v37, %v10783_v54  ;;  %v12062_v19 = vpop.f32.mrb[154].mxu1  ;;  %12072 = vmatpush3.bf16.msra.mxu0 %v10983_v17 }
0x2472   :  { %v10946_v26 = vadd.f32 %v12062_v19, %v10798_v53  ;;  %v10937_v10 = vpop.f32.mrb[155].mxu1  ;;  %12073 = vmatprep.subr.bf16.mxu0 %v12637_v13  ;;  %v10975_v31 = vmax.f32 %v10943_v1, 0.0 }
0x2473   :  { %v10938_v2 = vadd.f32 %v10937_v10, %v10788_v5  ;;  %v10973_v6 = vmax.f32 %v10935_v46, 0.0 }
0x2474   :  { %v10976_v32 = vmax.f32 %v10946_v26, 0.0 }
0x2475   :  { %v10974_v23 = vmax.f32 %v10938_v2, 0.0  ;;  %12074 = vmatpush3.bf16.msra.mxu0 %v10984_v62 }
0x2476   :  { %v10986_v12 = vpack.c.bf16 %v10976_v32, %v10975_v31  ;;  %12075 = vmatprep.subr.bf16.mxu0 %v12637_v13 }
0x2477   :  { %v10985_v7 = vpack.c.bf16 %v10974_v23, %v10973_v6  ;;  %v12065_v34 = vpop.f32.mrb[156].mxu1 }
0x2478   :  { %v10959_v39 = vadd.f32 %v12065_v34, %v10813_v27  ;;  %v10950_v18 = vpop.f32.mrb[157].mxu1 }
0x2479   :  { %v10951_v30 = vadd.f32 %v10950_v18, %v10803_v45  ;;  %v12066_v14 = vpop.f32.mrb[158].mxu1  ;;  %12076 = vmatpush3.bf16.msra.mxu0 %v10985_v7 }
0x247a   :  { %v10962_v11 = vadd.f32 %v12066_v14, %v10818_v4  ;;  %v10953_v20 = vpop.f32.mrb[159].mxu1  ;;  %12077 = vmatprep.subr.bf16.mxu0 %v12637_v13  ;;  %v10979_v42 = vmax.f32 %v10959_v39, 0.0 }
0x247b   :  { %v10954_v3 = vadd.f32 %v10953_v20, %v10808_v8  ;;  %v10977_v21 = vmax.f32 %v10951_v30, 0.0 }
0x247c   :  { %v10980_v50 = vmax.f32 %v10962_v11, 0.0 }
0x247d   :  { %v10978_v35 = vmax.f32 %v10954_v3, 0.0  ;;  %12078 = vmatpush3.bf16.msra.mxu0 %v10986_v12 }
0x247e   :  { %v10988_v58 = vpack.c.bf16 %v10980_v50, %v10979_v42  ;;  %12079 = vmatprep.subr.bf16.mxu0 %v12637_v13 }
0x247f   :  { %v10987_v59 = vpack.c.bf16 %v10978_v35, %v10977_v21 }
0x2481   :  { %12080 = vmatpush3.bf16.msra.mxu0 %v10987_v59 }
0x2482   :  { %12081 = vmatprep.subr.bf16.mxu0 %v12637_v13 }
0x2485   :  { %12082 = vmatpush3.bf16.msra.mxu0 %v10988_v58 }
0x2488   :  { %12084 = vmatmul.mubr.bf16.vlgmr.msra.gmra.mrb[148].mxu0 %v12577_v56 }
0x255b   :  { %v11043_v22 = vpop.f32.mrb[148].mxu0 }
0x255c   :  { %v11044_v61 = vadd.f32 %v11043_v22, %v10996_v16  ;;  %v12085_v41 = vpop.f32.mrb[149].mxu0 }
0x255d   :  { %v11046_v25 = vpop.f32.mrb[150].mxu0 }
0x255e   :  { %11051 = vst.msk [vmem:[%s11095_s27] sm:$0xff] %vm18669_vm5, %v11044_v61  ;;  %v11047_v36 = vadd.f32 %v11046_v25, %v11001_v33  ;;  %v12086_v47 = vpop.f32.mrb[151].mxu0 }
0x2560   :  { %11053 = vst.msk [vmem:[%s11095_s27 + $0x8] sm:$0x3] %vm11052_vm14, %v11047_v36 }

</bundles_post_ra>
